<compile_context>
chip_gen: v7x
topology: tpu7x:2x2x1
jax: 0.10.0
libtpu: 0.0.40
codegen_flags: <defaults>
</compile_context>

<pallas_src>
import jax
import jax.numpy as jnp
from jax.experimental import pallas as pl
from jax.experimental.pallas import tpu as pltpu


def mlp_gelu_kernel(x_ref, w1_ref, b1_ref, w2_ref, b2_ref, o_ref):
    # First matmul: bf16 operands, f32 accumulation (MXU-native on v5e/v6e/v7x).
    x = x_ref[...].astype(jnp.bfloat16)                                  # (tm, 768)
    h = jnp.dot(x, w1_ref[...],
                preferred_element_type=jnp.float32) + b1_ref[...]        # (tm, 3072) f32
    h = jnp.tanh(h)                                                      # elementwise in f32
    # Second matmul: cast the intermediate to bf16, keep f32 accumulation.
    y = jnp.dot(h.astype(jnp.bfloat16), w2_ref[...],
                preferred_element_type=jnp.float32) + b2_ref[...]        # (tm, 768) f32
    # exact erf-based GELU, exactly as written in the torch forward
    v4 = y * 0.5
    v6 = jax.lax.erf(y * 0.7071067811865476)
    o_ref[...] = v4 * (v6 + 1.0)


def mlp_gelu(x, w1, b1, w2, b2, *, block_m=256):
    """x:(M,768) f32; w1:(768,3072); b1:(1,3072); w2:(3072,768); b2:(1,768)."""
    M, d_in = x.shape
    d_hid = w1.shape[1]
    d_out = w2.shape[1]

    # Weight stream dominates HBM traffic -> narrow to bf16 at the call boundary.
    w1 = w1.astype(jnp.bfloat16)
    w2 = w2.astype(jnp.bfloat16)
    b1 = b1.astype(jnp.float32)
    b2 = b2.astype(jnp.float32)
    # TODO(synk): int8 weight quantization (v5e/v6e only; v7x MXU has no int path)
    # and cross-call weight prefetch for the persistent M=1 serving case.

    # Pad rows to a sublane multiple (8) for unmasked stores / full vregs, and
    # tile M so the (tm, 3072) f32 intermediate never blows VMEM at large M.
    tm = block_m if M >= block_m else ((M + 7) // 8) * 8
    m_pad = pl.cdiv(M, tm) * tm
    if m_pad != M:
        x = jnp.pad(x, ((0, m_pad - M), (0, 0)))

    grid = (m_pad // tm,)
    out = pl.pallas_call(
        mlp_gelu_kernel,
        out_shape=jax.ShapeDtypeStruct((m_pad, d_out), jnp.float32),
        grid=grid,
        in_specs=[
            pl.BlockSpec((tm, d_in), lambda i: (i, 0)),      # x tile (pipelined)
            pl.BlockSpec((d_in, d_hid), lambda i: (0, 0)),   # W1, resident across steps
            pl.BlockSpec((1, d_hid), lambda i: (0, 0)),      # b1, resident
            pl.BlockSpec((d_hid, d_out), lambda i: (0, 0)),  # W2, resident
            pl.BlockSpec((1, d_out), lambda i: (0, 0)),      # b2, resident
        ],
        out_specs=pl.BlockSpec((tm, d_out), lambda i: (i, 0)),
        compiler_params=pltpu.CompilerParams(
            dimension_semantics=("parallel",),     # megacore-shard the M axis
            vmem_limit_bytes=48 << 20,             # < v7x's 64 MiB physical VMEM
        ),
    )(x, w1, b1, w2, b2)
    return out[:M]


if __name__ == "__main__":
    D_IN, D_HID = 768, 3072
    M = 1  # module's example input is torch.randn(1, 768)

    key = jax.random.PRNGKey(0)
    k1, k2, k3, k4, k5 = jax.random.split(key, 5)

    x = jax.random.normal(k1, (M, D_IN), dtype=jnp.float32)

    # Deterministic init mimicking torch.nn.Linear's U(-1/sqrt(fan_in), 1/sqrt(fan_in)).
    lim1 = 1.0 / jnp.sqrt(jnp.float32(D_IN))
    lim2 = 1.0 / jnp.sqrt(jnp.float32(D_HID))
    w1 = jax.random.uniform(k2, (D_IN, D_HID), jnp.float32, -lim1, lim1)   # W1.T
    b1 = jax.random.uniform(k3, (1, D_HID), jnp.float32, -lim1, lim1)
    w2 = jax.random.uniform(k4, (D_HID, D_IN), jnp.float32, -lim2, lim2)   # W2.T
    b2 = jax.random.uniform(k5, (1, D_IN), jnp.float32, -lim2, lim2)

    out = mlp_gelu(x, w1, b1, w2, b2)
    jax.block_until_ready(out)

    # Pure-JAX reference emulating the kernel's bf16 operand rounding (f32 math).
    xb = x.astype(jnp.bfloat16).astype(jnp.float32)
    w1b = w1.astype(jnp.bfloat16).astype(jnp.float32)
    w2b = w2.astype(jnp.bfloat16).astype(jnp.float32)
    h_ref = jnp.tanh(xb @ w1b + b1)
    hb = h_ref.astype(jnp.bfloat16).astype(jnp.float32)
    y_ref = hb @ w2b + b2
    ref = (y_ref * 0.5) * (jax.lax.erf(y_ref * 0.7071067811865476) + 1.0)

    assert out.shape == (M, D_IN)
    assert jnp.allclose(out, ref, atol=1e-2, rtol=1e-2), "mismatch vs reference"

    print("KERNEL_OK")
</pallas_src>

<mosaic_0001>
module attributes {stable_mosaic.version = 11 : i64} {
  func.func @mlp_gelu_kernel(%arg0: i32, %arg1: memref<8x768xf32, #tpu.memory_space<vmem>>, %arg2: memref<768x3072xbf16, #tpu.memory_space<vmem>>, %arg3: memref<1x3072xf32, #tpu.memory_space<vmem>>, %arg4: memref<3072x768xbf16, #tpu.memory_space<vmem>>, %arg5: memref<1x768xf32, #tpu.memory_space<vmem>>, %arg6: memref<8x768xf32, #tpu.memory_space<vmem>>) attributes {dimension_semantics = [#tpu.dimension_semantics<parallel>], iteration_bounds = array<i64: 1>, scalar_prefetch = 0 : i64, scratch_operands = 0 : i64, tpu.core_type = #tpu.core_type<tc>, window_params = [{transform_indices = @transform_0, window_bounds = array<i64: 8, 768>}, {pipeline_mode = #tpu.pipeline_mode<synchronous>, transform_indices = @transform_1, window_bounds = array<i64: 768, 3072>}, {pipeline_mode = #tpu.pipeline_mode<synchronous>, transform_indices = @transform_2, window_bounds = array<i64: 1, 3072>}, {pipeline_mode = #tpu.pipeline_mode<synchronous>, transform_indices = @transform_3, window_bounds = array<i64: 3072, 768>}, {pipeline_mode = #tpu.pipeline_mode<synchronous>, transform_indices = @transform_4, window_bounds = array<i64: 1, 768>}, {transform_indices = @transform_5, window_bounds = array<i64: 8, 768>}]} {
    %c0 = arith.constant 0 : index
    %c0_0 = arith.constant 0 : index
    %0 = vector.load %arg1[%c0, %c0_0] : memref<8x768xf32, #tpu.memory_space<vmem>>, vector<8x768xf32>
    %1 = arith.truncf %0 : vector<8x768xf32> to vector<8x768xbf16>
    %c0_1 = arith.constant 0 : index
    %c0_2 = arith.constant 0 : index
    %2 = vector.load %arg2[%c0_1, %c0_2] : memref<768x3072xbf16, #tpu.memory_space<vmem>>, vector<768x3072xbf16>
    %cst = arith.constant dense<0.000000e+00> : vector<8x3072xf32>
    %3 = tpu.matmul %1, %2, %cst {dimension_numbers = #tpu.dot_dimension_numbers<[1], [0], [0], [1], [0, 0, 1, 1], [], []>} : vector<8x768xbf16>, vector<768x3072xbf16>, vector<8x3072xf32> -> vector<8x3072xf32>
    %c0_3 = arith.constant 0 : index
    %c0_4 = arith.constant 0 : index
    %4 = vector.load %arg3[%c0_3, %c0_4] : memref<1x3072xf32, #tpu.memory_space<vmem>>, vector<1x3072xf32>
    %5 = vector.broadcast %4 : vector<1x3072xf32> to vector<8x3072xf32>
    %6 = arith.addf %3, %5 : vector<8x3072xf32>
    %7 = math.tanh %6 : vector<8x3072xf32>
    %8 = arith.truncf %7 : vector<8x3072xf32> to vector<8x3072xbf16>
    %c0_5 = arith.constant 0 : index
    %c0_6 = arith.constant 0 : index
    %9 = vector.load %arg4[%c0_5, %c0_6] : memref<3072x768xbf16, #tpu.memory_space<vmem>>, vector<3072x768xbf16>
    %cst_7 = arith.constant dense<0.000000e+00> : vector<8x768xf32>
    %10 = tpu.matmul %8, %9, %cst_7 {dimension_numbers = #tpu.dot_dimension_numbers<[1], [0], [0], [1], [0, 0, 1, 1], [], []>} : vector<8x3072xbf16>, vector<3072x768xbf16>, vector<8x768xf32> -> vector<8x768xf32>
    %c0_8 = arith.constant 0 : index
    %c0_9 = arith.constant 0 : index
    %11 = vector.load %arg5[%c0_8, %c0_9] : memref<1x768xf32, #tpu.memory_space<vmem>>, vector<1x768xf32>
    %12 = vector.broadcast %11 : vector<1x768xf32> to vector<8x768xf32>
    %13 = arith.addf %10, %12 : vector<8x768xf32>
    %cst_10 = arith.constant 5.000000e-01 : f32
    %14 = vector.broadcast %cst_10 : f32 to vector<8x768xf32>
    %15 = arith.mulf %13, %14 : vector<8x768xf32>
    %cst_11 = arith.constant 0.707106769 : f32
    %16 = vector.broadcast %cst_11 : f32 to vector<8x768xf32>
    %17 = arith.mulf %13, %16 : vector<8x768xf32>
    %18 = math.erf %17 : vector<8x768xf32>
    %cst_12 = arith.constant 1.000000e+00 : f32
    %19 = vector.broadcast %cst_12 : f32 to vector<8x768xf32>
    %20 = arith.addf %18, %19 : vector<8x768xf32>
    %21 = arith.mulf %15, %20 : vector<8x768xf32>
    %c0_13 = arith.constant 0 : index
    %c0_14 = arith.constant 0 : index
    %22 = vector.load %arg6[%c0_13, %c0_14] : memref<8x768xf32, #tpu.memory_space<vmem>>, vector<8x768xf32>
    tpu.vector_store %arg6[%c0_13, %c0_14], %21 {strides = array<i32>} : memref<8x768xf32, #tpu.memory_space<vmem>>, vector<8x768xf32>,
    return
  }
  func.func @transform_0(%arg0: i32) -> (i32, i32) {
    %c0_i32 = arith.constant 0 : i32
    %c0_i32_0 = arith.constant 0 : i32
    return %arg0, %c0_i32 : i32, i32
  }
  func.func @transform_1(%arg0: i32) -> (i32, i32) {
    %c0_i32 = arith.constant 0 : i32
    %c0_i32_0 = arith.constant 0 : i32
    %c0_i32_1 = arith.constant 0 : i32
    return %c0_i32, %c0_i32_0 : i32, i32
  }
  func.func @transform_2(%arg0: i32) -> (i32, i32) {
    %c0_i32 = arith.constant 0 : i32
    %c0_i32_0 = arith.constant 0 : i32
    %c0_i32_1 = arith.constant 0 : i32
    return %c0_i32, %c0_i32_0 : i32, i32
  }
  func.func @transform_3(%arg0: i32) -> (i32, i32) {
    %c0_i32 = arith.constant 0 : i32
    %c0_i32_0 = arith.constant 0 : i32
    %c0_i32_1 = arith.constant 0 : i32
    return %c0_i32, %c0_i32_0 : i32, i32
  }
  func.func @transform_4(%arg0: i32) -> (i32, i32) {
    %c0_i32 = arith.constant 0 : i32
    %c0_i32_0 = arith.constant 0 : i32
    %c0_i32_1 = arith.constant 0 : i32
    return %c0_i32, %c0_i32_0 : i32, i32
  }
  func.func @transform_5(%arg0: i32) -> (i32, i32) {
    %c0_i32 = arith.constant 0 : i32
    %c0_i32_0 = arith.constant 0 : i32
    return %arg0, %c0_i32 : i32, i32
  }
}

</mosaic_0001>

<bundles_post_ra>
// kernel: tpu_custom_call.1
= control target key start
LH: loop header
LB: loop body
LE: loop exit
PB: predicated region body
PF: predicated region fallthrough
CT: control target
= control target key end

     0   :  { %10 = vsyncpa [#allocation3], 0  ;;  %s22087_s0 = inlined_call_operand.hbm [shape: f32[8,768], index: 0, kind: input, shape index: {}]   ;;  %s22088_s1 = inlined_call_operand.hbm [shape: bf16[768,3072], index: 1, kind: input, shape index: {}]   ;;  %s22089_s2 = inlined_call_operand.hbm [shape: f32[1,3072], index: 2, kind: input, shape index: {}]   ;;  %s22090_s3 = inlined_call_operand.hbm [shape: bf16[3072,768], index: 3, kind: input, shape index: {}]   ;;  %s22091_s4 = inlined_call_operand.hbm [shape: f32[1,768], index: 4, kind: input, shape index: {}]   ;;  %s22092_s5 = inlined_call_operand.hbm [shape: f32[8,768], index: 5, kind: output, shape index: {}]  }
   0x1   :  { %11 = vsyncpa [#allocation6], 0 }
   0x2   :  { %12 = vsyncpa [#allocation9], 0 }
   0x3   :  { %13 = vsyncpa [#allocation4], 0  ;;  %s21634_s18 = smov [#allocation5]   ;;  %s21494_s22 = scalar_lea.hbm %s22088_s1, 147456 }
   0x4   :  { %s29_s19 = sshll.u32 %s21634_s18, 4  ;;  %p21495_p0 = scmp.ne.s32.totalorder %s22088_s1, %s21494_s22  ;;  %s30_s19 = int_to_ptr.vmem [resolvable:$true] %s29_s19 }
   0x5   :  { %p21498_p1 = scmp.lt.u32.totalorder %s21494_s22, %s22088_s1 }
   0x7   :  { %p21500_p2 = pnand %p21498_p1, %p21495_p0 }
   0x9   :  { %21503 = shalt.err (!%p21500_p2)
}
   0xa   :  { %s21504_s27 = scalar_lea.vmem %s30_s19, 147456  ;;  %p21509_p4 = scmp.lt.s32.totalorder %s30_s19, %s30_s19 }
   0xb   :  { %p21505_p3 = scmp.ne.s32.totalorder %s30_s19, %s21504_s27  ;;  %p21510_p5 = scmp.lt.s32.totalorder %s21504_s27, %s21504_s27 }
   0xd   :  { %p21511_p6 = por %p21510_p5, %p21509_p4 }
   0xf   :  { %p21512_p7 = pnand %p21511_p6, %p21505_p3 }
  0x11   :  { %21515 = shalt.err (!%p21512_p7)
}
  0x12   :  { %s21635_s28 = smov 1536   ;;  %s21636_s29 = smov 96  }
  0x13   :  { %35 = dma.hbm_to_vmem [thread:$0]  %s22088_s1, 147456, %s30_s19, [#allocation6], %s21635_s28, %s21635_s28, %s21636_s29  }
  0x14   :  { %s21637_s7 = smov [#allocation8]   ;;  %s21516_s11 = scalar_lea.hbm %s22090_s3, 147456 }
  0x15   :  { %s51_s8 = sshll.u32 %s21637_s7, 4  ;;  %p21517_p8 = scmp.ne.s32.totalorder %s22090_s3, %s21516_s11  ;;  %s52_s8 = int_to_ptr.vmem [resolvable:$true] %s51_s8 }
  0x16   :  { %p21520_p9 = scmp.lt.u32.totalorder %s21516_s11, %s22090_s3 }
  0x18   :  { %p21522_p10 = pnand %p21520_p9, %p21517_p8 }
  0x1a   :  { %21525 = shalt.err (!%p21522_p10)
}
  0x1b   :  { %s21526_s16 = scalar_lea.vmem %s52_s8, 147456  ;;  %p21531_p12 = scmp.lt.s32.totalorder %s52_s8, %s52_s8 }
  0x1c   :  { %p21527_p11 = scmp.ne.s32.totalorder %s52_s8, %s21526_s16  ;;  %p21532_p13 = scmp.lt.s32.totalorder %s21526_s16, %s21526_s16 }
  0x1e   :  { %p21533_p0 = por %p21532_p13, %p21531_p12 }
  0x20   :  { %p21534_p1 = pnand %p21533_p0, %p21527_p11 }
  0x22   :  { %21537 = shalt.err (!%p21534_p1)
}
  0x23   :  { %s21638_s1 = smov 384   ;;  %s21639_s17 = smov 24  }
  0x24   :  { %57 = dma.hbm_to_vmem [thread:$0]  %s22090_s3, 147456, %s52_s8, [#allocation9], %s21638_s1, %s21638_s1, %s21639_s17  }
  0x25   :  { %s21640_s20 = smov [#allocation2]   ;;  %s21641_s22 = smov [#allocation7]  }
  0x26   :  { %s20_s21 = sshll.u32 %s21640_s20, 4  ;;  %s42_s23 = sshll.u32 %s21641_s22, 4  ;;  %s21_s21 = int_to_ptr.vmem [resolvable:$true] %s20_s21  ;;  %s43_s23 = int_to_ptr.vmem [resolvable:$true] %s42_s23 }
  0x27   :  { %s21538_s26 = scalar_lea.hbm %s22087_s0, 768 }
  0x28   :  { %p21539_p2 = scmp.ne.s32.totalorder %s22087_s0, %s21538_s26  ;;  %p21542_p3 = scmp.lt.u32.totalorder %s21538_s26, %s22087_s0 }
  0x2a   :  { %p21544_p4 = pnand %p21542_p3, %p21539_p2 }
  0x2c   :  { %21547 = shalt.err (!%p21544_p4)
}
  0x2d   :  { %s21548_s3 = scalar_lea.vmem %s21_s21, 768  ;;  %p21553_p6 = scmp.lt.s32.totalorder %s21_s21, %s21_s21 }
  0x2e   :  { %p21549_p5 = scmp.ne.s32.totalorder %s21_s21, %s21548_s3  ;;  %p21554_p7 = scmp.lt.s32.totalorder %s21548_s3, %s21548_s3 }
  0x30   :  { %p21555_p8 = por %p21554_p7, %p21553_p6 }
  0x32   :  { %p21556_p9 = pnand %p21555_p8, %p21549_p5 }
  0x34   :  { %21559 = shalt.err (!%p21556_p9)
}
  0x35   :  { %23 = dma.hbm_to_vmem [thread:$0]  %s22087_s0, 768, %s21_s21, [#allocation3]  }
  0x36   :  { %s21560_s10 = scalar_lea.hbm %s22089_s2, 384 }
  0x37   :  { %p21561_p10 = scmp.ne.s32.totalorder %s22089_s2, %s21560_s10  ;;  %p21564_p11 = scmp.lt.u32.totalorder %s21560_s10, %s22089_s2 }
  0x39   :  { %p21566_p12 = pnand %p21564_p11, %p21561_p10 }
  0x3b   :  { %21569 = shalt.err (!%p21566_p12)
}
  0x3c   :  { %s21570_s15 = scalar_lea.vmem %s43_s23, 384  ;;  %p21575_p0 = scmp.lt.s32.totalorder %s43_s23, %s43_s23 }
  0x3d   :  { %p21571_p13 = scmp.ne.s32.totalorder %s43_s23, %s21570_s15  ;;  %p21576_p1 = scmp.lt.s32.totalorder %s21570_s15, %s21570_s15 }
  0x3f   :  { %p21577_p2 = por %p21576_p1, %p21575_p0 }
  0x41   :  { %p21578_p3 = pnand %p21577_p2, %p21571_p13 }
  0x43   :  { %21581 = shalt.err (!%p21578_p3)
}
  0x44   :  { %45 = dma.hbm_to_vmem [thread:$0]  %s22089_s2, 384, %s43_s23, [#allocation6]  }
  0x45   :  { %s21642_s1 = smov [#allocation10]   ;;  %s21582_s20 = scalar_lea.hbm %s22091_s4, 96 }
  0x46   :  { %s64_s17 = sshll.u32 %s21642_s1, 4  ;;  %p21583_p4 = scmp.ne.s32.totalorder %s22091_s4, %s21582_s20  ;;  %s65_s17 = int_to_ptr.vmem [resolvable:$true] %s64_s17 }
  0x47   :  { %p21586_p5 = scmp.lt.u32.totalorder %s21582_s20, %s22091_s4 }
  0x49   :  { %p21588_p6 = pnand %p21586_p5, %p21583_p4 }
  0x4b   :  { %21591 = shalt.err (!%p21588_p6)
}
  0x4c   :  { %s21592_s26 = scalar_lea.vmem %s65_s17, 96  ;;  %p21597_p8 = scmp.lt.s32.totalorder %s65_s17, %s65_s17 }
  0x4d   :  { %p21593_p7 = scmp.ne.s32.totalorder %s65_s17, %s21592_s26  ;;  %p21598_p9 = scmp.lt.s32.totalorder %s21592_s26, %s21592_s26 }
  0x4f   :  { %p21599_p10 = por %p21598_p9, %p21597_p8 }
  0x51   :  { %p21600_p11 = pnand %p21599_p10, %p21593_p7 }
  0x53   :  { %21603 = shalt.err (!%p21600_p11)
}
  0x54   :  { %67 = dma.hbm_to_vmem [thread:$0]  %s22091_s4, 96, %s65_s17, [#allocation9]  }
  0x55   :  { %21626 = dma.done.wait [#allocation3], 768  }
  0x56   :  { %21627 = vsyncadd [#allocation3], 4294966528 }
  0x57   :  { %21628 = dma.done.wait [#allocation6], 147840  }
  0x58   :  { %21629 = vsyncadd [#allocation6], 4294819456 }
  0x59   :  { %21630 = dma.done.wait [#allocation9], 147552  }
  0x5a   :  { %21631 = vsyncadd [#allocation9], 4294819744  ;;  %v95_v0 = vld [vmem:[#allocation5] sm:$0xff]  ;;  %v84_v53 = vld [vmem:[#allocation2 + $0x8] sm:$0xff]  ;;  %s21643_s4 = smov [#allocation11]  }
  0x5b   :  { %v107_v1 = vld [vmem:[#allocation5 + $0x60] sm:$0xff]  ;;  %v21734_v57 = vpack.c.bf16 %v84_v53, %v84_v53  ;;  %s17119_s27 = sshll.u32 %s21643_s4, 4  ;;  %s17120_s27 = int_to_ptr.vmem [resolvable:$true] %s17119_s27 }
  0x5c   :  { %v99_v2 = vld [vmem:[#allocation5 + $0x20] sm:$0xff]  ;;  %v17131_v3 = vcombine.high %v95_v0, %v107_v1  ;;  %v17130_v5 = vcombine.low %v95_v0, %v107_v1  ;;  %s21604_s28 = scalar_lea.vmem %s17120_s27, 768  ;;  %p21609_p13 = scmp.lt.s32.totalorder %s17120_s27, %s17120_s27 }
  0x5d   :  { %v111_v4 = vld [vmem:[#allocation5 + $0x80] sm:$0xff]  ;;  %7165 = vmatprep.mubr.bf16.mxu1 %v21734_v57  ;;  %7657 = vmatprep.mubr.bf16.mxu0 %v21734_v57  ;;  %p21605_p12 = scmp.ne.s32.totalorder %s17120_s27, %s21604_s28  ;;  %p21610_p0 = scmp.lt.s32.totalorder %s21604_s28, %s21604_s28 }
  0x5e   :  { %v119_v6 = vld [vmem:[#allocation5 + $0xc0] sm:$0xff]  ;;  %v17139_v8 = vcombine.high %v99_v2, %v111_v4  ;;  %v17138_v9 = vcombine.low %v99_v2, %v111_v4  ;;  %7133 = vmatprep.subr.bf16.mxu1 %v17131_v3 }
  0x5f   :  { %v131_v7 = vld [vmem:[#allocation5 + $0x120] sm:$0xff]  ;;  %7134 = vmatpush1.bf16.msra.mxu1 %v17130_v5  ;;  %p21611_p1 = por %p21610_p0, %p21609_p13 }
  0x60   :  { %v17155_v10 = vcombine.high %v119_v6, %v131_v7  ;;  %v123_v11 = vld [vmem:[#allocation5 + $0xe0] sm:$0xff]  ;;  %7625 = vmatprep.subr.bf16.mxu0 %v17139_v8  ;;  %v17154_v18 = vcombine.low %v119_v6, %v131_v7 }
  0x61   :  { %v135_v12 = vld [vmem:[#allocation5 + $0x140] sm:$0xff]  ;;  %7626 = vmatpush1.bf16.msra.mxu0 %v17138_v9  ;;  %p21612_p2 = pnand %p21611_p1, %p21605_p12 }
  0x62   :  { %v143_v13 = vld [vmem:[#allocation5 + $0x180] sm:$0xff]  ;;  %v17163_v14 = vcombine.high %v123_v11, %v135_v12  ;;  %7135 = vmatprep.subr.bf16.mxu1 %v17155_v10  ;;  %v17162_v19 = vcombine.low %v123_v11, %v135_v12 }
  0x63   :  { %v155_v15 = vld [vmem:[#allocation5 + $0x1e0] sm:$0xff]  ;;  %7136 = vmatpush1.bf16.msra.mxu1 %v17154_v18 }
  0x64   :  { %v147_v16 = vld [vmem:[#allocation5 + $0x1a0] sm:$0xff]  ;;  %v17179_v20 = vcombine.high %v143_v13, %v155_v15  ;;  %7627 = vmatprep.subr.bf16.mxu0 %v17163_v14  ;;  %v17178_v26 = vcombine.low %v143_v13, %v155_v15 }
  0x65   :  { %v159_v17 = vld [vmem:[#allocation5 + $0x200] sm:$0xff]  ;;  %7628 = vmatpush1.bf16.msra.mxu0 %v17162_v19 }
  0x66   :  { %v17187_v21 = vcombine.high %v147_v16, %v159_v17  ;;  %v167_v22 = vld [vmem:[#allocation5 + $0x240] sm:$0xff]  ;;  %7137 = vmatprep.subr.bf16.mxu1 %v17179_v20  ;;  %v17186_v27 = vcombine.low %v147_v16, %v159_v17 }
  0x67   :  { %v179_v23 = vld [vmem:[#allocation5 + $0x2a0] sm:$0xff]  ;;  %7138 = vmatpush1.bf16.msra.mxu1 %v17178_v26 }
  0x68   :  { %v171_v24 = vld [vmem:[#allocation5 + $0x260] sm:$0xff]  ;;  %v17203_v28 = vcombine.high %v167_v22, %v179_v23  ;;  %7629 = vmatprep.subr.bf16.mxu0 %v17187_v21  ;;  %v17202_v34 = vcombine.low %v167_v22, %v179_v23 }
  0x69   :  { %v183_v25 = vld [vmem:[#allocation5 + $0x2c0] sm:$0xff]  ;;  %7630 = vmatpush1.bf16.msra.mxu0 %v17186_v27 }
  0x6a   :  { %v17211_v29 = vcombine.high %v171_v24, %v183_v25  ;;  %v191_v30 = vld [vmem:[#allocation5 + $0x300] sm:$0xff]  ;;  %7139 = vmatprep.subr.bf16.mxu1 %v17203_v28  ;;  %v17210_v35 = vcombine.low %v171_v24, %v183_v25 }
  0x6b   :  { %v203_v31 = vld [vmem:[#allocation5 + $0x360] sm:$0xff]  ;;  %7140 = vmatpush1.bf16.msra.mxu1 %v17202_v34 }
  0x6c   :  { %v195_v32 = vld [vmem:[#allocation5 + $0x320] sm:$0xff]  ;;  %v17227_v36 = vcombine.high %v191_v30, %v203_v31  ;;  %7631 = vmatprep.subr.bf16.mxu0 %v17211_v29  ;;  %v17226_v42 = vcombine.low %v191_v30, %v203_v31 }
  0x6d   :  { %v207_v33 = vld [vmem:[#allocation5 + $0x380] sm:$0xff]  ;;  %7632 = vmatpush1.bf16.msra.mxu0 %v17210_v35 }
  0x6e   :  { %v17235_v37 = vcombine.high %v195_v32, %v207_v33  ;;  %v215_v38 = vld [vmem:[#allocation5 + $0x3c0] sm:$0xff]  ;;  %7141 = vmatprep.subr.bf16.mxu1 %v17227_v36  ;;  %v17234_v43 = vcombine.low %v195_v32, %v207_v33 }
  0x6f   :  { %v227_v39 = vld [vmem:[#allocation5 + $0x420] sm:$0xff]  ;;  %7142 = vmatpush1.bf16.msra.mxu1 %v17226_v42 }
  0x70   :  { %v219_v40 = vld [vmem:[#allocation5 + $0x3e0] sm:$0xff]  ;;  %v17251_v44 = vcombine.high %v215_v38, %v227_v39  ;;  %7633 = vmatprep.subr.bf16.mxu0 %v17235_v37  ;;  %v17250_v50 = vcombine.low %v215_v38, %v227_v39 }
  0x71   :  { %v231_v41 = vld [vmem:[#allocation5 + $0x440] sm:$0xff]  ;;  %7634 = vmatpush1.bf16.msra.mxu0 %v17234_v43 }
  0x72   :  { %v17259_v45 = vcombine.high %v219_v40, %v231_v41  ;;  %v239_v46 = vld [vmem:[#allocation5 + $0x480] sm:$0xff]  ;;  %7143 = vmatprep.subr.bf16.mxu1 %v17251_v44  ;;  %v17258_v51 = vcombine.low %v219_v40, %v231_v41 }
  0x73   :  { %v251_v47 = vld [vmem:[#allocation5 + $0x4e0] sm:$0xff]  ;;  %7144 = vmatpush1.bf16.msra.mxu1 %v17250_v50 }
  0x74   :  { %v243_v48 = vld [vmem:[#allocation5 + $0x4a0] sm:$0xff]  ;;  %v17275_v52 = vcombine.high %v239_v46, %v251_v47  ;;  %7635 = vmatprep.subr.bf16.mxu0 %v17259_v45  ;;  %v17274_v60 = vcombine.low %v239_v46, %v251_v47 }
  0x75   :  { %v255_v49 = vld [vmem:[#allocation5 + $0x500] sm:$0xff]  ;;  %7636 = vmatpush1.bf16.msra.mxu0 %v17258_v51 }
  0x76   :  { %v17283_v54 = vcombine.high %v243_v48, %v255_v49  ;;  %v263_v55 = vld [vmem:[#allocation5 + $0x540] sm:$0xff]  ;;  %7145 = vmatprep.subr.bf16.mxu1 %v17275_v52  ;;  %v17282_v61 = vcombine.low %v243_v48, %v255_v49 }
  0x77   :  { %v275_v56 = vld [vmem:[#allocation5 + $0x5a0] sm:$0xff]  ;;  %7146 = vmatpush1.bf16.msra.mxu1 %v17274_v60 }
  0x78   :  { %v267_v58 = vld [vmem:[#allocation5 + $0x560] sm:$0xff]  ;;  %v17299_v62 = vcombine.high %v263_v55, %v275_v56  ;;  %7637 = vmatprep.subr.bf16.mxu0 %v17283_v54  ;;  %v17298_v4 = vcombine.low %v263_v55, %v275_v56 }
  0x79   :  { %v279_v59 = vld [vmem:[#allocation5 + $0x5c0] sm:$0xff]  ;;  %7638 = vmatpush1.bf16.msra.mxu0 %v17282_v61 }
  0x7a   :  { %v17307_v63 = vcombine.high %v267_v58, %v279_v59  ;;  %v287_v0 = vld [vmem:[#allocation5 + $0x600] sm:$0xff]  ;;  %7147 = vmatprep.subr.bf16.mxu1 %v17299_v62  ;;  %v17306_v5 = vcombine.low %v267_v58, %v279_v59 }
  0x7b   :  { %v299_v1 = vld [vmem:[#allocation5 + $0x660] sm:$0xff]  ;;  %7148 = vmatpush1.bf16.msra.mxu1 %v17298_v4 }
  0x7c   :  { %v291_v2 = vld [vmem:[#allocation5 + $0x620] sm:$0xff]  ;;  %v17323_v6 = vcombine.high %v287_v0, %v299_v1  ;;  %7639 = vmatprep.subr.bf16.mxu0 %v17307_v63  ;;  %v17322_v12 = vcombine.low %v287_v0, %v299_v1 }
  0x7d   :  { %v303_v3 = vld [vmem:[#allocation5 + $0x680] sm:$0xff]  ;;  %7640 = vmatpush1.bf16.msra.mxu0 %v17306_v5 }
  0x7e   :  { %v17331_v7 = vcombine.high %v291_v2, %v303_v3  ;;  %v311_v8 = vld [vmem:[#allocation5 + $0x6c0] sm:$0xff]  ;;  %7149 = vmatprep.subr.bf16.mxu1 %v17323_v6  ;;  %v17330_v13 = vcombine.low %v291_v2, %v303_v3  ;;  %v83_v6 = vld [vmem:[#allocation2] sm:$0xff] }
  0x7f   :  { %v323_v9 = vld [vmem:[#allocation5 + $0x720] sm:$0xff]  ;;  %7150 = vmatpush1.bf16.msra.mxu1 %v17322_v12  ;;  %v21738_v12 = vpack.c.bf16 %v83_v6, %v83_v6 }
  0x80   :  { %v315_v10 = vld [vmem:[#allocation5 + $0x6e0] sm:$0xff]  ;;  %v17347_v14 = vcombine.high %v311_v8, %v323_v9  ;;  %7641 = vmatprep.subr.bf16.mxu0 %v17331_v7  ;;  %v17346_v20 = vcombine.low %v311_v8, %v323_v9 }
  0x81   :  { %v327_v11 = vld [vmem:[#allocation5 + $0x740] sm:$0xff]  ;;  %7642 = vmatpush1.bf16.msra.mxu0 %v17330_v13 }
  0x82   :  { %v17355_v15 = vcombine.high %v315_v10, %v327_v11  ;;  %v335_v16 = vld [vmem:[#allocation5 + $0x780] sm:$0xff]  ;;  %7151 = vmatprep.subr.bf16.mxu1 %v17347_v14  ;;  %v17354_v21 = vcombine.low %v315_v10, %v327_v11 }
  0x83   :  { %v347_v17 = vld [vmem:[#allocation5 + $0x7e0] sm:$0xff]  ;;  %7152 = vmatpush1.bf16.msra.mxu1 %v17346_v20 }
  0x84   :  { %v339_v18 = vld [vmem:[#allocation5 + $0x7a0] sm:$0xff]  ;;  %v17371_v22 = vcombine.high %v335_v16, %v347_v17  ;;  %7643 = vmatprep.subr.bf16.mxu0 %v17355_v15  ;;  %v17370_v28 = vcombine.low %v335_v16, %v347_v17  ;;  %v86_v15 = vld [vmem:[#allocation2 + $0x18] sm:$0xff] }
  0x85   :  { %v351_v19 = vld [vmem:[#allocation5 + $0x800] sm:$0xff]  ;;  %7644 = vmatpush1.bf16.msra.mxu0 %v17354_v21 }
  0x86   :  { %v17379_v23 = vcombine.high %v339_v18, %v351_v19  ;;  %v359_v24 = vld [vmem:[#allocation5 + $0x840] sm:$0xff]  ;;  %7153 = vmatprep.subr.bf16.mxu1 %v17371_v22  ;;  %v17378_v29 = vcombine.low %v339_v18, %v351_v19 }
  0x87   :  { %v371_v25 = vld [vmem:[#allocation5 + $0x8a0] sm:$0xff]  ;;  %7154 = vmatpush1.bf16.msra.mxu1 %v17370_v28 }
  0x88   :  { %v363_v26 = vld [vmem:[#allocation5 + $0x860] sm:$0xff]  ;;  %v17395_v30 = vcombine.high %v359_v24, %v371_v25  ;;  %7645 = vmatprep.subr.bf16.mxu0 %v17379_v23  ;;  %v17394_v36 = vcombine.low %v359_v24, %v371_v25  ;;  %v21740_v23 = vpack.c.bf16 %v86_v15, %v86_v15 }
  0x89   :  { %v375_v27 = vld [vmem:[#allocation5 + $0x8c0] sm:$0xff]  ;;  %7646 = vmatpush1.bf16.msra.mxu0 %v17378_v29 }
  0x8a   :  { %v17403_v31 = vcombine.high %v363_v26, %v375_v27  ;;  %v383_v32 = vld [vmem:[#allocation5 + $0x900] sm:$0xff]  ;;  %7155 = vmatprep.subr.bf16.mxu1 %v17395_v30  ;;  %v17402_v37 = vcombine.low %v363_v26, %v375_v27 }
  0x8b   :  { %v395_v33 = vld [vmem:[#allocation5 + $0x960] sm:$0xff]  ;;  %7156 = vmatpush1.bf16.msra.mxu1 %v17394_v36 }
  0x8c   :  { %v387_v34 = vld [vmem:[#allocation5 + $0x920] sm:$0xff]  ;;  %v17419_v38 = vcombine.high %v383_v32, %v395_v33  ;;  %7647 = vmatprep.subr.bf16.mxu0 %v17403_v31  ;;  %v17418_v44 = vcombine.low %v383_v32, %v395_v33 }
  0x8d   :  { %v399_v35 = vld [vmem:[#allocation5 + $0x980] sm:$0xff]  ;;  %7648 = vmatpush1.bf16.msra.mxu0 %v17402_v37 }
  0x8e   :  { %v17427_v39 = vcombine.high %v387_v34, %v399_v35  ;;  %v407_v40 = vld [vmem:[#allocation5 + $0x9c0] sm:$0xff]  ;;  %7157 = vmatprep.subr.bf16.mxu1 %v17419_v38  ;;  %v17426_v45 = vcombine.low %v387_v34, %v399_v35 }
  0x8f   :  { %v419_v41 = vld [vmem:[#allocation5 + $0xa20] sm:$0xff]  ;;  %7158 = vmatpush1.bf16.msra.mxu1 %v17418_v44 }
  0x90   :  { %v411_v42 = vld [vmem:[#allocation5 + $0x9e0] sm:$0xff]  ;;  %v17443_v46 = vcombine.high %v407_v40, %v419_v41  ;;  %7649 = vmatprep.subr.bf16.mxu0 %v17427_v39  ;;  %v17442_v52 = vcombine.low %v407_v40, %v419_v41 }
  0x91   :  { %v423_v43 = vld [vmem:[#allocation5 + $0xa40] sm:$0xff]  ;;  %7650 = vmatpush1.bf16.msra.mxu0 %v17426_v45 }
  0x92   :  { %v17451_v47 = vcombine.high %v411_v42, %v423_v43  ;;  %v431_v48 = vld [vmem:[#allocation5 + $0xa80] sm:$0xff]  ;;  %7159 = vmatprep.subr.bf16.mxu1 %v17443_v46  ;;  %v17450_v53 = vcombine.low %v411_v42, %v423_v43 }
  0x93   :  { %v443_v49 = vld [vmem:[#allocation5 + $0xae0] sm:$0xff]  ;;  %7160 = vmatpush1.bf16.msra.mxu1 %v17442_v52 }
  0x94   :  { %v435_v50 = vld [vmem:[#allocation5 + $0xaa0] sm:$0xff]  ;;  %v17467_v54 = vcombine.high %v431_v48, %v443_v49  ;;  %7651 = vmatprep.subr.bf16.mxu0 %v17451_v47  ;;  %v17466_v61 = vcombine.low %v431_v48, %v443_v49 }
  0x95   :  { %v447_v51 = vld [vmem:[#allocation5 + $0xb00] sm:$0xff]  ;;  %7652 = vmatpush1.bf16.msra.mxu0 %v17450_v53 }
  0x96   :  { %v17475_v55 = vcombine.high %v435_v50, %v447_v51  ;;  %v455_v56 = vld [vmem:[#allocation5 + $0xb40] sm:$0xff]  ;;  %7161 = vmatprep.subr.bf16.mxu1 %v17467_v54  ;;  %v17474_v62 = vcombine.low %v435_v50, %v447_v51 }
  0x97   :  { %v467_v58 = vld [vmem:[#allocation5 + $0xba0] sm:$0xff]  ;;  %7162 = vmatpush1.bf16.msra.mxu1 %v17466_v61 }
  0x98   :  { %v459_v59 = vld [vmem:[#allocation5 + $0xb60] sm:$0xff]  ;;  %v17491_v63 = vcombine.high %v455_v56, %v467_v58  ;;  %7653 = vmatprep.subr.bf16.mxu0 %v17475_v55  ;;  %v17490_v5 = vcombine.low %v455_v56, %v467_v58 }
  0x99   :  { %v471_v60 = vld [vmem:[#allocation5 + $0xbc0] sm:$0xff]  ;;  %7654 = vmatpush1.bf16.msra.mxu0 %v17474_v62 }
  0x9a   :  { %v17499_v0 = vcombine.high %v459_v59, %v471_v60  ;;  %v479_v1 = vld [vmem:[#allocation5 + $0xc00] sm:$0xff]  ;;  %7163 = vmatprep.subr.bf16.mxu1 %v17491_v63  ;;  %v17498_v7 = vcombine.low %v459_v59, %v471_v60 }
  0x9b   :  { %v491_v2 = vld [vmem:[#allocation5 + $0xc60] sm:$0xff]  ;;  %7164 = vmatpush1.bf16.msra.mxu1 %v17490_v5 }
  0x9c   :  { %v483_v3 = vld [vmem:[#allocation5 + $0xc20] sm:$0xff]  ;;  %v17515_v8 = vcombine.high %v479_v1, %v491_v2  ;;  %7655 = vmatprep.subr.bf16.mxu0 %v17499_v0  ;;  %v17514_v16 = vcombine.low %v479_v1, %v491_v2 }
  0x9d   :  { %v495_v4 = vld [vmem:[#allocation5 + $0xc80] sm:$0xff]  ;;  %7656 = vmatpush1.bf16.msra.mxu0 %v17498_v7 }
  0x9e   :  { %v17523_v9 = vcombine.high %v483_v3, %v495_v4  ;;  %v503_v10 = vld [vmem:[#allocation5 + $0xcc0] sm:$0xff]  ;;  %7174 = vmatprep.subr.bf16.mxu1 %v17515_v8  ;;  %v17522_v17 = vcombine.low %v483_v3, %v495_v4  ;;  %7166 = vmatmul.mubr.bf16.vlgmr.msra.gmra.mrb[0].mxu1 %v21738_v12 }
  0x9f   :  { %v515_v11 = vld [vmem:[#allocation5 + $0xd20] sm:$0xff]  ;;  %7175 = vmatpush1.bf16.msra.mxu1 %v17514_v16  ;;  %7206 = vmatprep.mubr.bf16.mxu1 %v21740_v23 }
  0xa0   :  { %v507_v13 = vld [vmem:[#allocation5 + $0xce0] sm:$0xff]  ;;  %v17539_v18 = vcombine.high %v503_v10, %v515_v11  ;;  %7666 = vmatprep.subr.bf16.mxu0 %v17523_v9  ;;  %7658 = vmatmul.mubr.bf16.vlgmr.msra.gmra.mrb[0].mxu0 %v21738_v12  ;;  %v17538_v25 = vcombine.low %v503_v10, %v515_v11 }
  0xa1   :  { %v519_v14 = vld [vmem:[#allocation5 + $0xd40] sm:$0xff]  ;;  %7667 = vmatpush1.bf16.msra.mxu0 %v17522_v17  ;;  %7698 = vmatprep.mubr.bf16.mxu0 %v21740_v23 }
  0xa2   :  { %v17547_v19 = vcombine.high %v507_v13, %v519_v14  ;;  %v527_v20 = vld [vmem:[#allocation5 + $0xd80] sm:$0xff]  ;;  %7176 = vmatprep.subr.bf16.mxu1 %v17539_v18  ;;  %v17546_v26 = vcombine.low %v507_v13, %v519_v14 }
  0xa3   :  { %v539_v21 = vld [vmem:[#allocation5 + $0xde0] sm:$0xff]  ;;  %7177 = vmatpush1.bf16.msra.mxu1 %v17538_v25 }
  0xa4   :  { %v531_v22 = vld [vmem:[#allocation5 + $0xda0] sm:$0xff]  ;;  %v17563_v27 = vcombine.high %v527_v20, %v539_v21  ;;  %7668 = vmatprep.subr.bf16.mxu0 %v17547_v19  ;;  %v17562_v33 = vcombine.low %v527_v20, %v539_v21 }
  0xa5   :  { %v543_v24 = vld [vmem:[#allocation5 + $0xe00] sm:$0xff]  ;;  %7669 = vmatpush1.bf16.msra.mxu0 %v17546_v26 }
  0xa6   :  { %v551_v28 = vld [vmem:[#allocation5 + $0xe40] sm:$0xff]  ;;  %v17571_v31 = vcombine.high %v531_v22, %v543_v24  ;;  %7178 = vmatprep.subr.bf16.mxu1 %v17563_v27  ;;  %v17570_v34 = vcombine.low %v531_v22, %v543_v24 }
  0xa7   :  { %v563_v29 = vld [vmem:[#allocation5 + $0xea0] sm:$0xff]  ;;  %7179 = vmatpush1.bf16.msra.mxu1 %v17562_v33 }
  0xa8   :  { %v555_v30 = vld [vmem:[#allocation5 + $0xe60] sm:$0xff]  ;;  %v17587_v35 = vcombine.high %v551_v28, %v563_v29  ;;  %7670 = vmatprep.subr.bf16.mxu0 %v17571_v31  ;;  %v17586_v41 = vcombine.low %v551_v28, %v563_v29 }
  0xa9   :  { %v567_v32 = vld [vmem:[#allocation5 + $0xec0] sm:$0xff]  ;;  %7671 = vmatpush1.bf16.msra.mxu0 %v17570_v34 }
  0xaa   :  { %v575_v36 = vld [vmem:[#allocation5 + $0xf00] sm:$0xff]  ;;  %v17595_v39 = vcombine.high %v555_v30, %v567_v32  ;;  %7180 = vmatprep.subr.bf16.mxu1 %v17587_v35  ;;  %v17594_v42 = vcombine.low %v555_v30, %v567_v32 }
  0xab   :  { %v587_v37 = vld [vmem:[#allocation5 + $0xf60] sm:$0xff]  ;;  %7181 = vmatpush1.bf16.msra.mxu1 %v17586_v41 }
  0xac   :  { %v579_v38 = vld [vmem:[#allocation5 + $0xf20] sm:$0xff]  ;;  %v17611_v43 = vcombine.high %v575_v36, %v587_v37  ;;  %7672 = vmatprep.subr.bf16.mxu0 %v17595_v39  ;;  %v17610_v49 = vcombine.low %v575_v36, %v587_v37 }
  0xad   :  { %v591_v40 = vld [vmem:[#allocation5 + $0xf80] sm:$0xff]  ;;  %7673 = vmatpush1.bf16.msra.mxu0 %v17594_v42 }
  0xae   :  { %v599_v44 = vld [vmem:[#allocation5 + $0xfc0] sm:$0xff]  ;;  %v17619_v47 = vcombine.high %v579_v38, %v591_v40  ;;  %7182 = vmatprep.subr.bf16.mxu1 %v17611_v43  ;;  %v17618_v50 = vcombine.low %v579_v38, %v591_v40 }
  0xaf   :  { %v611_v45 = vld [vmem:[#allocation5 + $0x1020] sm:$0xff]  ;;  %7183 = vmatpush1.bf16.msra.mxu1 %v17610_v49 }
  0xb0   :  { %v603_v46 = vld [vmem:[#allocation5 + $0xfe0] sm:$0xff]  ;;  %v17635_v51 = vcombine.high %v599_v44, %v611_v45  ;;  %7674 = vmatprep.subr.bf16.mxu0 %v17619_v47  ;;  %v17634_v58 = vcombine.low %v599_v44, %v611_v45 }
  0xb1   :  { %v615_v48 = vld [vmem:[#allocation5 + $0x1040] sm:$0xff]  ;;  %7675 = vmatpush1.bf16.msra.mxu0 %v17618_v50 }
  0xb2   :  { %v623_v52 = vld [vmem:[#allocation5 + $0x1080] sm:$0xff]  ;;  %v17643_v55 = vcombine.high %v603_v46, %v615_v48  ;;  %7184 = vmatprep.subr.bf16.mxu1 %v17635_v51  ;;  %v17642_v59 = vcombine.low %v603_v46, %v615_v48 }
  0xb3   :  { %v635_v53 = vld [vmem:[#allocation5 + $0x10e0] sm:$0xff]  ;;  %7185 = vmatpush1.bf16.msra.mxu1 %v17634_v58 }
  0xb4   :  { %v627_v54 = vld [vmem:[#allocation5 + $0x10a0] sm:$0xff]  ;;  %v17659_v60 = vcombine.high %v623_v52, %v635_v53  ;;  %7676 = vmatprep.subr.bf16.mxu0 %v17643_v55  ;;  %v17658_v2 = vcombine.low %v623_v52, %v635_v53 }
  0xb5   :  { %v639_v56 = vld [vmem:[#allocation5 + $0x1100] sm:$0xff]  ;;  %7677 = vmatpush1.bf16.msra.mxu0 %v17642_v59 }
  0xb6   :  { %v647_v61 = vld [vmem:[#allocation5 + $0x1140] sm:$0xff]  ;;  %v17667_v0 = vcombine.high %v627_v54, %v639_v56  ;;  %7186 = vmatprep.subr.bf16.mxu1 %v17659_v60  ;;  %v17666_v3 = vcombine.low %v627_v54, %v639_v56 }
  0xb7   :  { %v659_v62 = vld [vmem:[#allocation5 + $0x11a0] sm:$0xff]  ;;  %7187 = vmatpush1.bf16.msra.mxu1 %v17658_v2 }
  0xb8   :  { %v651_v63 = vld [vmem:[#allocation5 + $0x1160] sm:$0xff]  ;;  %v17683_v4 = vcombine.high %v647_v61, %v659_v62  ;;  %7678 = vmatprep.subr.bf16.mxu0 %v17667_v0  ;;  %v17682_v10 = vcombine.low %v647_v61, %v659_v62 }
  0xb9   :  { %v663_v1 = vld [vmem:[#allocation5 + $0x11c0] sm:$0xff]  ;;  %7679 = vmatpush1.bf16.msra.mxu0 %v17666_v3 }
  0xba   :  { %v671_v5 = vld [vmem:[#allocation5 + $0x1200] sm:$0xff]  ;;  %v17691_v8 = vcombine.high %v651_v63, %v663_v1  ;;  %7188 = vmatprep.subr.bf16.mxu1 %v17683_v4  ;;  %v17690_v11 = vcombine.low %v651_v63, %v663_v1 }
  0xbb   :  { %v683_v6 = vld [vmem:[#allocation5 + $0x1260] sm:$0xff]  ;;  %7189 = vmatpush1.bf16.msra.mxu1 %v17682_v10 }
  0xbc   :  { %v675_v7 = vld [vmem:[#allocation5 + $0x1220] sm:$0xff]  ;;  %v17707_v13 = vcombine.high %v671_v5, %v683_v6  ;;  %7680 = vmatprep.subr.bf16.mxu0 %v17691_v8  ;;  %v17706_v19 = vcombine.low %v671_v5, %v683_v6 }
  0xbd   :  { %v687_v9 = vld [vmem:[#allocation5 + $0x1280] sm:$0xff]  ;;  %7681 = vmatpush1.bf16.msra.mxu0 %v17690_v11 }
  0xbe   :  { %v695_v14 = vld [vmem:[#allocation5 + $0x12c0] sm:$0xff]  ;;  %v17715_v17 = vcombine.high %v675_v7, %v687_v9  ;;  %7190 = vmatprep.subr.bf16.mxu1 %v17707_v13  ;;  %v17714_v20 = vcombine.low %v675_v7, %v687_v9 }
  0xbf   :  { %v707_v15 = vld [vmem:[#allocation5 + $0x1320] sm:$0xff]  ;;  %7191 = vmatpush1.bf16.msra.mxu1 %v17706_v19 }
  0xc0   :  { %v699_v16 = vld [vmem:[#allocation5 + $0x12e0] sm:$0xff]  ;;  %v17731_v21 = vcombine.high %v695_v14, %v707_v15  ;;  %7682 = vmatprep.subr.bf16.mxu0 %v17715_v17  ;;  %v17730_v28 = vcombine.low %v695_v14, %v707_v15 }
  0xc1   :  { %v711_v18 = vld [vmem:[#allocation5 + $0x1340] sm:$0xff]  ;;  %7683 = vmatpush1.bf16.msra.mxu0 %v17714_v20 }
  0xc2   :  { %v719_v22 = vld [vmem:[#allocation5 + $0x1380] sm:$0xff]  ;;  %v17739_v26 = vcombine.high %v699_v16, %v711_v18  ;;  %7192 = vmatprep.subr.bf16.mxu1 %v17731_v21  ;;  %v17738_v29 = vcombine.low %v699_v16, %v711_v18 }
  0xc3   :  { %v731_v24 = vld [vmem:[#allocation5 + $0x13e0] sm:$0xff]  ;;  %7193 = vmatpush1.bf16.msra.mxu1 %v17730_v28 }
  0xc4   :  { %v723_v25 = vld [vmem:[#allocation5 + $0x13a0] sm:$0xff]  ;;  %v17755_v30 = vcombine.high %v719_v22, %v731_v24  ;;  %7684 = vmatprep.subr.bf16.mxu0 %v17739_v26  ;;  %v17754_v36 = vcombine.low %v719_v22, %v731_v24  ;;  %v88_v24 = vld [vmem:[#allocation2 + $0x28] sm:$0xff] }
  0xc5   :  { %v735_v27 = vld [vmem:[#allocation5 + $0x1400] sm:$0xff]  ;;  %7685 = vmatpush1.bf16.msra.mxu0 %v17738_v29 }
  0xc6   :  { %v743_v31 = vld [vmem:[#allocation5 + $0x1440] sm:$0xff]  ;;  %v17763_v34 = vcombine.high %v723_v25, %v735_v27  ;;  %7194 = vmatprep.subr.bf16.mxu1 %v17755_v30  ;;  %v17762_v37 = vcombine.low %v723_v25, %v735_v27 }
  0xc7   :  { %v755_v32 = vld [vmem:[#allocation5 + $0x14a0] sm:$0xff]  ;;  %7195 = vmatpush1.bf16.msra.mxu1 %v17754_v36 }
  0xc8   :  { %v747_v33 = vld [vmem:[#allocation5 + $0x1460] sm:$0xff]  ;;  %v17779_v38 = vcombine.high %v743_v31, %v755_v32  ;;  %7686 = vmatprep.subr.bf16.mxu0 %v17763_v34  ;;  %v17778_v44 = vcombine.low %v743_v31, %v755_v32  ;;  %v21748_v34 = vpack.c.bf16 %v88_v24, %v88_v24 }
  0xc9   :  { %v759_v35 = vld [vmem:[#allocation5 + $0x14c0] sm:$0xff]  ;;  %7687 = vmatpush1.bf16.msra.mxu0 %v17762_v37 }
  0xca   :  { %v767_v39 = vld [vmem:[#allocation5 + $0x1500] sm:$0xff]  ;;  %v17787_v42 = vcombine.high %v747_v33, %v759_v35  ;;  %7196 = vmatprep.subr.bf16.mxu1 %v17779_v38  ;;  %v17786_v45 = vcombine.low %v747_v33, %v759_v35 }
  0xcb   :  { %v779_v40 = vld [vmem:[#allocation5 + $0x1560] sm:$0xff]  ;;  %7197 = vmatpush1.bf16.msra.mxu1 %v17778_v44 }
  0xcc   :  { %v771_v41 = vld [vmem:[#allocation5 + $0x1520] sm:$0xff]  ;;  %v17803_v46 = vcombine.high %v767_v39, %v779_v40  ;;  %7688 = vmatprep.subr.bf16.mxu0 %v17787_v42  ;;  %v17802_v52 = vcombine.low %v767_v39, %v779_v40 }
  0xcd   :  { %v783_v43 = vld [vmem:[#allocation5 + $0x1580] sm:$0xff]  ;;  %7689 = vmatpush1.bf16.msra.mxu0 %v17786_v45 }
  0xce   :  { %v791_v47 = vld [vmem:[#allocation5 + $0x15c0] sm:$0xff]  ;;  %v17811_v50 = vcombine.high %v771_v41, %v783_v43  ;;  %7198 = vmatprep.subr.bf16.mxu1 %v17803_v46  ;;  %v17810_v53 = vcombine.low %v771_v41, %v783_v43 }
  0xcf   :  { %v803_v48 = vld [vmem:[#allocation5 + $0x1620] sm:$0xff]  ;;  %7199 = vmatpush1.bf16.msra.mxu1 %v17802_v52 }
  0xd0   :  { %v795_v49 = vld [vmem:[#allocation5 + $0x15e0] sm:$0xff]  ;;  %v17827_v54 = vcombine.high %v791_v47, %v803_v48  ;;  %7690 = vmatprep.subr.bf16.mxu0 %v17811_v50  ;;  %v17826_v61 = vcombine.low %v791_v47, %v803_v48 }
  0xd1   :  { %v807_v51 = vld [vmem:[#allocation5 + $0x1640] sm:$0xff]  ;;  %7691 = vmatpush1.bf16.msra.mxu0 %v17810_v53 }
  0xd2   :  { %v815_v55 = vld [vmem:[#allocation5 + $0x1680] sm:$0xff]  ;;  %v17835_v59 = vcombine.high %v795_v49, %v807_v51  ;;  %7200 = vmatprep.subr.bf16.mxu1 %v17827_v54  ;;  %v17834_v62 = vcombine.low %v795_v49, %v807_v51 }
  0xd3   :  { %v827_v56 = vld [vmem:[#allocation5 + $0x16e0] sm:$0xff]  ;;  %7201 = vmatpush1.bf16.msra.mxu1 %v17826_v61 }
  0xd4   :  { %v819_v58 = vld [vmem:[#allocation5 + $0x16a0] sm:$0xff]  ;;  %v17851_v63 = vcombine.high %v815_v55, %v827_v56  ;;  %7692 = vmatprep.subr.bf16.mxu0 %v17835_v59  ;;  %v17850_v5 = vcombine.low %v815_v55, %v827_v56 }
  0xd5   :  { %v831_v60 = vld [vmem:[#allocation5 + $0x1700] sm:$0xff]  ;;  %7693 = vmatpush1.bf16.msra.mxu0 %v17834_v62 }
  0xd6   :  { %v839_v0 = vld [vmem:[#allocation5 + $0x1740] sm:$0xff]  ;;  %v17859_v3 = vcombine.high %v819_v58, %v831_v60  ;;  %7202 = vmatprep.subr.bf16.mxu1 %v17851_v63  ;;  %v17858_v7 = vcombine.low %v819_v58, %v831_v60 }
  0xd7   :  { %v851_v1 = vld [vmem:[#allocation5 + $0x17a0] sm:$0xff]  ;;  %7203 = vmatpush1.bf16.msra.mxu1 %v17850_v5 }
  0xd8   :  { %v843_v2 = vld [vmem:[#allocation5 + $0x1760] sm:$0xff]  ;;  %v17875_v8 = vcombine.high %v839_v0, %v851_v1  ;;  %7694 = vmatprep.subr.bf16.mxu0 %v17859_v3  ;;  %v17874_v15 = vcombine.low %v839_v0, %v851_v1 }
  0xd9   :  { %v855_v4 = vld [vmem:[#allocation5 + $0x17c0] sm:$0xff]  ;;  %7695 = vmatpush1.bf16.msra.mxu0 %v17858_v7 }
  0xda   :  { %v863_v6 = vld [vmem:[#allocation5 + $0x1800] sm:$0xff]  ;;  %v17883_v13 = vcombine.high %v843_v2, %v855_v4  ;;  %7204 = vmatprep.subr.bf16.mxu1 %v17875_v8  ;;  %v17882_v17 = vcombine.low %v843_v2, %v855_v4 }
  0xdb   :  { %v875_v9 = vld [vmem:[#allocation5 + $0x1860] sm:$0xff]  ;;  %7205 = vmatpush1.bf16.msra.mxu1 %v17874_v15 }
  0xdc   :  { %v867_v10 = vld [vmem:[#allocation5 + $0x1820] sm:$0xff]  ;;  %v17899_v18 = vcombine.high %v863_v6, %v875_v9  ;;  %7696 = vmatprep.subr.bf16.mxu0 %v17883_v13  ;;  %v17898_v26 = vcombine.low %v863_v6, %v875_v9 }
  0xdd   :  { %v879_v11 = vld [vmem:[#allocation5 + $0x1880] sm:$0xff]  ;;  %7697 = vmatpush1.bf16.msra.mxu0 %v17882_v17 }
  0xde   :  { %v85_v14 = vld [vmem:[#allocation2 + $0x10] sm:$0xff]  ;;  %v17907_v22 = vcombine.high %v867_v10, %v879_v11  ;;  %7215 = vmatprep.subr.bf16.mxu1 %v17899_v18  ;;  %v17906_v27 = vcombine.low %v867_v10, %v879_v11 }
  0xdf   :  { %v887_v16 = vld [vmem:[#allocation5 + $0x18c0] sm:$0xff]  ;;  %v21746_v25 = vpack.c.bf16 %v85_v14, %v85_v14 }
  0xe0   :  { %v899_v19 = vld [vmem:[#allocation5 + $0x1920] sm:$0xff]  ;;  %7707 = vmatprep.subr.bf16.mxu0 %v17907_v22 }
  0xe1   :  { %v891_v20 = vld [vmem:[#allocation5 + $0x18e0] sm:$0xff]  ;;  %v17923_v28 = vcombine.high %v887_v16, %v899_v19  ;;  %7207 = vmatmul.mubr.bf16.vlgmr.msra.gmra.mrb[0].mxu1 %v21746_v25  ;;  %7699 = vmatmul.mubr.bf16.vlgmr.msra.gmra.mrb[0].mxu0 %v21746_v25  ;;  %v17922_v35 = vcombine.low %v887_v16, %v899_v19 }
  0xe2   :  { %v903_v21 = vld [vmem:[#allocation5 + $0x1940] sm:$0xff]  ;;  %7216 = vmatpush1.bf16.msra.mxu1 %v17898_v26  ;;  %7708 = vmatpush1.bf16.msra.mxu0 %v17906_v27 }
  0xe3   :  { %v911_v29 = vld [vmem:[#allocation5 + $0x1980] sm:$0xff]  ;;  %v17931_v32 = vcombine.high %v891_v20, %v903_v21  ;;  %7217 = vmatprep.subr.bf16.mxu1 %v17923_v28  ;;  %v17930_v36 = vcombine.low %v891_v20, %v903_v21  ;;  %7247 = vmatprep.mubr.bf16.mxu1 %v21748_v34 }
  0xe4   :  { %v923_v30 = vld [vmem:[#allocation5 + $0x19e0] sm:$0xff]  ;;  %7739 = vmatprep.mubr.bf16.mxu0 %v21748_v34 }
  0xe5   :  { %v915_v31 = vld [vmem:[#allocation5 + $0x19a0] sm:$0xff]  ;;  %v17947_v37 = vcombine.high %v911_v29, %v923_v30  ;;  %7709 = vmatprep.subr.bf16.mxu0 %v17931_v32  ;;  %v17946_v43 = vcombine.low %v911_v29, %v923_v30 }
  0xe6   :  { %v927_v33 = vld [vmem:[#allocation5 + $0x1a00] sm:$0xff]  ;;  %7218 = vmatpush1.bf16.msra.mxu1 %v17922_v35  ;;  %7710 = vmatpush1.bf16.msra.mxu0 %v17930_v36 }
  0xe7   :  { %v935_v38 = vld [vmem:[#allocation5 + $0x1a40] sm:$0xff]  ;;  %v17955_v41 = vcombine.high %v915_v31, %v927_v33  ;;  %7219 = vmatprep.subr.bf16.mxu1 %v17947_v37  ;;  %v17954_v44 = vcombine.low %v915_v31, %v927_v33 }
  0xe8   :  { %v947_v39 = vld [vmem:[#allocation5 + $0x1aa0] sm:$0xff] }
  0xe9   :  { %v939_v40 = vld [vmem:[#allocation5 + $0x1a60] sm:$0xff]  ;;  %v17971_v45 = vcombine.high %v935_v38, %v947_v39  ;;  %7711 = vmatprep.subr.bf16.mxu0 %v17955_v41  ;;  %v17970_v51 = vcombine.low %v935_v38, %v947_v39 }
  0xea   :  { %v951_v42 = vld [vmem:[#allocation5 + $0x1ac0] sm:$0xff]  ;;  %7220 = vmatpush1.bf16.msra.mxu1 %v17946_v43  ;;  %7712 = vmatpush1.bf16.msra.mxu0 %v17954_v44 }
  0xeb   :  { %v959_v46 = vld [vmem:[#allocation5 + $0x1b00] sm:$0xff]  ;;  %v17979_v49 = vcombine.high %v939_v40, %v951_v42  ;;  %7221 = vmatprep.subr.bf16.mxu1 %v17971_v45  ;;  %v17978_v52 = vcombine.low %v939_v40, %v951_v42 }
  0xec   :  { %v971_v47 = vld [vmem:[#allocation5 + $0x1b60] sm:$0xff] }
  0xed   :  { %v963_v48 = vld [vmem:[#allocation5 + $0x1b20] sm:$0xff]  ;;  %v17995_v53 = vcombine.high %v959_v46, %v971_v47  ;;  %7713 = vmatprep.subr.bf16.mxu0 %v17979_v49  ;;  %v17994_v60 = vcombine.low %v959_v46, %v971_v47 }
  0xee   :  { %v975_v50 = vld [vmem:[#allocation5 + $0x1b80] sm:$0xff]  ;;  %7222 = vmatpush1.bf16.msra.mxu1 %v17970_v51  ;;  %7714 = vmatpush1.bf16.msra.mxu0 %v17978_v52 }
  0xef   :  { %v983_v54 = vld [vmem:[#allocation5 + $0x1bc0] sm:$0xff]  ;;  %v18003_v58 = vcombine.high %v963_v48, %v975_v50  ;;  %7223 = vmatprep.subr.bf16.mxu1 %v17995_v53  ;;  %v18002_v61 = vcombine.low %v963_v48, %v975_v50 }
  0xf0   :  { %v995_v55 = vld [vmem:[#allocation5 + $0x1c20] sm:$0xff] }
  0xf1   :  { %v987_v56 = vld [vmem:[#allocation5 + $0x1be0] sm:$0xff]  ;;  %v18019_v62 = vcombine.high %v983_v54, %v995_v55  ;;  %7715 = vmatprep.subr.bf16.mxu0 %v18003_v58  ;;  %v18018_v4 = vcombine.low %v983_v54, %v995_v55 }
  0xf2   :  { %v999_v59 = vld [vmem:[#allocation5 + $0x1c40] sm:$0xff]  ;;  %7224 = vmatpush1.bf16.msra.mxu1 %v17994_v60  ;;  %7716 = vmatpush1.bf16.msra.mxu0 %v18002_v61 }
  0xf3   :  { %v1007_v63 = vld [vmem:[#allocation5 + $0x1c80] sm:$0xff]  ;;  %v18027_v2 = vcombine.high %v987_v56, %v999_v59  ;;  %7225 = vmatprep.subr.bf16.mxu1 %v18019_v62  ;;  %v18026_v5 = vcombine.low %v987_v56, %v999_v59 }
  0xf4   :  { %v1019_v0 = vld [vmem:[#allocation5 + $0x1ce0] sm:$0xff] }
  0xf5   :  { %v1011_v1 = vld [vmem:[#allocation5 + $0x1ca0] sm:$0xff]  ;;  %v18043_v6 = vcombine.high %v1007_v63, %v1019_v0  ;;  %7717 = vmatprep.subr.bf16.mxu0 %v18027_v2  ;;  %v18042_v13 = vcombine.low %v1007_v63, %v1019_v0 }
  0xf6   :  { %v1023_v3 = vld [vmem:[#allocation5 + $0x1d00] sm:$0xff]  ;;  %7226 = vmatpush1.bf16.msra.mxu1 %v18018_v4  ;;  %7718 = vmatpush1.bf16.msra.mxu0 %v18026_v5 }
  0xf7   :  { %v1031_v7 = vld [vmem:[#allocation5 + $0x1d40] sm:$0xff]  ;;  %v18051_v10 = vcombine.high %v1011_v1, %v1023_v3  ;;  %7227 = vmatprep.subr.bf16.mxu1 %v18043_v6  ;;  %v18050_v14 = vcombine.low %v1011_v1, %v1023_v3 }
  0xf8   :  { %v1043_v8 = vld [vmem:[#allocation5 + $0x1da0] sm:$0xff] }
  0xf9   :  { %v1035_v9 = vld [vmem:[#allocation5 + $0x1d60] sm:$0xff]  ;;  %v18067_v15 = vcombine.high %v1031_v7, %v1043_v8  ;;  %7719 = vmatprep.subr.bf16.mxu0 %v18051_v10  ;;  %v18066_v21 = vcombine.low %v1031_v7, %v1043_v8 }
  0xfa   :  { %v1047_v11 = vld [vmem:[#allocation5 + $0x1dc0] sm:$0xff]  ;;  %7228 = vmatpush1.bf16.msra.mxu1 %v18042_v13  ;;  %7720 = vmatpush1.bf16.msra.mxu0 %v18050_v14 }
  0xfb   :  { %v1055_v16 = vld [vmem:[#allocation5 + $0x1e00] sm:$0xff]  ;;  %v18075_v19 = vcombine.high %v1035_v9, %v1047_v11  ;;  %7229 = vmatprep.subr.bf16.mxu1 %v18067_v15  ;;  %v18074_v22 = vcombine.low %v1035_v9, %v1047_v11 }
  0xfc   :  { %v1067_v17 = vld [vmem:[#allocation5 + $0x1e60] sm:$0xff] }
  0xfd   :  { %v1059_v18 = vld [vmem:[#allocation5 + $0x1e20] sm:$0xff]  ;;  %v18091_v24 = vcombine.high %v1055_v16, %v1067_v17  ;;  %7721 = vmatprep.subr.bf16.mxu0 %v18075_v19  ;;  %v18090_v31 = vcombine.low %v1055_v16, %v1067_v17 }
  0xfe   :  { %v1071_v20 = vld [vmem:[#allocation5 + $0x1e80] sm:$0xff]  ;;  %7230 = vmatpush1.bf16.msra.mxu1 %v18066_v21  ;;  %7722 = vmatpush1.bf16.msra.mxu0 %v18074_v22  ;;  %v96_v21 = vld [vmem:[#allocation5 + $0x8] sm:$0xff] }
  0xff   :  { %v1079_v26 = vld [vmem:[#allocation5 + $0x1ec0] sm:$0xff]  ;;  %v18099_v29 = vcombine.high %v1059_v18, %v1071_v20  ;;  %7231 = vmatprep.subr.bf16.mxu1 %v18091_v24  ;;  %v18098_v32 = vcombine.low %v1059_v18, %v1071_v20  ;;  %v108_v22 = vld [vmem:[#allocation5 + $0x68] sm:$0xff]  ;;  %v101_v24 = vld [vmem:[#allocation5 + $0x30] sm:$0xff] }
 0x100   :  { %v1091_v27 = vld [vmem:[#allocation5 + $0x1f20] sm:$0xff] }
 0x101   :  { %v1083_v28 = vld [vmem:[#allocation5 + $0x1ee0] sm:$0xff]  ;;  %v18115_v33 = vcombine.high %v1079_v26, %v1091_v27  ;;  %7723 = vmatprep.subr.bf16.mxu0 %v18099_v29  ;;  %v18114_v40 = vcombine.low %v1079_v26, %v1091_v27  ;;  %v87_v27 = vld [vmem:[#allocation2 + $0x20] sm:$0xff] }
 0x102   :  { %v1095_v30 = vld [vmem:[#allocation5 + $0x1f40] sm:$0xff]  ;;  %7232 = vmatpush1.bf16.msra.mxu1 %v18090_v31  ;;  %7724 = vmatpush1.bf16.msra.mxu0 %v18098_v32  ;;  %v17133_v31 = vcombine.high %v96_v21, %v108_v22  ;;  %v120_v32 = vld [vmem:[#allocation5 + $0xc8] sm:$0xff] }
 0x103   :  { %v1103_v35 = vld [vmem:[#allocation5 + $0x1f80] sm:$0xff]  ;;  %v18123_v38 = vcombine.high %v1083_v28, %v1095_v30  ;;  %7233 = vmatprep.subr.bf16.mxu1 %v18115_v33  ;;  %v18122_v41 = vcombine.low %v1083_v28, %v1095_v30  ;;  %v113_v28 = vld [vmem:[#allocation5 + $0x90] sm:$0xff]  ;;  %v132_v33 = vld [vmem:[#allocation5 + $0x128] sm:$0xff] }
 0x104   :  { %v1115_v36 = vld [vmem:[#allocation5 + $0x1fe0] sm:$0xff] }
 0x105   :  { %v1107_v37 = vld [vmem:[#allocation5 + $0x1fa0] sm:$0xff]  ;;  %v18139_v42 = vcombine.high %v1103_v35, %v1115_v36  ;;  %7725 = vmatprep.subr.bf16.mxu0 %v18123_v38  ;;  %v18138_v48 = vcombine.low %v1103_v35, %v1115_v36  ;;  %v125_v35 = vld [vmem:[#allocation5 + $0xf0] sm:$0xff]  ;;  %v17143_v36 = vcombine.high %v101_v24, %v113_v28  ;;  %v21754_v38 = vpack.c.bf16 %v87_v27, %v87_v27 }
 0x106   :  { %v1119_v39 = vld [vmem:[#allocation5 + $0x2000] sm:$0xff]  ;;  %7234 = vmatpush1.bf16.msra.mxu1 %v18114_v40  ;;  %7726 = vmatpush1.bf16.msra.mxu0 %v18122_v41  ;;  %v17142_v40 = vcombine.low %v101_v24, %v113_v28  ;;  %v17157_v41 = vcombine.high %v120_v32, %v132_v33 }
 0x107   :  { %v1127_v43 = vld [vmem:[#allocation5 + $0x2040] sm:$0xff]  ;;  %v18147_v46 = vcombine.high %v1107_v37, %v1119_v39  ;;  %7235 = vmatprep.subr.bf16.mxu1 %v18139_v42  ;;  %v18146_v49 = vcombine.low %v1107_v37, %v1119_v39  ;;  %v137_v37 = vld [vmem:[#allocation5 + $0x150] sm:$0xff]  ;;  %v17132_v39 = vcombine.low %v96_v21, %v108_v22  ;;  %v144_v42 = vld [vmem:[#allocation5 + $0x188] sm:$0xff] }
 0x108   :  { %v1139_v44 = vld [vmem:[#allocation5 + $0x20a0] sm:$0xff]  ;;  %v276_v21 = vld [vmem:[#allocation5 + $0x5a8] sm:$0xff]  ;;  %v269_v22 = vld [vmem:[#allocation5 + $0x570] sm:$0xff] }
 0x109   :  { %v1131_v45 = vld [vmem:[#allocation5 + $0x2060] sm:$0xff]  ;;  %v18163_v50 = vcombine.high %v1127_v43, %v1139_v44  ;;  %7727 = vmatprep.subr.bf16.mxu0 %v18147_v46  ;;  %v18162_v56 = vcombine.low %v1127_v43, %v1139_v44  ;;  %v156_v43 = vld [vmem:[#allocation5 + $0x1e8] sm:$0xff]  ;;  %v149_v44 = vld [vmem:[#allocation5 + $0x1b0] sm:$0xff] }
 0x10a   :  { %v1143_v47 = vld [vmem:[#allocation5 + $0x20c0] sm:$0xff]  ;;  %7236 = vmatpush1.bf16.msra.mxu1 %v18138_v48  ;;  %7728 = vmatpush1.bf16.msra.mxu0 %v18146_v49  ;;  %v161_v46 = vld [vmem:[#allocation5 + $0x210] sm:$0xff]  ;;  %v17166_v48 = vcombine.low %v125_v35, %v137_v37  ;;  %v17181_v49 = vcombine.high %v144_v42, %v156_v43 }
 0x10b   :  { %v1151_v51 = vld [vmem:[#allocation5 + $0x2100] sm:$0xff]  ;;  %v18171_v54 = vcombine.high %v1131_v45, %v1143_v47  ;;  %7237 = vmatprep.subr.bf16.mxu1 %v18163_v50  ;;  %v18170_v58 = vcombine.low %v1131_v45, %v1143_v47  ;;  %v17167_v45 = vcombine.high %v125_v35, %v137_v37  ;;  %v17156_v47 = vcombine.low %v120_v32, %v132_v33  ;;  %v168_v50 = vld [vmem:[#allocation5 + $0x248] sm:$0xff]  ;;  %v293_v32 = vld [vmem:[#allocation5 + $0x630] sm:$0xff] }
 0x10c   :  { %v1163_v52 = vld [vmem:[#allocation5 + $0x2160] sm:$0xff]  ;;  %v305_v35 = vld [vmem:[#allocation5 + $0x690] sm:$0xff] }
 0x10d   :  { %v1155_v53 = vld [vmem:[#allocation5 + $0x2120] sm:$0xff]  ;;  %v18187_v59 = vcombine.high %v1151_v51, %v1163_v52  ;;  %7729 = vmatprep.subr.bf16.mxu0 %v18171_v54  ;;  %v18186_v1 = vcombine.low %v1151_v51, %v1163_v52  ;;  %v180_v51 = vld [vmem:[#allocation5 + $0x2a8] sm:$0xff]  ;;  %v173_v52 = vld [vmem:[#allocation5 + $0x270] sm:$0xff] }
 0x10e   :  { %v1167_v55 = vld [vmem:[#allocation5 + $0x2180] sm:$0xff]  ;;  %7238 = vmatpush1.bf16.msra.mxu1 %v18162_v56  ;;  %7730 = vmatpush1.bf16.msra.mxu0 %v18170_v58  ;;  %v185_v54 = vld [vmem:[#allocation5 + $0x2d0] sm:$0xff]  ;;  %v17190_v56 = vcombine.low %v149_v44, %v161_v46  ;;  %v17205_v58 = vcombine.high %v168_v50, %v180_v51 }
 0x10f   :  { %v1175_v60 = vld [vmem:[#allocation5 + $0x21c0] sm:$0xff]  ;;  %v18195_v63 = vcombine.high %v1155_v53, %v1167_v55  ;;  %7239 = vmatprep.subr.bf16.mxu1 %v18187_v59  ;;  %v18194_v2 = vcombine.low %v1155_v53, %v1167_v55  ;;  %v17191_v53 = vcombine.high %v149_v44, %v161_v46  ;;  %v17180_v55 = vcombine.low %v144_v42, %v156_v43  ;;  %v192_v59 = vld [vmem:[#allocation5 + $0x308] sm:$0xff]  ;;  %v317_v42 = vld [vmem:[#allocation5 + $0x6f0] sm:$0xff] }
 0x110   :  { %v1187_v61 = vld [vmem:[#allocation5 + $0x2220] sm:$0xff]  ;;  %v17335_v43 = vcombine.high %v293_v32, %v305_v35  ;;  %v329_v44 = vld [vmem:[#allocation5 + $0x750] sm:$0xff]  ;;  %v17334_v46 = vcombine.low %v293_v32, %v305_v35 }
 0x111   :  { %v1179_v62 = vld [vmem:[#allocation5 + $0x21e0] sm:$0xff]  ;;  %v18211_v3 = vcombine.high %v1175_v60, %v1187_v61  ;;  %7731 = vmatprep.subr.bf16.mxu0 %v18195_v63  ;;  %v18210_v9 = vcombine.low %v1175_v60, %v1187_v61  ;;  %v204_v60 = vld [vmem:[#allocation5 + $0x368] sm:$0xff]  ;;  %v197_v61 = vld [vmem:[#allocation5 + $0x330] sm:$0xff] }
 0x112   :  { %v1191_v0 = vld [vmem:[#allocation5 + $0x2240] sm:$0xff]  ;;  %7240 = vmatpush1.bf16.msra.mxu1 %v18186_v1  ;;  %7732 = vmatpush1.bf16.msra.mxu0 %v18194_v2  ;;  %v209_v63 = vld [vmem:[#allocation5 + $0x390] sm:$0xff]  ;;  %v17214_v1 = vcombine.low %v173_v52, %v185_v54  ;;  %v17229_v2 = vcombine.high %v192_v59, %v204_v60 }
 0x113   :  { %v1199_v4 = vld [vmem:[#allocation5 + $0x2280] sm:$0xff]  ;;  %v18219_v7 = vcombine.high %v1179_v62, %v1191_v0  ;;  %7241 = vmatprep.subr.bf16.mxu1 %v18211_v3  ;;  %v18218_v10 = vcombine.low %v1179_v62, %v1191_v0  ;;  %v17215_v62 = vcombine.high %v173_v52, %v185_v54  ;;  %v17204_v0 = vcombine.low %v168_v50, %v180_v51  ;;  %v216_v3 = vld [vmem:[#allocation5 + $0x3c8] sm:$0xff]  ;;  %v341_v50 = vld [vmem:[#allocation5 + $0x7b0] sm:$0xff] }
 0x114   :  { %v1211_v5 = vld [vmem:[#allocation5 + $0x22e0] sm:$0xff]  ;;  %v17359_v51 = vcombine.high %v317_v42, %v329_v44  ;;  %v353_v52 = vld [vmem:[#allocation5 + $0x810] sm:$0xff]  ;;  %v17358_v54 = vcombine.low %v317_v42, %v329_v44 }
 0x115   :  { %v1203_v6 = vld [vmem:[#allocation5 + $0x22a0] sm:$0xff]  ;;  %v18235_v11 = vcombine.high %v1199_v4, %v1211_v5  ;;  %7733 = vmatprep.subr.bf16.mxu0 %v18219_v7  ;;  %v18234_v18 = vcombine.low %v1199_v4, %v1211_v5  ;;  %v228_v4 = vld [vmem:[#allocation5 + $0x428] sm:$0xff]  ;;  %v221_v5 = vld [vmem:[#allocation5 + $0x3f0] sm:$0xff] }
 0x116   :  { %v1215_v8 = vld [vmem:[#allocation5 + $0x2300] sm:$0xff]  ;;  %7242 = vmatpush1.bf16.msra.mxu1 %v18210_v9  ;;  %7734 = vmatpush1.bf16.msra.mxu0 %v18218_v10  ;;  %v233_v7 = vld [vmem:[#allocation5 + $0x450] sm:$0xff]  ;;  %v17238_v9 = vcombine.low %v197_v61, %v209_v63  ;;  %v17253_v10 = vcombine.high %v216_v3, %v228_v4 }
 0x117   :  { %v1223_v13 = vld [vmem:[#allocation5 + $0x2340] sm:$0xff]  ;;  %v18243_v16 = vcombine.high %v1203_v6, %v1215_v8  ;;  %7243 = vmatprep.subr.bf16.mxu1 %v18235_v11  ;;  %v18242_v19 = vcombine.low %v1203_v6, %v1215_v8  ;;  %v17239_v6 = vcombine.high %v197_v61, %v209_v63  ;;  %v17228_v8 = vcombine.low %v192_v59, %v204_v60  ;;  %v240_v11 = vld [vmem:[#allocation5 + $0x488] sm:$0xff]  ;;  %v365_v59 = vld [vmem:[#allocation5 + $0x870] sm:$0xff] }
 0x118   :  { %v1235_v14 = vld [vmem:[#allocation5 + $0x23a0] sm:$0xff]  ;;  %v17383_v60 = vcombine.high %v341_v50, %v353_v52  ;;  %v377_v61 = vld [vmem:[#allocation5 + $0x8d0] sm:$0xff]  ;;  %v17382_v63 = vcombine.low %v341_v50, %v353_v52 }
 0x119   :  { %v1227_v15 = vld [vmem:[#allocation5 + $0x2360] sm:$0xff]  ;;  %v18259_v20 = vcombine.high %v1223_v13, %v1235_v14  ;;  %7735 = vmatprep.subr.bf16.mxu0 %v18243_v16  ;;  %v18258_v29 = vcombine.low %v1223_v13, %v1235_v14  ;;  %v252_v13 = vld [vmem:[#allocation5 + $0x4e8] sm:$0xff]  ;;  %v245_v14 = vld [vmem:[#allocation5 + $0x4b0] sm:$0xff] }
 0x11a   :  { %v1239_v17 = vld [vmem:[#allocation5 + $0x23c0] sm:$0xff]  ;;  %7244 = vmatpush1.bf16.msra.mxu1 %v18234_v18  ;;  %7736 = vmatpush1.bf16.msra.mxu0 %v18242_v19  ;;  %v257_v16 = vld [vmem:[#allocation5 + $0x510] sm:$0xff]  ;;  %v17262_v18 = vcombine.low %v221_v5, %v233_v7  ;;  %v17277_v19 = vcombine.high %v240_v11, %v252_v13  ;;  %v17276_v27 = vcombine.low %v240_v11, %v252_v13 }
 0x11b   :  { %v18267_v26 = vcombine.high %v1227_v15, %v1239_v17  ;;  %7245 = vmatprep.subr.bf16.mxu1 %v18259_v20  ;;  %v18266_v30 = vcombine.low %v1227_v15, %v1239_v17  ;;  %v17263_v15 = vcombine.high %v221_v5, %v233_v7  ;;  %v17252_v17 = vcombine.low %v216_v3, %v228_v4  ;;  %v264_v20 = vld [vmem:[#allocation5 + $0x548] sm:$0xff]  ;;  %v389_v3 = vld [vmem:[#allocation5 + $0x930] sm:$0xff] }
 0x11c   :  { %v17287_v24 = vcombine.high %v245_v14, %v257_v16  ;;  %v17286_v28 = vcombine.low %v245_v14, %v257_v16  ;;  %v17407_v4 = vcombine.high %v365_v59, %v377_v61  ;;  %v401_v5 = vld [vmem:[#allocation5 + $0x990] sm:$0xff]  ;;  %v17406_v7 = vcombine.low %v365_v59, %v377_v61 }
 0x11d   :  { %7737 = vmatprep.subr.bf16.mxu0 %v18267_v26  ;;  %v281_v26 = vld [vmem:[#allocation5 + $0x5d0] sm:$0xff]  ;;  %v17431_v13 = vcombine.high %v389_v3, %v401_v5  ;;  %v17430_v16 = vcombine.low %v389_v3, %v401_v5 }
 0x11e   :  { %7246 = vmatpush1.bf16.msra.mxu1 %v18258_v29  ;;  %7738 = vmatpush1.bf16.msra.mxu0 %v18266_v30  ;;  %v17301_v29 = vcombine.high %v264_v20, %v276_v21  ;;  %v288_v30 = vld [vmem:[#allocation5 + $0x608] sm:$0xff]  ;;  %v17311_v33 = vcombine.high %v269_v22, %v281_v26  ;;  %v17310_v37 = vcombine.low %v269_v22, %v281_v26  ;;  %v413_v11 = vld [vmem:[#allocation5 + $0x9f0] sm:$0xff] }
 0x11f   :  { %7256 = vmatprep.subr.bf16.mxu1 %v17133_v31  ;;  %7871 = vmatprep.subr.bf16.mxu0 %v17143_v36  ;;  %v300_v31 = vld [vmem:[#allocation5 + $0x668] sm:$0xff]  ;;  %v17300_v36 = vcombine.low %v264_v20, %v276_v21  ;;  %v425_v14 = vld [vmem:[#allocation5 + $0xa50] sm:$0xff] }
 0x120   :  { %v437_v20 = vld [vmem:[#allocation5 + $0xab0] sm:$0xff]  ;;  %v17455_v21 = vcombine.high %v413_v11, %v425_v14  ;;  %v17454_v26 = vcombine.low %v413_v11, %v425_v14 }
 0x121   :  { %7248 = vmatmul.mubr.bf16.vlgmr.msra.gmra.mrb[0].mxu1 %v21754_v38  ;;  %7740 = vmatmul.mubr.bf16.vlgmr.msra.gmra.mrb[0].mxu0 %v21754_v38  ;;  %v449_v22 = vld [vmem:[#allocation5 + $0xb10] sm:$0xff] }
 0x122   :  { %7257 = vmatpush1.bf16.msra.mxu1 %v17132_v39  ;;  %7872 = vmatpush1.bf16.msra.mxu0 %v17142_v40  ;;  %v17325_v39 = vcombine.high %v288_v30, %v300_v31  ;;  %v312_v40 = vld [vmem:[#allocation5 + $0x6c8] sm:$0xff]  ;;  %v473_v32 = vld [vmem:[#allocation5 + $0xbd0] sm:$0xff]  ;;  %v17478_v35 = vcombine.low %v437_v20, %v449_v22 }
 0x123   :  { %7258 = vmatprep.subr.bf16.mxu1 %v17157_v41  ;;  %7873 = vmatprep.subr.bf16.mxu0 %v17167_v45  ;;  %v324_v41 = vld [vmem:[#allocation5 + $0x728] sm:$0xff]  ;;  %v17324_v45 = vcombine.low %v288_v30, %v300_v31  ;;  %v461_v30 = vld [vmem:[#allocation5 + $0xb70] sm:$0xff]  ;;  %v17479_v31 = vcombine.high %v437_v20, %v449_v22 }
 0x124   :  { %7288 = vmatprep.mubr.bf16.mxu1 %v21734_v57  ;;  %7903 = vmatprep.mubr.bf16.mxu0 %v21734_v57  ;;  %v497_v42 = vld [vmem:[#allocation5 + $0xc90] sm:$0xff]  ;;  %v17502_v44 = vcombine.low %v461_v30, %v473_v32 }
 0x125   :  { %v521_v50 = vld [vmem:[#allocation5 + $0xd50] sm:$0xff] }
 0x126   :  { %7259 = vmatpush1.bf16.msra.mxu1 %v17156_v47  ;;  %7874 = vmatpush1.bf16.msra.mxu0 %v17166_v48  ;;  %v17349_v47 = vcombine.high %v312_v40, %v324_v41  ;;  %v336_v48 = vld [vmem:[#allocation5 + $0x788] sm:$0xff]  ;;  %v545_v59 = vld [vmem:[#allocation5 + $0xe10] sm:$0xff] }
 0x127   :  { %7260 = vmatprep.subr.bf16.mxu1 %v17181_v49  ;;  %7875 = vmatprep.subr.bf16.mxu0 %v17191_v53  ;;  %v348_v49 = vld [vmem:[#allocation5 + $0x7e8] sm:$0xff]  ;;  %v17348_v53 = vcombine.low %v312_v40, %v324_v41  ;;  %v485_v40 = vld [vmem:[#allocation5 + $0xc30] sm:$0xff]  ;;  %v17503_v41 = vcombine.high %v461_v30, %v473_v32 }
 0x128   :  { %v17526_v52 = vcombine.low %v485_v40, %v497_v42  ;;  %v569_v3 = vld [vmem:[#allocation5 + $0xed0] sm:$0xff] }
 0x129   :  { %v593_v11 = vld [vmem:[#allocation5 + $0xf90] sm:$0xff] }
 0x12a   :  { %7261 = vmatpush1.bf16.msra.mxu1 %v17180_v55  ;;  %7876 = vmatpush1.bf16.msra.mxu0 %v17190_v56  ;;  %v17373_v55 = vcombine.high %v336_v48, %v348_v49  ;;  %v360_v56 = vld [vmem:[#allocation5 + $0x848] sm:$0xff]  ;;  %v617_v20 = vld [vmem:[#allocation5 + $0x1050] sm:$0xff] }
 0x12b   :  { %7262 = vmatprep.subr.bf16.mxu1 %v17205_v58  ;;  %7877 = vmatprep.subr.bf16.mxu0 %v17215_v62  ;;  %v372_v58 = vld [vmem:[#allocation5 + $0x8a8] sm:$0xff]  ;;  %v17372_v62 = vcombine.low %v336_v48, %v348_v49  ;;  %v509_v48 = vld [vmem:[#allocation5 + $0xcf0] sm:$0xff]  ;;  %v17527_v49 = vcombine.high %v485_v40, %v497_v42 }
 0x12c   :  { %v17550_v61 = vcombine.low %v509_v48, %v521_v50  ;;  %v641_v30 = vld [vmem:[#allocation5 + $0x1110] sm:$0xff] }
 0x12d   :  { %v665_v40 = vld [vmem:[#allocation5 + $0x11d0] sm:$0xff] }
 0x12e   :  { %7263 = vmatpush1.bf16.msra.mxu1 %v17204_v0  ;;  %7878 = vmatpush1.bf16.msra.mxu0 %v17214_v1  ;;  %v17397_v0 = vcombine.high %v360_v56, %v372_v58  ;;  %v384_v1 = vld [vmem:[#allocation5 + $0x908] sm:$0xff] }
 0x12f   :  { %7264 = vmatprep.subr.bf16.mxu1 %v17229_v2  ;;  %7879 = vmatprep.subr.bf16.mxu0 %v17239_v6  ;;  %v396_v2 = vld [vmem:[#allocation5 + $0x968] sm:$0xff]  ;;  %v17396_v6 = vcombine.low %v360_v56, %v372_v58  ;;  %v533_v56 = vld [vmem:[#allocation5 + $0xdb0] sm:$0xff]  ;;  %v17551_v58 = vcombine.high %v509_v48, %v521_v50 }
 0x130   :  { %v17574_v5 = vcombine.low %v533_v56, %v545_v59  ;;  %v689_v48 = vld [vmem:[#allocation5 + $0x1290] sm:$0xff] }
 0x132   :  { %7265 = vmatpush1.bf16.msra.mxu1 %v17228_v8  ;;  %7880 = vmatpush1.bf16.msra.mxu0 %v17238_v9  ;;  %v17421_v8 = vcombine.high %v384_v1, %v396_v2  ;;  %v408_v9 = vld [vmem:[#allocation5 + $0x9c8] sm:$0xff] }
 0x133   :  { %7266 = vmatprep.subr.bf16.mxu1 %v17253_v10  ;;  %7881 = vmatprep.subr.bf16.mxu0 %v17263_v15  ;;  %v420_v10 = vld [vmem:[#allocation5 + $0xa28] sm:$0xff]  ;;  %v17420_v15 = vcombine.low %v384_v1, %v396_v2  ;;  %v557_v1 = vld [vmem:[#allocation5 + $0xe70] sm:$0xff]  ;;  %v17575_v2 = vcombine.high %v533_v56, %v545_v59 }
 0x134   :  { %v17598_v14 = vcombine.low %v557_v1, %v569_v3  ;;  %v713_v56 = vld [vmem:[#allocation5 + $0x1350] sm:$0xff] }
 0x136   :  { %7267 = vmatpush1.bf16.msra.mxu1 %v17252_v17  ;;  %7882 = vmatpush1.bf16.msra.mxu0 %v17262_v18  ;;  %v17445_v17 = vcombine.high %v408_v9, %v420_v10  ;;  %v432_v18 = vld [vmem:[#allocation5 + $0xa88] sm:$0xff] }
 0x137   :  { %7268 = vmatprep.subr.bf16.mxu1 %v17277_v19  ;;  %7883 = vmatprep.subr.bf16.mxu0 %v17287_v24  ;;  %v444_v19 = vld [vmem:[#allocation5 + $0xae8] sm:$0xff]  ;;  %v17444_v24 = vcombine.low %v408_v9, %v420_v10  ;;  %v581_v9 = vld [vmem:[#allocation5 + $0xf30] sm:$0xff]  ;;  %v17599_v10 = vcombine.high %v557_v1, %v569_v3 }
 0x138   :  { %v17622_v22 = vcombine.low %v581_v9, %v593_v11  ;;  %v737_v1 = vld [vmem:[#allocation5 + $0x1410] sm:$0xff] }
 0x13a   :  { %7269 = vmatpush1.bf16.msra.mxu1 %v17276_v27  ;;  %7884 = vmatpush1.bf16.msra.mxu0 %v17286_v28  ;;  %v17469_v27 = vcombine.high %v432_v18, %v444_v19  ;;  %v456_v28 = vld [vmem:[#allocation5 + $0xb48] sm:$0xff] }
 0x13b   :  { %7270 = vmatprep.subr.bf16.mxu1 %v17301_v29  ;;  %7885 = vmatprep.subr.bf16.mxu0 %v17311_v33  ;;  %v468_v29 = vld [vmem:[#allocation5 + $0xba8] sm:$0xff]  ;;  %v17468_v33 = vcombine.low %v432_v18, %v444_v19  ;;  %v605_v18 = vld [vmem:[#allocation5 + $0xff0] sm:$0xff]  ;;  %v17623_v19 = vcombine.high %v581_v9, %v593_v11 }
 0x13c   :  { %v17646_v32 = vcombine.low %v605_v18, %v617_v20  ;;  %v761_v9 = vld [vmem:[#allocation5 + $0x14d0] sm:$0xff] }
 0x13e   :  { %7271 = vmatpush1.bf16.msra.mxu1 %v17300_v36  ;;  %7886 = vmatpush1.bf16.msra.mxu0 %v17310_v37  ;;  %v17493_v36 = vcombine.high %v456_v28, %v468_v29  ;;  %v480_v37 = vld [vmem:[#allocation5 + $0xc08] sm:$0xff] }
 0x13f   :  { %7272 = vmatprep.subr.bf16.mxu1 %v17325_v39  ;;  %7887 = vmatprep.subr.bf16.mxu0 %v17335_v43  ;;  %v492_v39 = vld [vmem:[#allocation5 + $0xc68] sm:$0xff]  ;;  %v17492_v43 = vcombine.low %v456_v28, %v468_v29  ;;  %v629_v28 = vld [vmem:[#allocation5 + $0x10b0] sm:$0xff]  ;;  %v17647_v29 = vcombine.high %v605_v18, %v617_v20 }
 0x140   :  { %v17670_v42 = vcombine.low %v629_v28, %v641_v30  ;;  %v785_v18 = vld [vmem:[#allocation5 + $0x1590] sm:$0xff] }
 0x142   :  { %7273 = vmatpush1.bf16.msra.mxu1 %v17324_v45  ;;  %7888 = vmatpush1.bf16.msra.mxu0 %v17334_v46  ;;  %v17517_v45 = vcombine.high %v480_v37, %v492_v39  ;;  %v504_v46 = vld [vmem:[#allocation5 + $0xcc8] sm:$0xff] }
 0x143   :  { %7274 = vmatprep.subr.bf16.mxu1 %v17349_v47  ;;  %7889 = vmatprep.subr.bf16.mxu0 %v17359_v51  ;;  %v516_v47 = vld [vmem:[#allocation5 + $0xd28] sm:$0xff]  ;;  %v17516_v51 = vcombine.low %v480_v37, %v492_v39  ;;  %v17671_v37 = vcombine.high %v629_v28, %v641_v30  ;;  %v653_v39 = vld [vmem:[#allocation5 + $0x1170] sm:$0xff] }
 0x144   :  { %v17694_v50 = vcombine.low %v653_v39, %v665_v40  ;;  %v809_v28 = vld [vmem:[#allocation5 + $0x1650] sm:$0xff] }
 0x146   :  { %7275 = vmatpush1.bf16.msra.mxu1 %v17348_v53  ;;  %7890 = vmatpush1.bf16.msra.mxu0 %v17358_v54  ;;  %v17541_v53 = vcombine.high %v504_v46, %v516_v47  ;;  %v528_v54 = vld [vmem:[#allocation5 + $0xd88] sm:$0xff] }
 0x147   :  { %7276 = vmatprep.subr.bf16.mxu1 %v17373_v55  ;;  %7891 = vmatprep.subr.bf16.mxu0 %v17383_v60  ;;  %v540_v55 = vld [vmem:[#allocation5 + $0xde8] sm:$0xff]  ;;  %v17540_v60 = vcombine.low %v504_v46, %v516_v47  ;;  %v677_v46 = vld [vmem:[#allocation5 + $0x1230] sm:$0xff]  ;;  %v17695_v47 = vcombine.high %v653_v39, %v665_v40 }
 0x148   :  { %v17718_v59 = vcombine.low %v677_v46, %v689_v48 }
 0x14a   :  { %7277 = vmatpush1.bf16.msra.mxu1 %v17372_v62  ;;  %7892 = vmatpush1.bf16.msra.mxu0 %v17382_v63  ;;  %v17565_v62 = vcombine.high %v528_v54, %v540_v55  ;;  %v552_v63 = vld [vmem:[#allocation5 + $0xe48] sm:$0xff] }
 0x14b   :  { %7278 = vmatprep.subr.bf16.mxu1 %v17397_v0  ;;  %7893 = vmatprep.subr.bf16.mxu0 %v17407_v4  ;;  %v564_v0 = vld [vmem:[#allocation5 + $0xea8] sm:$0xff]  ;;  %v17564_v4 = vcombine.low %v528_v54, %v540_v55  ;;  %v701_v54 = vld [vmem:[#allocation5 + $0x12f0] sm:$0xff]  ;;  %v17719_v55 = vcombine.high %v677_v46, %v689_v48 }
 0x14c   :  { %v17742_v3 = vcombine.low %v701_v54, %v713_v56  ;;  %v857_v46 = vld [vmem:[#allocation5 + $0x17d0] sm:$0xff] }
 0x14e   :  { %7279 = vmatpush1.bf16.msra.mxu1 %v17396_v6  ;;  %7894 = vmatpush1.bf16.msra.mxu0 %v17406_v7  ;;  %v17589_v6 = vcombine.high %v552_v63, %v564_v0  ;;  %v576_v7 = vld [vmem:[#allocation5 + $0xf08] sm:$0xff] }
 0x14f   :  { %7280 = vmatprep.subr.bf16.mxu1 %v17421_v8  ;;  %7895 = vmatprep.subr.bf16.mxu0 %v17431_v13  ;;  %v588_v8 = vld [vmem:[#allocation5 + $0xf68] sm:$0xff]  ;;  %v17588_v13 = vcombine.low %v552_v63, %v564_v0  ;;  %v725_v63 = vld [vmem:[#allocation5 + $0x13b0] sm:$0xff]  ;;  %v17743_v0 = vcombine.high %v701_v54, %v713_v56 }
 0x150   :  { %v17766_v11 = vcombine.low %v725_v63, %v737_v1  ;;  %v881_v54 = vld [vmem:[#allocation5 + $0x1890] sm:$0xff] }
 0x152   :  { %7281 = vmatpush1.bf16.msra.mxu1 %v17420_v15  ;;  %7896 = vmatpush1.bf16.msra.mxu0 %v17430_v16  ;;  %v17613_v15 = vcombine.high %v576_v7, %v588_v8  ;;  %v600_v16 = vld [vmem:[#allocation5 + $0xfc8] sm:$0xff] }
 0x153   :  { %7282 = vmatprep.subr.bf16.mxu1 %v17445_v17  ;;  %7897 = vmatprep.subr.bf16.mxu0 %v17455_v21  ;;  %v612_v17 = vld [vmem:[#allocation5 + $0x1028] sm:$0xff]  ;;  %v17612_v21 = vcombine.low %v576_v7, %v588_v8  ;;  %v749_v7 = vld [vmem:[#allocation5 + $0x1470] sm:$0xff]  ;;  %v17767_v8 = vcombine.high %v725_v63, %v737_v1 }
 0x154   :  { %v17790_v20 = vcombine.low %v749_v7, %v761_v9  ;;  %v905_v63 = vld [vmem:[#allocation5 + $0x1950] sm:$0xff] }
 0x156   :  { %7283 = vmatpush1.bf16.msra.mxu1 %v17444_v24  ;;  %7898 = vmatpush1.bf16.msra.mxu0 %v17454_v26  ;;  %v17637_v24 = vcombine.high %v600_v16, %v612_v17  ;;  %v624_v26 = vld [vmem:[#allocation5 + $0x1088] sm:$0xff] }
 0x157   :  { %7284 = vmatprep.subr.bf16.mxu1 %v17469_v27  ;;  %7899 = vmatprep.subr.bf16.mxu0 %v17479_v31  ;;  %v636_v27 = vld [vmem:[#allocation5 + $0x10e8] sm:$0xff]  ;;  %v17636_v31 = vcombine.low %v600_v16, %v612_v17  ;;  %v773_v16 = vld [vmem:[#allocation5 + $0x1530] sm:$0xff]  ;;  %v17791_v17 = vcombine.high %v749_v7, %v761_v9 }
 0x158   :  { %v17814_v30 = vcombine.low %v773_v16, %v785_v18  ;;  %v929_v7 = vld [vmem:[#allocation5 + $0x1a10] sm:$0xff] }
 0x15a   :  { %7285 = vmatpush1.bf16.msra.mxu1 %v17468_v33  ;;  %7900 = vmatpush1.bf16.msra.mxu0 %v17478_v35  ;;  %v17661_v33 = vcombine.high %v624_v26, %v636_v27  ;;  %v648_v35 = vld [vmem:[#allocation5 + $0x1148] sm:$0xff] }
 0x15b   :  { %7286 = vmatprep.subr.bf16.mxu1 %v17493_v36  ;;  %7901 = vmatprep.subr.bf16.mxu0 %v17503_v41  ;;  %v660_v36 = vld [vmem:[#allocation5 + $0x11a8] sm:$0xff]  ;;  %v17660_v41 = vcombine.low %v624_v26, %v636_v27  ;;  %v797_v26 = vld [vmem:[#allocation5 + $0x15f0] sm:$0xff]  ;;  %v17815_v27 = vcombine.high %v773_v16, %v785_v18 }
 0x15c   :  { %v17838_v40 = vcombine.low %v797_v26, %v809_v28  ;;  %v953_v16 = vld [vmem:[#allocation5 + $0x1ad0] sm:$0xff] }
 0x15e   :  { %7287 = vmatpush1.bf16.msra.mxu1 %v17492_v43  ;;  %7902 = vmatpush1.bf16.msra.mxu0 %v17502_v44  ;;  %v17685_v43 = vcombine.high %v648_v35, %v660_v36  ;;  %v672_v44 = vld [vmem:[#allocation5 + $0x1208] sm:$0xff] }
 0x15f   :  { %7297 = vmatprep.subr.bf16.mxu1 %v17517_v45  ;;  %7912 = vmatprep.subr.bf16.mxu0 %v17527_v49  ;;  %v684_v45 = vld [vmem:[#allocation5 + $0x1268] sm:$0xff]  ;;  %v17684_v49 = vcombine.low %v648_v35, %v660_v36  ;;  %v821_v35 = vld [vmem:[#allocation5 + $0x16b0] sm:$0xff]  ;;  %v17839_v36 = vcombine.high %v797_v26, %v809_v28 }
 0x160   :  { %v977_v26 = vld [vmem:[#allocation5 + $0x1b90] sm:$0xff] }
 0x161   :  { %7289 = vmatmul.mubr.bf16.vlgmr.msra.gmra.mrb[4].mxu1 %v21738_v12  ;;  %7904 = vmatmul.mubr.bf16.vlgmr.msra.gmra.mrb[4].mxu0 %v21738_v12 }
 0x162   :  { %7298 = vmatpush1.bf16.msra.mxu1 %v17516_v51  ;;  %7913 = vmatpush1.bf16.msra.mxu0 %v17526_v52  ;;  %v17709_v51 = vcombine.high %v672_v44, %v684_v45  ;;  %v696_v52 = vld [vmem:[#allocation5 + $0x12c8] sm:$0xff] }
 0x163   :  { %7299 = vmatprep.subr.bf16.mxu1 %v17541_v53  ;;  %7914 = vmatprep.subr.bf16.mxu0 %v17551_v58  ;;  %v708_v53 = vld [vmem:[#allocation5 + $0x1328] sm:$0xff]  ;;  %v17708_v58 = vcombine.low %v672_v44, %v684_v45  ;;  %v845_v44 = vld [vmem:[#allocation5 + $0x1770] sm:$0xff] }
 0x164   :  { %7329 = vmatprep.mubr.bf16.mxu1 %v21740_v23  ;;  %7944 = vmatprep.mubr.bf16.mxu0 %v21740_v23  ;;  %v17886_v56 = vcombine.low %v845_v44, %v857_v46 }
 0x166   :  { %7300 = vmatpush1.bf16.msra.mxu1 %v17540_v60  ;;  %7915 = vmatpush1.bf16.msra.mxu0 %v17550_v61  ;;  %v17733_v60 = vcombine.high %v696_v52, %v708_v53  ;;  %v720_v61 = vld [vmem:[#allocation5 + $0x1388] sm:$0xff] }
 0x167   :  { %7301 = vmatprep.subr.bf16.mxu1 %v17565_v62  ;;  %7916 = vmatprep.subr.bf16.mxu0 %v17575_v2  ;;  %v732_v62 = vld [vmem:[#allocation5 + $0x13e8] sm:$0xff]  ;;  %v17732_v2 = vcombine.low %v696_v52, %v708_v53  ;;  %v869_v52 = vld [vmem:[#allocation5 + $0x1830] sm:$0xff]  ;;  %v17887_v53 = vcombine.high %v845_v44, %v857_v46 }
 0x168   :  { %v17910_v1 = vcombine.low %v869_v52, %v881_v54  ;;  %v1025_v44 = vld [vmem:[#allocation5 + $0x1d10] sm:$0xff] }
 0x16a   :  { %7302 = vmatpush1.bf16.msra.mxu1 %v17564_v4  ;;  %7917 = vmatpush1.bf16.msra.mxu0 %v17574_v5  ;;  %v17757_v4 = vcombine.high %v720_v61, %v732_v62  ;;  %v744_v5 = vld [vmem:[#allocation5 + $0x1448] sm:$0xff] }
 0x16b   :  { %7303 = vmatprep.subr.bf16.mxu1 %v17589_v6  ;;  %7918 = vmatprep.subr.bf16.mxu0 %v17599_v10  ;;  %v756_v6 = vld [vmem:[#allocation5 + $0x14a8] sm:$0xff]  ;;  %v17756_v10 = vcombine.low %v720_v61, %v732_v62  ;;  %v893_v61 = vld [vmem:[#allocation5 + $0x18f0] sm:$0xff]  ;;  %v17911_v62 = vcombine.high %v869_v52, %v881_v54 }
 0x16c   :  { %v17934_v9 = vcombine.low %v893_v61, %v905_v63  ;;  %v1049_v52 = vld [vmem:[#allocation5 + $0x1dd0] sm:$0xff] }
 0x16e   :  { %7304 = vmatpush1.bf16.msra.mxu1 %v17588_v13  ;;  %7919 = vmatpush1.bf16.msra.mxu0 %v17598_v14  ;;  %v17781_v13 = vcombine.high %v744_v5, %v756_v6  ;;  %v768_v14 = vld [vmem:[#allocation5 + $0x1508] sm:$0xff] }
 0x16f   :  { %7305 = vmatprep.subr.bf16.mxu1 %v17613_v15  ;;  %7920 = vmatprep.subr.bf16.mxu0 %v17623_v19  ;;  %v780_v15 = vld [vmem:[#allocation5 + $0x1568] sm:$0xff]  ;;  %v17780_v19 = vcombine.low %v744_v5, %v756_v6  ;;  %v917_v5 = vld [vmem:[#allocation5 + $0x19b0] sm:$0xff]  ;;  %v17935_v6 = vcombine.high %v893_v61, %v905_v63 }
 0x170   :  { %v17958_v18 = vcombine.low %v917_v5, %v929_v7  ;;  %v1073_v61 = vld [vmem:[#allocation5 + $0x1e90] sm:$0xff] }
 0x172   :  { %7306 = vmatpush1.bf16.msra.mxu1 %v17612_v21  ;;  %7921 = vmatpush1.bf16.msra.mxu0 %v17622_v22  ;;  %v17805_v21 = vcombine.high %v768_v14, %v780_v15  ;;  %v792_v22 = vld [vmem:[#allocation5 + $0x15c8] sm:$0xff] }
 0x173   :  { %7307 = vmatprep.subr.bf16.mxu1 %v17637_v24  ;;  %7922 = vmatprep.subr.bf16.mxu0 %v17647_v29  ;;  %v804_v24 = vld [vmem:[#allocation5 + $0x1628] sm:$0xff]  ;;  %v17804_v29 = vcombine.low %v768_v14, %v780_v15  ;;  %v941_v14 = vld [vmem:[#allocation5 + $0x1a70] sm:$0xff]  ;;  %v17959_v15 = vcombine.high %v917_v5, %v929_v7 }
 0x174   :  { %v17828_v39 = vcombine.low %v792_v22, %v804_v24  ;;  %v17982_v28 = vcombine.low %v941_v14, %v953_v16  ;;  %v1097_v5 = vld [vmem:[#allocation5 + $0x1f50] sm:$0xff] }
 0x176   :  { %7308 = vmatpush1.bf16.msra.mxu1 %v17636_v31  ;;  %7923 = vmatpush1.bf16.msra.mxu0 %v17646_v32  ;;  %v17829_v31 = vcombine.high %v792_v22, %v804_v24  ;;  %v816_v32 = vld [vmem:[#allocation5 + $0x1688] sm:$0xff]  ;;  %v965_v22 = vld [vmem:[#allocation5 + $0x1b30] sm:$0xff]  ;;  %v17983_v24 = vcombine.high %v941_v14, %v953_v16 }
 0x177   :  { %7309 = vmatprep.subr.bf16.mxu1 %v17661_v33  ;;  %7924 = vmatprep.subr.bf16.mxu0 %v17671_v37  ;;  %v828_v33 = vld [vmem:[#allocation5 + $0x16e8] sm:$0xff]  ;;  %v833_v37 = vld [vmem:[#allocation5 + $0x1710] sm:$0xff] }
 0x178   :  { %v17863_v45 = vcombine.high %v821_v35, %v833_v37  ;;  %v17862_v48 = vcombine.low %v821_v35, %v833_v37  ;;  %v1001_v35 = vld [vmem:[#allocation5 + $0x1c50] sm:$0xff]  ;;  %v18006_v37 = vcombine.low %v965_v22, %v977_v26 }
 0x179   :  { %v1121_v14 = vld [vmem:[#allocation5 + $0x2010] sm:$0xff] }
 0x17a   :  { %7310 = vmatpush1.bf16.msra.mxu1 %v17660_v41  ;;  %7925 = vmatpush1.bf16.msra.mxu0 %v17670_v42  ;;  %v17853_v41 = vcombine.high %v816_v32, %v828_v33  ;;  %v840_v42 = vld [vmem:[#allocation5 + $0x1748] sm:$0xff] }
 0x17b   :  { %7311 = vmatprep.subr.bf16.mxu1 %v17685_v43  ;;  %7926 = vmatprep.subr.bf16.mxu0 %v17695_v47  ;;  %v852_v43 = vld [vmem:[#allocation5 + $0x17a8] sm:$0xff]  ;;  %v17852_v47 = vcombine.low %v816_v32, %v828_v33  ;;  %v989_v32 = vld [vmem:[#allocation5 + $0x1bf0] sm:$0xff]  ;;  %v18007_v33 = vcombine.high %v965_v22, %v977_v26 }
 0x17c   :  { %v18030_v46 = vcombine.low %v989_v32, %v1001_v35  ;;  %v1145_v22 = vld [vmem:[#allocation5 + $0x20d0] sm:$0xff] }
 0x17e   :  { %7312 = vmatpush1.bf16.msra.mxu1 %v17684_v49  ;;  %7927 = vmatpush1.bf16.msra.mxu0 %v17694_v50  ;;  %v17877_v49 = vcombine.high %v840_v42, %v852_v43  ;;  %v864_v50 = vld [vmem:[#allocation5 + $0x1808] sm:$0xff] }
 0x17f   :  { %7313 = vmatprep.subr.bf16.mxu1 %v17709_v51  ;;  %7928 = vmatprep.subr.bf16.mxu0 %v17719_v55  ;;  %v876_v51 = vld [vmem:[#allocation5 + $0x1868] sm:$0xff]  ;;  %v17876_v55 = vcombine.low %v840_v42, %v852_v43  ;;  %v1013_v42 = vld [vmem:[#allocation5 + $0x1cb0] sm:$0xff]  ;;  %v18031_v43 = vcombine.high %v989_v32, %v1001_v35 }
 0x180   :  { %v18054_v54 = vcombine.low %v1013_v42, %v1025_v44  ;;  %v1169_v32 = vld [vmem:[#allocation5 + $0x2190] sm:$0xff] }
 0x182   :  { %7314 = vmatpush1.bf16.msra.mxu1 %v17708_v58  ;;  %7929 = vmatpush1.bf16.msra.mxu0 %v17718_v59  ;;  %v17901_v58 = vcombine.high %v864_v50, %v876_v51  ;;  %v888_v59 = vld [vmem:[#allocation5 + $0x18c8] sm:$0xff] }
 0x183   :  { %7315 = vmatprep.subr.bf16.mxu1 %v17733_v60  ;;  %7930 = vmatprep.subr.bf16.mxu0 %v17743_v0  ;;  %v900_v60 = vld [vmem:[#allocation5 + $0x1928] sm:$0xff]  ;;  %v17900_v0 = vcombine.low %v864_v50, %v876_v51  ;;  %v1037_v50 = vld [vmem:[#allocation5 + $0x1d70] sm:$0xff]  ;;  %v18055_v51 = vcombine.high %v1013_v42, %v1025_v44 }
 0x184   :  { %v18078_v63 = vcombine.low %v1037_v50, %v1049_v52  ;;  %v1193_v42 = vld [vmem:[#allocation5 + $0x2250] sm:$0xff] }
 0x186   :  { %7316 = vmatpush1.bf16.msra.mxu1 %v17732_v2  ;;  %7931 = vmatpush1.bf16.msra.mxu0 %v17742_v3  ;;  %v17925_v2 = vcombine.high %v888_v59, %v900_v60  ;;  %v912_v3 = vld [vmem:[#allocation5 + $0x1988] sm:$0xff] }
 0x187   :  { %7317 = vmatprep.subr.bf16.mxu1 %v17757_v4  ;;  %7932 = vmatprep.subr.bf16.mxu0 %v17767_v8  ;;  %v924_v4 = vld [vmem:[#allocation5 + $0x19e8] sm:$0xff]  ;;  %v17924_v8 = vcombine.low %v888_v59, %v900_v60  ;;  %v1061_v59 = vld [vmem:[#allocation5 + $0x1e30] sm:$0xff]  ;;  %v18079_v60 = vcombine.high %v1037_v50, %v1049_v52 }
 0x188   :  { %v18102_v7 = vcombine.low %v1061_v59, %v1073_v61  ;;  %v1217_v50 = vld [vmem:[#allocation5 + $0x2310] sm:$0xff] }
 0x18a   :  { %7318 = vmatpush1.bf16.msra.mxu1 %v17756_v10  ;;  %7933 = vmatpush1.bf16.msra.mxu0 %v17766_v11  ;;  %v17949_v10 = vcombine.high %v912_v3, %v924_v4  ;;  %v936_v11 = vld [vmem:[#allocation5 + $0x1a48] sm:$0xff] }
 0x18b   :  { %7319 = vmatprep.subr.bf16.mxu1 %v17781_v13  ;;  %7934 = vmatprep.subr.bf16.mxu0 %v17791_v17  ;;  %v948_v13 = vld [vmem:[#allocation5 + $0x1aa8] sm:$0xff]  ;;  %v17948_v17 = vcombine.low %v912_v3, %v924_v4  ;;  %v1085_v3 = vld [vmem:[#allocation5 + $0x1ef0] sm:$0xff]  ;;  %v18103_v4 = vcombine.high %v1061_v59, %v1073_v61 }
 0x18c   :  { %v18126_v16 = vcombine.low %v1085_v3, %v1097_v5  ;;  %v1241_v59 = vld [vmem:[#allocation5 + $0x23d0] sm:$0xff] }
 0x18e   :  { %7320 = vmatpush1.bf16.msra.mxu1 %v17780_v19  ;;  %7935 = vmatpush1.bf16.msra.mxu0 %v17790_v20  ;;  %v17973_v19 = vcombine.high %v936_v11, %v948_v13  ;;  %v960_v20 = vld [vmem:[#allocation5 + $0x1b08] sm:$0xff] }
 0x18f   :  { %7321 = vmatprep.subr.bf16.mxu1 %v17805_v21  ;;  %7936 = vmatprep.subr.bf16.mxu0 %v17815_v27  ;;  %v972_v21 = vld [vmem:[#allocation5 + $0x1b68] sm:$0xff]  ;;  %v17972_v27 = vcombine.low %v936_v11, %v948_v13  ;;  %v1109_v11 = vld [vmem:[#allocation5 + $0x1fb0] sm:$0xff]  ;;  %v18127_v13 = vcombine.high %v1085_v3, %v1097_v5  ;;  %v115_v3 = vld [vmem:[#allocation5 + $0xa0] sm:$0xff] }
 0x190   :  { %v18150_v26 = vcombine.low %v1109_v11, %v1121_v14 }
 0x192   :  { %7322 = vmatpush1.bf16.msra.mxu1 %v17804_v29  ;;  %7937 = vmatpush1.bf16.msra.mxu0 %v17814_v30  ;;  %v17997_v29 = vcombine.high %v960_v20, %v972_v21  ;;  %v984_v30 = vld [vmem:[#allocation5 + $0x1bc8] sm:$0xff] }
 0x193   :  { %7323 = vmatprep.subr.bf16.mxu1 %v17829_v31  ;;  %7938 = vmatprep.subr.bf16.mxu0 %v17839_v36  ;;  %v996_v31 = vld [vmem:[#allocation5 + $0x1c28] sm:$0xff]  ;;  %v17996_v36 = vcombine.low %v960_v20, %v972_v21  ;;  %v1133_v20 = vld [vmem:[#allocation5 + $0x2070] sm:$0xff]  ;;  %v18151_v21 = vcombine.high %v1109_v11, %v1121_v14  ;;  %v139_v11 = vld [vmem:[#allocation5 + $0x160] sm:$0xff] }
 0x194   :  { %v18174_v35 = vcombine.low %v1133_v20, %v1145_v22 }
 0x196   :  { %7324 = vmatpush1.bf16.msra.mxu1 %v17828_v39  ;;  %7939 = vmatpush1.bf16.msra.mxu0 %v17838_v40  ;;  %v18021_v39 = vcombine.high %v984_v30, %v996_v31  ;;  %v1008_v40 = vld [vmem:[#allocation5 + $0x1c88] sm:$0xff] }
 0x197   :  { %7325 = vmatprep.subr.bf16.mxu1 %v17853_v41  ;;  %7940 = vmatprep.subr.bf16.mxu0 %v17863_v45  ;;  %v1020_v41 = vld [vmem:[#allocation5 + $0x1ce8] sm:$0xff]  ;;  %v18020_v45 = vcombine.low %v984_v30, %v996_v31  ;;  %v1157_v30 = vld [vmem:[#allocation5 + $0x2130] sm:$0xff]  ;;  %v18175_v31 = vcombine.high %v1133_v20, %v1145_v22  ;;  %v163_v20 = vld [vmem:[#allocation5 + $0x220] sm:$0xff] }
 0x198   :  { %v18198_v44 = vcombine.low %v1157_v30, %v1169_v32 }
 0x19a   :  { %7326 = vmatpush1.bf16.msra.mxu1 %v17852_v47  ;;  %7941 = vmatpush1.bf16.msra.mxu0 %v17862_v48  ;;  %v18045_v47 = vcombine.high %v1008_v40, %v1020_v41  ;;  %v1032_v48 = vld [vmem:[#allocation5 + $0x1d48] sm:$0xff] }
 0x19b   :  { %7327 = vmatprep.subr.bf16.mxu1 %v17877_v49  ;;  %7942 = vmatprep.subr.bf16.mxu0 %v17887_v53  ;;  %v1044_v49 = vld [vmem:[#allocation5 + $0x1da8] sm:$0xff]  ;;  %v18044_v53 = vcombine.low %v1008_v40, %v1020_v41  ;;  %v1181_v40 = vld [vmem:[#allocation5 + $0x21f0] sm:$0xff]  ;;  %v18199_v41 = vcombine.high %v1157_v30, %v1169_v32  ;;  %v187_v30 = vld [vmem:[#allocation5 + $0x2e0] sm:$0xff] }
 0x19c   :  { %v18222_v52 = vcombine.low %v1181_v40, %v1193_v42 }
 0x19e   :  { %7328 = vmatpush1.bf16.msra.mxu1 %v17876_v55  ;;  %7943 = vmatpush1.bf16.msra.mxu0 %v17886_v56  ;;  %v18069_v55 = vcombine.high %v1032_v48, %v1044_v49  ;;  %v1056_v56 = vld [vmem:[#allocation5 + $0x1e08] sm:$0xff] }
 0x19f   :  { %7338 = vmatprep.subr.bf16.mxu1 %v17901_v58  ;;  %7953 = vmatprep.subr.bf16.mxu0 %v17911_v62  ;;  %v1068_v58 = vld [vmem:[#allocation5 + $0x1e68] sm:$0xff]  ;;  %v18068_v62 = vcombine.low %v1032_v48, %v1044_v49  ;;  %v1205_v48 = vld [vmem:[#allocation5 + $0x22b0] sm:$0xff]  ;;  %v18223_v49 = vcombine.high %v1181_v40, %v1193_v42  ;;  %v211_v40 = vld [vmem:[#allocation5 + $0x3a0] sm:$0xff] }
 0x1a0   :  { %v18246_v61 = vcombine.low %v1205_v48, %v1217_v50 }
 0x1a1   :  { %7330 = vmatmul.mubr.bf16.vlgmr.msra.gmra.mrb[4].mxu1 %v21746_v25  ;;  %7945 = vmatmul.mubr.bf16.vlgmr.msra.gmra.mrb[4].mxu0 %v21746_v25 }
 0x1a2   :  { %7339 = vmatpush1.bf16.msra.mxu1 %v17900_v0  ;;  %7954 = vmatpush1.bf16.msra.mxu0 %v17910_v1  ;;  %v18093_v0 = vcombine.high %v1056_v56, %v1068_v58  ;;  %v1080_v1 = vld [vmem:[#allocation5 + $0x1ec8] sm:$0xff] }
 0x1a3   :  { %7340 = vmatprep.subr.bf16.mxu1 %v17925_v2  ;;  %7955 = vmatprep.subr.bf16.mxu0 %v17935_v6  ;;  %v1092_v2 = vld [vmem:[#allocation5 + $0x1f28] sm:$0xff]  ;;  %v18092_v6 = vcombine.low %v1056_v56, %v1068_v58  ;;  %v1229_v56 = vld [vmem:[#allocation5 + $0x2370] sm:$0xff]  ;;  %v18247_v58 = vcombine.high %v1205_v48, %v1217_v50  ;;  %v235_v48 = vld [vmem:[#allocation5 + $0x460] sm:$0xff] }
 0x1a4   :  { %7370 = vmatprep.mubr.bf16.mxu1 %v21748_v34  ;;  %7985 = vmatprep.mubr.bf16.mxu0 %v21748_v34  ;;  %v18270_v5 = vcombine.low %v1229_v56, %v1241_v59 }
 0x1a6   :  { %7341 = vmatpush1.bf16.msra.mxu1 %v17924_v8  ;;  %7956 = vmatpush1.bf16.msra.mxu0 %v17934_v9  ;;  %v18117_v8 = vcombine.high %v1080_v1, %v1092_v2  ;;  %v1104_v9 = vld [vmem:[#allocation5 + $0x1f88] sm:$0xff] }
 0x1a7   :  { %7342 = vmatprep.subr.bf16.mxu1 %v17949_v10  ;;  %7957 = vmatprep.subr.bf16.mxu0 %v17959_v15  ;;  %v1116_v10 = vld [vmem:[#allocation5 + $0x1fe8] sm:$0xff]  ;;  %v18116_v15 = vcombine.low %v1080_v1, %v1092_v2  ;;  %v103_v1 = vld [vmem:[#allocation5 + $0x40] sm:$0xff]  ;;  %v18271_v2 = vcombine.high %v1229_v56, %v1241_v59 }
 0x1a8   :  { %v17146_v14 = vcombine.low %v103_v1, %v115_v3  ;;  %v259_v56 = vld [vmem:[#allocation5 + $0x520] sm:$0xff] }
 0x1aa   :  { %7343 = vmatpush1.bf16.msra.mxu1 %v17948_v17  ;;  %7958 = vmatpush1.bf16.msra.mxu0 %v17958_v18  ;;  %v18141_v17 = vcombine.high %v1104_v9, %v1116_v10  ;;  %v1128_v18 = vld [vmem:[#allocation5 + $0x2048] sm:$0xff] }
 0x1ab   :  { %7344 = vmatprep.subr.bf16.mxu1 %v17973_v19  ;;  %7959 = vmatprep.subr.bf16.mxu0 %v17983_v24  ;;  %v1140_v19 = vld [vmem:[#allocation5 + $0x20a8] sm:$0xff]  ;;  %v18140_v24 = vcombine.low %v1104_v9, %v1116_v10  ;;  %v127_v9 = vld [vmem:[#allocation5 + $0x100] sm:$0xff]  ;;  %v17147_v10 = vcombine.high %v103_v1, %v115_v3 }
 0x1ac   :  { %v17170_v22 = vcombine.low %v127_v9, %v139_v11 }
 0x1ae   :  { %7345 = vmatpush1.bf16.msra.mxu1 %v17972_v27  ;;  %7960 = vmatpush1.bf16.msra.mxu0 %v17982_v28  ;;  %v18165_v27 = vcombine.high %v1128_v18, %v1140_v19  ;;  %v1152_v28 = vld [vmem:[#allocation5 + $0x2108] sm:$0xff] }
 0x1af   :  { %7346 = vmatprep.subr.bf16.mxu1 %v17997_v29  ;;  %7961 = vmatprep.subr.bf16.mxu0 %v18007_v33  ;;  %v1164_v29 = vld [vmem:[#allocation5 + $0x2168] sm:$0xff]  ;;  %v18164_v33 = vcombine.low %v1128_v18, %v1140_v19  ;;  %v151_v18 = vld [vmem:[#allocation5 + $0x1c0] sm:$0xff]  ;;  %v17171_v19 = vcombine.high %v127_v9, %v139_v11  ;;  %v289_v11 = vld [vmem:[#allocation5 + $0x610] sm:$0xff] }
 0x1b0   :  { %v17194_v32 = vcombine.low %v151_v18, %v163_v20 }
 0x1b2   :  { %7347 = vmatpush1.bf16.msra.mxu1 %v17996_v36  ;;  %7962 = vmatpush1.bf16.msra.mxu0 %v18006_v37  ;;  %v18189_v36 = vcombine.high %v1152_v28, %v1164_v29  ;;  %v1176_v37 = vld [vmem:[#allocation5 + $0x21c8] sm:$0xff] }
 0x1b3   :  { %7348 = vmatprep.subr.bf16.mxu1 %v18021_v39  ;;  %7963 = vmatprep.subr.bf16.mxu0 %v18031_v43  ;;  %v1188_v39 = vld [vmem:[#allocation5 + $0x2228] sm:$0xff]  ;;  %v18188_v43 = vcombine.low %v1152_v28, %v1164_v29  ;;  %v175_v28 = vld [vmem:[#allocation5 + $0x280] sm:$0xff]  ;;  %v17195_v29 = vcombine.high %v151_v18, %v163_v20 }
 0x1b4   :  { %v17218_v42 = vcombine.low %v175_v28, %v187_v30 }
 0x1b6   :  { %7349 = vmatpush1.bf16.msra.mxu1 %v18020_v45  ;;  %7964 = vmatpush1.bf16.msra.mxu0 %v18030_v46  ;;  %v18213_v45 = vcombine.high %v1176_v37, %v1188_v39  ;;  %v1200_v46 = vld [vmem:[#allocation5 + $0x2288] sm:$0xff] }
 0x1b7   :  { %7350 = vmatprep.subr.bf16.mxu1 %v18045_v47  ;;  %7965 = vmatprep.subr.bf16.mxu0 %v18055_v51  ;;  %v1212_v47 = vld [vmem:[#allocation5 + $0x22e8] sm:$0xff]  ;;  %v18212_v51 = vcombine.low %v1176_v37, %v1188_v39  ;;  %v199_v37 = vld [vmem:[#allocation5 + $0x340] sm:$0xff]  ;;  %v17219_v39 = vcombine.high %v175_v28, %v187_v30 }
 0x1b8   :  { %v17242_v50 = vcombine.low %v199_v37, %v211_v40  ;;  %v331_v28 = vld [vmem:[#allocation5 + $0x760] sm:$0xff] }
 0x1ba   :  { %7351 = vmatpush1.bf16.msra.mxu1 %v18044_v53  ;;  %7966 = vmatpush1.bf16.msra.mxu0 %v18054_v54  ;;  %v18237_v53 = vcombine.high %v1200_v46, %v1212_v47  ;;  %v1224_v54 = vld [vmem:[#allocation5 + $0x2348] sm:$0xff] }
 0x1bb   :  { %7352 = vmatprep.subr.bf16.mxu1 %v18069_v55  ;;  %7967 = vmatprep.subr.bf16.mxu0 %v18079_v60  ;;  %v1236_v55 = vld [vmem:[#allocation5 + $0x23a8] sm:$0xff]  ;;  %v18236_v60 = vcombine.low %v1200_v46, %v1212_v47  ;;  %v223_v46 = vld [vmem:[#allocation5 + $0x400] sm:$0xff]  ;;  %v17243_v47 = vcombine.high %v199_v37, %v211_v40 }
 0x1bc   :  { %v17266_v59 = vcombine.low %v223_v46, %v235_v48  ;;  %v355_v37 = vld [vmem:[#allocation5 + $0x820] sm:$0xff] }
 0x1be   :  { %7353 = vmatpush1.bf16.msra.mxu1 %v18068_v62  ;;  %7968 = vmatpush1.bf16.msra.mxu0 %v18078_v63  ;;  %v18261_v62 = vcombine.high %v1224_v54, %v1236_v55  ;;  %v97_v63 = vld [vmem:[#allocation5 + $0x10] sm:$0xff] }
 0x1bf   :  { %7354 = vmatprep.subr.bf16.mxu1 %v18093_v0  ;;  %7969 = vmatprep.subr.bf16.mxu0 %v18103_v4  ;;  %v109_v0 = vld [vmem:[#allocation5 + $0x70] sm:$0xff]  ;;  %v18260_v4 = vcombine.low %v1224_v54, %v1236_v55  ;;  %v247_v54 = vld [vmem:[#allocation5 + $0x4c0] sm:$0xff]  ;;  %v17267_v55 = vcombine.high %v223_v46, %v235_v48 }
 0x1c0   :  { %v17291_v1 = vcombine.high %v247_v54, %v259_v56  ;;  %v17290_v9 = vcombine.low %v247_v54, %v259_v56  ;;  %v379_v46 = vld [vmem:[#allocation5 + $0x8e0] sm:$0xff] }
 0x1c1   :  { %v403_v54 = vld [vmem:[#allocation5 + $0x9a0] sm:$0xff] }
 0x1c2   :  { %7355 = vmatpush1.bf16.msra.mxu1 %v18092_v6  ;;  %7970 = vmatpush1.bf16.msra.mxu0 %v18102_v7  ;;  %v17135_v6 = vcombine.high %v97_v63, %v109_v0  ;;  %v121_v7 = vld [vmem:[#allocation5 + $0xd0] sm:$0xff] }
 0x1c3   :  { %7356 = vmatprep.subr.bf16.mxu1 %v18117_v8  ;;  %7971 = vmatprep.subr.bf16.mxu0 %v18127_v13  ;;  %v133_v8 = vld [vmem:[#allocation5 + $0x130] sm:$0xff]  ;;  %v17134_v13 = vcombine.low %v97_v63, %v109_v0  ;;  %v271_v63 = vld [vmem:[#allocation5 + $0x580] sm:$0xff] }
 0x1c6   :  { %7357 = vmatpush1.bf16.msra.mxu1 %v18116_v15  ;;  %7972 = vmatpush1.bf16.msra.mxu0 %v18126_v16  ;;  %v17159_v15 = vcombine.high %v121_v7, %v133_v8  ;;  %v145_v16 = vld [vmem:[#allocation5 + $0x190] sm:$0xff] }
 0x1c7   :  { %7358 = vmatprep.subr.bf16.mxu1 %v18141_v17  ;;  %7973 = vmatprep.subr.bf16.mxu0 %v18151_v21  ;;  %v157_v17 = vld [vmem:[#allocation5 + $0x1f0] sm:$0xff]  ;;  %v17158_v21 = vcombine.low %v121_v7, %v133_v8 }
 0x1ca   :  { %7359 = vmatpush1.bf16.msra.mxu1 %v18140_v24  ;;  %7974 = vmatpush1.bf16.msra.mxu0 %v18150_v26  ;;  %v17183_v24 = vcombine.high %v145_v16, %v157_v17  ;;  %v169_v26 = vld [vmem:[#allocation5 + $0x250] sm:$0xff] }
 0x1cb   :  { %7360 = vmatprep.subr.bf16.mxu1 %v18165_v27  ;;  %7975 = vmatprep.subr.bf16.mxu0 %v18175_v31  ;;  %v181_v27 = vld [vmem:[#allocation5 + $0x2b0] sm:$0xff]  ;;  %v17182_v31 = vcombine.low %v145_v16, %v157_v17  ;;  %v307_v17 = vld [vmem:[#allocation5 + $0x6a0] sm:$0xff] }
 0x1ce   :  { %7361 = vmatpush1.bf16.msra.mxu1 %v18164_v33  ;;  %7976 = vmatpush1.bf16.msra.mxu0 %v18174_v35  ;;  %v17207_v33 = vcombine.high %v169_v26, %v181_v27  ;;  %v193_v35 = vld [vmem:[#allocation5 + $0x310] sm:$0xff] }
 0x1cf   :  { %7362 = vmatprep.subr.bf16.mxu1 %v18189_v36  ;;  %7977 = vmatprep.subr.bf16.mxu0 %v18199_v41  ;;  %v205_v36 = vld [vmem:[#allocation5 + $0x370] sm:$0xff]  ;;  %v17206_v41 = vcombine.low %v169_v26, %v181_v27  ;;  %v319_v26 = vld [vmem:[#allocation5 + $0x700] sm:$0xff] }
 0x1d0   :  { %v17362_v40 = vcombine.low %v319_v26, %v331_v28 }
 0x1d2   :  { %7363 = vmatpush1.bf16.msra.mxu1 %v18188_v43  ;;  %7978 = vmatpush1.bf16.msra.mxu0 %v18198_v44  ;;  %v17231_v43 = vcombine.high %v193_v35, %v205_v36  ;;  %v217_v44 = vld [vmem:[#allocation5 + $0x3d0] sm:$0xff] }
 0x1d3   :  { %7364 = vmatprep.subr.bf16.mxu1 %v18213_v45  ;;  %7979 = vmatprep.subr.bf16.mxu0 %v18223_v49  ;;  %v229_v45 = vld [vmem:[#allocation5 + $0x430] sm:$0xff]  ;;  %v17230_v49 = vcombine.low %v193_v35, %v205_v36  ;;  %v343_v35 = vld [vmem:[#allocation5 + $0x7c0] sm:$0xff]  ;;  %v17363_v36 = vcombine.high %v319_v26, %v331_v28 }
 0x1d4   :  { %v17386_v48 = vcombine.low %v343_v35, %v355_v37  ;;  %v481_v26 = vld [vmem:[#allocation5 + $0xc10] sm:$0xff]  ;;  %v487_v28 = vld [vmem:[#allocation5 + $0xc40] sm:$0xff] }
 0x1d6   :  { %7365 = vmatpush1.bf16.msra.mxu1 %v18212_v51  ;;  %7980 = vmatpush1.bf16.msra.mxu0 %v18222_v52  ;;  %v17255_v51 = vcombine.high %v217_v44, %v229_v45  ;;  %v241_v52 = vld [vmem:[#allocation5 + $0x490] sm:$0xff] }
 0x1d7   :  { %7366 = vmatprep.subr.bf16.mxu1 %v18237_v53  ;;  %7981 = vmatprep.subr.bf16.mxu0 %v18247_v58  ;;  %v253_v53 = vld [vmem:[#allocation5 + $0x4f0] sm:$0xff]  ;;  %v17254_v58 = vcombine.low %v217_v44, %v229_v45  ;;  %v367_v44 = vld [vmem:[#allocation5 + $0x880] sm:$0xff]  ;;  %v17387_v45 = vcombine.high %v343_v35, %v355_v37 }
 0x1d8   :  { %v17410_v56 = vcombine.low %v367_v44, %v379_v46  ;;  %v505_v35 = vld [vmem:[#allocation5 + $0xcd0] sm:$0xff]  ;;  %v511_v37 = vld [vmem:[#allocation5 + $0xd00] sm:$0xff] }
 0x1da   :  { %7367 = vmatpush1.bf16.msra.mxu1 %v18236_v60  ;;  %7982 = vmatpush1.bf16.msra.mxu0 %v18246_v61  ;;  %v17279_v60 = vcombine.high %v241_v52, %v253_v53  ;;  %v265_v61 = vld [vmem:[#allocation5 + $0x550] sm:$0xff] }
 0x1db   :  { %7368 = vmatprep.subr.bf16.mxu1 %v18261_v62  ;;  %7983 = vmatprep.subr.bf16.mxu0 %v18271_v2  ;;  %v277_v62 = vld [vmem:[#allocation5 + $0x5b0] sm:$0xff]  ;;  %v283_v2 = vld [vmem:[#allocation5 + $0x5e0] sm:$0xff] }
 0x1dc   :  { %v17315_v16 = vcombine.high %v271_v63, %v283_v2  ;;  %v17314_v20 = vcombine.low %v271_v63, %v283_v2  ;;  %v427_v63 = vld [vmem:[#allocation5 + $0xa60] sm:$0xff] }
 0x1de   :  { %7369 = vmatpush1.bf16.msra.mxu1 %v18260_v4  ;;  %7984 = vmatpush1.bf16.msra.mxu0 %v18270_v5 }
 0x1df   :  { %7379 = vmatprep.subr.bf16.mxu1 %v17135_v6  ;;  %8117 = vmatprep.subr.bf16.mxu0 %v17147_v10  ;;  %v17278_v6 = vcombine.low %v241_v52, %v253_v53  ;;  %v17303_v10 = vcombine.high %v265_v61, %v277_v62  ;;  %v391_v52 = vld [vmem:[#allocation5 + $0x940] sm:$0xff]  ;;  %v17411_v53 = vcombine.high %v367_v44, %v379_v46  ;;  %v529_v44 = vld [vmem:[#allocation5 + $0xd90] sm:$0xff] }
 0x1e0   :  { %v17434_v2 = vcombine.low %v391_v52, %v403_v54  ;;  %v535_v46 = vld [vmem:[#allocation5 + $0xdc0] sm:$0xff] }
 0x1e1   :  { %7371 = vmatmul.mubr.bf16.vlgmr.msra.gmra.mrb[4].mxu1 %v21754_v38  ;;  %7986 = vmatmul.mubr.bf16.vlgmr.msra.gmra.mrb[4].mxu0 %v21754_v38 }
 0x1e2   :  { %7380 = vmatpush1.bf16.msra.mxu1 %v17134_v13  ;;  %8118 = vmatpush1.bf16.msra.mxu0 %v17146_v14  ;;  %v301_v13 = vld [vmem:[#allocation5 + $0x670] sm:$0xff]  ;;  %v295_v14 = vld [vmem:[#allocation5 + $0x640] sm:$0xff] }
 0x1e3   :  { %7381 = vmatprep.subr.bf16.mxu1 %v17159_v15  ;;  %8119 = vmatprep.subr.bf16.mxu0 %v17171_v19  ;;  %v17302_v19 = vcombine.low %v265_v61, %v277_v62  ;;  %v17339_v27 = vcombine.high %v295_v14, %v307_v17  ;;  %v17338_v30 = vcombine.low %v295_v14, %v307_v17  ;;  %v415_v61 = vld [vmem:[#allocation5 + $0xa00] sm:$0xff]  ;;  %v469_v17 = vld [vmem:[#allocation5 + $0xbb0] sm:$0xff] }
 0x1e4   :  { %7411 = vmatprep.mubr.bf16.mxu1 %v21734_v57  ;;  %8149 = vmatprep.mubr.bf16.mxu0 %v21734_v57  ;;  %v17435_v62 = vcombine.high %v391_v52, %v403_v54  ;;  %v17458_v14 = vcombine.low %v415_v61, %v427_v63  ;;  %v553_v52 = vld [vmem:[#allocation5 + $0xe50] sm:$0xff]  ;;  %v559_v54 = vld [vmem:[#allocation5 + $0xe80] sm:$0xff] }
 0x1e6   :  { %7382 = vmatpush1.bf16.msra.mxu1 %v17158_v21  ;;  %8120 = vmatpush1.bf16.msra.mxu0 %v17170_v22  ;;  %v17327_v21 = vcombine.high %v289_v11, %v301_v13  ;;  %v313_v22 = vld [vmem:[#allocation5 + $0x6d0] sm:$0xff] }
 0x1e7   :  { %7383 = vmatprep.subr.bf16.mxu1 %v17183_v24  ;;  %8121 = vmatprep.subr.bf16.mxu0 %v17195_v29  ;;  %v325_v24 = vld [vmem:[#allocation5 + $0x730] sm:$0xff]  ;;  %v17326_v29 = vcombine.low %v289_v11, %v301_v13  ;;  %v451_v11 = vld [vmem:[#allocation5 + $0xb20] sm:$0xff] }
 0x1ea   :  { %7384 = vmatpush1.bf16.msra.mxu1 %v17182_v31  ;;  %8122 = vmatpush1.bf16.msra.mxu0 %v17194_v32  ;;  %v17351_v31 = vcombine.high %v313_v22, %v325_v24  ;;  %v337_v32 = vld [vmem:[#allocation5 + $0x790] sm:$0xff] }
 0x1eb   :  { %7385 = vmatprep.subr.bf16.mxu1 %v17207_v33  ;;  %8123 = vmatprep.subr.bf16.mxu0 %v17219_v39  ;;  %v349_v33 = vld [vmem:[#allocation5 + $0x7f0] sm:$0xff]  ;;  %v17350_v39 = vcombine.low %v313_v22, %v325_v24 }
 0x1ee   :  { %7386 = vmatpush1.bf16.msra.mxu1 %v17206_v41  ;;  %8124 = vmatpush1.bf16.msra.mxu0 %v17218_v42  ;;  %v17375_v41 = vcombine.high %v337_v32, %v349_v33  ;;  %v361_v42 = vld [vmem:[#allocation5 + $0x850] sm:$0xff] }
 0x1ef   :  { %7387 = vmatprep.subr.bf16.mxu1 %v17231_v43  ;;  %8125 = vmatprep.subr.bf16.mxu0 %v17243_v47  ;;  %v373_v43 = vld [vmem:[#allocation5 + $0x8b0] sm:$0xff]  ;;  %v17374_v47 = vcombine.low %v337_v32, %v349_v33 }
 0x1f2   :  { %7388 = vmatpush1.bf16.msra.mxu1 %v17230_v49  ;;  %8126 = vmatpush1.bf16.msra.mxu0 %v17242_v50  ;;  %v17399_v49 = vcombine.high %v361_v42, %v373_v43  ;;  %v385_v50 = vld [vmem:[#allocation5 + $0x910] sm:$0xff] }
 0x1f3   :  { %7389 = vmatprep.subr.bf16.mxu1 %v17255_v51  ;;  %8127 = vmatprep.subr.bf16.mxu0 %v17267_v55  ;;  %v397_v51 = vld [vmem:[#allocation5 + $0x970] sm:$0xff]  ;;  %v17398_v55 = vcombine.low %v361_v42, %v373_v43 }
 0x1f4   :  { %v21772_v0 = vpop.f32.mrb[0].mxu1  ;;  %v21776_v4 = vpop.f32.mrb[0].mxu0 }
 0x1f5   :  { %v21774_v3 = vpop.f32.mrb[1].mxu1  ;;  %v21778_v7 = vpop.f32.mrb[1].mxu0 }
 0x1f6   :  { %v7253_v5 = vpop.f32.mrb[2].mxu1  ;;  %7390 = vmatpush1.bf16.msra.mxu1 %v17254_v58  ;;  %8128 = vmatpush1.bf16.msra.mxu0 %v17266_v59  ;;  %v7745_v15 = vpop.f32.mrb[2].mxu0  ;;  %v17423_v58 = vcombine.high %v385_v50, %v397_v51  ;;  %v409_v59 = vld [vmem:[#allocation5 + $0x9d0] sm:$0xff] }
 0x1f7   :  { %v7254_v8 = vpop.f32.mrb[3].mxu1  ;;  %7391 = vmatprep.subr.bf16.mxu1 %v17279_v60  ;;  %8129 = vmatprep.subr.bf16.mxu0 %v17291_v1  ;;  %v7746_v18 = vpop.f32.mrb[3].mxu0  ;;  %v421_v60 = vld [vmem:[#allocation5 + $0xa30] sm:$0xff]  ;;  %v17422_v1 = vcombine.low %v385_v50, %v397_v51 }
 0x1f8   :  { %v17447_v5 = vcombine.high %v409_v59, %v421_v60  ;;  %v445_v8 = vld [vmem:[#allocation5 + $0xaf0] sm:$0xff]  ;;  %v17446_v13 = vcombine.low %v409_v59, %v421_v60  ;;  %v463_v18 = vld [vmem:[#allocation5 + $0xb80] sm:$0xff] }
 0x1fa   :  { %7392 = vmatpush1.bf16.msra.mxu1 %v17278_v6  ;;  %8130 = vmatpush1.bf16.msra.mxu0 %v17290_v9  ;;  %v433_v6 = vld [vmem:[#allocation5 + $0xa90] sm:$0xff]  ;;  %v439_v9 = vld [vmem:[#allocation5 + $0xac0] sm:$0xff] }
 0x1fb   :  { %7393 = vmatprep.subr.bf16.mxu1 %v17303_v10  ;;  %8131 = vmatprep.subr.bf16.mxu0 %v17315_v16  ;;  %v17459_v10 = vcombine.high %v415_v61, %v427_v63  ;;  %v17471_v15 = vcombine.high %v433_v6, %v445_v8  ;;  %v457_v16 = vld [vmem:[#allocation5 + $0xb50] sm:$0xff]  ;;  %v17482_v22 = vcombine.low %v439_v9, %v451_v11  ;;  %v583_v63 = vld [vmem:[#allocation5 + $0xf40] sm:$0xff] }
 0x1fc   :  { %v17495_v24 = vcombine.high %v457_v16, %v469_v17  ;;  %v577_v61 = vld [vmem:[#allocation5 + $0xf10] sm:$0xff] }
 0x1fe   :  { %7394 = vmatpush1.bf16.msra.mxu1 %v17302_v19  ;;  %8132 = vmatpush1.bf16.msra.mxu0 %v17314_v20  ;;  %v17483_v19 = vcombine.high %v439_v9, %v451_v11  ;;  %v475_v20 = vld [vmem:[#allocation5 + $0xbe0] sm:$0xff]  ;;  %v601_v9 = vld [vmem:[#allocation5 + $0xfd0] sm:$0xff] }
 0x1ff   :  { %7395 = vmatprep.subr.bf16.mxu1 %v17327_v21  ;;  %8133 = vmatprep.subr.bf16.mxu0 %v17339_v27  ;;  %v17470_v21 = vcombine.low %v433_v6, %v445_v8  ;;  %v493_v27 = vld [vmem:[#allocation5 + $0xc70] sm:$0xff]  ;;  %v17506_v32 = vcombine.low %v463_v18, %v475_v20  ;;  %v607_v11 = vld [vmem:[#allocation5 + $0x1000] sm:$0xff] }
 0x200   :  { %v17519_v33 = vcombine.high %v481_v26, %v493_v27 }
 0x202   :  { %7396 = vmatpush1.bf16.msra.mxu1 %v17326_v29  ;;  %8134 = vmatpush1.bf16.msra.mxu0 %v17338_v30  ;;  %v17507_v29 = vcombine.high %v463_v18, %v475_v20  ;;  %v499_v30 = vld [vmem:[#allocation5 + $0xca0] sm:$0xff]  ;;  %v625_v18 = vld [vmem:[#allocation5 + $0x1090] sm:$0xff] }
 0x203   :  { %7397 = vmatprep.subr.bf16.mxu1 %v17351_v31  ;;  %8135 = vmatprep.subr.bf16.mxu0 %v17363_v36  ;;  %v17494_v31 = vcombine.low %v457_v16, %v469_v17  ;;  %v517_v36 = vld [vmem:[#allocation5 + $0xd30] sm:$0xff]  ;;  %v17530_v42 = vcombine.low %v487_v28, %v499_v30  ;;  %v631_v20 = vld [vmem:[#allocation5 + $0x10c0] sm:$0xff] }
 0x204   :  { %v17543_v43 = vcombine.high %v505_v35, %v517_v36 }
 0x206   :  { %7398 = vmatpush1.bf16.msra.mxu1 %v17350_v39  ;;  %8136 = vmatpush1.bf16.msra.mxu0 %v17362_v40  ;;  %v17531_v39 = vcombine.high %v487_v28, %v499_v30  ;;  %v523_v40 = vld [vmem:[#allocation5 + $0xd60] sm:$0xff]  ;;  %v649_v28 = vld [vmem:[#allocation5 + $0x1150] sm:$0xff] }
 0x207   :  { %7399 = vmatprep.subr.bf16.mxu1 %v17375_v41  ;;  %8137 = vmatprep.subr.bf16.mxu0 %v17387_v45  ;;  %v17518_v41 = vcombine.low %v481_v26, %v493_v27  ;;  %v541_v45 = vld [vmem:[#allocation5 + $0xdf0] sm:$0xff]  ;;  %v17554_v50 = vcombine.low %v511_v37, %v523_v40  ;;  %v655_v30 = vld [vmem:[#allocation5 + $0x1180] sm:$0xff] }
 0x208   :  { %v17567_v51 = vcombine.high %v529_v44, %v541_v45 }
 0x20a   :  { %7400 = vmatpush1.bf16.msra.mxu1 %v17374_v47  ;;  %8138 = vmatpush1.bf16.msra.mxu0 %v17386_v48  ;;  %v17555_v47 = vcombine.high %v511_v37, %v523_v40  ;;  %v547_v48 = vld [vmem:[#allocation5 + $0xe20] sm:$0xff]  ;;  %v673_v37 = vld [vmem:[#allocation5 + $0x1210] sm:$0xff] }
 0x20b   :  { %7401 = vmatprep.subr.bf16.mxu1 %v17399_v49  ;;  %8139 = vmatprep.subr.bf16.mxu0 %v17411_v53  ;;  %v17542_v49 = vcombine.low %v505_v35, %v517_v36  ;;  %v565_v53 = vld [vmem:[#allocation5 + $0xeb0] sm:$0xff]  ;;  %v17578_v59 = vcombine.low %v535_v46, %v547_v48  ;;  %v679_v40 = vld [vmem:[#allocation5 + $0x1240] sm:$0xff] }
 0x20c   :  { %v17591_v60 = vcombine.high %v553_v52, %v565_v53 }
 0x20e   :  { %7402 = vmatpush1.bf16.msra.mxu1 %v17398_v55  ;;  %8140 = vmatpush1.bf16.msra.mxu0 %v17410_v56  ;;  %v17579_v55 = vcombine.high %v535_v46, %v547_v48  ;;  %v571_v56 = vld [vmem:[#allocation5 + $0xee0] sm:$0xff]  ;;  %v697_v46 = vld [vmem:[#allocation5 + $0x12d0] sm:$0xff] }
 0x20f   :  { %7403 = vmatprep.subr.bf16.mxu1 %v17423_v58  ;;  %8141 = vmatprep.subr.bf16.mxu0 %v17435_v62  ;;  %v17566_v58 = vcombine.low %v529_v44, %v541_v45  ;;  %v589_v62 = vld [vmem:[#allocation5 + $0xf70] sm:$0xff]  ;;  %v17602_v6 = vcombine.low %v559_v54, %v571_v56  ;;  %v703_v48 = vld [vmem:[#allocation5 + $0x1300] sm:$0xff] }
 0x210   :  { %v17615_v8 = vcombine.high %v577_v61, %v589_v62 }
 0x212   :  { %7404 = vmatpush1.bf16.msra.mxu1 %v17422_v1  ;;  %8142 = vmatpush1.bf16.msra.mxu0 %v17434_v2  ;;  %v17603_v1 = vcombine.high %v559_v54, %v571_v56  ;;  %v595_v2 = vld [vmem:[#allocation5 + $0xfa0] sm:$0xff]  ;;  %v721_v54 = vld [vmem:[#allocation5 + $0x1390] sm:$0xff] }
 0x213   :  { %7405 = vmatprep.subr.bf16.mxu1 %v17447_v5  ;;  %8143 = vmatprep.subr.bf16.mxu0 %v17459_v10  ;;  %v17590_v5 = vcombine.low %v553_v52, %v565_v53  ;;  %v613_v10 = vld [vmem:[#allocation5 + $0x1030] sm:$0xff]  ;;  %v17626_v16 = vcombine.low %v583_v63, %v595_v2  ;;  %v727_v56 = vld [vmem:[#allocation5 + $0x13c0] sm:$0xff] }
 0x214   :  { %v17639_v17 = vcombine.high %v601_v9, %v613_v10 }
 0x216   :  { %7406 = vmatpush1.bf16.msra.mxu1 %v17446_v13  ;;  %8144 = vmatpush1.bf16.msra.mxu0 %v17458_v14  ;;  %v17627_v13 = vcombine.high %v583_v63, %v595_v2  ;;  %v619_v14 = vld [vmem:[#allocation5 + $0x1060] sm:$0xff]  ;;  %v745_v63 = vld [vmem:[#allocation5 + $0x1450] sm:$0xff] }
 0x217   :  { %7407 = vmatprep.subr.bf16.mxu1 %v17471_v15  ;;  %8145 = vmatprep.subr.bf16.mxu0 %v17483_v19  ;;  %v17614_v15 = vcombine.low %v577_v61, %v589_v62  ;;  %v637_v19 = vld [vmem:[#allocation5 + $0x10f0] sm:$0xff]  ;;  %v17650_v26 = vcombine.low %v607_v11, %v619_v14  ;;  %v751_v2 = vld [vmem:[#allocation5 + $0x1480] sm:$0xff] }
 0x218   :  { %v17663_v27 = vcombine.high %v625_v18, %v637_v19 }
 0x21a   :  { %7408 = vmatpush1.bf16.msra.mxu1 %v17470_v21  ;;  %8146 = vmatpush1.bf16.msra.mxu0 %v17482_v22  ;;  %v17651_v21 = vcombine.high %v607_v11, %v619_v14  ;;  %v643_v22 = vld [vmem:[#allocation5 + $0x1120] sm:$0xff]  ;;  %v769_v11 = vld [vmem:[#allocation5 + $0x1510] sm:$0xff] }
 0x21b   :  { %7409 = vmatprep.subr.bf16.mxu1 %v17495_v24  ;;  %8147 = vmatprep.subr.bf16.mxu0 %v17507_v29  ;;  %v17638_v24 = vcombine.low %v601_v9, %v613_v10  ;;  %v661_v29 = vld [vmem:[#allocation5 + $0x11b0] sm:$0xff]  ;;  %v17674_v35 = vcombine.low %v631_v20, %v643_v22  ;;  %v775_v14 = vld [vmem:[#allocation5 + $0x1540] sm:$0xff] }
 0x21c   :  { %v17687_v36 = vcombine.high %v649_v28, %v661_v29 }
 0x21e   :  { %7410 = vmatpush1.bf16.msra.mxu1 %v17494_v31  ;;  %8148 = vmatpush1.bf16.msra.mxu0 %v17506_v32  ;;  %v17675_v31 = vcombine.high %v631_v20, %v643_v22  ;;  %v667_v32 = vld [vmem:[#allocation5 + $0x11e0] sm:$0xff]  ;;  %v793_v20 = vld [vmem:[#allocation5 + $0x15d0] sm:$0xff] }
 0x21f   :  { %7420 = vmatprep.subr.bf16.mxu1 %v17519_v33  ;;  %8158 = vmatprep.subr.bf16.mxu0 %v17531_v39  ;;  %v17662_v33 = vcombine.low %v625_v18, %v637_v19  ;;  %v685_v39 = vld [vmem:[#allocation5 + $0x1270] sm:$0xff]  ;;  %v17698_v44 = vcombine.low %v655_v30, %v667_v32  ;;  %v799_v22 = vld [vmem:[#allocation5 + $0x1600] sm:$0xff] }
 0x220   :  { %v17711_v45 = vcombine.high %v673_v37, %v685_v39 }
 0x221   :  { %7412 = vmatmul.mubr.bf16.vlgmr.msra.gmra.mrb[8].mxu1 %v21738_v12  ;;  %8150 = vmatmul.mubr.bf16.vlgmr.msra.gmra.mrb[8].mxu0 %v21738_v12 }
 0x222   :  { %7421 = vmatpush1.bf16.msra.mxu1 %v17518_v41  ;;  %8159 = vmatpush1.bf16.msra.mxu0 %v17530_v42  ;;  %v17699_v41 = vcombine.high %v655_v30, %v667_v32  ;;  %v691_v42 = vld [vmem:[#allocation5 + $0x12a0] sm:$0xff]  ;;  %v817_v30 = vld [vmem:[#allocation5 + $0x1690] sm:$0xff] }
 0x223   :  { %7422 = vmatprep.subr.bf16.mxu1 %v17543_v43  ;;  %8160 = vmatprep.subr.bf16.mxu0 %v17555_v47  ;;  %v17686_v43 = vcombine.low %v649_v28, %v661_v29  ;;  %v709_v47 = vld [vmem:[#allocation5 + $0x1330] sm:$0xff]  ;;  %v17722_v52 = vcombine.low %v679_v40, %v691_v42  ;;  %v823_v32 = vld [vmem:[#allocation5 + $0x16c0] sm:$0xff] }
 0x224   :  { %7452 = vmatprep.mubr.bf16.mxu1 %v21740_v23  ;;  %8190 = vmatprep.mubr.bf16.mxu0 %v21740_v23  ;;  %v17735_v53 = vcombine.high %v697_v46, %v709_v47 }
 0x226   :  { %7423 = vmatpush1.bf16.msra.mxu1 %v17542_v49  ;;  %8161 = vmatpush1.bf16.msra.mxu0 %v17554_v50  ;;  %v17723_v49 = vcombine.high %v679_v40, %v691_v42  ;;  %v715_v50 = vld [vmem:[#allocation5 + $0x1360] sm:$0xff]  ;;  %v841_v40 = vld [vmem:[#allocation5 + $0x1750] sm:$0xff] }
 0x227   :  { %7424 = vmatprep.subr.bf16.mxu1 %v17567_v51  ;;  %8162 = vmatprep.subr.bf16.mxu0 %v17579_v55  ;;  %v17710_v51 = vcombine.low %v673_v37, %v685_v39  ;;  %v733_v55 = vld [vmem:[#allocation5 + $0x13f0] sm:$0xff]  ;;  %v17746_v61 = vcombine.low %v703_v48, %v715_v50  ;;  %v847_v42 = vld [vmem:[#allocation5 + $0x1780] sm:$0xff] }
 0x228   :  { %v17759_v62 = vcombine.high %v721_v54, %v733_v55 }
 0x22a   :  { %7425 = vmatpush1.bf16.msra.mxu1 %v17566_v58  ;;  %8163 = vmatpush1.bf16.msra.mxu0 %v17578_v59  ;;  %v17747_v58 = vcombine.high %v703_v48, %v715_v50  ;;  %v739_v59 = vld [vmem:[#allocation5 + $0x1420] sm:$0xff]  ;;  %v865_v48 = vld [vmem:[#allocation5 + $0x1810] sm:$0xff] }
 0x22b   :  { %7426 = vmatprep.subr.bf16.mxu1 %v17591_v60  ;;  %8164 = vmatprep.subr.bf16.mxu0 %v17603_v1  ;;  %v17734_v60 = vcombine.low %v697_v46, %v709_v47  ;;  %v757_v1 = vld [vmem:[#allocation5 + $0x14b0] sm:$0xff]  ;;  %v17770_v9 = vcombine.low %v727_v56, %v739_v59  ;;  %v871_v50 = vld [vmem:[#allocation5 + $0x1840] sm:$0xff] }
 0x22c   :  { %v17783_v10 = vcombine.high %v745_v63, %v757_v1 }
 0x22e   :  { %7427 = vmatpush1.bf16.msra.mxu1 %v17590_v5  ;;  %8165 = vmatpush1.bf16.msra.mxu0 %v17602_v6  ;;  %v17771_v5 = vcombine.high %v727_v56, %v739_v59  ;;  %v763_v6 = vld [vmem:[#allocation5 + $0x14e0] sm:$0xff]  ;;  %v889_v56 = vld [vmem:[#allocation5 + $0x18d0] sm:$0xff] }
 0x22f   :  { %7428 = vmatprep.subr.bf16.mxu1 %v17615_v8  ;;  %8166 = vmatprep.subr.bf16.mxu0 %v17627_v13  ;;  %v17758_v8 = vcombine.low %v721_v54, %v733_v55  ;;  %v781_v13 = vld [vmem:[#allocation5 + $0x1570] sm:$0xff]  ;;  %v17794_v18 = vcombine.low %v751_v2, %v763_v6  ;;  %v895_v59 = vld [vmem:[#allocation5 + $0x1900] sm:$0xff] }
 0x230   :  { %v17807_v19 = vcombine.high %v769_v11, %v781_v13 }
 0x232   :  { %7429 = vmatpush1.bf16.msra.mxu1 %v17614_v15  ;;  %8167 = vmatpush1.bf16.msra.mxu0 %v17626_v16  ;;  %v17795_v15 = vcombine.high %v751_v2, %v763_v6  ;;  %v787_v16 = vld [vmem:[#allocation5 + $0x15a0] sm:$0xff]  ;;  %v913_v2 = vld [vmem:[#allocation5 + $0x1990] sm:$0xff] }
 0x233   :  { %7430 = vmatprep.subr.bf16.mxu1 %v17639_v17  ;;  %8168 = vmatprep.subr.bf16.mxu0 %v17651_v21  ;;  %v17782_v17 = vcombine.low %v745_v63, %v757_v1  ;;  %v805_v21 = vld [vmem:[#allocation5 + $0x1630] sm:$0xff]  ;;  %v17818_v28 = vcombine.low %v775_v14, %v787_v16  ;;  %v919_v6 = vld [vmem:[#allocation5 + $0x19c0] sm:$0xff] }
 0x234   :  { %v17831_v29 = vcombine.high %v793_v20, %v805_v21 }
 0x236   :  { %7431 = vmatpush1.bf16.msra.mxu1 %v17638_v24  ;;  %8169 = vmatpush1.bf16.msra.mxu0 %v17650_v26  ;;  %v17819_v24 = vcombine.high %v775_v14, %v787_v16  ;;  %v811_v26 = vld [vmem:[#allocation5 + $0x1660] sm:$0xff]  ;;  %v937_v14 = vld [vmem:[#allocation5 + $0x1a50] sm:$0xff] }
 0x237   :  { %7432 = vmatprep.subr.bf16.mxu1 %v17663_v27  ;;  %8170 = vmatprep.subr.bf16.mxu0 %v17675_v31  ;;  %v17806_v27 = vcombine.low %v769_v11, %v781_v13  ;;  %v829_v31 = vld [vmem:[#allocation5 + $0x16f0] sm:$0xff]  ;;  %v17842_v37 = vcombine.low %v799_v22, %v811_v26  ;;  %v943_v16 = vld [vmem:[#allocation5 + $0x1a80] sm:$0xff] }
 0x238   :  { %v17855_v39 = vcombine.high %v817_v30, %v829_v31 }
 0x23a   :  { %7433 = vmatpush1.bf16.msra.mxu1 %v17662_v33  ;;  %8171 = vmatpush1.bf16.msra.mxu0 %v17674_v35  ;;  %v17843_v33 = vcombine.high %v799_v22, %v811_v26  ;;  %v835_v35 = vld [vmem:[#allocation5 + $0x1720] sm:$0xff]  ;;  %v961_v22 = vld [vmem:[#allocation5 + $0x1b10] sm:$0xff] }
 0x23b   :  { %7434 = vmatprep.subr.bf16.mxu1 %v17687_v36  ;;  %8172 = vmatprep.subr.bf16.mxu0 %v17699_v41  ;;  %v17830_v36 = vcombine.low %v793_v20, %v805_v21  ;;  %v853_v41 = vld [vmem:[#allocation5 + $0x17b0] sm:$0xff]  ;;  %v17866_v46 = vcombine.low %v823_v32, %v835_v35  ;;  %v967_v26 = vld [vmem:[#allocation5 + $0x1b40] sm:$0xff] }
 0x23c   :  { %v17879_v47 = vcombine.high %v841_v40, %v853_v41 }
 0x23e   :  { %7435 = vmatpush1.bf16.msra.mxu1 %v17686_v43  ;;  %8173 = vmatpush1.bf16.msra.mxu0 %v17698_v44  ;;  %v17867_v43 = vcombine.high %v823_v32, %v835_v35  ;;  %v859_v44 = vld [vmem:[#allocation5 + $0x17e0] sm:$0xff]  ;;  %v985_v32 = vld [vmem:[#allocation5 + $0x1bd0] sm:$0xff] }
 0x23f   :  { %7436 = vmatprep.subr.bf16.mxu1 %v17711_v45  ;;  %8174 = vmatprep.subr.bf16.mxu0 %v17723_v49  ;;  %v17854_v45 = vcombine.low %v817_v30, %v829_v31  ;;  %v877_v49 = vld [vmem:[#allocation5 + $0x1870] sm:$0xff]  ;;  %v17890_v54 = vcombine.low %v847_v42, %v859_v44  ;;  %v991_v35 = vld [vmem:[#allocation5 + $0x1c00] sm:$0xff] }
 0x240   :  { %v17903_v55 = vcombine.high %v865_v48, %v877_v49 }
 0x242   :  { %7437 = vmatpush1.bf16.msra.mxu1 %v17710_v51  ;;  %8175 = vmatpush1.bf16.msra.mxu0 %v17722_v52  ;;  %v17891_v51 = vcombine.high %v847_v42, %v859_v44  ;;  %v883_v52 = vld [vmem:[#allocation5 + $0x18a0] sm:$0xff]  ;;  %v1009_v42 = vld [vmem:[#allocation5 + $0x1c90] sm:$0xff] }
 0x243   :  { %7438 = vmatprep.subr.bf16.mxu1 %v17735_v53  ;;  %8176 = vmatprep.subr.bf16.mxu0 %v17747_v58  ;;  %v17878_v53 = vcombine.low %v841_v40, %v853_v41  ;;  %v901_v58 = vld [vmem:[#allocation5 + $0x1930] sm:$0xff]  ;;  %v17914_v63 = vcombine.low %v871_v50, %v883_v52  ;;  %v1015_v44 = vld [vmem:[#allocation5 + $0x1cc0] sm:$0xff] }
 0x244   :  { %v17927_v1 = vcombine.high %v889_v56, %v901_v58 }
 0x246   :  { %7439 = vmatpush1.bf16.msra.mxu1 %v17734_v60  ;;  %8177 = vmatpush1.bf16.msra.mxu0 %v17746_v61  ;;  %v17915_v60 = vcombine.high %v871_v50, %v883_v52  ;;  %v907_v61 = vld [vmem:[#allocation5 + $0x1960] sm:$0xff]  ;;  %v1033_v50 = vld [vmem:[#allocation5 + $0x1d50] sm:$0xff] }
 0x247   :  { %7440 = vmatprep.subr.bf16.mxu1 %v17759_v62  ;;  %8178 = vmatprep.subr.bf16.mxu0 %v17771_v5  ;;  %v17902_v62 = vcombine.low %v865_v48, %v877_v49  ;;  %v925_v5 = vld [vmem:[#allocation5 + $0x19f0] sm:$0xff]  ;;  %v17938_v11 = vcombine.low %v895_v59, %v907_v61  ;;  %v1039_v52 = vld [vmem:[#allocation5 + $0x1d80] sm:$0xff] }
 0x248   :  { %v17951_v13 = vcombine.high %v913_v2, %v925_v5 }
 0x24a   :  { %7441 = vmatpush1.bf16.msra.mxu1 %v17758_v8  ;;  %8179 = vmatpush1.bf16.msra.mxu0 %v17770_v9  ;;  %v17939_v8 = vcombine.high %v895_v59, %v907_v61  ;;  %v931_v9 = vld [vmem:[#allocation5 + $0x1a20] sm:$0xff]  ;;  %v1057_v59 = vld [vmem:[#allocation5 + $0x1e10] sm:$0xff] }
 0x24b   :  { %7442 = vmatprep.subr.bf16.mxu1 %v17783_v10  ;;  %8180 = vmatprep.subr.bf16.mxu0 %v17795_v15  ;;  %v17926_v10 = vcombine.low %v889_v56, %v901_v58  ;;  %v949_v15 = vld [vmem:[#allocation5 + $0x1ab0] sm:$0xff]  ;;  %v17962_v20 = vcombine.low %v919_v6, %v931_v9  ;;  %v1063_v61 = vld [vmem:[#allocation5 + $0x1e40] sm:$0xff] }
 0x24c   :  { %v17975_v21 = vcombine.high %v937_v14, %v949_v15 }
 0x24e   :  { %7443 = vmatpush1.bf16.msra.mxu1 %v17782_v17  ;;  %8181 = vmatpush1.bf16.msra.mxu0 %v17794_v18  ;;  %v17963_v17 = vcombine.high %v919_v6, %v931_v9  ;;  %v955_v18 = vld [vmem:[#allocation5 + $0x1ae0] sm:$0xff]  ;;  %v1081_v6 = vld [vmem:[#allocation5 + $0x1ed0] sm:$0xff] }
 0x24f   :  { %7444 = vmatprep.subr.bf16.mxu1 %v17807_v19  ;;  %8182 = vmatprep.subr.bf16.mxu0 %v17819_v24  ;;  %v17950_v19 = vcombine.low %v913_v2, %v925_v5  ;;  %v973_v24 = vld [vmem:[#allocation5 + $0x1b70] sm:$0xff]  ;;  %v17986_v30 = vcombine.low %v943_v16, %v955_v18  ;;  %v1087_v9 = vld [vmem:[#allocation5 + $0x1f00] sm:$0xff] }
 0x250   :  { %v17999_v31 = vcombine.high %v961_v22, %v973_v24 }
 0x252   :  { %7445 = vmatpush1.bf16.msra.mxu1 %v17806_v27  ;;  %8183 = vmatpush1.bf16.msra.mxu0 %v17818_v28  ;;  %v17987_v27 = vcombine.high %v943_v16, %v955_v18  ;;  %v979_v28 = vld [vmem:[#allocation5 + $0x1ba0] sm:$0xff]  ;;  %v1105_v16 = vld [vmem:[#allocation5 + $0x1f90] sm:$0xff] }
 0x253   :  { %7446 = vmatprep.subr.bf16.mxu1 %v17831_v29  ;;  %8184 = vmatprep.subr.bf16.mxu0 %v17843_v33  ;;  %v17974_v29 = vcombine.low %v937_v14, %v949_v15  ;;  %v997_v33 = vld [vmem:[#allocation5 + $0x1c30] sm:$0xff]  ;;  %v18010_v40 = vcombine.low %v967_v26, %v979_v28  ;;  %v1111_v18 = vld [vmem:[#allocation5 + $0x1fc0] sm:$0xff] }
 0x254   :  { %v18023_v41 = vcombine.high %v985_v32, %v997_v33 }
 0x256   :  { %7447 = vmatpush1.bf16.msra.mxu1 %v17830_v36  ;;  %8185 = vmatpush1.bf16.msra.mxu0 %v17842_v37  ;;  %v18011_v36 = vcombine.high %v967_v26, %v979_v28  ;;  %v1003_v37 = vld [vmem:[#allocation5 + $0x1c60] sm:$0xff]  ;;  %v1129_v26 = vld [vmem:[#allocation5 + $0x2050] sm:$0xff] }
 0x257   :  { %7448 = vmatprep.subr.bf16.mxu1 %v17855_v39  ;;  %8186 = vmatprep.subr.bf16.mxu0 %v17867_v43  ;;  %v17998_v39 = vcombine.low %v961_v22, %v973_v24  ;;  %v1021_v43 = vld [vmem:[#allocation5 + $0x1cf0] sm:$0xff]  ;;  %v18034_v48 = vcombine.low %v991_v35, %v1003_v37  ;;  %v1135_v28 = vld [vmem:[#allocation5 + $0x2080] sm:$0xff] }
 0x258   :  { %v18047_v49 = vcombine.high %v1009_v42, %v1021_v43 }
 0x25a   :  { %7449 = vmatpush1.bf16.msra.mxu1 %v17854_v45  ;;  %8187 = vmatpush1.bf16.msra.mxu0 %v17866_v46  ;;  %v18035_v45 = vcombine.high %v991_v35, %v1003_v37  ;;  %v1027_v46 = vld [vmem:[#allocation5 + $0x1d20] sm:$0xff]  ;;  %v1153_v35 = vld [vmem:[#allocation5 + $0x2110] sm:$0xff] }
 0x25b   :  { %7450 = vmatprep.subr.bf16.mxu1 %v17879_v47  ;;  %8188 = vmatprep.subr.bf16.mxu0 %v17891_v51  ;;  %v18022_v47 = vcombine.low %v985_v32, %v997_v33  ;;  %v1045_v51 = vld [vmem:[#allocation5 + $0x1db0] sm:$0xff]  ;;  %v18058_v56 = vcombine.low %v1015_v44, %v1027_v46  ;;  %v1159_v37 = vld [vmem:[#allocation5 + $0x2140] sm:$0xff] }
 0x25c   :  { %v18071_v58 = vcombine.high %v1033_v50, %v1045_v51 }
 0x25e   :  { %7451 = vmatpush1.bf16.msra.mxu1 %v17878_v53  ;;  %8189 = vmatpush1.bf16.msra.mxu0 %v17890_v54  ;;  %v18059_v53 = vcombine.high %v1015_v44, %v1027_v46  ;;  %v1051_v54 = vld [vmem:[#allocation5 + $0x1de0] sm:$0xff]  ;;  %v1177_v44 = vld [vmem:[#allocation5 + $0x21d0] sm:$0xff] }
 0x25f   :  { %7461 = vmatprep.subr.bf16.mxu1 %v17903_v55  ;;  %8199 = vmatprep.subr.bf16.mxu0 %v17915_v60  ;;  %v18046_v55 = vcombine.low %v1009_v42, %v1021_v43  ;;  %v1069_v60 = vld [vmem:[#allocation5 + $0x1e70] sm:$0xff]  ;;  %v18082_v2 = vcombine.low %v1039_v52, %v1051_v54  ;;  %v1183_v46 = vld [vmem:[#allocation5 + $0x2200] sm:$0xff] }
 0x260   :  { %v18095_v5 = vcombine.high %v1057_v59, %v1069_v60 }
 0x261   :  { %7453 = vmatmul.mubr.bf16.vlgmr.msra.gmra.mrb[8].mxu1 %v21746_v25  ;;  %8191 = vmatmul.mubr.bf16.vlgmr.msra.gmra.mrb[8].mxu0 %v21746_v25 }
 0x262   :  { %7462 = vmatpush1.bf16.msra.mxu1 %v17902_v62  ;;  %8200 = vmatpush1.bf16.msra.mxu0 %v17914_v63  ;;  %v18083_v62 = vcombine.high %v1039_v52, %v1051_v54  ;;  %v1075_v63 = vld [vmem:[#allocation5 + $0x1ea0] sm:$0xff]  ;;  %v1201_v52 = vld [vmem:[#allocation5 + $0x2290] sm:$0xff] }
 0x263   :  { %7463 = vmatprep.subr.bf16.mxu1 %v17927_v1  ;;  %8201 = vmatprep.subr.bf16.mxu0 %v17939_v8  ;;  %v18070_v1 = vcombine.low %v1033_v50, %v1045_v51  ;;  %v1093_v8 = vld [vmem:[#allocation5 + $0x1f30] sm:$0xff]  ;;  %v18106_v14 = vcombine.low %v1063_v61, %v1075_v63  ;;  %v1207_v54 = vld [vmem:[#allocation5 + $0x22c0] sm:$0xff] }
 0x264   :  { %7493 = vmatprep.mubr.bf16.mxu1 %v21748_v34  ;;  %8231 = vmatprep.mubr.bf16.mxu0 %v21748_v34  ;;  %v18119_v15 = vcombine.high %v1081_v6, %v1093_v8 }
 0x266   :  { %7464 = vmatpush1.bf16.msra.mxu1 %v17926_v10  ;;  %8202 = vmatpush1.bf16.msra.mxu0 %v17938_v11  ;;  %v18107_v10 = vcombine.high %v1063_v61, %v1075_v63  ;;  %v1099_v11 = vld [vmem:[#allocation5 + $0x1f60] sm:$0xff]  ;;  %v1225_v61 = vld [vmem:[#allocation5 + $0x2350] sm:$0xff] }
 0x267   :  { %7465 = vmatprep.subr.bf16.mxu1 %v17951_v13  ;;  %8203 = vmatprep.subr.bf16.mxu0 %v17963_v17  ;;  %v18094_v13 = vcombine.low %v1057_v59, %v1069_v60  ;;  %v1117_v17 = vld [vmem:[#allocation5 + $0x1ff0] sm:$0xff]  ;;  %v18130_v22 = vcombine.low %v1087_v9, %v1099_v11  ;;  %v1231_v63 = vld [vmem:[#allocation5 + $0x2380] sm:$0xff] }
 0x268   :  { %v18143_v24 = vcombine.high %v1105_v16, %v1117_v17 }
 0x26a   :  { %7466 = vmatpush1.bf16.msra.mxu1 %v17950_v19  ;;  %8204 = vmatpush1.bf16.msra.mxu0 %v17962_v20  ;;  %v18131_v19 = vcombine.high %v1087_v9, %v1099_v11  ;;  %v1123_v20 = vld [vmem:[#allocation5 + $0x2020] sm:$0xff]  ;;  %v98_v9 = vld [vmem:[#allocation5 + $0x18] sm:$0xff]  ;;  %v105_v11 = vld [vmem:[#allocation5 + $0x50] sm:$0xff] }
 0x26b   :  { %7467 = vmatprep.subr.bf16.mxu1 %v17975_v21  ;;  %8205 = vmatprep.subr.bf16.mxu0 %v17987_v27  ;;  %v18118_v21 = vcombine.low %v1081_v6, %v1093_v8  ;;  %v1141_v27 = vld [vmem:[#allocation5 + $0x20b0] sm:$0xff]  ;;  %v18154_v32 = vcombine.low %v1111_v18, %v1123_v20 }
 0x26c   :  { %v18167_v33 = vcombine.high %v1129_v26, %v1141_v27 }
 0x26e   :  { %7468 = vmatpush1.bf16.msra.mxu1 %v17974_v29  ;;  %8206 = vmatpush1.bf16.msra.mxu0 %v17986_v30  ;;  %v18155_v29 = vcombine.high %v1111_v18, %v1123_v20  ;;  %v1147_v30 = vld [vmem:[#allocation5 + $0x20e0] sm:$0xff]  ;;  %v122_v18 = vld [vmem:[#allocation5 + $0xd8] sm:$0xff]  ;;  %v129_v20 = vld [vmem:[#allocation5 + $0x110] sm:$0xff] }
 0x26f   :  { %7469 = vmatprep.subr.bf16.mxu1 %v17999_v31  ;;  %8207 = vmatprep.subr.bf16.mxu0 %v18011_v36  ;;  %v18142_v31 = vcombine.low %v1105_v16, %v1117_v17  ;;  %v1165_v36 = vld [vmem:[#allocation5 + $0x2170] sm:$0xff]  ;;  %v18178_v42 = vcombine.low %v1135_v28, %v1147_v30 }
 0x270   :  { %v18191_v43 = vcombine.high %v1153_v35, %v1165_v36 }
 0x272   :  { %7470 = vmatpush1.bf16.msra.mxu1 %v17998_v39  ;;  %8208 = vmatpush1.bf16.msra.mxu0 %v18010_v40  ;;  %v18179_v39 = vcombine.high %v1135_v28, %v1147_v30  ;;  %v1171_v40 = vld [vmem:[#allocation5 + $0x21a0] sm:$0xff]  ;;  %v146_v28 = vld [vmem:[#allocation5 + $0x198] sm:$0xff]  ;;  %v153_v30 = vld [vmem:[#allocation5 + $0x1d0] sm:$0xff] }
 0x273   :  { %7471 = vmatprep.subr.bf16.mxu1 %v18023_v41  ;;  %8209 = vmatprep.subr.bf16.mxu0 %v18035_v45  ;;  %v18166_v41 = vcombine.low %v1129_v26, %v1141_v27  ;;  %v1189_v45 = vld [vmem:[#allocation5 + $0x2230] sm:$0xff]  ;;  %v18202_v50 = vcombine.low %v1159_v37, %v1171_v40 }
 0x274   :  { %v18215_v51 = vcombine.high %v1177_v44, %v1189_v45 }
 0x276   :  { %7472 = vmatpush1.bf16.msra.mxu1 %v18022_v47  ;;  %8210 = vmatpush1.bf16.msra.mxu0 %v18034_v48  ;;  %v18203_v47 = vcombine.high %v1159_v37, %v1171_v40  ;;  %v1195_v48 = vld [vmem:[#allocation5 + $0x2260] sm:$0xff]  ;;  %v170_v37 = vld [vmem:[#allocation5 + $0x258] sm:$0xff]  ;;  %v177_v40 = vld [vmem:[#allocation5 + $0x290] sm:$0xff] }
 0x277   :  { %7473 = vmatprep.subr.bf16.mxu1 %v18047_v49  ;;  %8211 = vmatprep.subr.bf16.mxu0 %v18059_v53  ;;  %v18190_v49 = vcombine.low %v1153_v35, %v1165_v36  ;;  %v1213_v53 = vld [vmem:[#allocation5 + $0x22f0] sm:$0xff]  ;;  %v18226_v59 = vcombine.low %v1183_v46, %v1195_v48 }
 0x278   :  { %v18239_v60 = vcombine.high %v1201_v52, %v1213_v53 }
 0x27a   :  { %7474 = vmatpush1.bf16.msra.mxu1 %v18046_v55  ;;  %8212 = vmatpush1.bf16.msra.mxu0 %v18058_v56  ;;  %v18227_v55 = vcombine.high %v1183_v46, %v1195_v48  ;;  %v1219_v56 = vld [vmem:[#allocation5 + $0x2320] sm:$0xff]  ;;  %v194_v46 = vld [vmem:[#allocation5 + $0x318] sm:$0xff]  ;;  %v201_v48 = vld [vmem:[#allocation5 + $0x350] sm:$0xff] }
 0x27b   :  { %7475 = vmatprep.subr.bf16.mxu1 %v18071_v58  ;;  %8213 = vmatprep.subr.bf16.mxu0 %v18083_v62  ;;  %v18214_v58 = vcombine.low %v1177_v44, %v1189_v45  ;;  %v1237_v62 = vld [vmem:[#allocation5 + $0x23b0] sm:$0xff]  ;;  %v18250_v6 = vcombine.low %v1207_v54, %v1219_v56 }
 0x27c   :  { %v18263_v8 = vcombine.high %v1225_v61, %v1237_v62 }
 0x27e   :  { %7476 = vmatpush1.bf16.msra.mxu1 %v18070_v1  ;;  %8214 = vmatpush1.bf16.msra.mxu0 %v18082_v2  ;;  %v18251_v1 = vcombine.high %v1207_v54, %v1219_v56  ;;  %v1243_v2 = vld [vmem:[#allocation5 + $0x23e0] sm:$0xff]  ;;  %v218_v54 = vld [vmem:[#allocation5 + $0x3d8] sm:$0xff]  ;;  %v225_v56 = vld [vmem:[#allocation5 + $0x410] sm:$0xff] }
 0x27f   :  { %7477 = vmatprep.subr.bf16.mxu1 %v18095_v5  ;;  %8215 = vmatprep.subr.bf16.mxu0 %v18107_v10  ;;  %v18238_v5 = vcombine.low %v1201_v52, %v1213_v53  ;;  %v110_v10 = vld [vmem:[#allocation5 + $0x78] sm:$0xff]  ;;  %v18274_v16 = vcombine.low %v1231_v63, %v1243_v2 }
 0x280   :  { %v17137_v17 = vcombine.high %v98_v9, %v110_v10 }
 0x282   :  { %7478 = vmatpush1.bf16.msra.mxu1 %v18094_v13  ;;  %8216 = vmatpush1.bf16.msra.mxu0 %v18106_v14  ;;  %v18275_v13 = vcombine.high %v1231_v63, %v1243_v2  ;;  %v117_v14 = vld [vmem:[#allocation5 + $0xb0] sm:$0xff]  ;;  %v242_v63 = vld [vmem:[#allocation5 + $0x498] sm:$0xff] }
 0x283   :  { %7479 = vmatprep.subr.bf16.mxu1 %v18119_v15  ;;  %8217 = vmatprep.subr.bf16.mxu0 %v18131_v19  ;;  %v18262_v15 = vcombine.low %v1225_v61, %v1237_v62  ;;  %v134_v19 = vld [vmem:[#allocation5 + $0x138] sm:$0xff]  ;;  %v17150_v26 = vcombine.low %v105_v11, %v117_v14  ;;  %v249_v2 = vld [vmem:[#allocation5 + $0x4d0] sm:$0xff] }
 0x284   :  { %v17161_v27 = vcombine.high %v122_v18, %v134_v19 }
 0x286   :  { %7480 = vmatpush1.bf16.msra.mxu1 %v18118_v21  ;;  %8218 = vmatpush1.bf16.msra.mxu0 %v18130_v22  ;;  %v17151_v21 = vcombine.high %v105_v11, %v117_v14  ;;  %v141_v22 = vld [vmem:[#allocation5 + $0x170] sm:$0xff]  ;;  %v266_v11 = vld [vmem:[#allocation5 + $0x558] sm:$0xff] }
 0x287   :  { %7481 = vmatprep.subr.bf16.mxu1 %v18143_v24  ;;  %8219 = vmatprep.subr.bf16.mxu0 %v18155_v29  ;;  %v17136_v24 = vcombine.low %v98_v9, %v110_v10  ;;  %v158_v29 = vld [vmem:[#allocation5 + $0x1f8] sm:$0xff]  ;;  %v17174_v35 = vcombine.low %v129_v20, %v141_v22  ;;  %v273_v14 = vld [vmem:[#allocation5 + $0x590] sm:$0xff] }
 0x288   :  { %v17185_v36 = vcombine.high %v146_v28, %v158_v29 }
 0x28a   :  { %7482 = vmatpush1.bf16.msra.mxu1 %v18142_v31  ;;  %8220 = vmatpush1.bf16.msra.mxu0 %v18154_v32  ;;  %v17175_v31 = vcombine.high %v129_v20, %v141_v22  ;;  %v165_v32 = vld [vmem:[#allocation5 + $0x230] sm:$0xff] }
 0x28b   :  { %7483 = vmatprep.subr.bf16.mxu1 %v18167_v33  ;;  %8221 = vmatprep.subr.bf16.mxu0 %v18179_v39  ;;  %v17160_v33 = vcombine.low %v122_v18, %v134_v19  ;;  %v182_v39 = vld [vmem:[#allocation5 + $0x2b8] sm:$0xff]  ;;  %v17198_v44 = vcombine.low %v153_v30, %v165_v32 }
 0x28c   :  { %v17209_v45 = vcombine.high %v170_v37, %v182_v39 }
 0x28e   :  { %7484 = vmatpush1.bf16.msra.mxu1 %v18166_v41  ;;  %8222 = vmatpush1.bf16.msra.mxu0 %v18178_v42  ;;  %v17199_v41 = vcombine.high %v153_v30, %v165_v32  ;;  %v189_v42 = vld [vmem:[#allocation5 + $0x2f0] sm:$0xff] }
 0x28f   :  { %7485 = vmatprep.subr.bf16.mxu1 %v18191_v43  ;;  %8223 = vmatprep.subr.bf16.mxu0 %v18203_v47  ;;  %v17184_v43 = vcombine.low %v146_v28, %v158_v29  ;;  %v206_v47 = vld [vmem:[#allocation5 + $0x378] sm:$0xff]  ;;  %v17222_v52 = vcombine.low %v177_v40, %v189_v42  ;;  %v297_v30 = vld [vmem:[#allocation5 + $0x650] sm:$0xff] }
 0x290   :  { %v17233_v53 = vcombine.high %v194_v46, %v206_v47  ;;  %v290_v28 = vld [vmem:[#allocation5 + $0x618] sm:$0xff] }
 0x291   :  { %v302_v29 = vld [vmem:[#allocation5 + $0x678] sm:$0xff] }
 0x292   :  { %7486 = vmatpush1.bf16.msra.mxu1 %v18190_v49  ;;  %8224 = vmatpush1.bf16.msra.mxu0 %v18202_v50  ;;  %v17223_v49 = vcombine.high %v177_v40, %v189_v42  ;;  %v213_v50 = vld [vmem:[#allocation5 + $0x3b0] sm:$0xff]  ;;  %v314_v40 = vld [vmem:[#allocation5 + $0x6d8] sm:$0xff] }
 0x293   :  { %7487 = vmatprep.subr.bf16.mxu1 %v18215_v51  ;;  %8225 = vmatprep.subr.bf16.mxu0 %v18227_v55  ;;  %v17208_v51 = vcombine.low %v170_v37, %v182_v39  ;;  %v230_v55 = vld [vmem:[#allocation5 + $0x438] sm:$0xff]  ;;  %v17246_v61 = vcombine.low %v201_v48, %v213_v50  ;;  %v17329_v39 = vcombine.high %v290_v28, %v302_v29  ;;  %v321_v42 = vld [vmem:[#allocation5 + $0x710] sm:$0xff] }
 0x294   :  { %v17257_v62 = vcombine.high %v218_v54, %v230_v55 }
 0x296   :  { %7488 = vmatpush1.bf16.msra.mxu1 %v18214_v58  ;;  %8226 = vmatpush1.bf16.msra.mxu0 %v18226_v59  ;;  %v17247_v58 = vcombine.high %v201_v48, %v213_v50  ;;  %v237_v59 = vld [vmem:[#allocation5 + $0x470] sm:$0xff]  ;;  %v338_v48 = vld [vmem:[#allocation5 + $0x798] sm:$0xff] }
 0x297   :  { %7489 = vmatprep.subr.bf16.mxu1 %v18239_v60  ;;  %8227 = vmatprep.subr.bf16.mxu0 %v18251_v1  ;;  %v17232_v60 = vcombine.low %v194_v46, %v206_v47  ;;  %v254_v1 = vld [vmem:[#allocation5 + $0x4f8] sm:$0xff]  ;;  %v17270_v9 = vcombine.low %v225_v56, %v237_v59  ;;  %v345_v50 = vld [vmem:[#allocation5 + $0x7d0] sm:$0xff] }
 0x298   :  { %v17281_v10 = vcombine.high %v242_v63, %v254_v1 }
 0x29a   :  { %7490 = vmatpush1.bf16.msra.mxu1 %v18238_v5  ;;  %8228 = vmatpush1.bf16.msra.mxu0 %v18250_v6  ;;  %v17271_v5 = vcombine.high %v225_v56, %v237_v59  ;;  %v261_v6 = vld [vmem:[#allocation5 + $0x530] sm:$0xff]  ;;  %v362_v56 = vld [vmem:[#allocation5 + $0x858] sm:$0xff] }
 0x29b   :  { %7491 = vmatprep.subr.bf16.mxu1 %v18263_v8  ;;  %8229 = vmatprep.subr.bf16.mxu0 %v18275_v13  ;;  %v17256_v8 = vcombine.low %v218_v54, %v230_v55  ;;  %v278_v13 = vld [vmem:[#allocation5 + $0x5b8] sm:$0xff]  ;;  %v369_v59 = vld [vmem:[#allocation5 + $0x890] sm:$0xff] }
 0x29e   :  { %7492 = vmatpush1.bf16.msra.mxu1 %v18262_v15  ;;  %8230 = vmatpush1.bf16.msra.mxu0 %v18274_v16  ;;  %v17295_v16 = vcombine.high %v249_v2, %v261_v6 }
 0x29f   :  { %7502 = vmatprep.subr.bf16.mxu1 %v17137_v17  ;;  %8363 = vmatprep.subr.bf16.mxu0 %v17151_v21  ;;  %v285_v17 = vld [vmem:[#allocation5 + $0x5f0] sm:$0xff]  ;;  %v17280_v21 = vcombine.low %v242_v63, %v254_v1 }
 0x2a0   :  { %v17319_v32 = vcombine.high %v273_v14, %v285_v17  ;;  %v17318_v37 = vcombine.low %v273_v14, %v285_v17  ;;  %v410_v14 = vld [vmem:[#allocation5 + $0x9d8] sm:$0xff]  ;;  %v417_v17 = vld [vmem:[#allocation5 + $0xa10] sm:$0xff] }
 0x2a1   :  { %7494 = vmatmul.mubr.bf16.vlgmr.msra.gmra.mrb[8].mxu1 %v21754_v38  ;;  %8232 = vmatmul.mubr.bf16.vlgmr.msra.gmra.mrb[8].mxu0 %v21754_v38 }
 0x2a2   :  { %7503 = vmatpush1.bf16.msra.mxu1 %v17136_v24  ;;  %8364 = vmatpush1.bf16.msra.mxu0 %v17150_v26  ;;  %v17294_v26 = vcombine.low %v249_v2, %v261_v6  ;;  %v386_v2 = vld [vmem:[#allocation5 + $0x918] sm:$0xff]  ;;  %v393_v6 = vld [vmem:[#allocation5 + $0x950] sm:$0xff] }
 0x2a3   :  { %7504 = vmatprep.subr.bf16.mxu1 %v17161_v27  ;;  %8365 = vmatprep.subr.bf16.mxu0 %v17175_v31  ;;  %v17305_v27 = vcombine.high %v266_v11, %v278_v13 }
 0x2a4   :  { %7534 = vmatprep.mubr.bf16.mxu1 %v21734_v57  ;;  %8395 = vmatprep.mubr.bf16.mxu0 %v21734_v57 }
 0x2a6   :  { %7505 = vmatpush1.bf16.msra.mxu1 %v17160_v33  ;;  %8366 = vmatpush1.bf16.msra.mxu0 %v17174_v35  ;;  %v309_v33 = vld [vmem:[#allocation5 + $0x6b0] sm:$0xff] }
 0x2a7   :  { %7506 = vmatprep.subr.bf16.mxu1 %v17185_v36  ;;  %8367 = vmatprep.subr.bf16.mxu0 %v17199_v41  ;;  %v17304_v36 = vcombine.low %v266_v11, %v278_v13  ;;  %v326_v41 = vld [vmem:[#allocation5 + $0x738] sm:$0xff]  ;;  %v17342_v46 = vcombine.low %v297_v30, %v309_v33 }
 0x2a8   :  { %v17353_v47 = vcombine.high %v314_v40, %v326_v41 }
 0x2aa   :  { %7507 = vmatpush1.bf16.msra.mxu1 %v17184_v43  ;;  %8368 = vmatpush1.bf16.msra.mxu0 %v17198_v44  ;;  %v17343_v43 = vcombine.high %v297_v30, %v309_v33  ;;  %v333_v44 = vld [vmem:[#allocation5 + $0x770] sm:$0xff] }
 0x2ab   :  { %7508 = vmatprep.subr.bf16.mxu1 %v17209_v45  ;;  %8369 = vmatprep.subr.bf16.mxu0 %v17223_v49  ;;  %v17328_v45 = vcombine.low %v290_v28, %v302_v29  ;;  %v350_v49 = vld [vmem:[#allocation5 + $0x7f8] sm:$0xff]  ;;  %v17366_v54 = vcombine.low %v321_v42, %v333_v44  ;;  %v441_v30 = vld [vmem:[#allocation5 + $0xad0] sm:$0xff] }
 0x2ac   :  { %v17377_v55 = vcombine.high %v338_v48, %v350_v49  ;;  %v434_v28 = vld [vmem:[#allocation5 + $0xa98] sm:$0xff] }
 0x2ad   :  { %v446_v29 = vld [vmem:[#allocation5 + $0xaf8] sm:$0xff] }
 0x2ae   :  { %7509 = vmatpush1.bf16.msra.mxu1 %v17208_v51  ;;  %8370 = vmatpush1.bf16.msra.mxu0 %v17222_v52  ;;  %v17367_v51 = vcombine.high %v321_v42, %v333_v44  ;;  %v357_v52 = vld [vmem:[#allocation5 + $0x830] sm:$0xff] }
 0x2af   :  { %7510 = vmatprep.subr.bf16.mxu1 %v17233_v53  ;;  %8371 = vmatprep.subr.bf16.mxu0 %v17247_v58  ;;  %v17352_v53 = vcombine.low %v314_v40, %v326_v41  ;;  %v374_v58 = vld [vmem:[#allocation5 + $0x8b8] sm:$0xff]  ;;  %v17390_v63 = vcombine.low %v345_v50, %v357_v52  ;;  %v465_v40 = vld [vmem:[#allocation5 + $0xb90] sm:$0xff] }
 0x2b0   :  { %v17401_v1 = vcombine.high %v362_v56, %v374_v58  ;;  %v477_v42 = vld [vmem:[#allocation5 + $0xbf0] sm:$0xff] }
 0x2b2   :  { %7511 = vmatpush1.bf16.msra.mxu1 %v17232_v60  ;;  %8372 = vmatpush1.bf16.msra.mxu0 %v17246_v61  ;;  %v17391_v60 = vcombine.high %v345_v50, %v357_v52  ;;  %v381_v61 = vld [vmem:[#allocation5 + $0x8f0] sm:$0xff]  ;;  %v17510_v52 = vcombine.low %v465_v40, %v477_v42 }
 0x2b3   :  { %7512 = vmatprep.subr.bf16.mxu1 %v17257_v62  ;;  %8373 = vmatprep.subr.bf16.mxu0 %v17271_v5  ;;  %v17376_v62 = vcombine.low %v338_v48, %v350_v49  ;;  %v398_v5 = vld [vmem:[#allocation5 + $0x978] sm:$0xff]  ;;  %v17414_v11 = vcombine.low %v369_v59, %v381_v61  ;;  %v489_v48 = vld [vmem:[#allocation5 + $0xc50] sm:$0xff]  ;;  %v17511_v49 = vcombine.high %v465_v40, %v477_v42 }
 0x2b4   :  { %v21792_v15 = vpop.f32.mrb[4].mxu1  ;;  %v21796_v19 = vpop.f32.mrb[4].mxu0  ;;  %v17425_v13 = vcombine.high %v386_v2, %v398_v5  ;;  %v501_v50 = vld [vmem:[#allocation5 + $0xcb0] sm:$0xff] }
 0x2b5   :  { %v21794_v18 = vpop.f32.mrb[5].mxu1  ;;  %v21798_v22 = vpop.f32.mrb[5].mxu0  ;;  %v621_v40 = vld [vmem:[#allocation5 + $0x1070] sm:$0xff] }
 0x2b6   :  { %v7376_v20 = vpop.f32.mrb[6].mxu1  ;;  %7513 = vmatpush1.bf16.msra.mxu1 %v17256_v8  ;;  %8374 = vmatpush1.bf16.msra.mxu0 %v17270_v9  ;;  %v7991_v31 = vpop.f32.mrb[6].mxu0  ;;  %v17415_v8 = vcombine.high %v369_v59, %v381_v61  ;;  %v405_v9 = vld [vmem:[#allocation5 + $0x9b0] sm:$0xff]  ;;  %v17534_v61 = vcombine.low %v489_v48, %v501_v50 }
 0x2b7   :  { %v7377_v24 = vpop.f32.mrb[7].mxu1  ;;  %7514 = vmatprep.subr.bf16.mxu1 %v17281_v10  ;;  %8375 = vmatprep.subr.bf16.mxu0 %v17295_v16  ;;  %v7992_v35 = vpop.f32.mrb[7].mxu0  ;;  %v17400_v10 = vcombine.low %v362_v56, %v374_v58  ;;  %v422_v16 = vld [vmem:[#allocation5 + $0xa38] sm:$0xff]  ;;  %v17439_v20 = vcombine.high %v393_v6, %v405_v9  ;;  %v513_v56 = vld [vmem:[#allocation5 + $0xd10] sm:$0xff]  ;;  %v17535_v58 = vcombine.high %v489_v48, %v501_v50 }
 0x2b8   :  { %v17424_v24 = vcombine.low %v386_v2, %v398_v5  ;;  %v17448_v33 = vcombine.low %v410_v14, %v422_v16  ;;  %v525_v59 = vld [vmem:[#allocation5 + $0xd70] sm:$0xff] }
 0x2b9   :  { %v17559_v2 = vcombine.high %v513_v56, %v525_v59  ;;  %v537_v5 = vld [vmem:[#allocation5 + $0xdd0] sm:$0xff] }
 0x2ba   :  { %7515 = vmatpush1.bf16.msra.mxu1 %v17280_v21  ;;  %8376 = vmatpush1.bf16.msra.mxu0 %v17294_v26  ;;  %v429_v21 = vld [vmem:[#allocation5 + $0xa70] sm:$0xff]  ;;  %v17438_v26 = vcombine.low %v393_v6, %v405_v9  ;;  %v17558_v9 = vcombine.low %v513_v56, %v525_v59 }
 0x2bb   :  { %7516 = vmatprep.subr.bf16.mxu1 %v17305_v27  ;;  %8377 = vmatprep.subr.bf16.mxu0 %v17319_v32  ;;  %v17449_v27 = vcombine.high %v410_v14, %v422_v16  ;;  %v17463_v31 = vcombine.high %v417_v17, %v429_v21  ;;  %v453_v32 = vld [vmem:[#allocation5 + $0xb30] sm:$0xff]  ;;  %v17462_v35 = vcombine.low %v417_v17, %v429_v21  ;;  %v566_v14 = vld [vmem:[#allocation5 + $0xeb8] sm:$0xff] }
 0x2bc   :  { %v17487_v41 = vcombine.high %v441_v30, %v453_v32  ;;  %v17486_v44 = vcombine.low %v441_v30, %v453_v32  ;;  %v549_v6 = vld [vmem:[#allocation5 + $0xe30] sm:$0xff] }
 0x2bd   :  { %v561_v16 = vld [vmem:[#allocation5 + $0xe90] sm:$0xff]  ;;  %v17582_v21 = vcombine.low %v537_v5, %v549_v6 }
 0x2be   :  { %7517 = vmatpush1.bf16.msra.mxu1 %v17304_v36  ;;  %8378 = vmatpush1.bf16.msra.mxu0 %v17318_v37  ;;  %v17473_v36 = vcombine.high %v434_v28, %v446_v29  ;;  %v458_v37 = vld [vmem:[#allocation5 + $0xb58] sm:$0xff]  ;;  %v573_v17 = vld [vmem:[#allocation5 + $0xef0] sm:$0xff] }
 0x2bf   :  { %7518 = vmatprep.subr.bf16.mxu1 %v17329_v39  ;;  %8379 = vmatprep.subr.bf16.mxu0 %v17343_v43  ;;  %v470_v39 = vld [vmem:[#allocation5 + $0xbb8] sm:$0xff]  ;;  %v17472_v43 = vcombine.low %v434_v28, %v446_v29  ;;  %v585_v29 = vld [vmem:[#allocation5 + $0xf50] sm:$0xff]  ;;  %v17606_v32 = vcombine.low %v561_v16, %v573_v17 }
 0x2c0   :  { %v590_v28 = vld [vmem:[#allocation5 + $0xf78] sm:$0xff]  ;;  %v597_v30 = vld [vmem:[#allocation5 + $0xfb0] sm:$0xff] }
 0x2c1   :  { %v17630_v42 = vcombine.low %v585_v29, %v597_v30  ;;  %v645_v48 = vld [vmem:[#allocation5 + $0x1130] sm:$0xff] }
 0x2c2   :  { %7519 = vmatpush1.bf16.msra.mxu1 %v17328_v45  ;;  %8380 = vmatpush1.bf16.msra.mxu0 %v17342_v46  ;;  %v17497_v45 = vcombine.high %v458_v37, %v470_v39  ;;  %v482_v46 = vld [vmem:[#allocation5 + $0xc18] sm:$0xff]  ;;  %v669_v56 = vld [vmem:[#allocation5 + $0x11f0] sm:$0xff] }
 0x2c3   :  { %7520 = vmatprep.subr.bf16.mxu1 %v17353_v47  ;;  %8381 = vmatprep.subr.bf16.mxu0 %v17367_v51  ;;  %v494_v47 = vld [vmem:[#allocation5 + $0xc78] sm:$0xff]  ;;  %v17496_v51 = vcombine.low %v458_v37, %v470_v39  ;;  %v609_v39 = vld [vmem:[#allocation5 + $0x1010] sm:$0xff] }
 0x2c4   :  { %v614_v37 = vld [vmem:[#allocation5 + $0x1038] sm:$0xff]  ;;  %v17654_v50 = vcombine.low %v609_v39, %v621_v40 }
 0x2c6   :  { %7521 = vmatpush1.bf16.msra.mxu1 %v17352_v53  ;;  %8382 = vmatpush1.bf16.msra.mxu0 %v17366_v54  ;;  %v17521_v53 = vcombine.high %v482_v46, %v494_v47  ;;  %v506_v54 = vld [vmem:[#allocation5 + $0xcd8] sm:$0xff] }
 0x2c7   :  { %7522 = vmatprep.subr.bf16.mxu1 %v17377_v55  ;;  %8383 = vmatprep.subr.bf16.mxu0 %v17391_v60  ;;  %v518_v55 = vld [vmem:[#allocation5 + $0xd38] sm:$0xff]  ;;  %v17520_v60 = vcombine.low %v482_v46, %v494_v47  ;;  %v633_v47 = vld [vmem:[#allocation5 + $0x10d0] sm:$0xff] }
 0x2c8   :  { %v638_v46 = vld [vmem:[#allocation5 + $0x10f8] sm:$0xff]  ;;  %v17678_v59 = vcombine.low %v633_v47, %v645_v48 }
 0x2ca   :  { %7523 = vmatpush1.bf16.msra.mxu1 %v17376_v62  ;;  %8384 = vmatpush1.bf16.msra.mxu0 %v17390_v63  ;;  %v17545_v62 = vcombine.high %v506_v54, %v518_v55  ;;  %v530_v63 = vld [vmem:[#allocation5 + $0xd98] sm:$0xff] }
 0x2cb   :  { %7524 = vmatprep.subr.bf16.mxu1 %v17401_v1  ;;  %8385 = vmatprep.subr.bf16.mxu0 %v17415_v8  ;;  %v542_v1 = vld [vmem:[#allocation5 + $0xdf8] sm:$0xff]  ;;  %v17544_v8 = vcombine.low %v506_v54, %v518_v55  ;;  %v657_v55 = vld [vmem:[#allocation5 + $0x1190] sm:$0xff] }
 0x2cc   :  { %v662_v54 = vld [vmem:[#allocation5 + $0x11b8] sm:$0xff] }
 0x2ce   :  { %7525 = vmatpush1.bf16.msra.mxu1 %v17400_v10  ;;  %8386 = vmatpush1.bf16.msra.mxu0 %v17414_v11  ;;  %v17569_v10 = vcombine.high %v530_v63, %v542_v1  ;;  %v17583_v11 = vcombine.high %v537_v5, %v549_v6  ;;  %v17702_v6 = vcombine.low %v657_v55, %v669_v56 }
 0x2cf   :  { %7526 = vmatprep.subr.bf16.mxu1 %v17425_v13  ;;  %8387 = vmatprep.subr.bf16.mxu0 %v17439_v20  ;;  %v554_v13 = vld [vmem:[#allocation5 + $0xe58] sm:$0xff]  ;;  %v17568_v20 = vcombine.low %v530_v63, %v542_v1  ;;  %v681_v1 = vld [vmem:[#allocation5 + $0x1250] sm:$0xff] }
 0x2d0   :  { %v686_v63 = vld [vmem:[#allocation5 + $0x1278] sm:$0xff] }
 0x2d2   :  { %7527 = vmatpush1.bf16.msra.mxu1 %v17424_v24  ;;  %8388 = vmatpush1.bf16.msra.mxu0 %v17438_v26  ;;  %v17593_v24 = vcombine.high %v554_v13, %v566_v14  ;;  %v17607_v26 = vcombine.high %v561_v16, %v573_v17 }
 0x2d3   :  { %7528 = vmatprep.subr.bf16.mxu1 %v17449_v27  ;;  %8389 = vmatprep.subr.bf16.mxu0 %v17463_v31  ;;  %v578_v27 = vld [vmem:[#allocation5 + $0xf18] sm:$0xff]  ;;  %v17592_v31 = vcombine.low %v554_v13, %v566_v14  ;;  %v705_v13 = vld [vmem:[#allocation5 + $0x1310] sm:$0xff] }
 0x2d4   :  { %v717_v14 = vld [vmem:[#allocation5 + $0x1370] sm:$0xff] }
 0x2d6   :  { %7529 = vmatpush1.bf16.msra.mxu1 %v17448_v33  ;;  %8390 = vmatpush1.bf16.msra.mxu0 %v17462_v35  ;;  %v17617_v33 = vcombine.high %v578_v27, %v590_v28  ;;  %v17631_v35 = vcombine.high %v585_v29, %v597_v30  ;;  %v17750_v30 = vcombine.low %v705_v13, %v717_v14 }
 0x2d7   :  { %7530 = vmatprep.subr.bf16.mxu1 %v17473_v36  ;;  %8391 = vmatprep.subr.bf16.mxu0 %v17487_v41  ;;  %v602_v36 = vld [vmem:[#allocation5 + $0xfd8] sm:$0xff]  ;;  %v17616_v41 = vcombine.low %v578_v27, %v590_v28  ;;  %v729_v27 = vld [vmem:[#allocation5 + $0x13d0] sm:$0xff] }
 0x2d8   :  { %v741_v28 = vld [vmem:[#allocation5 + $0x1430] sm:$0xff] }
 0x2da   :  { %7531 = vmatpush1.bf16.msra.mxu1 %v17472_v43  ;;  %8392 = vmatpush1.bf16.msra.mxu0 %v17486_v44  ;;  %v17641_v43 = vcombine.high %v602_v36, %v614_v37  ;;  %v17655_v44 = vcombine.high %v609_v39, %v621_v40  ;;  %v17774_v40 = vcombine.low %v729_v27, %v741_v28 }
 0x2db   :  { %7532 = vmatprep.subr.bf16.mxu1 %v17497_v45  ;;  %8393 = vmatprep.subr.bf16.mxu0 %v17511_v49  ;;  %v626_v45 = vld [vmem:[#allocation5 + $0x1098] sm:$0xff]  ;;  %v17640_v49 = vcombine.low %v602_v36, %v614_v37  ;;  %v753_v36 = vld [vmem:[#allocation5 + $0x1490] sm:$0xff] }
 0x2dc   :  { %v765_v37 = vld [vmem:[#allocation5 + $0x14f0] sm:$0xff] }
 0x2de   :  { %7533 = vmatpush1.bf16.msra.mxu1 %v17496_v51  ;;  %8394 = vmatpush1.bf16.msra.mxu0 %v17510_v52  ;;  %v17665_v51 = vcombine.high %v626_v45, %v638_v46  ;;  %v17679_v52 = vcombine.high %v633_v47, %v645_v48  ;;  %v17798_v48 = vcombine.low %v753_v36, %v765_v37 }
 0x2df   :  { %7543 = vmatprep.subr.bf16.mxu1 %v17521_v53  ;;  %8404 = vmatprep.subr.bf16.mxu0 %v17535_v58  ;;  %v650_v53 = vld [vmem:[#allocation5 + $0x1158] sm:$0xff]  ;;  %v17664_v58 = vcombine.low %v626_v45, %v638_v46  ;;  %v777_v45 = vld [vmem:[#allocation5 + $0x1550] sm:$0xff] }
 0x2e0   :  { %v17688_v5 = vcombine.low %v650_v53, %v662_v54  ;;  %v789_v46 = vld [vmem:[#allocation5 + $0x15b0] sm:$0xff] }
 0x2e1   :  { %7535 = vmatmul.mubr.bf16.vlgmr.msra.gmra.mrb[12].mxu1 %v21738_v12  ;;  %8396 = vmatmul.mubr.bf16.vlgmr.msra.gmra.mrb[12].mxu0 %v21738_v12 }
 0x2e2   :  { %7544 = vmatpush1.bf16.msra.mxu1 %v17520_v60  ;;  %8405 = vmatpush1.bf16.msra.mxu0 %v17534_v61  ;;  %v17689_v60 = vcombine.high %v650_v53, %v662_v54  ;;  %v17703_v61 = vcombine.high %v657_v55, %v669_v56  ;;  %v801_v53 = vld [vmem:[#allocation5 + $0x1610] sm:$0xff]  ;;  %v17822_v56 = vcombine.low %v777_v45, %v789_v46 }
 0x2e3   :  { %7545 = vmatprep.subr.bf16.mxu1 %v17545_v62  ;;  %8406 = vmatprep.subr.bf16.mxu0 %v17559_v2  ;;  %v674_v62 = vld [vmem:[#allocation5 + $0x1218] sm:$0xff]  ;;  %v693_v2 = vld [vmem:[#allocation5 + $0x12b0] sm:$0xff] }
 0x2e4   :  { %7575 = vmatprep.mubr.bf16.mxu1 %v21740_v23  ;;  %8436 = vmatprep.mubr.bf16.mxu0 %v21740_v23  ;;  %v17712_v16 = vcombine.low %v674_v62, %v686_v63  ;;  %v17726_v17 = vcombine.low %v681_v1, %v693_v2  ;;  %v813_v54 = vld [vmem:[#allocation5 + $0x1670] sm:$0xff] }
 0x2e6   :  { %7546 = vmatpush1.bf16.msra.mxu1 %v17544_v8  ;;  %8407 = vmatpush1.bf16.msra.mxu0 %v17558_v9  ;;  %v17713_v8 = vcombine.high %v674_v62, %v686_v63  ;;  %v17727_v9 = vcombine.high %v681_v1, %v693_v2  ;;  %v825_v62 = vld [vmem:[#allocation5 + $0x16d0] sm:$0xff]  ;;  %v17846_v2 = vcombine.low %v801_v53, %v813_v54 }
 0x2e7   :  { %7547 = vmatprep.subr.bf16.mxu1 %v17569_v10  ;;  %8408 = vmatprep.subr.bf16.mxu0 %v17583_v11  ;;  %v698_v10 = vld [vmem:[#allocation5 + $0x12d8] sm:$0xff]  ;;  %v837_v63 = vld [vmem:[#allocation5 + $0x1730] sm:$0xff] }
 0x2e8   :  { %v710_v11 = vld [vmem:[#allocation5 + $0x1338] sm:$0xff] }
 0x2e9   :  { %v17736_v29 = vcombine.low %v698_v10, %v710_v11 }
 0x2ea   :  { %7548 = vmatpush1.bf16.msra.mxu1 %v17568_v20  ;;  %8409 = vmatpush1.bf16.msra.mxu0 %v17582_v21  ;;  %v17737_v20 = vcombine.high %v698_v10, %v710_v11  ;;  %v17751_v21 = vcombine.high %v705_v13, %v717_v14  ;;  %v849_v10 = vld [vmem:[#allocation5 + $0x1790] sm:$0xff]  ;;  %v17870_v14 = vcombine.low %v825_v62, %v837_v63 }
 0x2eb   :  { %7549 = vmatprep.subr.bf16.mxu1 %v17593_v24  ;;  %8410 = vmatprep.subr.bf16.mxu0 %v17607_v26  ;;  %v722_v24 = vld [vmem:[#allocation5 + $0x1398] sm:$0xff]  ;;  %v861_v11 = vld [vmem:[#allocation5 + $0x17f0] sm:$0xff] }
 0x2ec   :  { %v734_v26 = vld [vmem:[#allocation5 + $0x13f8] sm:$0xff] }
 0x2ed   :  { %v17760_v39 = vcombine.low %v722_v24, %v734_v26 }
 0x2ee   :  { %7550 = vmatpush1.bf16.msra.mxu1 %v17592_v31  ;;  %8411 = vmatpush1.bf16.msra.mxu0 %v17606_v32  ;;  %v17761_v31 = vcombine.high %v722_v24, %v734_v26  ;;  %v17775_v32 = vcombine.high %v729_v27, %v741_v28  ;;  %v873_v24 = vld [vmem:[#allocation5 + $0x1850] sm:$0xff]  ;;  %v17894_v28 = vcombine.low %v849_v10, %v861_v11 }
 0x2ef   :  { %7551 = vmatprep.subr.bf16.mxu1 %v17617_v33  ;;  %8412 = vmatprep.subr.bf16.mxu0 %v17631_v35  ;;  %v746_v33 = vld [vmem:[#allocation5 + $0x1458] sm:$0xff]  ;;  %v885_v26 = vld [vmem:[#allocation5 + $0x18b0] sm:$0xff] }
 0x2f0   :  { %v758_v35 = vld [vmem:[#allocation5 + $0x14b8] sm:$0xff] }
 0x2f1   :  { %v17784_v47 = vcombine.low %v746_v33, %v758_v35 }
 0x2f2   :  { %7552 = vmatpush1.bf16.msra.mxu1 %v17616_v41  ;;  %8413 = vmatpush1.bf16.msra.mxu0 %v17630_v42  ;;  %v17785_v41 = vcombine.high %v746_v33, %v758_v35  ;;  %v17799_v42 = vcombine.high %v753_v36, %v765_v37  ;;  %v897_v33 = vld [vmem:[#allocation5 + $0x1910] sm:$0xff]  ;;  %v17918_v37 = vcombine.low %v873_v24, %v885_v26 }
 0x2f3   :  { %7553 = vmatprep.subr.bf16.mxu1 %v17641_v43  ;;  %8414 = vmatprep.subr.bf16.mxu0 %v17655_v44  ;;  %v770_v43 = vld [vmem:[#allocation5 + $0x1518] sm:$0xff]  ;;  %v909_v35 = vld [vmem:[#allocation5 + $0x1970] sm:$0xff] }
 0x2f4   :  { %v782_v44 = vld [vmem:[#allocation5 + $0x1578] sm:$0xff] }
 0x2f5   :  { %v17808_v55 = vcombine.low %v770_v43, %v782_v44 }
 0x2f6   :  { %7554 = vmatpush1.bf16.msra.mxu1 %v17640_v49  ;;  %8415 = vmatpush1.bf16.msra.mxu0 %v17654_v50  ;;  %v17809_v49 = vcombine.high %v770_v43, %v782_v44  ;;  %v17823_v50 = vcombine.high %v777_v45, %v789_v46  ;;  %v921_v43 = vld [vmem:[#allocation5 + $0x19d0] sm:$0xff]  ;;  %v17942_v46 = vcombine.low %v897_v33, %v909_v35 }
 0x2f7   :  { %7555 = vmatprep.subr.bf16.mxu1 %v17665_v51  ;;  %8416 = vmatprep.subr.bf16.mxu0 %v17679_v52  ;;  %v794_v51 = vld [vmem:[#allocation5 + $0x15d8] sm:$0xff]  ;;  %v933_v44 = vld [vmem:[#allocation5 + $0x1a30] sm:$0xff] }
 0x2f8   :  { %v806_v52 = vld [vmem:[#allocation5 + $0x1638] sm:$0xff] }
 0x2f9   :  { %v17832_v1 = vcombine.low %v794_v51, %v806_v52 }
 0x2fa   :  { %7556 = vmatpush1.bf16.msra.mxu1 %v17664_v58  ;;  %8417 = vmatpush1.bf16.msra.mxu0 %v17678_v59  ;;  %v17833_v58 = vcombine.high %v794_v51, %v806_v52  ;;  %v17847_v59 = vcombine.high %v801_v53, %v813_v54  ;;  %v945_v51 = vld [vmem:[#allocation5 + $0x1a90] sm:$0xff]  ;;  %v17966_v54 = vcombine.low %v921_v43, %v933_v44 }
 0x2fb   :  { %7557 = vmatprep.subr.bf16.mxu1 %v17689_v60  ;;  %8418 = vmatprep.subr.bf16.mxu0 %v17703_v61  ;;  %v818_v60 = vld [vmem:[#allocation5 + $0x1698] sm:$0xff]  ;;  %v957_v52 = vld [vmem:[#allocation5 + $0x1af0] sm:$0xff] }
 0x2fc   :  { %v830_v61 = vld [vmem:[#allocation5 + $0x16f8] sm:$0xff] }
 0x2fd   :  { %v17856_v13 = vcombine.low %v818_v60, %v830_v61 }
 0x2fe   :  { %7558 = vmatpush1.bf16.msra.mxu1 %v17688_v5  ;;  %8419 = vmatpush1.bf16.msra.mxu0 %v17702_v6  ;;  %v17857_v5 = vcombine.high %v818_v60, %v830_v61  ;;  %v17871_v6 = vcombine.high %v825_v62, %v837_v63  ;;  %v969_v60 = vld [vmem:[#allocation5 + $0x1b50] sm:$0xff]  ;;  %v17990_v63 = vcombine.low %v945_v51, %v957_v52 }
 0x2ff   :  { %7559 = vmatprep.subr.bf16.mxu1 %v17713_v8  ;;  %8420 = vmatprep.subr.bf16.mxu0 %v17727_v9  ;;  %v842_v8 = vld [vmem:[#allocation5 + $0x1758] sm:$0xff]  ;;  %v981_v61 = vld [vmem:[#allocation5 + $0x1bb0] sm:$0xff] }
 0x300   :  { %v854_v9 = vld [vmem:[#allocation5 + $0x17b8] sm:$0xff] }
 0x301   :  { %v17880_v27 = vcombine.low %v842_v8, %v854_v9 }
 0x302   :  { %7560 = vmatpush1.bf16.msra.mxu1 %v17712_v16  ;;  %8421 = vmatpush1.bf16.msra.mxu0 %v17726_v17  ;;  %v17881_v16 = vcombine.high %v842_v8, %v854_v9  ;;  %v17895_v17 = vcombine.high %v849_v10, %v861_v11  ;;  %v993_v8 = vld [vmem:[#allocation5 + $0x1c10] sm:$0xff]  ;;  %v18014_v11 = vcombine.low %v969_v60, %v981_v61 }
 0x303   :  { %7561 = vmatprep.subr.bf16.mxu1 %v17737_v20  ;;  %8422 = vmatprep.subr.bf16.mxu0 %v17751_v21  ;;  %v866_v20 = vld [vmem:[#allocation5 + $0x1818] sm:$0xff]  ;;  %v1005_v9 = vld [vmem:[#allocation5 + $0x1c70] sm:$0xff] }
 0x304   :  { %v878_v21 = vld [vmem:[#allocation5 + $0x1878] sm:$0xff] }
 0x305   :  { %v17904_v36 = vcombine.low %v866_v20, %v878_v21 }
 0x306   :  { %7562 = vmatpush1.bf16.msra.mxu1 %v17736_v29  ;;  %8423 = vmatpush1.bf16.msra.mxu0 %v17750_v30  ;;  %v17905_v29 = vcombine.high %v866_v20, %v878_v21  ;;  %v17919_v30 = vcombine.high %v873_v24, %v885_v26  ;;  %v1017_v20 = vld [vmem:[#allocation5 + $0x1cd0] sm:$0xff]  ;;  %v18038_v26 = vcombine.low %v993_v8, %v1005_v9 }
 0x307   :  { %7563 = vmatprep.subr.bf16.mxu1 %v17761_v31  ;;  %8424 = vmatprep.subr.bf16.mxu0 %v17775_v32  ;;  %v890_v31 = vld [vmem:[#allocation5 + $0x18d8] sm:$0xff]  ;;  %v1029_v21 = vld [vmem:[#allocation5 + $0x1d30] sm:$0xff] }
 0x308   :  { %v902_v32 = vld [vmem:[#allocation5 + $0x1938] sm:$0xff] }
 0x309   :  { %v17928_v45 = vcombine.low %v890_v31, %v902_v32 }
 0x30a   :  { %7564 = vmatpush1.bf16.msra.mxu1 %v17760_v39  ;;  %8425 = vmatpush1.bf16.msra.mxu0 %v17774_v40  ;;  %v17929_v39 = vcombine.high %v890_v31, %v902_v32  ;;  %v17943_v40 = vcombine.high %v897_v33, %v909_v35  ;;  %v1041_v31 = vld [vmem:[#allocation5 + $0x1d90] sm:$0xff]  ;;  %v18062_v35 = vcombine.low %v1017_v20, %v1029_v21 }
 0x30b   :  { %7565 = vmatprep.subr.bf16.mxu1 %v17785_v41  ;;  %8426 = vmatprep.subr.bf16.mxu0 %v17799_v42  ;;  %v914_v41 = vld [vmem:[#allocation5 + $0x1998] sm:$0xff]  ;;  %v1053_v32 = vld [vmem:[#allocation5 + $0x1df0] sm:$0xff] }
 0x30c   :  { %v926_v42 = vld [vmem:[#allocation5 + $0x19f8] sm:$0xff] }
 0x30d   :  { %v17952_v53 = vcombine.low %v914_v41, %v926_v42 }
 0x30e   :  { %7566 = vmatpush1.bf16.msra.mxu1 %v17784_v47  ;;  %8427 = vmatpush1.bf16.msra.mxu0 %v17798_v48  ;;  %v17953_v47 = vcombine.high %v914_v41, %v926_v42  ;;  %v17967_v48 = vcombine.high %v921_v43, %v933_v44  ;;  %v1065_v41 = vld [vmem:[#allocation5 + $0x1e50] sm:$0xff]  ;;  %v18086_v44 = vcombine.low %v1041_v31, %v1053_v32 }
 0x30f   :  { %7567 = vmatprep.subr.bf16.mxu1 %v17809_v49  ;;  %8428 = vmatprep.subr.bf16.mxu0 %v17823_v50  ;;  %v938_v49 = vld [vmem:[#allocation5 + $0x1a58] sm:$0xff]  ;;  %v1077_v42 = vld [vmem:[#allocation5 + $0x1eb0] sm:$0xff] }
 0x310   :  { %v950_v50 = vld [vmem:[#allocation5 + $0x1ab8] sm:$0xff] }
 0x311   :  { %v17976_v62 = vcombine.low %v938_v49, %v950_v50 }
 0x312   :  { %7568 = vmatpush1.bf16.msra.mxu1 %v17808_v55  ;;  %8429 = vmatpush1.bf16.msra.mxu0 %v17822_v56  ;;  %v17977_v55 = vcombine.high %v938_v49, %v950_v50  ;;  %v17991_v56 = vcombine.high %v945_v51, %v957_v52  ;;  %v1089_v49 = vld [vmem:[#allocation5 + $0x1f10] sm:$0xff]  ;;  %v18110_v52 = vcombine.low %v1065_v41, %v1077_v42 }
 0x313   :  { %7569 = vmatprep.subr.bf16.mxu1 %v17833_v58  ;;  %8430 = vmatprep.subr.bf16.mxu0 %v17847_v59  ;;  %v962_v58 = vld [vmem:[#allocation5 + $0x1b18] sm:$0xff]  ;;  %v1101_v50 = vld [vmem:[#allocation5 + $0x1f70] sm:$0xff] }
 0x314   :  { %v974_v59 = vld [vmem:[#allocation5 + $0x1b78] sm:$0xff] }
 0x315   :  { %v18000_v10 = vcombine.low %v962_v58, %v974_v59 }
 0x316   :  { %7570 = vmatpush1.bf16.msra.mxu1 %v17832_v1  ;;  %8431 = vmatpush1.bf16.msra.mxu0 %v17846_v2  ;;  %v18001_v1 = vcombine.high %v962_v58, %v974_v59  ;;  %v18015_v2 = vcombine.high %v969_v60, %v981_v61  ;;  %v1118_v58 = vld [vmem:[#allocation5 + $0x1ff8] sm:$0xff]  ;;  %v1113_v59 = vld [vmem:[#allocation5 + $0x1fd0] sm:$0xff] }
 0x317   :  { %7571 = vmatprep.subr.bf16.mxu1 %v17857_v5  ;;  %8432 = vmatprep.subr.bf16.mxu0 %v17871_v6  ;;  %v986_v5 = vld [vmem:[#allocation5 + $0x1bd8] sm:$0xff]  ;;  %v1125_v60 = vld [vmem:[#allocation5 + $0x2030] sm:$0xff] }
 0x318   :  { %v998_v6 = vld [vmem:[#allocation5 + $0x1c38] sm:$0xff] }
 0x319   :  { %v18024_v24 = vcombine.low %v986_v5, %v998_v6 }
 0x31a   :  { %7572 = vmatpush1.bf16.msra.mxu1 %v17856_v13  ;;  %8433 = vmatpush1.bf16.msra.mxu0 %v17870_v14  ;;  %v18025_v13 = vcombine.high %v986_v5, %v998_v6  ;;  %v18039_v14 = vcombine.high %v993_v8, %v1005_v9  ;;  %v1130_v5 = vld [vmem:[#allocation5 + $0x2058] sm:$0xff]  ;;  %v1137_v8 = vld [vmem:[#allocation5 + $0x2090] sm:$0xff] }
 0x31b   :  { %7573 = vmatprep.subr.bf16.mxu1 %v17881_v16  ;;  %8434 = vmatprep.subr.bf16.mxu0 %v17895_v17  ;;  %v1010_v16 = vld [vmem:[#allocation5 + $0x1c98] sm:$0xff]  ;;  %v1149_v9 = vld [vmem:[#allocation5 + $0x20f0] sm:$0xff] }
 0x31c   :  { %v1022_v17 = vld [vmem:[#allocation5 + $0x1cf8] sm:$0xff] }
 0x31d   :  { %v18048_v33 = vcombine.low %v1010_v16, %v1022_v17  ;;  %v1142_v6 = vld [vmem:[#allocation5 + $0x20b8] sm:$0xff] }
 0x31e   :  { %7574 = vmatpush1.bf16.msra.mxu1 %v17880_v27  ;;  %8435 = vmatpush1.bf16.msra.mxu0 %v17894_v28  ;;  %v18049_v27 = vcombine.high %v1010_v16, %v1022_v17  ;;  %v18063_v28 = vcombine.high %v1017_v20, %v1029_v21  ;;  %v18183_v16 = vcombine.high %v1137_v8, %v1149_v9  ;;  %v1154_v17 = vld [vmem:[#allocation5 + $0x2118] sm:$0xff]  ;;  %v21813_v21 = vld [vmem:[#allocation7] sm:$0xff] }
 0x31f   :  { %7584 = vmatprep.subr.bf16.mxu1 %v17905_v29  ;;  %8445 = vmatprep.subr.bf16.mxu0 %v17919_v30  ;;  %v1034_v29 = vld [vmem:[#allocation5 + $0x1d58] sm:$0xff] }
 0x320   :  { %v1046_v30 = vld [vmem:[#allocation5 + $0x1db8] sm:$0xff] }
 0x321   :  { %7576 = vmatmul.mubr.bf16.vlgmr.msra.gmra.mrb[12].mxu1 %v21746_v25  ;;  %8437 = vmatmul.mubr.bf16.vlgmr.msra.gmra.mrb[12].mxu0 %v21746_v25  ;;  %v18072_v43 = vcombine.low %v1034_v29, %v1046_v30  ;;  %v1166_v20 = vld [vmem:[#allocation5 + $0x2178] sm:$0xff] }
 0x322   :  { %7585 = vmatpush1.bf16.msra.mxu1 %v17904_v36  ;;  %8446 = vmatpush1.bf16.msra.mxu0 %v17918_v37  ;;  %v18073_v36 = vcombine.high %v1034_v29, %v1046_v30  ;;  %v18087_v37 = vcombine.high %v1041_v31, %v1053_v32  ;;  %v18193_v29 = vcombine.high %v1154_v17, %v1166_v20  ;;  %v1178_v32 = vld [vmem:[#allocation5 + $0x21d8] sm:$0xff] }
 0x323   :  { %7586 = vmatprep.subr.bf16.mxu1 %v17929_v39  ;;  %8447 = vmatprep.subr.bf16.mxu0 %v17943_v40  ;;  %v1058_v39 = vld [vmem:[#allocation5 + $0x1e18] sm:$0xff] }
 0x324   :  { %7616 = vmatprep.mubr.bf16.mxu1 %v21748_v34  ;;  %8477 = vmatprep.mubr.bf16.mxu0 %v21748_v34  ;;  %v1070_v40 = vld [vmem:[#allocation5 + $0x1e78] sm:$0xff] }
 0x325   :  { %v18096_v51 = vcombine.low %v1058_v39, %v1070_v40 }
 0x326   :  { %7587 = vmatpush1.bf16.msra.mxu1 %v17928_v45  ;;  %8448 = vmatpush1.bf16.msra.mxu0 %v17942_v46  ;;  %v18097_v45 = vcombine.high %v1058_v39, %v1070_v40  ;;  %v18111_v46 = vcombine.high %v1065_v41, %v1077_v42 }
 0x327   :  { %7588 = vmatprep.subr.bf16.mxu1 %v17953_v47  ;;  %8449 = vmatprep.subr.bf16.mxu0 %v17967_v48  ;;  %v1082_v47 = vld [vmem:[#allocation5 + $0x1ed8] sm:$0xff] }
 0x328   :  { %v1094_v48 = vld [vmem:[#allocation5 + $0x1f38] sm:$0xff] }
 0x329   :  { %v18120_v61 = vcombine.low %v1082_v47, %v1094_v48 }
 0x32a   :  { %7589 = vmatpush1.bf16.msra.mxu1 %v17952_v53  ;;  %8450 = vmatpush1.bf16.msra.mxu0 %v17966_v54  ;;  %v18121_v53 = vcombine.high %v1082_v47, %v1094_v48  ;;  %v1253_v54 = vlaneseq }
 0x32b   :  { %7590 = vmatprep.subr.bf16.mxu1 %v17977_v55  ;;  %8451 = vmatprep.subr.bf16.mxu0 %v17991_v56  ;;  %v18135_v55 = vcombine.high %v1089_v49, %v1101_v50  ;;  %v1106_v56 = vld [vmem:[#allocation5 + $0x1f98] sm:$0xff] }
 0x32e   :  { %7591 = vmatpush1.bf16.msra.mxu1 %v17976_v62  ;;  %8452 = vmatpush1.bf16.msra.mxu0 %v17990_v63  ;;  %v18134_v62 = vcombine.low %v1089_v49, %v1101_v50  ;;  %v18145_v63 = vcombine.high %v1106_v56, %v1118_v58 }
 0x32f   :  { %7592 = vmatprep.subr.bf16.mxu1 %v18001_v1  ;;  %8453 = vmatprep.subr.bf16.mxu0 %v18015_v2  ;;  %v21808_v1 = vshrl.u32 %v1253_v54, 7  ;;  %v18159_v2 = vcombine.high %v1113_v59, %v1125_v60  ;;  %v1245_v54 = vld [vmem:[#allocation5 + $0x23f0] sm:$0xff] }
 0x332   :  { %7593 = vmatpush1.bf16.msra.mxu1 %v18000_v10  ;;  %8454 = vmatpush1.bf16.msra.mxu0 %v18014_v11  ;;  %v18144_v10 = vcombine.low %v1106_v56, %v1118_v58  ;;  %v18158_v11 = vcombine.low %v1113_v59, %v1125_v60  ;;  %v100_v59 = vld [vmem:[#allocation5 + $0x28] sm:$0xff] }
 0x333   :  { %7594 = vmatprep.subr.bf16.mxu1 %v18025_v13  ;;  %8455 = vmatprep.subr.bf16.mxu0 %v18039_v14  ;;  %v18169_v13 = vcombine.high %v1130_v5, %v1142_v6  ;;  %v21811_v14 = vsub.s32 1, %v21808_v1  ;;  %v112_v60 = vld [vmem:[#allocation5 + $0x88] sm:$0xff] }
 0x335   :  { %v1260_v30 = vrot.slane %v21813_v21, %v21811_v14 }
 0x336   :  { %7595 = vmatpush1.bf16.msra.mxu1 %v18024_v24  ;;  %8456 = vmatpush1.bf16.msra.mxu0 %v18038_v26  ;;  %v1161_v24 = vld [vmem:[#allocation5 + $0x2150] sm:$0xff] }
 0x337   :  { %7596 = vmatprep.subr.bf16.mxu1 %v18049_v27  ;;  %8457 = vmatprep.subr.bf16.mxu0 %v18063_v28  ;;  %v1173_v26 = vld [vmem:[#allocation5 + $0x21b0] sm:$0xff]  ;;  %v18168_v27 = vcombine.low %v1130_v5, %v1142_v6  ;;  %v18182_v28 = vcombine.low %v1137_v8, %v1149_v9  ;;  %v19435_v41 = vadd.f32 %v21774_v3, %v1260_v30  ;;  %v124_v5 = vld [vmem:[#allocation5 + $0xe8] sm:$0xff] }
 0x338   :  { %v18207_v31 = vcombine.high %v1161_v24, %v1173_v26  ;;  %v18206_v39 = vcombine.low %v1161_v24, %v1173_v26  ;;  %v136_v6 = vld [vmem:[#allocation5 + $0x148] sm:$0xff]  ;;  %v17140_v9 = vcombine.low %v100_v59, %v112_v60 }
 0x339   :  { %21430 = vtanh.f32 %v19435_v41  ;;  %v17164_v24 = vcombine.low %v124_v5, %v136_v6  ;;  %v19705_v26 = vld [vmem:[#allocation8 + $0x30] ss:$24 sps:$4 sm:$0xff]  }
 0x33a   :  { %7597 = vmatpush1.bf16.msra.mxu1 %v18048_v33  ;;  %8458 = vmatpush1.bf16.msra.mxu0 %v18062_v35  ;;  %v1190_v33 = vld [vmem:[#allocation5 + $0x2238] sm:$0xff]  ;;  %v1185_v35 = vld [vmem:[#allocation5 + $0x2210] sm:$0xff]  ;;  %v184_v30 = vld [vmem:[#allocation5 + $0x2c8] sm:$0xff] }
 0x33b   :  { %7598 = vmatprep.subr.bf16.mxu1 %v18073_v36  ;;  %8459 = vmatprep.subr.bf16.mxu0 %v18087_v37  ;;  %v1197_v36 = vld [vmem:[#allocation5 + $0x2270] sm:$0xff]  ;;  %v18192_v37 = vcombine.low %v1154_v17, %v1166_v20  ;;  %v18217_v40 = vcombine.high %v1178_v32, %v1190_v33  ;;  %v18216_v47 = vcombine.low %v1178_v32, %v1190_v33  ;;  %v160_v17 = vld [vmem:[#allocation5 + $0x208] sm:$0xff] }
 0x33c   :  { %v18231_v42 = vcombine.high %v1185_v35, %v1197_v36  ;;  %v18230_v48 = vcombine.low %v1185_v35, %v1197_v36  ;;  %v19708_v32 = vld [vmem:[#allocation8 + $0x60] ss:$24 sps:$4 sm:$0xff]   ;;  %v19713_v35 = vld [vmem:[#allocation8 + $0x94] ss:$24 sps:$4 sm:$0xff]  }
 0x33d   :  { %v196_v36 = vld [vmem:[#allocation5 + $0x328] sm:$0xff] }
 0x33e   :  { %7599 = vmatpush1.bf16.msra.mxu1 %v18072_v43  ;;  %8460 = vmatpush1.bf16.msra.mxu0 %v18086_v44  ;;  %v1202_v43 = vld [vmem:[#allocation5 + $0x2298] sm:$0xff] }
 0x33f   :  { %7600 = vmatprep.subr.bf16.mxu1 %v18097_v45  ;;  %8461 = vmatprep.subr.bf16.mxu0 %v18111_v46  ;;  %v1214_v44 = vld [vmem:[#allocation5 + $0x22f8] sm:$0xff]  ;;  %v1209_v45 = vld [vmem:[#allocation5 + $0x22d0] sm:$0xff] }
 0x340   :  { %v1221_v46 = vld [vmem:[#allocation5 + $0x2330] sm:$0xff]  ;;  %v18241_v49 = vcombine.high %v1202_v43, %v1214_v44  ;;  %v18240_v3 = vcombine.low %v1202_v43, %v1214_v44  ;;  %v220_v43 = vld [vmem:[#allocation5 + $0x3e8] sm:$0xff] }
 0x341   :  { %v18255_v50 = vcombine.high %v1209_v45, %v1221_v46  ;;  %v232_v44 = vld [vmem:[#allocation5 + $0x448] sm:$0xff] }
 0x342   :  { %7601 = vmatpush1.bf16.msra.mxu1 %v18096_v51  ;;  %8462 = vmatpush1.bf16.msra.mxu0 %v18110_v52  ;;  %v1226_v51 = vld [vmem:[#allocation5 + $0x2358] sm:$0xff] }
 0x343   :  { %7602 = vmatprep.subr.bf16.mxu1 %v18121_v53  ;;  %8463 = vmatprep.subr.bf16.mxu0 %v18135_v55  ;;  %v1238_v52 = vld [vmem:[#allocation5 + $0x23b8] sm:$0xff]  ;;  %v1233_v53 = vld [vmem:[#allocation5 + $0x2390] sm:$0xff]  ;;  %v18254_v55 = vcombine.low %v1209_v45, %v1221_v46  ;;  %v21431_v8 = vpop.eup %21430 }
 0x344   :  { %v18265_v56 = vcombine.high %v1226_v51, %v1238_v52  ;;  %v18279_v58 = vcombine.high %v1233_v53, %v1245_v54  ;;  %v21818_v20 = vpack.c.bf16 %v21431_v8, %v21431_v8  ;;  %v19714_v46 = vld [vmem:[#allocation8 + $0xc0] ss:$24 sps:$4 sm:$0xff]   ;;  %v19725_v8 = vld [vmem:[#allocation8 + $0x154] ss:$24 sps:$4 sm:$0xff]  }
 0x346   :  { %7603 = vmatpush1.bf16.msra.mxu1 %v18120_v61  ;;  %8464 = vmatpush1.bf16.msra.mxu0 %v18134_v62  ;;  %v18264_v61 = vcombine.low %v1226_v51, %v1238_v52  ;;  %v18278_v62 = vcombine.low %v1233_v53, %v1245_v54  ;;  %v17260_v51 = vcombine.low %v220_v43, %v232_v44  ;;  %v19717_v52 = vld [vmem:[#allocation8 + $0xf0] ss:$24 sps:$4 sm:$0xff]  }
 0x347   :  { %7604 = vmatprep.subr.bf16.mxu1 %v18145_v63  ;;  %8465 = vmatprep.subr.bf16.mxu0 %v18159_v2  ;;  %v17141_v63 = vcombine.high %v100_v59, %v112_v60  ;;  %v19704_v2 = vld [vmem:[#allocation8 + $0x4] ss:$24 sps:$4 sm:$0xff]  }
 0x34a   :  { %7605 = vmatpush1.bf16.msra.mxu1 %v18144_v10  ;;  %8466 = vmatpush1.bf16.msra.mxu0 %v18158_v11  ;;  %v19702_v10 = vld [vmem:[#allocation8] ss:$24 sps:$4 sm:$0xff]   ;;  %v17165_v11 = vcombine.high %v124_v5, %v136_v6 }
 0x34b   :  { %7606 = vmatprep.subr.bf16.mxu1 %v18169_v13  ;;  %8467 = vmatprep.subr.bf16.mxu0 %v18183_v16  ;;  %v19707_v13 = vld [vmem:[#allocation8 + $0x34] ss:$24 sps:$4 sm:$0xff]  }
 0x34c   :  { %v148_v16 = vld [vmem:[#allocation5 + $0x1a8] sm:$0xff] }
 0x34e   :  { %7607 = vmatpush1.bf16.msra.mxu1 %v18168_v27  ;;  %8468 = vmatpush1.bf16.msra.mxu0 %v18182_v28  ;;  %v17189_v27 = vcombine.high %v148_v16, %v160_v17  ;;  %v19710_v28 = vld [vmem:[#allocation8 + $0x64] ss:$24 sps:$4 sm:$0xff]  }
 0x34f   :  { %7608 = vmatprep.subr.bf16.mxu1 %v18193_v29  ;;  %8469 = vmatprep.subr.bf16.mxu0 %v18207_v31  ;;  %v172_v29 = vld [vmem:[#allocation5 + $0x268] sm:$0xff]  ;;  %v17188_v31 = vcombine.low %v148_v16, %v160_v17 }
 0x350   :  { %v17213_v33 = vcombine.high %v172_v29, %v184_v30  ;;  %v19723_v16 = vld [vmem:[#allocation8 + $0x150] ss:$24 sps:$4 sm:$0xff]  }
 0x352   :  { %7609 = vmatpush1.bf16.msra.mxu1 %v18192_v37  ;;  %8470 = vmatpush1.bf16.msra.mxu0 %v18206_v39  ;;  %v208_v37 = vld [vmem:[#allocation5 + $0x388] sm:$0xff]  ;;  %v17212_v39 = vcombine.low %v172_v29, %v184_v30  ;;  %v19726_v29 = vld [vmem:[#allocation8 + $0x180] ss:$24 sps:$4 sm:$0xff]  }
 0x353   :  { %7610 = vmatprep.subr.bf16.mxu1 %v18217_v40  ;;  %8471 = vmatprep.subr.bf16.mxu0 %v18231_v42  ;;  %v19711_v40 = vld [vmem:[#allocation8 + $0x90] ss:$24 sps:$4 sm:$0xff]   ;;  %v17237_v41 = vcombine.high %v196_v36, %v208_v37  ;;  %v19716_v42 = vld [vmem:[#allocation8 + $0xc4] ss:$24 sps:$4 sm:$0xff]   ;;  %v17236_v45 = vcombine.low %v196_v36, %v208_v37 }
 0x354   :  { %v19729_v36 = vld [vmem:[#allocation8 + $0x1b0] ss:$24 sps:$4 sm:$0xff]  }
 0x356   :  { %7611 = vmatpush1.bf16.msra.mxu1 %v18216_v47  ;;  %8472 = vmatpush1.bf16.msra.mxu0 %v18230_v48  ;;  %v17261_v47 = vcombine.high %v220_v43, %v232_v44  ;;  %v19719_v48 = vld [vmem:[#allocation8 + $0xf4] ss:$24 sps:$4 sm:$0xff]   ;;  %v21833_v43 = vsub.s32 0, %v21808_v1  ;;  %v19732_v44 = vld [vmem:[#allocation8 + $0x1e0] ss:$24 sps:$4 sm:$0xff]  }
 0x357   :  { %7612 = vmatprep.subr.bf16.mxu1 %v18241_v49  ;;  %8473 = vmatprep.subr.bf16.mxu0 %v18255_v50  ;;  %v244_v49 = vld [vmem:[#allocation5 + $0x4a8] sm:$0xff] }
 0x358   :  { %v256_v50 = vld [vmem:[#allocation5 + $0x508] sm:$0xff] }
 0x359   :  { %v17285_v53 = vcombine.high %v244_v49, %v256_v50 }
 0x35a   :  { %7613 = vmatpush1.bf16.msra.mxu1 %v18240_v3  ;;  %8474 = vmatpush1.bf16.msra.mxu0 %v18254_v55  ;;  %v19722_v3 = vld [vmem:[#allocation8 + $0x124] ss:$24 sps:$4 sm:$0xff]   ;;  %v268_v55 = vld [vmem:[#allocation5 + $0x568] sm:$0xff] }
 0x35b   :  { %7614 = vmatprep.subr.bf16.mxu1 %v18265_v56  ;;  %8475 = vmatprep.subr.bf16.mxu0 %v18279_v58  ;;  %v280_v56 = vld [vmem:[#allocation5 + $0x5c8] sm:$0xff] }
 0x35c   :  { %v17309_v5 = vcombine.high %v268_v55, %v280_v56 }
 0x35e   :  { %7615 = vmatpush1.bf16.msra.mxu1 %v18264_v61  ;;  %8476 = vmatpush1.bf16.msra.mxu0 %v18278_v62  ;;  %v17284_v61 = vcombine.low %v244_v49, %v256_v50  ;;  %v400_v49 = vld [vmem:[#allocation5 + $0x988] sm:$0xff] }
 0x35f   :  { %7748 = vmatprep.subr.bf16.mxu1 %v17141_v63  ;;  %15601 = vmatprep.subr.bf16.mxu0 %v19704_v2  ;;  %v19720_v2 = vld [vmem:[#allocation8 + $0x120] ss:$24 sps:$4 sm:$0xff]  }
 0x361   :  { %7617 = vmatmul.mubr.bf16.vlgmr.msra.gmra.mrb[12].mxu1 %v21754_v38  ;;  %8478 = vmatmul.mubr.bf16.vlgmr.msra.gmra.mrb[12].mxu0 %v21754_v38 }
 0x362   :  { %7749 = vmatpush1.bf16.msra.mxu1 %v17140_v9  ;;  %15602 = vmatpush1.bf16.msra.mxu0 %v19702_v10  ;;  %v292_v9 = vld [vmem:[#allocation5 + $0x628] sm:$0xff] }
 0x363   :  { %15633 = vmatprep.mubr.bf16.mxu0 %v21818_v20  ;;  %7750 = vmatprep.subr.bf16.mxu1 %v17165_v11  ;;  %v304_v10 = vld [vmem:[#allocation5 + $0x688] sm:$0xff] }
 0x364   :  { %15603 = vmatprep.subr.bf16.mxu0 %v19707_v13  ;;  %7780 = vmatprep.mubr.bf16.mxu1 %v21734_v57  ;;  %v17308_v13 = vcombine.low %v268_v55, %v280_v56  ;;  %v17333_v17 = vcombine.high %v292_v9, %v304_v10  ;;  %v19740_v55 = vld [vmem:[#allocation8 + $0x244] ss:$24 sps:$4 sm:$0xff]   ;;  %v412_v56 = vld [vmem:[#allocation5 + $0x9e8] sm:$0xff] }
 0x366   :  { %7751 = vmatpush1.bf16.msra.mxu1 %v17164_v24  ;;  %15604 = vmatpush1.bf16.msra.mxu0 %v19705_v26  ;;  %v19728_v24 = vld [vmem:[#allocation8 + $0x184] ss:$24 sps:$4 sm:$0xff]   ;;  %v316_v26 = vld [vmem:[#allocation5 + $0x6e8] sm:$0xff] }
 0x367   :  { %7752 = vmatprep.subr.bf16.mxu1 %v17189_v27  ;;  %15605 = vmatprep.subr.bf16.mxu0 %v19710_v28  ;;  %v328_v27 = vld [vmem:[#allocation5 + $0x748] sm:$0xff]  ;;  %v17332_v28 = vcombine.low %v292_v9, %v304_v10 }
 0x368   :  { %v17357_v30 = vcombine.high %v316_v26, %v328_v27  ;;  %v436_v9 = vld [vmem:[#allocation5 + $0xaa8] sm:$0xff] }
 0x369   :  { %v448_v10 = vld [vmem:[#allocation5 + $0xb08] sm:$0xff] }
 0x36a   :  { %7753 = vmatpush1.bf16.msra.mxu1 %v17188_v31  ;;  %15606 = vmatpush1.bf16.msra.mxu0 %v19708_v32  ;;  %v19731_v31 = vld [vmem:[#allocation8 + $0x1b4] ss:$24 sps:$4 sm:$0xff]  }
 0x36b   :  { %7754 = vmatprep.subr.bf16.mxu1 %v17213_v33  ;;  %15607 = vmatprep.subr.bf16.mxu0 %v19713_v35  ;;  %v340_v32 = vld [vmem:[#allocation5 + $0x7a8] sm:$0xff]  ;;  %v17356_v35 = vcombine.low %v316_v26, %v328_v27  ;;  %v17476_v26 = vcombine.low %v436_v9, %v448_v10 }
 0x36c   :  { %v352_v33 = vld [vmem:[#allocation5 + $0x808] sm:$0xff] }
 0x36d   :  { %v17381_v37 = vcombine.high %v340_v32, %v352_v33 }
 0x36e   :  { %7755 = vmatpush1.bf16.msra.mxu1 %v17212_v39  ;;  %15608 = vmatpush1.bf16.msra.mxu0 %v19711_v40  ;;  %v19734_v39 = vld [vmem:[#allocation8 + $0x1e4] ss:$24 sps:$4 sm:$0xff]   ;;  %v364_v40 = vld [vmem:[#allocation5 + $0x868] sm:$0xff] }
 0x36f   :  { %7756 = vmatprep.subr.bf16.mxu1 %v17237_v41  ;;  %15609 = vmatprep.subr.bf16.mxu0 %v19716_v42  ;;  %v376_v41 = vld [vmem:[#allocation5 + $0x8c8] sm:$0xff]  ;;  %v17380_v42 = vcombine.low %v340_v32, %v352_v33 }
 0x370   :  { %v17404_v50 = vcombine.low %v364_v40, %v376_v41  ;;  %v19747_v32 = vld [vmem:[#allocation8 + $0x2d0] ss:$24 sps:$4 sm:$0xff]  }
 0x372   :  { %7757 = vmatpush1.bf16.msra.mxu1 %v17236_v45  ;;  %15610 = vmatpush1.bf16.msra.mxu0 %v19714_v46  ;;  %v17405_v45 = vcombine.high %v364_v40, %v376_v41  ;;  %v21836_v46 = vsub.s32 3, %v21808_v1 }
 0x373   :  { %7758 = vmatprep.subr.bf16.mxu1 %v17261_v47  ;;  %15611 = vmatprep.subr.bf16.mxu0 %v19719_v48  ;;  %v19737_v47 = vld [vmem:[#allocation8 + $0x214] ss:$24 sps:$4 sm:$0xff]  }
 0x374   :  { %v21824_v54 = vpop.f32.mrb[8].mxu1  ;;  %v21828_v59 = vpop.f32.mrb[8].mxu0  ;;  %v388_v48 = vld [vmem:[#allocation5 + $0x928] sm:$0xff] }
 0x375   :  { %v21826_v58 = vpop.f32.mrb[9].mxu1  ;;  %v21830_v62 = vpop.f32.mrb[9].mxu0 }
 0x376   :  { %v7499_v60 = vpop.f32.mrb[10].mxu1  ;;  %7759 = vmatpush1.bf16.msra.mxu1 %v17260_v51  ;;  %15612 = vmatpush1.bf16.msra.mxu0 %v19717_v52  ;;  %v8237_v6 = vpop.f32.mrb[10].mxu0  ;;  %v1256_v51 = vrot.slane %v21813_v21, %v21833_v43  ;;  %v19735_v52 = vld [vmem:[#allocation8 + $0x210] ss:$24 sps:$4 sm:$0xff]  }
 0x377   :  { %v7500_v63 = vpop.f32.mrb[11].mxu1  ;;  %7760 = vmatprep.subr.bf16.mxu1 %v17285_v53  ;;  %15613 = vmatprep.subr.bf16.mxu0 %v19722_v3  ;;  %v8238_v11 = vpop.f32.mrb[11].mxu0  ;;  %v17429_v53 = vcombine.high %v388_v48, %v400_v49  ;;  %v1268_v3 = vrot.slane %v21813_v21, %v21836_v46  ;;  %v424_v60 = vld [vmem:[#allocation5 + $0xa48] sm:$0xff] }
 0x378   :  { %v19434_v63 = vadd.f32 %v21772_v0, %v1256_v51  ;;  %v17452_v11 = vcombine.low %v412_v56, %v424_v60  ;;  %v19746_v0 = vld [vmem:[#allocation8 + $0x2a4] ss:$24 sps:$4 sm:$0xff]  }
 0x379   :  { %v19437_v6 = vadd.f32 %v21794_v18, %v1268_v3  ;;  %v19744_v18 = vld [vmem:[#allocation8 + $0x2a0] ss:$24 sps:$4 sm:$0xff]   ;;  %v19758_v3 = vld [vmem:[#allocation8 + $0x364] ss:$24 sps:$4 sm:$0xff]  }
 0x37a   :  { %7761 = vmatpush1.bf16.msra.mxu1 %v17284_v61  ;;  %15614 = vmatpush1.bf16.msra.mxu0 %v19720_v2  ;;  %v17428_v61 = vcombine.low %v388_v48, %v400_v49  ;;  %v19738_v2 = vld [vmem:[#allocation8 + $0x240] ss:$24 sps:$4 sm:$0xff]   ;;  %21432 = vtanh.f32 %v19434_v63  ;;  %v532_v48 = vld [vmem:[#allocation5 + $0xda8] sm:$0xff] }
 0x37b   :  { %7762 = vmatprep.subr.bf16.mxu1 %v17309_v5  ;;  %15615 = vmatprep.subr.bf16.mxu0 %v19725_v8  ;;  %v17453_v5 = vcombine.high %v412_v56, %v424_v60  ;;  %v19743_v8 = vld [vmem:[#allocation8 + $0x274] ss:$24 sps:$4 sm:$0xff]   ;;  %21434 = vtanh.f32 %v19437_v6 }
 0x37c   :  { %v544_v49 = vld [vmem:[#allocation5 + $0xe08] sm:$0xff] }
 0x37d   :  { %v568_v56 = vld [vmem:[#allocation5 + $0xec8] sm:$0xff]  ;;  %v17572_v60 = vcombine.low %v532_v48, %v544_v49 }
 0x37e   :  { %7763 = vmatpush1.bf16.msra.mxu1 %v17308_v13  ;;  %15616 = vmatpush1.bf16.msra.mxu0 %v19723_v16  ;;  %v19741_v13 = vld [vmem:[#allocation8 + $0x270] ss:$24 sps:$4 sm:$0xff]   ;;  %v17477_v16 = vcombine.high %v436_v9, %v448_v10 }
 0x37f   :  { %7764 = vmatprep.subr.bf16.mxu1 %v17333_v17  ;;  %15617 = vmatprep.subr.bf16.mxu0 %v19728_v24  ;;  %v460_v17 = vld [vmem:[#allocation5 + $0xb68] sm:$0xff] }
 0x380   :  { %v472_v24 = vld [vmem:[#allocation5 + $0xbc8] sm:$0xff] }
 0x381   :  { %v17501_v27 = vcombine.high %v460_v17, %v472_v24  ;;  %v592_v6 = vld [vmem:[#allocation5 + $0xf88] sm:$0xff] }
 0x382   :  { %7765 = vmatpush1.bf16.msra.mxu1 %v17332_v28  ;;  %15618 = vmatpush1.bf16.msra.mxu0 %v19726_v29  ;;  %v19749_v28 = vld [vmem:[#allocation8 + $0x2d4] ss:$24 sps:$4 sm:$0xff]   ;;  %v19759_v9 = vld [vmem:[#allocation8 + $0x390] ss:$24 sps:$4 sm:$0xff]  }
 0x383   :  { %7766 = vmatprep.subr.bf16.mxu1 %v17357_v30  ;;  %15619 = vmatprep.subr.bf16.mxu0 %v19731_v31  ;;  %v484_v29 = vld [vmem:[#allocation5 + $0xc28] sm:$0xff]  ;;  %v17500_v31 = vcombine.low %v460_v17, %v472_v24  ;;  %v19762_v17 = vld [vmem:[#allocation8 + $0x3c0] ss:$24 sps:$4 sm:$0xff]  }
 0x384   :  { %v496_v30 = vld [vmem:[#allocation5 + $0xc88] sm:$0xff] }
 0x385   :  { %v17525_v33 = vcombine.high %v484_v29, %v496_v30  ;;  %v17524_v41 = vcombine.low %v484_v29, %v496_v30  ;;  %v19765_v29 = vld [vmem:[#allocation8 + $0x3f0] ss:$24 sps:$4 sm:$0xff]  }
 0x386   :  { %7767 = vmatpush1.bf16.msra.mxu1 %v17356_v35  ;;  %15620 = vmatpush1.bf16.msra.mxu0 %v19729_v36  ;;  %v19752_v35 = vld [vmem:[#allocation8 + $0x304] ss:$24 sps:$4 sm:$0xff]   ;;  %v21433_v36 = vpop.eup %21432 }
 0x387   :  { %7768 = vmatprep.subr.bf16.mxu1 %v17381_v37  ;;  %15621 = vmatprep.subr.bf16.mxu0 %v19734_v39  ;;  %v508_v37 = vld [vmem:[#allocation5 + $0xce8] sm:$0xff]  ;;  %v21435_v40 = vpop.eup %21434 }
 0x388   :  { %v520_v39 = vld [vmem:[#allocation5 + $0xd48] sm:$0xff] }
 0x389   :  { %v17548_v51 = vcombine.low %v508_v37, %v520_v39 }
 0x38a   :  { %7769 = vmatpush1.bf16.msra.mxu1 %v17380_v42  ;;  %15622 = vmatpush1.bf16.msra.mxu0 %v19732_v44  ;;  %v19750_v42 = vld [vmem:[#allocation8 + $0x300] ss:$24 sps:$4 sm:$0xff]   ;;  %v21844_v44 = vpack.c.bf16 %v21433_v36, %v21433_v36 }
 0x38b   :  { %7770 = vmatprep.subr.bf16.mxu1 %v17405_v45  ;;  %15623 = vmatprep.subr.bf16.mxu0 %v19737_v47  ;;  %v17549_v45 = vcombine.high %v508_v37, %v520_v39  ;;  %v19755_v47 = vld [vmem:[#allocation8 + $0x334] ss:$24 sps:$4 sm:$0xff]   ;;  %v19768_v36 = vld [vmem:[#allocation8 + $0x420] ss:$24 sps:$4 sm:$0xff]  }
 0x38c   :  { %v19773_v39 = vld [vmem:[#allocation8 + $0x454] ss:$24 sps:$4 sm:$0xff]  }
 0x38e   :  { %7771 = vmatpush1.bf16.msra.mxu1 %v17404_v50  ;;  %15624 = vmatpush1.bf16.msra.mxu0 %v19735_v52  ;;  %v21846_v50 = vpack.c.bf16 %v21435_v40, %v21435_v40  ;;  %v19753_v52 = vld [vmem:[#allocation8 + $0x330] ss:$24 sps:$4 sm:$0xff]  }
 0x38f   :  { %7772 = vmatprep.subr.bf16.mxu1 %v17429_v53  ;;  %15625 = vmatprep.subr.bf16.mxu0 %v19740_v55  ;;  %v17573_v53 = vcombine.high %v532_v48, %v544_v49  ;;  %v556_v55 = vld [vmem:[#allocation5 + $0xe68] sm:$0xff]  ;;  %v19776_v48 = vld [vmem:[#allocation8 + $0x484] ss:$24 sps:$4 sm:$0xff]  }
 0x390   :  { %v17597_v63 = vcombine.high %v556_v55, %v568_v56  ;;  %v676_v40 = vld [vmem:[#allocation5 + $0x1228] sm:$0xff] }
 0x391   :  { %v700_v49 = vld [vmem:[#allocation5 + $0x12e8] sm:$0xff] }
 0x392   :  { %7773 = vmatpush1.bf16.msra.mxu1 %v17428_v61  ;;  %15626 = vmatpush1.bf16.msra.mxu0 %v19738_v2  ;;  %v19756_v61 = vld [vmem:[#allocation8 + $0x360] ss:$24 sps:$4 sm:$0xff]   ;;  %v19761_v2 = vld [vmem:[#allocation8 + $0x394] ss:$24 sps:$4 sm:$0xff]  }
 0x393   :  { %7774 = vmatprep.subr.bf16.mxu1 %v17453_v5  ;;  %15627 = vmatprep.subr.bf16.mxu0 %v19743_v8  ;;  %v580_v5 = vld [vmem:[#allocation5 + $0xf28] sm:$0xff]  ;;  %v17596_v8 = vcombine.low %v556_v55, %v568_v56 }
 0x394   :  { %v17621_v10 = vcombine.high %v580_v5, %v592_v6  ;;  %v19779_v55 = vld [vmem:[#allocation8 + $0x4b4] ss:$24 sps:$4 sm:$0xff]  }
 0x395   :  { %v724_v56 = vld [vmem:[#allocation5 + $0x13a8] sm:$0xff] }
 0x396   :  { %7775 = vmatpush1.bf16.msra.mxu1 %v17452_v11  ;;  %15628 = vmatpush1.bf16.msra.mxu0 %v19741_v13  ;;  %v19764_v11 = vld [vmem:[#allocation8 + $0x3c4] ss:$24 sps:$4 sm:$0xff]   ;;  %v604_v13 = vld [vmem:[#allocation5 + $0xfe8] sm:$0xff] }
 0x397   :  { %7776 = vmatprep.subr.bf16.mxu1 %v17477_v16  ;;  %15629 = vmatprep.subr.bf16.mxu0 %v19746_v0  ;;  %v616_v16 = vld [vmem:[#allocation5 + $0x1048] sm:$0xff]  ;;  %v17620_v0 = vcombine.low %v580_v5, %v592_v6  ;;  %v19782_v5 = vld [vmem:[#allocation8 + $0x4e4] ss:$24 sps:$4 sm:$0xff]  }
 0x398   :  { %v17645_v24 = vcombine.high %v604_v13, %v616_v16  ;;  %v748_v6 = vld [vmem:[#allocation5 + $0x1468] sm:$0xff] }
 0x39a   :  { %7777 = vmatpush1.bf16.msra.mxu1 %v17476_v26  ;;  %15630 = vmatpush1.bf16.msra.mxu0 %v19744_v18  ;;  %v19767_v26 = vld [vmem:[#allocation8 + $0x3f4] ss:$24 sps:$4 sm:$0xff]  }
 0x39b   :  { %7778 = vmatprep.subr.bf16.mxu1 %v17501_v27  ;;  %15631 = vmatprep.subr.bf16.mxu0 %v19749_v28  ;;  %v628_v18 = vld [vmem:[#allocation5 + $0x10a8] sm:$0xff]  ;;  %v17644_v28 = vcombine.low %v604_v13, %v616_v16 }
 0x39c   :  { %v640_v27 = vld [vmem:[#allocation5 + $0x1108] sm:$0xff] }
 0x39d   :  { %v17669_v30 = vcombine.high %v628_v18, %v640_v27  ;;  %v19785_v16 = vld [vmem:[#allocation8 + $0x514] ss:$24 sps:$4 sm:$0xff]  }
 0x39e   :  { %7779 = vmatpush1.bf16.msra.mxu1 %v17500_v31  ;;  %15632 = vmatpush1.bf16.msra.mxu0 %v19747_v32  ;;  %v19770_v31 = vld [vmem:[#allocation8 + $0x424] ss:$24 sps:$4 sm:$0xff]   ;;  %v652_v32 = vld [vmem:[#allocation5 + $0x1168] sm:$0xff] }
 0x39f   :  { %7789 = vmatprep.subr.bf16.mxu1 %v17525_v33  ;;  %15642 = vmatprep.subr.bf16.mxu0 %v19752_v35  ;;  %v664_v33 = vld [vmem:[#allocation5 + $0x11c8] sm:$0xff]  ;;  %v17668_v35 = vcombine.low %v628_v18, %v640_v27 }
 0x3a0   :  { %v17693_v37 = vcombine.high %v652_v32, %v664_v33  ;;  %v19783_v27 = vld [vmem:[#allocation8 + $0x510] ss:$24 sps:$4 sm:$0xff]  }
 0x3a1   :  { %7781 = vmatmul.mubr.bf16.vlgmr.msra.gmra.mrb[16].mxu1 %v21738_v12  ;;  %15634 = vmatmul.mubr.bf16.vlgmr.msra.gmra.mrb[16].mxu0 %v21844_v44 }
 0x3a2   :  { %7790 = vmatpush1.bf16.msra.mxu1 %v17524_v41  ;;  %15643 = vmatpush1.bf16.msra.mxu0 %v19750_v42  ;;  %v688_v41 = vld [vmem:[#allocation5 + $0x1288] sm:$0xff]  ;;  %v17692_v42 = vcombine.low %v652_v32, %v664_v33 }
 0x3a3   :  { %15674 = vmatprep.mubr.bf16.mxu0 %v21846_v50  ;;  %7791 = vmatprep.subr.bf16.mxu1 %v17549_v45  ;;  %v19771_v45 = vld [vmem:[#allocation8 + $0x450] ss:$24 sps:$4 sm:$0xff]  }
 0x3a4   :  { %15644 = vmatprep.subr.bf16.mxu0 %v19755_v47  ;;  %7821 = vmatprep.mubr.bf16.mxu1 %v21740_v23  ;;  %v17717_v47 = vcombine.high %v676_v40, %v688_v41  ;;  %v808_v32 = vld [vmem:[#allocation5 + $0x1648] sm:$0xff] }
 0x3a6   :  { %7792 = vmatpush1.bf16.msra.mxu1 %v17548_v51  ;;  %15645 = vmatpush1.bf16.msra.mxu0 %v19753_v52  ;;  %v712_v51 = vld [vmem:[#allocation5 + $0x1348] sm:$0xff]  ;;  %v17716_v52 = vcombine.low %v676_v40, %v688_v41 }
 0x3a7   :  { %7793 = vmatprep.subr.bf16.mxu1 %v17573_v53  ;;  %15646 = vmatprep.subr.bf16.mxu0 %v19758_v3  ;;  %v19774_v53 = vld [vmem:[#allocation8 + $0x480] ss:$24 sps:$4 sm:$0xff]   ;;  %v17741_v3 = vcombine.high %v700_v49, %v712_v51  ;;  %v19791_v40 = vld [vmem:[#allocation8 + $0x574] ss:$24 sps:$4 sm:$0xff]  }
 0x3a8   :  { %v820_v41 = vld [vmem:[#allocation5 + $0x16a8] sm:$0xff] }
 0x3aa   :  { %7794 = vmatpush1.bf16.msra.mxu1 %v17572_v60  ;;  %15647 = vmatpush1.bf16.msra.mxu0 %v19756_v61  ;;  %v736_v60 = vld [vmem:[#allocation5 + $0x1408] sm:$0xff]  ;;  %v17740_v61 = vcombine.low %v700_v49, %v712_v51 }
 0x3ab   :  { %7795 = vmatprep.subr.bf16.mxu1 %v17597_v63  ;;  %15648 = vmatprep.subr.bf16.mxu0 %v19761_v2  ;;  %v19777_v63 = vld [vmem:[#allocation8 + $0x4b0] ss:$24 sps:$4 sm:$0xff]   ;;  %v17765_v2 = vcombine.high %v724_v56, %v736_v60 }
 0x3ac   :  { %v856_v49 = vld [vmem:[#allocation5 + $0x17c8] sm:$0xff] }
 0x3ae   :  { %7796 = vmatpush1.bf16.msra.mxu1 %v17596_v8  ;;  %15649 = vmatpush1.bf16.msra.mxu0 %v19759_v9  ;;  %v760_v8 = vld [vmem:[#allocation5 + $0x14c8] sm:$0xff]  ;;  %v17764_v9 = vcombine.low %v724_v56, %v736_v60 }
 0x3af   :  { %7797 = vmatprep.subr.bf16.mxu1 %v17621_v10  ;;  %15650 = vmatprep.subr.bf16.mxu0 %v19764_v11  ;;  %v21853_v10 = vsub.s32 2, %v21808_v1  ;;  %v19780_v11 = vld [vmem:[#allocation8 + $0x4e0] ss:$24 sps:$4 sm:$0xff]   ;;  %v17789_v13 = vcombine.high %v748_v6, %v760_v8  ;;  %v19795_v60 = vld [vmem:[#allocation8 + $0x5d0] ss:$24 sps:$4 sm:$0xff]  }
 0x3b1   :  { %v1264_v18 = vrot.slane %v21813_v21, %v21853_v10 }
 0x3b2   :  { %7798 = vmatpush1.bf16.msra.mxu1 %v17620_v0  ;;  %15651 = vmatpush1.bf16.msra.mxu0 %v19762_v17  ;;  %v772_v0 = vld [vmem:[#allocation5 + $0x1528] sm:$0xff] }
 0x3b3   :  { %7799 = vmatprep.subr.bf16.mxu1 %v17645_v24  ;;  %15652 = vmatprep.subr.bf16.mxu0 %v19767_v26  ;;  %v784_v17 = vld [vmem:[#allocation5 + $0x1588] sm:$0xff]  ;;  %v21856_v24 = vsub.s32 5, %v21808_v1  ;;  %v17788_v26 = vcombine.low %v748_v6, %v760_v8 }
 0x3b4   :  { %v17812_v33 = vcombine.low %v772_v0, %v784_v17  ;;  %v904_v6 = vld [vmem:[#allocation5 + $0x1948] sm:$0xff] }
 0x3b6   :  { %7800 = vmatpush1.bf16.msra.mxu1 %v17644_v28  ;;  %15653 = vmatpush1.bf16.msra.mxu0 %v19765_v29  ;;  %v17813_v28 = vcombine.high %v772_v0, %v784_v17  ;;  %v1276_v29 = vrot.slane %v21813_v21, %v21856_v24  ;;  %v19803_v0 = vld [vmem:[#allocation8 + $0x634] ss:$24 sps:$4 sm:$0xff]  }
 0x3b7   :  { %7801 = vmatprep.subr.bf16.mxu1 %v17669_v30  ;;  %15654 = vmatprep.subr.bf16.mxu0 %v19770_v31  ;;  %v19788_v30 = vld [vmem:[#allocation8 + $0x544] ss:$24 sps:$4 sm:$0xff]   ;;  %v796_v31 = vld [vmem:[#allocation5 + $0x15e8] sm:$0xff] }
 0x3b8   :  { %v17836_v21 = vcombine.low %v796_v31, %v808_v32  ;;  %v916_v17 = vld [vmem:[#allocation5 + $0x19a8] sm:$0xff] }
 0x3ba   :  { %7802 = vmatpush1.bf16.msra.mxu1 %v17668_v35  ;;  %15655 = vmatpush1.bf16.msra.mxu0 %v19768_v36  ;;  %v19436_v35 = vadd.f32 %v21792_v15, %v1264_v18  ;;  %v19786_v36 = vld [vmem:[#allocation8 + $0x540] ss:$24 sps:$4 sm:$0xff]   ;;  %v19794_v15 = vld [vmem:[#allocation8 + $0x5a4] ss:$24 sps:$4 sm:$0xff]  }
 0x3bb   :  { %7803 = vmatprep.subr.bf16.mxu1 %v17693_v37  ;;  %15656 = vmatprep.subr.bf16.mxu0 %v19773_v39  ;;  %v17837_v37 = vcombine.high %v796_v31, %v808_v32  ;;  %v19439_v39 = vadd.f32 %v21826_v58, %v1276_v29  ;;  %v19792_v58 = vld [vmem:[#allocation8 + $0x5a0] ss:$24 sps:$4 sm:$0xff]   ;;  %v940_v31 = vld [vmem:[#allocation5 + $0x1a68] sm:$0xff] }
 0x3bc   :  { %21436 = vtanh.f32 %v19436_v35  ;;  %v952_v32 = vld [vmem:[#allocation5 + $0x1ac8] sm:$0xff]  ;;  %v19804_v35 = vld [vmem:[#allocation8 + $0x660] ss:$24 sps:$4 sm:$0xff]  }
 0x3bd   :  { %21438 = vtanh.f32 %v19439_v39  ;;  %v964_v39 = vld [vmem:[#allocation5 + $0x1b28] sm:$0xff] }
 0x3be   :  { %7804 = vmatpush1.bf16.msra.mxu1 %v17692_v42  ;;  %15657 = vmatpush1.bf16.msra.mxu0 %v19771_v45  ;;  %v832_v42 = vld [vmem:[#allocation5 + $0x1708] sm:$0xff] }
 0x3bf   :  { %7805 = vmatprep.subr.bf16.mxu1 %v17717_v47  ;;  %15658 = vmatprep.subr.bf16.mxu0 %v19776_v48  ;;  %v19789_v45 = vld [vmem:[#allocation8 + $0x570] ss:$24 sps:$4 sm:$0xff]   ;;  %v17861_v47 = vcombine.high %v820_v41, %v832_v42  ;;  %v17860_v51 = vcombine.low %v820_v41, %v832_v42  ;;  %v17980_v41 = vcombine.low %v940_v31, %v952_v32 }
 0x3c0   :  { %v844_v48 = vld [vmem:[#allocation5 + $0x1768] sm:$0xff] }
 0x3c1   :  { %v17884_v56 = vcombine.low %v844_v48, %v856_v49  ;;  %v19807_v42 = vld [vmem:[#allocation8 + $0x690] ss:$24 sps:$4 sm:$0xff]  }
 0x3c2   :  { %7806 = vmatpush1.bf16.msra.mxu1 %v17716_v52  ;;  %15659 = vmatpush1.bf16.msra.mxu0 %v19774_v53  ;;  %v17885_v52 = vcombine.high %v844_v48, %v856_v49  ;;  %v19797_v53 = vld [vmem:[#allocation8 + $0x5d4] ss:$24 sps:$4 sm:$0xff]   ;;  %v19810_v49 = vld [vmem:[#allocation8 + $0x6c0] ss:$24 sps:$4 sm:$0xff]  }
 0x3c3   :  { %7807 = vmatprep.subr.bf16.mxu1 %v17741_v3  ;;  %15660 = vmatprep.subr.bf16.mxu0 %v19779_v55  ;;  %v868_v3 = vld [vmem:[#allocation5 + $0x1828] sm:$0xff] }
 0x3c4   :  { %v880_v55 = vld [vmem:[#allocation5 + $0x1888] sm:$0xff] }
 0x3c6   :  { %7808 = vmatpush1.bf16.msra.mxu1 %v17740_v61  ;;  %15661 = vmatpush1.bf16.msra.mxu0 %v19777_v63  ;;  %v17909_v61 = vcombine.high %v868_v3, %v880_v55  ;;  %v19800_v63 = vld [vmem:[#allocation8 + $0x604] ss:$24 sps:$4 sm:$0xff]  }
 0x3c7   :  { %7809 = vmatprep.subr.bf16.mxu1 %v17765_v2  ;;  %15662 = vmatprep.subr.bf16.mxu0 %v19782_v5  ;;  %v21437_v2 = vpop.eup %21436  ;;  %v892_v5 = vld [vmem:[#allocation5 + $0x18e8] sm:$0xff] }
 0x3c8   :  { %v21439_v8 = vpop.eup %21438 }
 0x3c9   :  { %v21866_v18 = vpack.c.bf16 %v21439_v8, %v21439_v8  ;;  %v19821_v8 = vld [vmem:[#allocation8 + $0x754] ss:$24 sps:$4 sm:$0xff]  }
 0x3ca   :  { %7810 = vmatpush1.bf16.msra.mxu1 %v17764_v9  ;;  %15663 = vmatpush1.bf16.msra.mxu0 %v19780_v11  ;;  %v17908_v9 = vcombine.low %v868_v3, %v880_v55  ;;  %v19798_v11 = vld [vmem:[#allocation8 + $0x600] ss:$24 sps:$4 sm:$0xff]   ;;  %v19813_v55 = vld [vmem:[#allocation8 + $0x6f0] ss:$24 sps:$4 sm:$0xff]  }
 0x3cb   :  { %7811 = vmatprep.subr.bf16.mxu1 %v17789_v13  ;;  %15664 = vmatprep.subr.bf16.mxu0 %v19785_v16  ;;  %v21864_v13 = vpack.c.bf16 %v21437_v2, %v21437_v2  ;;  %v17933_v16 = vcombine.high %v892_v5, %v904_v6 }
 0x3ce   :  { %7812 = vmatpush1.bf16.msra.mxu1 %v17788_v26  ;;  %15665 = vmatpush1.bf16.msra.mxu0 %v19783_v27  ;;  %v928_v26 = vld [vmem:[#allocation5 + $0x1a08] sm:$0xff]  ;;  %v17932_v27 = vcombine.low %v892_v5, %v904_v6  ;;  %v19816_v5 = vld [vmem:[#allocation8 + $0x720] ss:$24 sps:$4 sm:$0xff]  }
 0x3cf   :  { %7813 = vmatprep.subr.bf16.mxu1 %v17813_v28  ;;  %15666 = vmatprep.subr.bf16.mxu0 %v19788_v30  ;;  %v19801_v28 = vld [vmem:[#allocation8 + $0x630] ss:$24 sps:$4 sm:$0xff]   ;;  %v17957_v29 = vcombine.high %v916_v17, %v928_v26  ;;  %v19806_v30 = vld [vmem:[#allocation8 + $0x664] ss:$24 sps:$4 sm:$0xff]  }
 0x3d2   :  { %7814 = vmatpush1.bf16.msra.mxu1 %v17812_v33  ;;  %15667 = vmatpush1.bf16.msra.mxu0 %v19786_v36  ;;  %v17956_v33 = vcombine.low %v916_v17, %v928_v26  ;;  %v17981_v36 = vcombine.high %v940_v31, %v952_v32  ;;  %v19824_v26 = vld [vmem:[#allocation8 + $0x784] ss:$24 sps:$4 sm:$0xff]   ;;  %v19827_v32 = vld [vmem:[#allocation8 + $0x7b4] ss:$24 sps:$4 sm:$0xff]  }
 0x3d3   :  { %7815 = vmatprep.subr.bf16.mxu1 %v17837_v37  ;;  %15668 = vmatprep.subr.bf16.mxu0 %v19791_v40  ;;  %v19809_v37 = vld [vmem:[#allocation8 + $0x694] ss:$24 sps:$4 sm:$0xff]  }
 0x3d4   :  { %v976_v40 = vld [vmem:[#allocation5 + $0x1b88] sm:$0xff] }
 0x3d5   :  { %v18004_v48 = vcombine.low %v964_v39, %v976_v40 }
 0x3d6   :  { %7816 = vmatpush1.bf16.msra.mxu1 %v17836_v21  ;;  %15669 = vmatpush1.bf16.msra.mxu0 %v19789_v45  ;;  %v18005_v21 = vcombine.high %v964_v39, %v976_v40  ;;  %v19812_v45 = vld [vmem:[#allocation8 + $0x6c4] ss:$24 sps:$4 sm:$0xff]  }
 0x3d7   :  { %7817 = vmatprep.subr.bf16.mxu1 %v17861_v47  ;;  %15670 = vmatprep.subr.bf16.mxu0 %v19794_v15  ;;  %v988_v47 = vld [vmem:[#allocation5 + $0x1be8] sm:$0xff]  ;;  %v19830_v40 = vld [vmem:[#allocation8 + $0x7e4] ss:$24 sps:$4 sm:$0xff]  }
 0x3d8   :  { %v1000_v15 = vld [vmem:[#allocation5 + $0x1c48] sm:$0xff] }
 0x3d9   :  { %v18028_v3 = vcombine.low %v988_v47, %v1000_v15 }
 0x3da   :  { %7818 = vmatpush1.bf16.msra.mxu1 %v17860_v51  ;;  %15671 = vmatpush1.bf16.msra.mxu0 %v19792_v58  ;;  %v18029_v51 = vcombine.high %v988_v47, %v1000_v15  ;;  %v19815_v58 = vld [vmem:[#allocation8 + $0x6f4] ss:$24 sps:$4 sm:$0xff]  }
 0x3db   :  { %7819 = vmatprep.subr.bf16.mxu1 %v17885_v52  ;;  %15672 = vmatprep.subr.bf16.mxu0 %v19797_v53  ;;  %v1012_v52 = vld [vmem:[#allocation5 + $0x1ca8] sm:$0xff] }
 0x3dc   :  { %v1024_v53 = vld [vmem:[#allocation5 + $0x1d08] sm:$0xff] }
 0x3dd   :  { %v18052_v2 = vcombine.low %v1012_v52, %v1024_v53  ;;  %v19833_v15 = vld [vmem:[#allocation8 + $0x814] ss:$24 sps:$4 sm:$0xff]  }
 0x3de   :  { %7820 = vmatpush1.bf16.msra.mxu1 %v17884_v56  ;;  %15673 = vmatpush1.bf16.msra.mxu0 %v19795_v60  ;;  %v18053_v56 = vcombine.high %v1012_v52, %v1024_v53  ;;  %v19818_v60 = vld [vmem:[#allocation8 + $0x724] ss:$24 sps:$4 sm:$0xff]   ;;  %v21875_v52 = vld [vmem:[#allocation7] sm:$0xff] }
 0x3df   :  { %7830 = vmatprep.subr.bf16.mxu1 %v17909_v61  ;;  %15683 = vmatprep.subr.bf16.mxu0 %v19800_v63  ;;  %v1036_v61 = vld [vmem:[#allocation5 + $0x1d68] sm:$0xff] }
 0x3e0   :  { %v1048_v63 = vld [vmem:[#allocation5 + $0x1dc8] sm:$0xff] }
 0x3e1   :  { %7822 = vmatmul.mubr.bf16.vlgmr.msra.gmra.mrb[16].mxu1 %v21746_v25  ;;  %15675 = vmatmul.mubr.bf16.vlgmr.msra.gmra.mrb[16].mxu0 %v21864_v13  ;;  %v18077_v6 = vcombine.high %v1036_v61, %v1048_v63 }
 0x3e2   :  { %7831 = vmatpush1.bf16.msra.mxu1 %v17908_v9  ;;  %15684 = vmatpush1.bf16.msra.mxu0 %v19798_v11  ;;  %v1060_v9 = vld [vmem:[#allocation5 + $0x1e28] sm:$0xff] }
 0x3e3   :  { %15715 = vmatprep.mubr.bf16.mxu0 %v21866_v18  ;;  %7832 = vmatprep.subr.bf16.mxu1 %v17933_v16  ;;  %v1072_v11 = vld [vmem:[#allocation5 + $0x1e88] sm:$0xff]  ;;  %v18076_v16 = vcombine.low %v1036_v61, %v1048_v63 }
 0x3e4   :  { %15685 = vmatprep.subr.bf16.mxu0 %v19803_v0  ;;  %7862 = vmatprep.mubr.bf16.mxu1 %v21748_v34  ;;  %v19819_v0 = vld [vmem:[#allocation8 + $0x750] ss:$24 sps:$4 sm:$0xff]   ;;  %v18101_v17 = vcombine.high %v1060_v9, %v1072_v11 }
 0x3e5   :  { %v1192_v61 = vld [vmem:[#allocation5 + $0x2248] sm:$0xff] }
 0x3e6   :  { %7833 = vmatpush1.bf16.msra.mxu1 %v17932_v27  ;;  %15686 = vmatpush1.bf16.msra.mxu0 %v19801_v28  ;;  %v1084_v27 = vld [vmem:[#allocation5 + $0x1ee8] sm:$0xff] }
 0x3e7   :  { %7834 = vmatprep.subr.bf16.mxu1 %v17957_v29  ;;  %15687 = vmatprep.subr.bf16.mxu0 %v19806_v30  ;;  %v1096_v28 = vld [vmem:[#allocation5 + $0x1f48] sm:$0xff]  ;;  %v18100_v29 = vcombine.low %v1060_v9, %v1072_v11  ;;  %v19822_v30 = vld [vmem:[#allocation8 + $0x780] ss:$24 sps:$4 sm:$0xff]  }
 0x3e8   :  { %v18125_v31 = vcombine.high %v1084_v27, %v1096_v28  ;;  %v1204_v9 = vld [vmem:[#allocation5 + $0x22a8] sm:$0xff] }
 0x3e9   :  { %v1216_v11 = vld [vmem:[#allocation5 + $0x2308] sm:$0xff] }
 0x3ea   :  { %7835 = vmatpush1.bf16.msra.mxu1 %v17956_v33  ;;  %15688 = vmatpush1.bf16.msra.mxu0 %v19804_v35  ;;  %v1108_v33 = vld [vmem:[#allocation5 + $0x1fa8] sm:$0xff] }
 0x3eb   :  { %7836 = vmatprep.subr.bf16.mxu1 %v17981_v36  ;;  %15689 = vmatprep.subr.bf16.mxu0 %v19809_v37  ;;  %v1120_v35 = vld [vmem:[#allocation5 + $0x2008] sm:$0xff]  ;;  %v18124_v36 = vcombine.low %v1084_v27, %v1096_v28 }
 0x3ec   :  { %v19825_v37 = vld [vmem:[#allocation8 + $0x7b0] ss:$24 sps:$4 sm:$0xff]   ;;  %v18149_v39 = vcombine.high %v1108_v33, %v1120_v35 }
 0x3ed   :  { %v1228_v27 = vld [vmem:[#allocation5 + $0x2368] sm:$0xff] }
 0x3ee   :  { %7837 = vmatpush1.bf16.msra.mxu1 %v17980_v41  ;;  %15690 = vmatpush1.bf16.msra.mxu0 %v19807_v42  ;;  %v1132_v41 = vld [vmem:[#allocation5 + $0x2068] sm:$0xff] }
 0x3ef   :  { %7838 = vmatprep.subr.bf16.mxu1 %v18005_v21  ;;  %15691 = vmatprep.subr.bf16.mxu0 %v19812_v45  ;;  %v1144_v42 = vld [vmem:[#allocation5 + $0x20c8] sm:$0xff]  ;;  %v18148_v21 = vcombine.low %v1108_v33, %v1120_v35  ;;  %v19828_v45 = vld [vmem:[#allocation8 + $0x7e0] ss:$24 sps:$4 sm:$0xff]  }
 0x3f0   :  { %v18173_v47 = vcombine.high %v1132_v41, %v1144_v42  ;;  %v1240_v28 = vld [vmem:[#allocation5 + $0x23c8] sm:$0xff]  ;;  %v114_v33 = vld [vmem:[#allocation5 + $0x98] sm:$0xff] }
 0x3f1   :  { %v18268_v35 = vcombine.low %v1228_v27, %v1240_v28 }
 0x3f2   :  { %7839 = vmatpush1.bf16.msra.mxu1 %v18004_v48  ;;  %15692 = vmatpush1.bf16.msra.mxu0 %v19810_v49  ;;  %v1156_v48 = vld [vmem:[#allocation5 + $0x2128] sm:$0xff] }
 0x3f3   :  { %7840 = vmatprep.subr.bf16.mxu1 %v18029_v51  ;;  %15693 = vmatprep.subr.bf16.mxu0 %v19815_v58  ;;  %v1168_v49 = vld [vmem:[#allocation5 + $0x2188] sm:$0xff]  ;;  %v21873_v51 = vsub.s32 4, %v21808_v1  ;;  %v18172_v58 = vcombine.low %v1132_v41, %v1144_v42  ;;  %v138_v41 = vld [vmem:[#allocation5 + $0x158] sm:$0xff] }
 0x3f4   :  { %v18196_v63 = vcombine.low %v1156_v48, %v1168_v49 }
 0x3f5   :  { %v1272_v53 = vrot.slane %v21875_v52, %v21873_v51 }
 0x3f6   :  { %7841 = vmatpush1.bf16.msra.mxu1 %v18028_v3  ;;  %15694 = vmatpush1.bf16.msra.mxu0 %v19813_v55  ;;  %v19831_v3 = vld [vmem:[#allocation8 + $0x810] ss:$24 sps:$4 sm:$0xff]   ;;  %v18197_v55 = vcombine.high %v1156_v48, %v1168_v49  ;;  %v19851_v48 = vld [vmem:[#allocation8 + $0x934] ss:$24 sps:$4 sm:$0xff]   ;;  %v150_v49 = vld [vmem:[#allocation5 + $0x1b8] sm:$0xff] }
 0x3f7   :  { %7842 = vmatprep.subr.bf16.mxu1 %v18053_v56  ;;  %15695 = vmatprep.subr.bf16.mxu0 %v19818_v60  ;;  %v19836_v56 = vld [vmem:[#allocation8 + $0x844] ss:$24 sps:$4 sm:$0xff]   ;;  %v1180_v60 = vld [vmem:[#allocation5 + $0x21e8] sm:$0xff] }
 0x3fa   :  { %7843 = vmatpush1.bf16.msra.mxu1 %v18052_v2  ;;  %15696 = vmatpush1.bf16.msra.mxu0 %v19816_v5  ;;  %v19438_v2 = vadd.f32 %v21824_v54, %v1272_v53  ;;  %v19834_v5 = vld [vmem:[#allocation8 + $0x840] ss:$24 sps:$4 sm:$0xff]   ;;  %v18244_v54 = vcombine.low %v1204_v9, %v1216_v11 }
 0x3fb   :  { %7844 = vmatprep.subr.bf16.mxu1 %v18077_v6  ;;  %15697 = vmatprep.subr.bf16.mxu0 %v19821_v8  ;;  %v18221_v6 = vcombine.high %v1180_v60, %v1192_v61  ;;  %v19839_v8 = vld [vmem:[#allocation8 + $0x874] ss:$24 sps:$4 sm:$0xff]  }
 0x3fc   :  { %21440 = vtanh.f32 %v19438_v2  ;;  %v19852_v2 = vld [vmem:[#allocation8 + $0x960] ss:$24 sps:$4 sm:$0xff]  }
 0x3fe   :  { %7845 = vmatpush1.bf16.msra.mxu1 %v18076_v16  ;;  %15698 = vmatpush1.bf16.msra.mxu0 %v19819_v0  ;;  %v18220_v16 = vcombine.low %v1180_v60, %v1192_v61  ;;  %v19837_v0 = vld [vmem:[#allocation8 + $0x870] ss:$24 sps:$4 sm:$0xff]   ;;  %v174_v60 = vld [vmem:[#allocation5 + $0x278] sm:$0xff] }
 0x3ff   :  { %7846 = vmatprep.subr.bf16.mxu1 %v18101_v17  ;;  %15699 = vmatprep.subr.bf16.mxu0 %v19824_v26  ;;  %v18245_v17 = vcombine.high %v1204_v9, %v1216_v11  ;;  %v19842_v26 = vld [vmem:[#allocation8 + $0x8a4] ss:$24 sps:$4 sm:$0xff]  }
 0x400   :  { %v186_v61 = vld [vmem:[#allocation5 + $0x2d8] sm:$0xff] }
 0x401   :  { %v210_v9 = vld [vmem:[#allocation5 + $0x398] sm:$0xff]  ;;  %v17216_v11 = vcombine.low %v174_v60, %v186_v61 }
 0x402   :  { %7847 = vmatpush1.bf16.msra.mxu1 %v18100_v29  ;;  %15700 = vmatpush1.bf16.msra.mxu0 %v19822_v30  ;;  %v19840_v29 = vld [vmem:[#allocation8 + $0x8a0] ss:$24 sps:$4 sm:$0xff]   ;;  %v18269_v30 = vcombine.high %v1228_v27, %v1240_v28 }
 0x403   :  { %7848 = vmatprep.subr.bf16.mxu1 %v18125_v31  ;;  %15701 = vmatprep.subr.bf16.mxu0 %v19827_v32  ;;  %v19845_v31 = vld [vmem:[#allocation8 + $0x8d4] ss:$24 sps:$4 sm:$0xff]   ;;  %v102_v32 = vld [vmem:[#allocation5 + $0x38] sm:$0xff] }
 0x404   :  { %v234_v27 = vld [vmem:[#allocation5 + $0x458] sm:$0xff] }
 0x406   :  { %7849 = vmatpush1.bf16.msra.mxu1 %v18124_v36  ;;  %15702 = vmatpush1.bf16.msra.mxu0 %v19825_v37  ;;  %v19843_v36 = vld [vmem:[#allocation8 + $0x8d0] ss:$24 sps:$4 sm:$0xff]   ;;  %v17145_v37 = vcombine.high %v102_v32, %v114_v33  ;;  %v21441_v42 = vpop.eup %21440 }
 0x407   :  { %7850 = vmatprep.subr.bf16.mxu1 %v18149_v39  ;;  %15703 = vmatprep.subr.bf16.mxu0 %v19830_v40  ;;  %v19848_v39 = vld [vmem:[#allocation8 + $0x904] ss:$24 sps:$4 sm:$0xff]  }
 0x408   :  { %v126_v40 = vld [vmem:[#allocation5 + $0xf8] sm:$0xff] }
 0x409   :  { %v17168_v53 = vcombine.low %v126_v40, %v138_v41 }
 0x40a   :  { %7851 = vmatpush1.bf16.msra.mxu1 %v18148_v21  ;;  %15704 = vmatpush1.bf16.msra.mxu0 %v19828_v45  ;;  %v17144_v21 = vcombine.low %v102_v32, %v114_v33  ;;  %v19846_v45 = vld [vmem:[#allocation8 + $0x900] ss:$24 sps:$4 sm:$0xff]  }
 0x40b   :  { %7852 = vmatprep.subr.bf16.mxu1 %v18173_v47  ;;  %15705 = vmatprep.subr.bf16.mxu0 %v19833_v15  ;;  %v17169_v47 = vcombine.high %v126_v40, %v138_v41  ;;  %v21880_v15 = vpack.c.bf16 %v21441_v42, %v21441_v42  ;;  %v246_v32 = vld [vmem:[#allocation5 + $0x4b8] sm:$0xff] }
 0x40c   :  { %v258_v33 = vld [vmem:[#allocation5 + $0x518] sm:$0xff] }
 0x40d   :  { %v19866_v41 = vld [vmem:[#allocation8 + $0xa24] ss:$24 sps:$4 sm:$0xff]  }
 0x40e   :  { %7853 = vmatpush1.bf16.msra.mxu1 %v18172_v58  ;;  %15706 = vmatpush1.bf16.msra.mxu0 %v19831_v3  ;;  %v162_v58 = vld [vmem:[#allocation5 + $0x218] sm:$0xff]  ;;  %v19849_v3 = vld [vmem:[#allocation8 + $0x930] ss:$24 sps:$4 sm:$0xff]  }
 0x40f   :  { %7854 = vmatprep.subr.bf16.mxu1 %v18197_v55  ;;  %15707 = vmatprep.subr.bf16.mxu0 %v19836_v56  ;;  %v17193_v55 = vcombine.high %v150_v49, %v162_v58  ;;  %v19854_v56 = vld [vmem:[#allocation8 + $0x964] ss:$24 sps:$4 sm:$0xff]  }
 0x410   :  { %v270_v42 = vld [vmem:[#allocation5 + $0x578] sm:$0xff] }
 0x412   :  { %7855 = vmatpush1.bf16.msra.mxu1 %v18196_v63  ;;  %15708 = vmatpush1.bf16.msra.mxu0 %v19834_v5  ;;  %v17192_v63 = vcombine.low %v150_v49, %v162_v58  ;;  %v17217_v5 = vcombine.high %v174_v60, %v186_v61  ;;  %v17288_v58 = vcombine.low %v246_v32, %v258_v33  ;;  %v19869_v61 = vld [vmem:[#allocation8 + $0xa54] ss:$24 sps:$4 sm:$0xff]  }
 0x413   :  { %7856 = vmatprep.subr.bf16.mxu1 %v18221_v6  ;;  %15709 = vmatprep.subr.bf16.mxu0 %v19839_v8  ;;  %v19857_v6 = vld [vmem:[#allocation8 + $0x994] ss:$24 sps:$4 sm:$0xff]   ;;  %v198_v8 = vld [vmem:[#allocation5 + $0x338] sm:$0xff] }
 0x414   :  { %v17240_v28 = vcombine.low %v198_v8, %v210_v9 }
 0x416   :  { %7857 = vmatpush1.bf16.msra.mxu1 %v18220_v16  ;;  %15710 = vmatpush1.bf16.msra.mxu0 %v19837_v0  ;;  %v19855_v16 = vld [vmem:[#allocation8 + $0x990] ss:$24 sps:$4 sm:$0xff]   ;;  %v17241_v0 = vcombine.high %v198_v8, %v210_v9 }
 0x417   :  { %7858 = vmatprep.subr.bf16.mxu1 %v18245_v17  ;;  %15711 = vmatprep.subr.bf16.mxu0 %v19842_v26  ;;  %v19860_v17 = vld [vmem:[#allocation8 + $0x9c4] ss:$24 sps:$4 sm:$0xff]   ;;  %v19867_v8 = vld [vmem:[#allocation8 + $0xa50] ss:$24 sps:$4 sm:$0xff]  }
 0x418   :  { %v222_v26 = vld [vmem:[#allocation5 + $0x3f8] sm:$0xff] }
 0x41a   :  { %7859 = vmatpush1.bf16.msra.mxu1 %v18244_v54  ;;  %15712 = vmatpush1.bf16.msra.mxu0 %v19840_v29  ;;  %v21886_v54 = vsub.s32 7, %v21808_v1  ;;  %v19858_v29 = vld [vmem:[#allocation8 + $0x9c0] ss:$24 sps:$4 sm:$0xff]  }
 0x41b   :  { %7860 = vmatprep.subr.bf16.mxu1 %v18269_v30  ;;  %15713 = vmatprep.subr.bf16.mxu0 %v19845_v31  ;;  %v17265_v30 = vcombine.high %v222_v26, %v234_v27  ;;  %v19863_v31 = vld [vmem:[#allocation8 + $0x9f4] ss:$24 sps:$4 sm:$0xff]  }
 0x41e   :  { %7861 = vmatpush1.bf16.msra.mxu1 %v18268_v35  ;;  %15714 = vmatpush1.bf16.msra.mxu0 %v19843_v36  ;;  %v1284_v35 = vrot.slane %v21875_v52, %v21886_v54  ;;  %v17264_v36 = vcombine.low %v222_v26, %v234_v27  ;;  %v19870_v26 = vld [vmem:[#allocation8 + $0xa80] ss:$24 sps:$4 sm:$0xff]  }
 0x41f   :  { %7994 = vmatprep.subr.bf16.mxu1 %v17145_v37  ;;  %15724 = vmatprep.subr.bf16.mxu0 %v19848_v39  ;;  %v19861_v37 = vld [vmem:[#allocation8 + $0x9f0] ss:$24 sps:$4 sm:$0xff]   ;;  %v17289_v39 = vcombine.high %v246_v32, %v258_v33 }
 0x421   :  { %7863 = vmatmul.mubr.bf16.vlgmr.msra.gmra.mrb[16].mxu1 %v21754_v38  ;;  %15716 = vmatmul.mubr.bf16.vlgmr.msra.gmra.mrb[16].mxu0 %v21880_v15 }
 0x422   :  { %7995 = vmatpush1.bf16.msra.mxu1 %v17144_v21  ;;  %15725 = vmatpush1.bf16.msra.mxu0 %v19846_v45  ;;  %v282_v21 = vld [vmem:[#allocation5 + $0x5d8] sm:$0xff] }
 0x423   :  { %7996 = vmatprep.subr.bf16.mxu1 %v17169_v47  ;;  %15726 = vmatprep.subr.bf16.mxu0 %v19851_v48 }
 0x424   :  { %8026 = vmatprep.mubr.bf16.mxu1 %v21734_v57 }
 0x426   :  { %7997 = vmatpush1.bf16.msra.mxu1 %v17168_v53  ;;  %15727 = vmatpush1.bf16.msra.mxu0 %v19849_v3 }
 0x427   :  { %7998 = vmatprep.subr.bf16.mxu1 %v17193_v55  ;;  %15728 = vmatprep.subr.bf16.mxu0 %v19854_v56  ;;  %v19864_v55 = vld [vmem:[#allocation8 + $0xa20] ss:$24 sps:$4 sm:$0xff]   ;;  %v17313_v56 = vcombine.high %v270_v42, %v282_v21 }
 0x42a   :  { %7999 = vmatpush1.bf16.msra.mxu1 %v17192_v63  ;;  %15729 = vmatpush1.bf16.msra.mxu0 %v19852_v2  ;;  %v294_v63 = vld [vmem:[#allocation5 + $0x638] sm:$0xff] }
 0x42b   :  { %8000 = vmatprep.subr.bf16.mxu1 %v17217_v5  ;;  %15730 = vmatprep.subr.bf16.mxu0 %v19857_v6  ;;  %v306_v2 = vld [vmem:[#allocation5 + $0x698] sm:$0xff]  ;;  %v17312_v6 = vcombine.low %v270_v42, %v282_v21  ;;  %v21900_v21 = vsub.s32 6, %v21808_v1 }
 0x42c   :  { %v17337_v9 = vcombine.high %v294_v63, %v306_v2 }
 0x42e   :  { %8001 = vmatpush1.bf16.msra.mxu1 %v17216_v11  ;;  %15731 = vmatpush1.bf16.msra.mxu0 %v19855_v16  ;;  %v19872_v11 = vld [vmem:[#allocation8 + $0xa84] ss:$24 sps:$4 sm:$0xff]  }
 0x42f   :  { %8002 = vmatprep.subr.bf16.mxu1 %v17241_v0  ;;  %15732 = vmatprep.subr.bf16.mxu0 %v19860_v17  ;;  %v318_v16 = vld [vmem:[#allocation5 + $0x6f8] sm:$0xff]  ;;  %v17336_v17 = vcombine.low %v294_v63, %v306_v2 }
 0x430   :  { %v330_v0 = vld [vmem:[#allocation5 + $0x758] sm:$0xff] }
 0x431   :  { %v17361_v27 = vcombine.high %v318_v16, %v330_v0  ;;  %v17360_v32 = vcombine.low %v318_v16, %v330_v0  ;;  %v19884_v2 = vld [vmem:[#allocation8 + $0xb44] ss:$24 sps:$4 sm:$0xff]   ;;  %v19887_v0 = vld [vmem:[#allocation8 + $0xb74] ss:$24 sps:$4 sm:$0xff]  }
 0x432   :  { %8003 = vmatpush1.bf16.msra.mxu1 %v17240_v28  ;;  %15733 = vmatpush1.bf16.msra.mxu0 %v19858_v29  ;;  %v19875_v28 = vld [vmem:[#allocation8 + $0xab4] ss:$24 sps:$4 sm:$0xff]   ;;  %v342_v29 = vld [vmem:[#allocation5 + $0x7b8] sm:$0xff] }
 0x433   :  { %8004 = vmatprep.subr.bf16.mxu1 %v17265_v30  ;;  %15734 = vmatprep.subr.bf16.mxu0 %v19863_v31  ;;  %v354_v30 = vld [vmem:[#allocation5 + $0x818] sm:$0xff] }
 0x434   :  { %v21890_v40 = vpop.f32.mrb[12].mxu1  ;;  %v21892_v47 = vpop.f32.mrb[12].mxu0  ;;  %v17384_v42 = vcombine.low %v342_v29, %v354_v30 }
 0x435   :  { %v7620_v45 = vpop.f32.mrb[13].mxu1  ;;  %v21894_v53 = vpop.f32.mrb[13].mxu0 }
 0x436   :  { %v19441_v48 = vadd.f32 %v7620_v45, %v1284_v35  ;;  %v7622_v49 = vpop.f32.mrb[14].mxu1  ;;  %8005 = vmatpush1.bf16.msra.mxu1 %v17264_v36  ;;  %15735 = vmatpush1.bf16.msra.mxu0 %v19861_v37  ;;  %v8483_v60 = vpop.f32.mrb[14].mxu0  ;;  %v19873_v35 = vld [vmem:[#allocation8 + $0xab0] ss:$24 sps:$4 sm:$0xff]   ;;  %v17385_v36 = vcombine.high %v342_v29, %v354_v30  ;;  %v19878_v37 = vld [vmem:[#allocation8 + $0xae4] ss:$24 sps:$4 sm:$0xff]  }
 0x437   :  { %v7623_v3 = vpop.f32.mrb[15].mxu1  ;;  %8006 = vmatprep.subr.bf16.mxu1 %v17289_v39  ;;  %15736 = vmatprep.subr.bf16.mxu0 %v19866_v41  ;;  %v8484_v5 = vpop.f32.mrb[15].mxu0  ;;  %v366_v39 = vld [vmem:[#allocation5 + $0x878] sm:$0xff]  ;;  %v19881_v49 = vld [vmem:[#allocation8 + $0xb14] ss:$24 sps:$4 sm:$0xff]   ;;  %v1280_v60 = vrot.slane %v21875_v52, %v21900_v21 }
 0x438   :  { %21442 = vtanh.f32 %v19441_v48  ;;  %v378_v41 = vld [vmem:[#allocation5 + $0x8d8] sm:$0xff] }
 0x439   :  { %v19876_v45 = vld [vmem:[#allocation8 + $0xae0] ss:$24 sps:$4 sm:$0xff]   ;;  %v17409_v48 = vcombine.high %v366_v39, %v378_v41 }
 0x43a   :  { %8007 = vmatpush1.bf16.msra.mxu1 %v17288_v58  ;;  %15737 = vmatpush1.bf16.msra.mxu0 %v19864_v55  ;;  %v390_v58 = vld [vmem:[#allocation5 + $0x938] sm:$0xff]  ;;  %v21902_v55 = vld [vmem:[#allocation7 + $0x8] sm:$0xff] }
 0x43b   :  { %8008 = vmatprep.subr.bf16.mxu1 %v17313_v56  ;;  %15738 = vmatprep.subr.bf16.mxu0 %v19869_v61  ;;  %v402_v3 = vld [vmem:[#allocation5 + $0x998] sm:$0xff]  ;;  %v17408_v56 = vcombine.low %v366_v39, %v378_v41  ;;  %v19879_v61 = vld [vmem:[#allocation8 + $0xb10] ss:$24 sps:$4 sm:$0xff]   ;;  %v1292_v63 = vrot.slane %v21902_v55, %v21811_v14 }
 0x43c   :  { %v17433_v1 = vcombine.high %v390_v58, %v402_v3  ;;  %v414_v5 = vld [vmem:[#allocation5 + $0x9f8] sm:$0xff] }
 0x43d   :  { %v19443_v52 = vadd.f32 %v21778_v7, %v1292_v63  ;;  %v462_v30 = vld [vmem:[#allocation5 + $0xb78] sm:$0xff] }
 0x43e   :  { %8009 = vmatpush1.bf16.msra.mxu1 %v17312_v6  ;;  %15739 = vmatpush1.bf16.msra.mxu0 %v19867_v8  ;;  %v426_v6 = vld [vmem:[#allocation5 + $0xa58] sm:$0xff]  ;;  %v17432_v8 = vcombine.low %v390_v58, %v402_v3 }
 0x43f   :  { %8010 = vmatprep.subr.bf16.mxu1 %v17337_v9  ;;  %15740 = vmatprep.subr.bf16.mxu0 %v19872_v11  ;;  %v19440_v9 = vadd.f32 %v21890_v40, %v1280_v60  ;;  %v19882_v11 = vld [vmem:[#allocation8 + $0xb40] ss:$24 sps:$4 sm:$0xff]   ;;  %v17457_v16 = vcombine.high %v414_v5, %v426_v6  ;;  %v19890_v40 = vld [vmem:[#allocation8 + $0xba4] ss:$24 sps:$4 sm:$0xff]  }
 0x440   :  { %v19888_v7 = vld [vmem:[#allocation8 + $0xba0] ss:$24 sps:$4 sm:$0xff]  }
 0x441   :  { %21444 = vtanh.f32 %v19440_v9  ;;  %v498_v39 = vld [vmem:[#allocation5 + $0xc98] sm:$0xff] }
 0x442   :  { %v21443_v31 = vpop.eup %21442  ;;  %8011 = vmatpush1.bf16.msra.mxu1 %v17336_v17  ;;  %15741 = vmatpush1.bf16.msra.mxu0 %v19870_v26  ;;  %v438_v17 = vld [vmem:[#allocation5 + $0xab8] sm:$0xff]  ;;  %21446 = vtanh.f32 %v19443_v52 }
 0x443   :  { %v21896_v33 = vpack.c.bf16 %v21443_v31, %v21443_v31  ;;  %8012 = vmatprep.subr.bf16.mxu1 %v17361_v27  ;;  %15742 = vmatprep.subr.bf16.mxu0 %v19875_v28  ;;  %v450_v26 = vld [vmem:[#allocation5 + $0xb18] sm:$0xff]  ;;  %v17456_v27 = vcombine.low %v414_v5, %v426_v6  ;;  %v19885_v28 = vld [vmem:[#allocation8 + $0xb70] ss:$24 sps:$4 sm:$0xff]  }
 0x444   :  { %v17481_v29 = vcombine.high %v438_v17, %v450_v26  ;;  %v474_v31 = vld [vmem:[#allocation5 + $0xbd8] sm:$0xff] }
 0x445   :  { %15756 = vmatprep.mubr.bf16.mxu0 %v21896_v33  ;;  %v17504_v41 = vcombine.low %v462_v30, %v474_v31  ;;  %v510_v58 = vld [vmem:[#allocation5 + $0xcf8] sm:$0xff] }
 0x446   :  { %8013 = vmatpush1.bf16.msra.mxu1 %v17360_v32  ;;  %15743 = vmatpush1.bf16.msra.mxu0 %v19873_v35  ;;  %v17480_v32 = vcombine.low %v438_v17, %v450_v26  ;;  %v17505_v35 = vcombine.high %v462_v30, %v474_v31  ;;  %v522_v3 = vld [vmem:[#allocation5 + $0xd58] sm:$0xff] }
 0x447   :  { %8014 = vmatprep.subr.bf16.mxu1 %v17385_v36  ;;  %15744 = vmatprep.subr.bf16.mxu0 %v19878_v37  ;;  %v19893_v36 = vld [vmem:[#allocation8 + $0xbd4] ss:$24 sps:$4 sm:$0xff]   ;;  %v486_v37 = vld [vmem:[#allocation5 + $0xc38] sm:$0xff]  ;;  %v17553_v63 = vcombine.high %v510_v58, %v522_v3  ;;  %v17552_v9 = vcombine.low %v510_v58, %v522_v3  ;;  %v19909_v3 = vld [vmem:[#allocation8 + $0xcf0] ss:$24 sps:$4 sm:$0xff]  }
 0x448   :  { %v17528_v60 = vcombine.low %v486_v37, %v498_v39  ;;  %v534_v5 = vld [vmem:[#allocation5 + $0xdb8] sm:$0xff] }
 0x449   :  { %v546_v6 = vld [vmem:[#allocation5 + $0xe18] sm:$0xff] }
 0x44a   :  { %8015 = vmatpush1.bf16.msra.mxu1 %v17384_v42  ;;  %15745 = vmatpush1.bf16.msra.mxu0 %v19876_v45  ;;  %v19891_v42 = vld [vmem:[#allocation8 + $0xbd0] ss:$24 sps:$4 sm:$0xff]   ;;  %v17529_v45 = vcombine.high %v486_v37, %v498_v39  ;;  %v19902_v52 = vld [vmem:[#allocation8 + $0xc64] ss:$24 sps:$4 sm:$0xff]   ;;  %v17576_v26 = vcombine.low %v534_v5, %v546_v6 }
 0x44b   :  { %8016 = vmatprep.subr.bf16.mxu1 %v17409_v48  ;;  %15746 = vmatprep.subr.bf16.mxu0 %v19881_v49  ;;  %v19896_v48 = vld [vmem:[#allocation8 + $0xc04] ss:$24 sps:$4 sm:$0xff]   ;;  %v21445_v49 = vpop.eup %21444 }
 0x44c   :  { %v570_v17 = vld [vmem:[#allocation5 + $0xed8] sm:$0xff] }
 0x44d   :  { %v594_v30 = vld [vmem:[#allocation5 + $0xf98] sm:$0xff] }
 0x44e   :  { %8017 = vmatpush1.bf16.msra.mxu1 %v17408_v56  ;;  %15747 = vmatpush1.bf16.msra.mxu0 %v19879_v61  ;;  %v21447_v56 = vpop.eup %21446  ;;  %v19894_v61 = vld [vmem:[#allocation8 + $0xc00] ss:$24 sps:$4 sm:$0xff]  }
 0x44f   :  { %8018 = vmatprep.subr.bf16.mxu1 %v17433_v1  ;;  %15748 = vmatprep.subr.bf16.mxu0 %v19884_v2  ;;  %v21910_v1 = vpack.c.bf16 %v21445_v49, %v21445_v49  ;;  %v19899_v2 = vld [vmem:[#allocation8 + $0xc34] ss:$24 sps:$4 sm:$0xff]   ;;  %v618_v37 = vld [vmem:[#allocation5 + $0x1058] sm:$0xff] }
 0x450   :  { %v642_v49 = vld [vmem:[#allocation5 + $0x1118] sm:$0xff] }
 0x452   :  { %8019 = vmatpush1.bf16.msra.mxu1 %v17432_v8  ;;  %15749 = vmatpush1.bf16.msra.mxu0 %v19882_v11  ;;  %v21912_v8 = vpack.c.bf16 %v21447_v56, %v21447_v56  ;;  %v19897_v11 = vld [vmem:[#allocation8 + $0xc30] ss:$24 sps:$4 sm:$0xff]  }
 0x453   :  { %8020 = vmatprep.subr.bf16.mxu1 %v17457_v16  ;;  %15750 = vmatprep.subr.bf16.mxu0 %v19887_v0  ;;  %v17577_v16 = vcombine.high %v534_v5, %v546_v6  ;;  %v558_v0 = vld [vmem:[#allocation5 + $0xe78] sm:$0xff] }
 0x454   :  { %v17600_v31 = vcombine.low %v558_v0, %v570_v17  ;;  %v19912_v5 = vld [vmem:[#allocation8 + $0xd20] ss:$24 sps:$4 sm:$0xff]  }
 0x456   :  { %8021 = vmatpush1.bf16.msra.mxu1 %v17456_v27  ;;  %15751 = vmatpush1.bf16.msra.mxu0 %v19885_v28  ;;  %v19900_v27 = vld [vmem:[#allocation8 + $0xc60] ss:$24 sps:$4 sm:$0xff]   ;;  %v17601_v28 = vcombine.high %v558_v0, %v570_v17  ;;  %v19915_v0 = vld [vmem:[#allocation8 + $0xd50] ss:$24 sps:$4 sm:$0xff]  }
 0x457   :  { %8022 = vmatprep.subr.bf16.mxu1 %v17481_v29  ;;  %15752 = vmatprep.subr.bf16.mxu0 %v19890_v40  ;;  %v19905_v29 = vld [vmem:[#allocation8 + $0xc94] ss:$24 sps:$4 sm:$0xff]   ;;  %v582_v40 = vld [vmem:[#allocation5 + $0xf38] sm:$0xff] }
 0x458   :  { %v17624_v39 = vcombine.low %v582_v40, %v594_v30 }
 0x45a   :  { %8023 = vmatpush1.bf16.msra.mxu1 %v17480_v32  ;;  %15753 = vmatpush1.bf16.msra.mxu0 %v19888_v7  ;;  %v19903_v32 = vld [vmem:[#allocation8 + $0xc90] ss:$24 sps:$4 sm:$0xff]   ;;  %v17625_v7 = vcombine.high %v582_v40, %v594_v30  ;;  %v19918_v40 = vld [vmem:[#allocation8 + $0xd80] ss:$24 sps:$4 sm:$0xff]  }
 0x45b   :  { %8024 = vmatprep.subr.bf16.mxu1 %v17505_v35  ;;  %15754 = vmatprep.subr.bf16.mxu0 %v19893_v36  ;;  %v19908_v35 = vld [vmem:[#allocation8 + $0xcc4] ss:$24 sps:$4 sm:$0xff]  }
 0x45c   :  { %v606_v36 = vld [vmem:[#allocation5 + $0xff8] sm:$0xff] }
 0x45d   :  { %v17648_v58 = vcombine.low %v606_v36, %v618_v37 }
 0x45e   :  { %8025 = vmatpush1.bf16.msra.mxu1 %v17504_v41  ;;  %15755 = vmatpush1.bf16.msra.mxu0 %v19891_v42  ;;  %v19906_v41 = vld [vmem:[#allocation8 + $0xcc0] ss:$24 sps:$4 sm:$0xff]   ;;  %v17649_v42 = vcombine.high %v606_v36, %v618_v37  ;;  %v19921_v36 = vld [vmem:[#allocation8 + $0xdb0] ss:$24 sps:$4 sm:$0xff]  }
 0x45f   :  { %8035 = vmatprep.subr.bf16.mxu1 %v17529_v45  ;;  %15765 = vmatprep.subr.bf16.mxu0 %v19896_v48  ;;  %v19911_v45 = vld [vmem:[#allocation8 + $0xcf4] ss:$24 sps:$4 sm:$0xff]   ;;  %v630_v48 = vld [vmem:[#allocation5 + $0x10b8] sm:$0xff] }
 0x460   :  { %v17673_v56 = vcombine.high %v630_v48, %v642_v49 }
 0x461   :  { %8027 = vmatmul.mubr.bf16.vlgmr.msra.gmra.mrb[20].mxu1 %v21738_v12  ;;  %15757 = vmatmul.mubr.bf16.vlgmr.msra.gmra.mrb[16].mxu0 %v21910_v1 }
 0x462   :  { %8036 = vmatpush1.bf16.msra.mxu1 %v17528_v60  ;;  %15766 = vmatpush1.bf16.msra.mxu0 %v19894_v61  ;;  %v19914_v60 = vld [vmem:[#allocation8 + $0xd24] ss:$24 sps:$4 sm:$0xff]  }
 0x463   :  { %15797 = vmatprep.mubr.bf16.mxu0 %v21912_v8  ;;  %8037 = vmatprep.subr.bf16.mxu1 %v17553_v63  ;;  %v654_v61 = vld [vmem:[#allocation5 + $0x1178] sm:$0xff] }
 0x464   :  { %15767 = vmatprep.subr.bf16.mxu0 %v19899_v2  ;;  %8067 = vmatprep.mubr.bf16.mxu1 %v21740_v23  ;;  %v666_v63 = vld [vmem:[#allocation5 + $0x11d8] sm:$0xff]  ;;  %v17672_v2 = vcombine.low %v630_v48, %v642_v49 }
 0x465   :  { %v17697_v6 = vcombine.high %v654_v61, %v666_v63  ;;  %v19924_v48 = vld [vmem:[#allocation8 + $0xde0] ss:$24 sps:$4 sm:$0xff]  }
 0x466   :  { %8038 = vmatpush1.bf16.msra.mxu1 %v17552_v9  ;;  %15768 = vmatpush1.bf16.msra.mxu0 %v19897_v11  ;;  %v19917_v9 = vld [vmem:[#allocation8 + $0xd54] ss:$24 sps:$4 sm:$0xff]   ;;  %v678_v11 = vld [vmem:[#allocation5 + $0x1238] sm:$0xff] }
 0x467   :  { %8039 = vmatprep.subr.bf16.mxu1 %v17577_v16  ;;  %15769 = vmatprep.subr.bf16.mxu0 %v19902_v52  ;;  %v690_v16 = vld [vmem:[#allocation5 + $0x1298] sm:$0xff]  ;;  %v17696_v52 = vcombine.low %v654_v61, %v666_v63  ;;  %v1288_v61 = vrot.slane %v21902_v55, %v21833_v43  ;;  %v19927_v63 = vld [vmem:[#allocation8 + $0xe10] ss:$24 sps:$4 sm:$0xff]  }
 0x468   :  { %v17721_v17 = vcombine.high %v678_v11, %v690_v16 }
 0x46a   :  { %8040 = vmatpush1.bf16.msra.mxu1 %v17576_v26  ;;  %15770 = vmatpush1.bf16.msra.mxu0 %v19900_v27  ;;  %v19920_v26 = vld [vmem:[#allocation8 + $0xd84] ss:$24 sps:$4 sm:$0xff]  }
 0x46b   :  { %8041 = vmatprep.subr.bf16.mxu1 %v17601_v28  ;;  %15771 = vmatprep.subr.bf16.mxu0 %v19905_v29  ;;  %v702_v27 = vld [vmem:[#allocation5 + $0x12f8] sm:$0xff]  ;;  %v17720_v29 = vcombine.low %v678_v11, %v690_v16  ;;  %v19442_v16 = vadd.f32 %v21776_v4, %v1288_v61 }
 0x46c   :  { %v714_v28 = vld [vmem:[#allocation5 + $0x1358] sm:$0xff] }
 0x46d   :  { %v17745_v30 = vcombine.high %v702_v27, %v714_v28  ;;  %21448 = vtanh.f32 %v19442_v16  ;;  %v19942_v61 = vld [vmem:[#allocation8 + $0xf00] ss:$24 sps:$4 sm:$0xff]   ;;  %v19945_v16 = vld [vmem:[#allocation8 + $0xf30] ss:$24 sps:$4 sm:$0xff]  }
 0x46e   :  { %8042 = vmatpush1.bf16.msra.mxu1 %v17600_v31  ;;  %15772 = vmatpush1.bf16.msra.mxu0 %v19903_v32  ;;  %v19923_v31 = vld [vmem:[#allocation8 + $0xdb4] ss:$24 sps:$4 sm:$0xff]   ;;  %v726_v32 = vld [vmem:[#allocation5 + $0x13b8] sm:$0xff] }
 0x46f   :  { %8043 = vmatprep.subr.bf16.mxu1 %v17625_v7  ;;  %15773 = vmatprep.subr.bf16.mxu0 %v19908_v35  ;;  %v738_v7 = vld [vmem:[#allocation5 + $0x1418] sm:$0xff]  ;;  %v17744_v35 = vcombine.low %v702_v27, %v714_v28 }
 0x470   :  { %v17769_v37 = vcombine.high %v726_v32, %v738_v7  ;;  %v834_v27 = vld [vmem:[#allocation5 + $0x1718] sm:$0xff] }
 0x472   :  { %8044 = vmatpush1.bf16.msra.mxu1 %v17624_v39  ;;  %15774 = vmatpush1.bf16.msra.mxu0 %v19906_v41  ;;  %v19926_v39 = vld [vmem:[#allocation8 + $0xde4] ss:$24 sps:$4 sm:$0xff]  }
 0x473   :  { %8045 = vmatprep.subr.bf16.mxu1 %v17649_v42  ;;  %15775 = vmatprep.subr.bf16.mxu0 %v19911_v45  ;;  %v750_v41 = vld [vmem:[#allocation5 + $0x1478] sm:$0xff]  ;;  %v17768_v45 = vcombine.low %v726_v32, %v738_v7 }
 0x474   :  { %v762_v42 = vld [vmem:[#allocation5 + $0x14d8] sm:$0xff] }
 0x475   :  { %v17793_v49 = vcombine.high %v750_v41, %v762_v42  ;;  %v858_v32 = vld [vmem:[#allocation5 + $0x17d8] sm:$0xff] }
 0x476   :  { %8046 = vmatpush1.bf16.msra.mxu1 %v17648_v58  ;;  %15776 = vmatpush1.bf16.msra.mxu0 %v19909_v3  ;;  %v19929_v58 = vld [vmem:[#allocation8 + $0xe14] ss:$24 sps:$4 sm:$0xff]   ;;  %v774_v3 = vld [vmem:[#allocation5 + $0x1538] sm:$0xff] }
 0x477   :  { %8047 = vmatprep.subr.bf16.mxu1 %v17673_v56  ;;  %15777 = vmatprep.subr.bf16.mxu0 %v19914_v60  ;;  %v786_v56 = vld [vmem:[#allocation5 + $0x1598] sm:$0xff]  ;;  %v17792_v60 = vcombine.low %v750_v41, %v762_v42  ;;  %v19939_v42 = vld [vmem:[#allocation8 + $0xed0] ss:$24 sps:$4 sm:$0xff]  }
 0x478   :  { %v17816_v11 = vcombine.low %v774_v3, %v786_v56  ;;  %v19936_v7 = vld [vmem:[#allocation8 + $0xea0] ss:$24 sps:$4 sm:$0xff]  }
 0x47a   :  { %8048 = vmatpush1.bf16.msra.mxu1 %v17672_v2  ;;  %15778 = vmatpush1.bf16.msra.mxu0 %v19912_v5  ;;  %v17817_v2 = vcombine.high %v774_v3, %v786_v56  ;;  %v19932_v5 = vld [vmem:[#allocation8 + $0xe44] ss:$24 sps:$4 sm:$0xff]   ;;  %v21449_v3 = vpop.eup %21448 }
 0x47b   :  { %8049 = vmatprep.subr.bf16.mxu1 %v17697_v6  ;;  %15779 = vmatprep.subr.bf16.mxu0 %v19917_v9  ;;  %v798_v6 = vld [vmem:[#allocation5 + $0x15f8] sm:$0xff] }
 0x47c   :  { %v810_v9 = vld [vmem:[#allocation5 + $0x1658] sm:$0xff] }
 0x47d   :  { %v17840_v28 = vcombine.low %v798_v6, %v810_v9 }
 0x47e   :  { %8050 = vmatpush1.bf16.msra.mxu1 %v17696_v52  ;;  %15780 = vmatpush1.bf16.msra.mxu0 %v19915_v0  ;;  %v19930_v52 = vld [vmem:[#allocation8 + $0xe40] ss:$24 sps:$4 sm:$0xff]   ;;  %v17841_v0 = vcombine.high %v798_v6, %v810_v9  ;;  %v19947_v6 = vld [vmem:[#allocation8 + $0xf34] ss:$24 sps:$4 sm:$0xff]  }
 0x47f   :  { %8051 = vmatprep.subr.bf16.mxu1 %v17721_v17  ;;  %15781 = vmatprep.subr.bf16.mxu0 %v19920_v26  ;;  %v19935_v17 = vld [vmem:[#allocation8 + $0xe74] ss:$24 sps:$4 sm:$0xff]   ;;  %v822_v26 = vld [vmem:[#allocation5 + $0x16b8] sm:$0xff] }
 0x480   :  { %v17864_v4 = vcombine.low %v822_v26, %v834_v27 }
 0x482   :  { %8052 = vmatpush1.bf16.msra.mxu1 %v17720_v29  ;;  %15782 = vmatpush1.bf16.msra.mxu0 %v19918_v40  ;;  %v19933_v29 = vld [vmem:[#allocation8 + $0xe70] ss:$24 sps:$4 sm:$0xff]   ;;  %v17865_v40 = vcombine.high %v822_v26, %v834_v27 }
 0x483   :  { %8053 = vmatprep.subr.bf16.mxu1 %v17745_v30  ;;  %15783 = vmatprep.subr.bf16.mxu0 %v19923_v31  ;;  %v19938_v30 = vld [vmem:[#allocation8 + $0xea4] ss:$24 sps:$4 sm:$0xff]  }
 0x484   :  { %v846_v31 = vld [vmem:[#allocation5 + $0x1778] sm:$0xff] }
 0x485   :  { %v17888_v41 = vcombine.low %v846_v31, %v858_v32 }
 0x486   :  { %8054 = vmatpush1.bf16.msra.mxu1 %v17744_v35  ;;  %15784 = vmatpush1.bf16.msra.mxu0 %v19921_v36  ;;  %v17889_v35 = vcombine.high %v846_v31, %v858_v32  ;;  %v19941_v36 = vld [vmem:[#allocation8 + $0xed4] ss:$24 sps:$4 sm:$0xff]  }
 0x487   :  { %8055 = vmatprep.subr.bf16.mxu1 %v17769_v37  ;;  %15785 = vmatprep.subr.bf16.mxu0 %v19926_v39  ;;  %v870_v37 = vld [vmem:[#allocation5 + $0x1838] sm:$0xff] }
 0x488   :  { %v882_v39 = vld [vmem:[#allocation5 + $0x1898] sm:$0xff] }
 0x489   :  { %v17912_v56 = vcombine.low %v870_v37, %v882_v39 }
 0x48a   :  { %8056 = vmatpush1.bf16.msra.mxu1 %v17768_v45  ;;  %15786 = vmatpush1.bf16.msra.mxu0 %v19924_v48  ;;  %v17913_v45 = vcombine.high %v870_v37, %v882_v39  ;;  %v894_v48 = vld [vmem:[#allocation5 + $0x18f8] sm:$0xff] }
 0x48b   :  { %8057 = vmatprep.subr.bf16.mxu1 %v17793_v49  ;;  %15787 = vmatprep.subr.bf16.mxu0 %v19929_v58  ;;  %v906_v49 = vld [vmem:[#allocation5 + $0x1958] sm:$0xff] }
 0x48c   :  { %v19944_v58 = vld [vmem:[#allocation8 + $0xf04] ss:$24 sps:$4 sm:$0xff]   ;;  %v17936_v9 = vcombine.low %v894_v48, %v906_v49 }
 0x48e   :  { %8058 = vmatpush1.bf16.msra.mxu1 %v17792_v60  ;;  %15788 = vmatpush1.bf16.msra.mxu0 %v19927_v63  ;;  %v17937_v60 = vcombine.high %v894_v48, %v906_v49  ;;  %v21921_v63 = vpack.c.bf16 %v21449_v3, %v21449_v3  ;;  %v19959_v48 = vld [vmem:[#allocation8 + $0xff4] ss:$24 sps:$4 sm:$0xff]   ;;  %v19957_v3 = vld [vmem:[#allocation8 + $0xff0] ss:$24 sps:$4 sm:$0xff]  }
 0x48f   :  { %8059 = vmatprep.subr.bf16.mxu1 %v17817_v2  ;;  %15789 = vmatprep.subr.bf16.mxu0 %v19932_v5  ;;  %v918_v2 = vld [vmem:[#allocation5 + $0x19b8] sm:$0xff] }
 0x490   :  { %v930_v5 = vld [vmem:[#allocation5 + $0x1a18] sm:$0xff] }
 0x491   :  { %v17960_v26 = vcombine.low %v918_v2, %v930_v5 }
 0x492   :  { %8060 = vmatpush1.bf16.msra.mxu1 %v17816_v11  ;;  %15790 = vmatpush1.bf16.msra.mxu0 %v19930_v52  ;;  %v17961_v11 = vcombine.high %v918_v2, %v930_v5  ;;  %v942_v52 = vld [vmem:[#allocation5 + $0x1a78] sm:$0xff] }
 0x493   :  { %8061 = vmatprep.subr.bf16.mxu1 %v17841_v0  ;;  %15791 = vmatprep.subr.bf16.mxu0 %v19935_v17  ;;  %v954_v0 = vld [vmem:[#allocation5 + $0x1ad8] sm:$0xff] }
 0x494   :  { %v19950_v17 = vld [vmem:[#allocation8 + $0xf64] ss:$24 sps:$4 sm:$0xff]   ;;  %v17985_v27 = vcombine.high %v942_v52, %v954_v0  ;;  %v17984_v31 = vcombine.low %v942_v52, %v954_v0 }
 0x496   :  { %8062 = vmatpush1.bf16.msra.mxu1 %v17840_v28  ;;  %15792 = vmatpush1.bf16.msra.mxu0 %v19933_v29  ;;  %v19948_v28 = vld [vmem:[#allocation8 + $0xf60] ss:$24 sps:$4 sm:$0xff]  }
 0x497   :  { %8063 = vmatprep.subr.bf16.mxu1 %v17865_v40  ;;  %15793 = vmatprep.subr.bf16.mxu0 %v19938_v30  ;;  %v966_v29 = vld [vmem:[#allocation5 + $0x1b38] sm:$0xff]  ;;  %v19953_v30 = vld [vmem:[#allocation8 + $0xf94] ss:$24 sps:$4 sm:$0xff]  }
 0x498   :  { %v978_v40 = vld [vmem:[#allocation5 + $0x1b98] sm:$0xff] }
 0x499   :  { %v18009_v32 = vcombine.high %v966_v29, %v978_v40  ;;  %v18008_v37 = vcombine.low %v966_v29, %v978_v40 }
 0x49a   :  { %8064 = vmatpush1.bf16.msra.mxu1 %v17864_v4  ;;  %15794 = vmatpush1.bf16.msra.mxu0 %v19936_v7  ;;  %v19951_v4 = vld [vmem:[#allocation8 + $0xf90] ss:$24 sps:$4 sm:$0xff]   ;;  %v990_v7 = vld [vmem:[#allocation5 + $0x1bf8] sm:$0xff] }
 0x49b   :  { %8065 = vmatprep.subr.bf16.mxu1 %v17889_v35  ;;  %15795 = vmatprep.subr.bf16.mxu0 %v19941_v36  ;;  %v1002_v35 = vld [vmem:[#allocation5 + $0x1c58] sm:$0xff] }
 0x49c   :  { %v19956_v36 = vld [vmem:[#allocation8 + $0xfc4] ss:$24 sps:$4 sm:$0xff]   ;;  %v18033_v39 = vcombine.high %v990_v7, %v1002_v35  ;;  %v18032_v49 = vcombine.low %v990_v7, %v1002_v35 }
 0x49e   :  { %8066 = vmatpush1.bf16.msra.mxu1 %v17888_v41  ;;  %15796 = vmatpush1.bf16.msra.mxu0 %v19939_v42  ;;  %v19954_v41 = vld [vmem:[#allocation8 + $0xfc0] ss:$24 sps:$4 sm:$0xff]  }
 0x49f   :  { %8076 = vmatprep.subr.bf16.mxu1 %v17913_v45  ;;  %15806 = vmatprep.subr.bf16.mxu0 %v19944_v58  ;;  %v1014_v42 = vld [vmem:[#allocation5 + $0x1cb8] sm:$0xff] }
 0x4a0   :  { %v1026_v45 = vld [vmem:[#allocation5 + $0x1d18] sm:$0xff] }
 0x4a1   :  { %8068 = vmatmul.mubr.bf16.vlgmr.msra.gmra.mrb[20].mxu1 %v21746_v25  ;;  %15798 = vmatmul.mubr.bf16.vlgmr.msra.gmra.mrb[16].mxu0 %v21921_v63  ;;  %v18057_v58 = vcombine.high %v1014_v42, %v1026_v45  ;;  %v18056_v2 = vcombine.low %v1014_v42, %v1026_v45 }
 0x4a2   :  { %8077 = vmatpush1.bf16.msra.mxu1 %v17912_v56  ;;  %15807 = vmatpush1.bf16.msra.mxu0 %v19942_v61  ;;  %v1038_v56 = vld [vmem:[#allocation5 + $0x1d78] sm:$0xff] }
 0x4a3   :  { %8078 = vmatprep.subr.bf16.mxu1 %v17937_v60  ;;  %15808 = vmatprep.subr.bf16.mxu0 %v19947_v6  ;;  %v1050_v60 = vld [vmem:[#allocation5 + $0x1dd8] sm:$0xff] }
 0x4a4   :  { %8108 = vmatprep.mubr.bf16.mxu1 %v21748_v34  ;;  %v19962_v61 = vld [vmem:[#allocation8 + $0x1024] ss:$24 sps:$4 sm:$0xff]   ;;  %v18081_v5 = vcombine.high %v1038_v56, %v1050_v60  ;;  %v19960_v6 = vld [vmem:[#allocation8 + $0x1020] ss:$24 sps:$4 sm:$0xff]   ;;  %v18080_v52 = vcombine.low %v1038_v56, %v1050_v60 }
 0x4a6   :  { %8079 = vmatpush1.bf16.msra.mxu1 %v17936_v9  ;;  %15809 = vmatpush1.bf16.msra.mxu0 %v19945_v16  ;;  %v1062_v9 = vld [vmem:[#allocation5 + $0x1e38] sm:$0xff]  ;;  %v19965_v16 = vld [vmem:[#allocation8 + $0x1054] ss:$24 sps:$4 sm:$0xff]  }
 0x4a7   :  { %8080 = vmatprep.subr.bf16.mxu1 %v17961_v11  ;;  %15810 = vmatprep.subr.bf16.mxu0 %v19950_v17  ;;  %v1074_v11 = vld [vmem:[#allocation5 + $0x1e98] sm:$0xff]  ;;  %v19963_v17 = vld [vmem:[#allocation8 + $0x1050] ss:$24 sps:$4 sm:$0xff]  }
 0x4a8   :  { %v18105_v0 = vcombine.high %v1062_v9, %v1074_v11  ;;  %v18104_v29 = vcombine.low %v1062_v9, %v1074_v11 }
 0x4aa   :  { %8081 = vmatpush1.bf16.msra.mxu1 %v17960_v26  ;;  %15811 = vmatpush1.bf16.msra.mxu0 %v19948_v28  ;;  %v1086_v26 = vld [vmem:[#allocation5 + $0x1ef8] sm:$0xff] }
 0x4ab   :  { %8082 = vmatprep.subr.bf16.mxu1 %v17985_v27  ;;  %15812 = vmatprep.subr.bf16.mxu0 %v19953_v30  ;;  %v1098_v27 = vld [vmem:[#allocation5 + $0x1f58] sm:$0xff] }
 0x4ac   :  { %v19968_v28 = vld [vmem:[#allocation8 + $0x1084] ss:$24 sps:$4 sm:$0xff]   ;;  %v18129_v40 = vcombine.high %v1086_v26, %v1098_v27  ;;  %v19966_v30 = vld [vmem:[#allocation8 + $0x1080] ss:$24 sps:$4 sm:$0xff]   ;;  %v18128_v7 = vcombine.low %v1086_v26, %v1098_v27 }
 0x4ae   :  { %8083 = vmatpush1.bf16.msra.mxu1 %v17984_v31  ;;  %15813 = vmatpush1.bf16.msra.mxu0 %v19951_v4  ;;  %v1110_v31 = vld [vmem:[#allocation5 + $0x1fb8] sm:$0xff]  ;;  %v19971_v4 = vld [vmem:[#allocation8 + $0x10b4] ss:$24 sps:$4 sm:$0xff]  }
 0x4af   :  { %8084 = vmatprep.subr.bf16.mxu1 %v18009_v32  ;;  %15814 = vmatprep.subr.bf16.mxu0 %v19956_v36  ;;  %v1122_v32 = vld [vmem:[#allocation5 + $0x2018] sm:$0xff]  ;;  %v19969_v36 = vld [vmem:[#allocation8 + $0x10b0] ss:$24 sps:$4 sm:$0xff]  }
 0x4b0   :  { %v18153_v35 = vcombine.high %v1110_v31, %v1122_v32  ;;  %v18152_v42 = vcombine.low %v1110_v31, %v1122_v32 }
 0x4b2   :  { %8085 = vmatpush1.bf16.msra.mxu1 %v18008_v37  ;;  %15815 = vmatpush1.bf16.msra.mxu0 %v19954_v41  ;;  %v1134_v37 = vld [vmem:[#allocation5 + $0x2078] sm:$0xff] }
 0x4b3   :  { %8086 = vmatprep.subr.bf16.mxu1 %v18033_v39  ;;  %15816 = vmatprep.subr.bf16.mxu0 %v19959_v48  ;;  %v1146_v39 = vld [vmem:[#allocation5 + $0x20d8] sm:$0xff] }
 0x4b4   :  { %v19974_v41 = vld [vmem:[#allocation8 + $0x10e4] ss:$24 sps:$4 sm:$0xff]   ;;  %v18177_v45 = vcombine.high %v1134_v37, %v1146_v39  ;;  %v19972_v48 = vld [vmem:[#allocation8 + $0x10e0] ss:$24 sps:$4 sm:$0xff]   ;;  %v18176_v56 = vcombine.low %v1134_v37, %v1146_v39 }
 0x4b6   :  { %8087 = vmatpush1.bf16.msra.mxu1 %v18032_v49  ;;  %15817 = vmatpush1.bf16.msra.mxu0 %v19957_v3  ;;  %v1158_v49 = vld [vmem:[#allocation5 + $0x2138] sm:$0xff]  ;;  %v19977_v3 = vld [vmem:[#allocation8 + $0x1114] ss:$24 sps:$4 sm:$0xff]  }
 0x4b7   :  { %8088 = vmatprep.subr.bf16.mxu1 %v18057_v58  ;;  %15818 = vmatprep.subr.bf16.mxu0 %v19962_v61  ;;  %v1170_v58 = vld [vmem:[#allocation5 + $0x2198] sm:$0xff]  ;;  %v19975_v61 = vld [vmem:[#allocation8 + $0x1110] ss:$24 sps:$4 sm:$0xff]  }
 0x4b8   :  { %v18201_v60 = vcombine.high %v1158_v49, %v1170_v58  ;;  %v18200_v9 = vcombine.low %v1158_v49, %v1170_v58 }
 0x4ba   :  { %8089 = vmatpush1.bf16.msra.mxu1 %v18056_v2  ;;  %15819 = vmatpush1.bf16.msra.mxu0 %v19960_v6  ;;  %v1182_v2 = vld [vmem:[#allocation5 + $0x21f8] sm:$0xff] }
 0x4bb   :  { %8090 = vmatprep.subr.bf16.mxu1 %v18081_v5  ;;  %15820 = vmatprep.subr.bf16.mxu0 %v19965_v16  ;;  %v1194_v5 = vld [vmem:[#allocation5 + $0x2258] sm:$0xff] }
 0x4bc   :  { %v19980_v6 = vld [vmem:[#allocation8 + $0x1144] ss:$24 sps:$4 sm:$0xff]   ;;  %v18225_v11 = vcombine.high %v1182_v2, %v1194_v5  ;;  %v19978_v16 = vld [vmem:[#allocation8 + $0x1140] ss:$24 sps:$4 sm:$0xff]   ;;  %v18224_v26 = vcombine.low %v1182_v2, %v1194_v5  ;;  %v176_v2 = vld [vmem:[#allocation5 + $0x288] sm:$0xff] }
 0x4bd   :  { %v188_v5 = vld [vmem:[#allocation5 + $0x2e8] sm:$0xff] }
 0x4be   :  { %8091 = vmatpush1.bf16.msra.mxu1 %v18080_v52  ;;  %15821 = vmatpush1.bf16.msra.mxu0 %v19963_v17  ;;  %v1206_v52 = vld [vmem:[#allocation5 + $0x22b8] sm:$0xff]  ;;  %v19983_v17 = vld [vmem:[#allocation8 + $0x1174] ss:$24 sps:$4 sm:$0xff]  }
 0x4bf   :  { %8092 = vmatprep.subr.bf16.mxu1 %v18105_v0  ;;  %15822 = vmatprep.subr.bf16.mxu0 %v19968_v28  ;;  %v1218_v0 = vld [vmem:[#allocation5 + $0x2318] sm:$0xff]  ;;  %v19981_v28 = vld [vmem:[#allocation8 + $0x1170] ss:$24 sps:$4 sm:$0xff]  }
 0x4c0   :  { %v18249_v27 = vcombine.high %v1206_v52, %v1218_v0  ;;  %v18248_v31 = vcombine.low %v1206_v52, %v1218_v0  ;;  %v17220_v52 = vcombine.low %v176_v2, %v188_v5 }
 0x4c2   :  { %8093 = vmatpush1.bf16.msra.mxu1 %v18104_v29  ;;  %15823 = vmatpush1.bf16.msra.mxu0 %v19966_v30  ;;  %v1230_v29 = vld [vmem:[#allocation5 + $0x2378] sm:$0xff] }
 0x4c3   :  { %8094 = vmatprep.subr.bf16.mxu1 %v18129_v40  ;;  %15824 = vmatprep.subr.bf16.mxu0 %v19971_v4  ;;  %v1242_v40 = vld [vmem:[#allocation5 + $0x23d8] sm:$0xff] }
 0x4c4   :  { %v19986_v30 = vld [vmem:[#allocation8 + $0x11a4] ss:$24 sps:$4 sm:$0xff]   ;;  %v18273_v32 = vcombine.high %v1230_v29, %v1242_v40  ;;  %v19984_v4 = vld [vmem:[#allocation8 + $0x11a0] ss:$24 sps:$4 sm:$0xff]   ;;  %v18272_v37 = vcombine.low %v1230_v29, %v1242_v40  ;;  %v248_v40 = vld [vmem:[#allocation5 + $0x4c8] sm:$0xff] }
 0x4c6   :  { %8095 = vmatpush1.bf16.msra.mxu1 %v18128_v7  ;;  %15825 = vmatpush1.bf16.msra.mxu0 %v19969_v36  ;;  %v104_v7 = vld [vmem:[#allocation5 + $0x48] sm:$0xff] }
 0x4c7   :  { %8096 = vmatprep.subr.bf16.mxu1 %v18153_v35  ;;  %15826 = vmatprep.subr.bf16.mxu0 %v19974_v41  ;;  %v116_v35 = vld [vmem:[#allocation5 + $0xa8] sm:$0xff] }
 0x4c8   :  { %v19989_v36 = vld [vmem:[#allocation8 + $0x11d4] ss:$24 sps:$4 sm:$0xff]   ;;  %v17149_v39 = vcombine.high %v104_v7, %v116_v35  ;;  %v19987_v41 = vld [vmem:[#allocation8 + $0x11d0] ss:$24 sps:$4 sm:$0xff]   ;;  %v17148_v49 = vcombine.low %v104_v7, %v116_v35 }
 0x4ca   :  { %8097 = vmatpush1.bf16.msra.mxu1 %v18152_v42  ;;  %15827 = vmatpush1.bf16.msra.mxu0 %v19972_v48  ;;  %v128_v42 = vld [vmem:[#allocation5 + $0x108] sm:$0xff]  ;;  %v19992_v48 = vld [vmem:[#allocation8 + $0x1204] ss:$24 sps:$4 sm:$0xff]  }
 0x4cb   :  { %8098 = vmatprep.subr.bf16.mxu1 %v18177_v45  ;;  %15828 = vmatprep.subr.bf16.mxu0 %v19977_v3  ;;  %v140_v45 = vld [vmem:[#allocation5 + $0x168] sm:$0xff] }
 0x4cc   :  { %v17173_v58 = vcombine.high %v128_v42, %v140_v45  ;;  %v152_v3 = vld [vmem:[#allocation5 + $0x1c8] sm:$0xff] }
 0x4ce   :  { %8099 = vmatpush1.bf16.msra.mxu1 %v18176_v56  ;;  %15829 = vmatpush1.bf16.msra.mxu0 %v19975_v61  ;;  %v164_v56 = vld [vmem:[#allocation5 + $0x228] sm:$0xff] }
 0x4cf   :  { %8100 = vmatprep.subr.bf16.mxu1 %v18201_v60  ;;  %15830 = vmatprep.subr.bf16.mxu0 %v19980_v6  ;;  %v17172_v60 = vcombine.low %v128_v42, %v140_v45  ;;  %v17197_v61 = vcombine.high %v152_v3, %v164_v56  ;;  %v17196_v6 = vcombine.low %v152_v3, %v164_v56  ;;  %v296_v3 = vld [vmem:[#allocation5 + $0x648] sm:$0xff] }
 0x4d2   :  { %8101 = vmatpush1.bf16.msra.mxu1 %v18200_v9  ;;  %15831 = vmatpush1.bf16.msra.mxu0 %v19978_v16  ;;  %v17221_v9 = vcombine.high %v176_v2, %v188_v5  ;;  %v212_v16 = vld [vmem:[#allocation5 + $0x3a8] sm:$0xff] }
 0x4d3   :  { %8102 = vmatprep.subr.bf16.mxu1 %v18225_v11  ;;  %15832 = vmatprep.subr.bf16.mxu0 %v19983_v17  ;;  %v200_v11 = vld [vmem:[#allocation5 + $0x348] sm:$0xff] }
 0x4d4   :  { %v17245_v0 = vcombine.high %v200_v11, %v212_v16  ;;  %v224_v17 = vld [vmem:[#allocation5 + $0x408] sm:$0xff] }
 0x4d5   :  { %v332_v2 = vld [vmem:[#allocation5 + $0x768] sm:$0xff] }
 0x4d6   :  { %8103 = vmatpush1.bf16.msra.mxu1 %v18224_v26  ;;  %15833 = vmatpush1.bf16.msra.mxu0 %v19981_v28  ;;  %v236_v26 = vld [vmem:[#allocation5 + $0x468] sm:$0xff]  ;;  %v17244_v28 = vcombine.low %v200_v11, %v212_v16 }
 0x4d7   :  { %8104 = vmatprep.subr.bf16.mxu1 %v18249_v27  ;;  %15834 = vmatprep.subr.bf16.mxu0 %v19986_v30  ;;  %v1308_v27 = vrot.slane %v21902_v55, %v21856_v24  ;;  %v17269_v29 = vcombine.high %v224_v17, %v236_v26  ;;  %v260_v30 = vld [vmem:[#allocation5 + $0x528] sm:$0xff]  ;;  %v17268_v7 = vcombine.low %v224_v17, %v236_v26 }
 0x4d8   :  { %v17293_v35 = vcombine.high %v248_v40, %v260_v30  ;;  %v344_v16 = vld [vmem:[#allocation5 + $0x7c8] sm:$0xff] }
 0x4da   :  { %8105 = vmatpush1.bf16.msra.mxu1 %v18248_v31  ;;  %15835 = vmatpush1.bf16.msra.mxu0 %v19984_v4  ;;  %v1296_v31 = vrot.slane %v21902_v55, %v21853_v10  ;;  %v1300_v4 = vrot.slane %v21902_v55, %v21836_v46  ;;  %v308_v55 = vld [vmem:[#allocation5 + $0x6a8] sm:$0xff] }
 0x4db   :  { %8106 = vmatprep.subr.bf16.mxu1 %v18273_v32  ;;  %15836 = vmatprep.subr.bf16.mxu0 %v19989_v36  ;;  %v19447_v32 = vadd.f32 %v21798_v22, %v1308_v27  ;;  %v17340_v5 = vcombine.low %v296_v3, %v308_v55  ;;  %v19990_v27 = vld [vmem:[#allocation8 + $0x1200] ss:$24 sps:$4 sm:$0xff]  }
 0x4dd   :  { %21450 = vtanh.f32 %v19447_v32 }
 0x4de   :  { %8107 = vmatpush1.bf16.msra.mxu1 %v18272_v37  ;;  %15837 = vmatpush1.bf16.msra.mxu0 %v19987_v41  ;;  %v272_v37 = vld [vmem:[#allocation5 + $0x588] sm:$0xff] }
 0x4df   :  { %8240 = vmatprep.subr.bf16.mxu1 %v17149_v39  ;;  %15847 = vmatprep.subr.bf16.mxu0 %v19992_v48  ;;  %v284_v39 = vld [vmem:[#allocation5 + $0x5e8] sm:$0xff] }
 0x4e0   :  { %v17317_v22 = vcombine.high %v272_v37, %v284_v39  ;;  %v17316_v56 = vcombine.low %v272_v37, %v284_v39  ;;  %v392_v37 = vld [vmem:[#allocation5 + $0x948] sm:$0xff] }
 0x4e1   :  { %8109 = vmatmul.mubr.bf16.vlgmr.msra.gmra.mrb[20].mxu1 %v21754_v38  ;;  %v404_v39 = vld [vmem:[#allocation5 + $0x9a8] sm:$0xff] }
 0x4e2   :  { %8241 = vmatpush1.bf16.msra.mxu1 %v17148_v49  ;;  %8272 = vmatprep.mubr.bf16.mxu1 %v21734_v57  ;;  %v17292_v49 = vcombine.low %v248_v40, %v260_v30  ;;  %v19995_v40 = vld [vmem:[#allocation8 + $0x1234] ss:$24 sps:$4 sm:$0xff]  }
 0x4e3   :  { %8242 = vmatprep.subr.bf16.mxu1 %v17173_v58  ;;  %v368_v30 = vld [vmem:[#allocation5 + $0x888] sm:$0xff] }
 0x4e6   :  { %8243 = vmatpush1.bf16.msra.mxu1 %v17172_v60  ;;  %v17341_v60 = vcombine.high %v296_v3, %v308_v55  ;;  %v19999_v3 = vld [vmem:[#allocation8 + $0x1290] ss:$24 sps:$4 sm:$0xff]  }
 0x4e7   :  { %8244 = vmatprep.subr.bf16.mxu1 %v17197_v61  ;;  %v320_v61 = vld [vmem:[#allocation5 + $0x708] sm:$0xff] }
 0x4e8   :  { %v17364_v17 = vcombine.low %v320_v61, %v332_v2 }
 0x4ea   :  { %8245 = vmatpush1.bf16.msra.mxu1 %v17196_v6  ;;  %v17365_v6 = vcombine.high %v320_v61, %v332_v2  ;;  %v452_v61 = vld [vmem:[#allocation5 + $0xb28] sm:$0xff] }
 0x4eb   :  { %8246 = vmatprep.subr.bf16.mxu1 %v17221_v9  ;;  %v21451_v9 = vpop.eup %21450 }
 0x4ec   :  { %v21939_v32 = vpack.c.bf16 %v21451_v9, %v21451_v9  ;;  %v20007_v9 = vld [vmem:[#allocation8 + $0x12f4] ss:$24 sps:$4 sm:$0xff]  }
 0x4ee   :  { %8247 = vmatpush1.bf16.msra.mxu1 %v17220_v52  ;;  %v356_v52 = vld [vmem:[#allocation5 + $0x828] sm:$0xff] }
 0x4ef   :  { %8248 = vmatprep.subr.bf16.mxu1 %v17245_v0 }
 0x4f2   :  { %8249 = vmatpush1.bf16.msra.mxu1 %v17244_v28 }
 0x4f3   :  { %8250 = vmatprep.subr.bf16.mxu1 %v17269_v29  ;;  %v17389_v29 = vcombine.high %v344_v16, %v356_v52 }
 0x4f4   :  { %v7864_v36 = vpop.f32.mrb[16].mxu1 }
 0x4f5   :  { %v19444_v41 = vadd.f32 %v7864_v36, %v1296_v31  ;;  %v7866_v42 = vpop.f32.mrb[17].mxu1  ;;  %v380_v31 = vld [vmem:[#allocation5 + $0x8e8] sm:$0xff]  ;;  %v19998_v36 = vld [vmem:[#allocation8 + $0x1264] ss:$24 sps:$4 sm:$0xff]  }
 0x4f6   :  { %v19445_v45 = vadd.f32 %v7866_v42, %v1300_v4  ;;  %v7868_v48 = vpop.f32.mrb[18].mxu1  ;;  %8251 = vmatpush1.bf16.msra.mxu1 %v17268_v7  ;;  %v17388_v4 = vcombine.low %v344_v16, %v356_v52  ;;  %v19993_v7 = vld [vmem:[#allocation8 + $0x1230] ss:$24 sps:$4 sm:$0xff]   ;;  %v19996_v42 = vld [vmem:[#allocation8 + $0x1260] ss:$24 sps:$4 sm:$0xff]  }
 0x4f7   :  { %21452 = vtanh.f32 %v19444_v41  ;;  %v7869_v58 = vpop.f32.mrb[19].mxu1  ;;  %8252 = vmatprep.subr.bf16.mxu1 %v17293_v35  ;;  %v17413_v35 = vcombine.high %v368_v30, %v380_v31  ;;  %v17412_v41 = vcombine.low %v368_v30, %v380_v31  ;;  %v20001_v48 = vld [vmem:[#allocation8 + $0x1294] ss:$24 sps:$4 sm:$0xff]   ;;  %v20008_v31 = vld [vmem:[#allocation8 + $0x1320] ss:$24 sps:$4 sm:$0xff]  }
 0x4f8   :  { %21454 = vtanh.f32 %v19445_v45  ;;  %v17437_v45 = vcombine.high %v392_v37, %v404_v39  ;;  %v428_v58 = vld [vmem:[#allocation5 + $0xa68] sm:$0xff] }
 0x4f9   :  { %v476_v16 = vld [vmem:[#allocation5 + $0xbe8] sm:$0xff] }
 0x4fa   :  { %8253 = vmatpush1.bf16.msra.mxu1 %v17292_v49  ;;  %v416_v49 = vld [vmem:[#allocation5 + $0xa08] sm:$0xff] }
 0x4fb   :  { %8254 = vmatprep.subr.bf16.mxu1 %v17317_v22  ;;  %v17436_v22 = vcombine.low %v392_v37, %v404_v39  ;;  %v17461_v55 = vcombine.high %v416_v49, %v428_v58  ;;  %v17460_v2 = vcombine.low %v416_v49, %v428_v58  ;;  %v20011_v39 = vld [vmem:[#allocation8 + $0x1350] ss:$24 sps:$4 sm:$0xff]   ;;  %v20014_v58 = vld [vmem:[#allocation8 + $0x1380] ss:$24 sps:$4 sm:$0xff]  }
 0x4fe   :  { %8255 = vmatpush1.bf16.msra.mxu1 %v17316_v56  ;;  %v20004_v56 = vld [vmem:[#allocation8 + $0x12c4] ss:$24 sps:$4 sm:$0xff]  }
 0x4ff   :  { %8256 = vmatprep.subr.bf16.mxu1 %v17341_v60  ;;  %v440_v60 = vld [vmem:[#allocation5 + $0xac8] sm:$0xff] }
 0x500   :  { %v17484_v52 = vcombine.low %v440_v60, %v452_v61 }
 0x501   :  { %v21453_v11 = vpop.eup %21452 }
 0x502   :  { %v21455_v0 = vpop.eup %21454  ;;  %8257 = vmatpush1.bf16.msra.mxu1 %v17340_v5  ;;  %v21937_v28 = vpack.c.bf16 %v21453_v11, %v21453_v11  ;;  %v20002_v5 = vld [vmem:[#allocation8 + $0x12c0] ss:$24 sps:$4 sm:$0xff]   ;;  %v464_v11 = vld [vmem:[#allocation5 + $0xb88] sm:$0xff] }
 0x503   :  { %v21935_v26 = vpack.c.bf16 %v21455_v0, %v21455_v0  ;;  %8258 = vmatprep.subr.bf16.mxu1 %v17365_v6  ;;  %v17485_v6 = vcombine.high %v440_v60, %v452_v61  ;;  %v20005_v0 = vld [vmem:[#allocation8 + $0x12f0] ss:$24 sps:$4 sm:$0xff]   ;;  %v17508_v30 = vcombine.low %v464_v11, %v476_v16 }
 0x504   :  { %v20017_v61 = vld [vmem:[#allocation8 + $0x13b0] ss:$24 sps:$4 sm:$0xff]  }
 0x505   :  { %15838 = vmatprep.mubr.bf16.mxu0 %v21935_v26 }
 0x506   :  { %8259 = vmatpush1.bf16.msra.mxu1 %v17364_v17  ;;  %15839 = vmatmul.mubr.bf16.vlgmr.msra.gmra.mrb[16].mxu0 %v21937_v28  ;;  %v17509_v17 = vcombine.high %v464_v11, %v476_v16  ;;  %v20020_v16 = vld [vmem:[#allocation8 + $0x13e0] ss:$24 sps:$4 sm:$0xff]  }
 0x507   :  { %15848 = vmatpush1.bf16.msra.mxu0 %v19990_v27  ;;  %15879 = vmatprep.mubr.bf16.mxu0 %v21939_v32  ;;  %v20010_v27 = vld [vmem:[#allocation8 + $0x1324] ss:$24 sps:$4 sm:$0xff]  }
 0x508   :  { %8260 = vmatprep.subr.bf16.mxu1 %v17389_v29  ;;  %15849 = vmatprep.subr.bf16.mxu0 %v19995_v40  ;;  %v488_v29 = vld [vmem:[#allocation5 + $0xc48] sm:$0xff] }
 0x509   :  { %v500_v40 = vld [vmem:[#allocation5 + $0xca8] sm:$0xff] }
 0x50a   :  { %8261 = vmatpush1.bf16.msra.mxu1 %v17388_v4  ;;  %v17533_v4 = vcombine.high %v488_v29, %v500_v40  ;;  %v17532_v37 = vcombine.low %v488_v29, %v500_v40  ;;  %v21946_v40 = vld [vmem:[#allocation7 + $0x8] sm:$0xff] }
 0x50b   :  { %15850 = vmatpush1.bf16.msra.mxu0 %v19993_v7  ;;  %8262 = vmatprep.subr.bf16.mxu1 %v17413_v35  ;;  %v20013_v7 = vld [vmem:[#allocation8 + $0x1354] ss:$24 sps:$4 sm:$0xff]  }
 0x50c   :  { %15851 = vmatprep.subr.bf16.mxu0 %v19998_v36  ;;  %v512_v35 = vld [vmem:[#allocation5 + $0xd08] sm:$0xff] }
 0x50d   :  { %v524_v36 = vld [vmem:[#allocation5 + $0xd68] sm:$0xff] }
 0x50e   :  { %8263 = vmatpush1.bf16.msra.mxu1 %v17412_v41  ;;  %v17557_v41 = vcombine.high %v512_v35, %v524_v36  ;;  %v17556_v49 = vcombine.low %v512_v35, %v524_v36  ;;  %v632_v35 = vld [vmem:[#allocation5 + $0x10c8] sm:$0xff] }
 0x50f   :  { %15852 = vmatpush1.bf16.msra.mxu0 %v19996_v42  ;;  %8264 = vmatprep.subr.bf16.mxu1 %v17437_v45  ;;  %v20016_v42 = vld [vmem:[#allocation8 + $0x1384] ss:$24 sps:$4 sm:$0xff]   ;;  %v536_v45 = vld [vmem:[#allocation5 + $0xdc8] sm:$0xff] }
 0x510   :  { %15853 = vmatprep.subr.bf16.mxu0 %v20001_v48  ;;  %v548_v48 = vld [vmem:[#allocation5 + $0xe28] sm:$0xff] }
 0x511   :  { %v17580_v60 = vcombine.low %v536_v45, %v548_v48  ;;  %v644_v36 = vld [vmem:[#allocation5 + $0x1128] sm:$0xff] }
 0x512   :  { %8265 = vmatpush1.bf16.msra.mxu1 %v17436_v22  ;;  %v17581_v22 = vcombine.high %v536_v45, %v548_v48  ;;  %v20031_v45 = vld [vmem:[#allocation8 + $0x1474] ss:$24 sps:$4 sm:$0xff]  }
 0x513   :  { %15854 = vmatpush1.bf16.msra.mxu0 %v19999_v3  ;;  %8266 = vmatprep.subr.bf16.mxu1 %v17461_v55  ;;  %v20019_v3 = vld [vmem:[#allocation8 + $0x13b4] ss:$24 sps:$4 sm:$0xff]  }
 0x514   :  { %15855 = vmatprep.subr.bf16.mxu0 %v20004_v56  ;;  %v560_v55 = vld [vmem:[#allocation5 + $0xe88] sm:$0xff] }
 0x515   :  { %v572_v56 = vld [vmem:[#allocation5 + $0xee8] sm:$0xff] }
 0x516   :  { %8267 = vmatpush1.bf16.msra.mxu1 %v17460_v2  ;;  %v17605_v2 = vcombine.high %v560_v55, %v572_v56  ;;  %v17604_v11 = vcombine.low %v560_v55, %v572_v56  ;;  %v656_v48 = vld [vmem:[#allocation5 + $0x1188] sm:$0xff]  ;;  %v20034_v55 = vld [vmem:[#allocation8 + $0x14a4] ss:$24 sps:$4 sm:$0xff]  }
 0x517   :  { %15856 = vmatpush1.bf16.msra.mxu0 %v20002_v5  ;;  %8268 = vmatprep.subr.bf16.mxu1 %v17485_v6  ;;  %v20022_v5 = vld [vmem:[#allocation8 + $0x13e4] ss:$24 sps:$4 sm:$0xff]   ;;  %v584_v6 = vld [vmem:[#allocation5 + $0xf48] sm:$0xff] }
 0x518   :  { %15857 = vmatprep.subr.bf16.mxu0 %v20007_v9  ;;  %v596_v9 = vld [vmem:[#allocation5 + $0xfa8] sm:$0xff] }
 0x519   :  { %v17628_v29 = vcombine.low %v584_v6, %v596_v9  ;;  %v680_v56 = vld [vmem:[#allocation5 + $0x1248] sm:$0xff] }
 0x51a   :  { %8269 = vmatpush1.bf16.msra.mxu1 %v17484_v52  ;;  %v17629_v52 = vcombine.high %v584_v6, %v596_v9  ;;  %v704_v6 = vld [vmem:[#allocation5 + $0x1308] sm:$0xff] }
 0x51b   :  { %15858 = vmatpush1.bf16.msra.mxu0 %v20005_v0  ;;  %8270 = vmatprep.subr.bf16.mxu1 %v17509_v17  ;;  %v20025_v0 = vld [vmem:[#allocation8 + $0x1414] ss:$24 sps:$4 sm:$0xff]  }
 0x51c   :  { %15859 = vmatprep.subr.bf16.mxu0 %v20010_v27  ;;  %v608_v17 = vld [vmem:[#allocation5 + $0x1008] sm:$0xff] }
 0x51d   :  { %v620_v27 = vld [vmem:[#allocation5 + $0x1068] sm:$0xff] }
 0x51e   :  { %8271 = vmatpush1.bf16.msra.mxu1 %v17508_v30  ;;  %v1304_v30 = vrot.slane %v21946_v40, %v21873_v51  ;;  %v716_v9 = vld [vmem:[#allocation5 + $0x1368] sm:$0xff] }
 0x51f   :  { %15860 = vmatpush1.bf16.msra.mxu0 %v20008_v31  ;;  %8281 = vmatprep.subr.bf16.mxu1 %v17533_v4  ;;  %v20023_v31 = vld [vmem:[#allocation8 + $0x1410] ss:$24 sps:$4 sm:$0xff]   ;;  %v17653_v4 = vcombine.high %v608_v17, %v620_v27 }
 0x520   :  { %15861 = vmatprep.subr.bf16.mxu0 %v20013_v7  ;;  %v20028_v7 = vld [vmem:[#allocation8 + $0x1444] ss:$24 sps:$4 sm:$0xff]  }
 0x521   :  { %8273 = vmatmul.mubr.bf16.vlgmr.msra.gmra.mrb[24].mxu1 %v21738_v12 }
 0x522   :  { %8282 = vmatpush1.bf16.msra.mxu1 %v17532_v37  ;;  %8313 = vmatprep.mubr.bf16.mxu1 %v21740_v23  ;;  %v17652_v37 = vcombine.low %v608_v17, %v620_v27  ;;  %v740_v17 = vld [vmem:[#allocation5 + $0x1428] sm:$0xff]  ;;  %v20040_v27 = vld [vmem:[#allocation8 + $0x1504] ss:$24 sps:$4 sm:$0xff]  }
 0x523   :  { %15862 = vmatpush1.bf16.msra.mxu0 %v20011_v39  ;;  %8283 = vmatprep.subr.bf16.mxu1 %v17557_v41  ;;  %v19446_v39 = vadd.f32 %v21796_v19, %v1304_v30  ;;  %v20026_v41 = vld [vmem:[#allocation8 + $0x1440] ss:$24 sps:$4 sm:$0xff]   ;;  %v17748_v30 = vcombine.low %v704_v6, %v716_v9 }
 0x524   :  { %15863 = vmatprep.subr.bf16.mxu0 %v20016_v42  ;;  %v17677_v42 = vcombine.high %v632_v35, %v644_v36 }
 0x525   :  { %21456 = vtanh.f32 %v19446_v39 }
 0x526   :  { %8284 = vmatpush1.bf16.msra.mxu1 %v17556_v49  ;;  %v668_v49 = vld [vmem:[#allocation5 + $0x11e8] sm:$0xff] }
 0x527   :  { %15864 = vmatpush1.bf16.msra.mxu0 %v20014_v58  ;;  %8285 = vmatprep.subr.bf16.mxu1 %v17581_v22  ;;  %v17676_v58 = vcombine.low %v632_v35, %v644_v36  ;;  %v20029_v22 = vld [vmem:[#allocation8 + $0x1470] ss:$24 sps:$4 sm:$0xff]   ;;  %v17700_v19 = vcombine.low %v656_v48, %v668_v49 }
 0x528   :  { %15865 = vmatprep.subr.bf16.mxu0 %v20019_v3  ;;  %v17701_v3 = vcombine.high %v656_v48, %v668_v49  ;;  %v752_v35 = vld [vmem:[#allocation5 + $0x1488] sm:$0xff]  ;;  %v20046_v49 = vld [vmem:[#allocation8 + $0x1564] ss:$24 sps:$4 sm:$0xff]  }
 0x529   :  { %v764_v36 = vld [vmem:[#allocation5 + $0x14e8] sm:$0xff] }
 0x52a   :  { %8286 = vmatpush1.bf16.msra.mxu1 %v17580_v60  ;;  %v692_v60 = vld [vmem:[#allocation5 + $0x12a8] sm:$0xff] }
 0x52b   :  { %15866 = vmatpush1.bf16.msra.mxu0 %v20017_v61  ;;  %8287 = vmatprep.subr.bf16.mxu1 %v17605_v2  ;;  %v20032_v61 = vld [vmem:[#allocation8 + $0x14a0] ss:$24 sps:$4 sm:$0xff]   ;;  %v17725_v2 = vcombine.high %v680_v56, %v692_v60  ;;  %v788_v48 = vld [vmem:[#allocation5 + $0x15a8] sm:$0xff] }
 0x52c   :  { %15867 = vmatprep.subr.bf16.mxu0 %v20022_v5  ;;  %v20037_v5 = vld [vmem:[#allocation8 + $0x14d4] ss:$24 sps:$4 sm:$0xff]  }
 0x52e   :  { %8288 = vmatpush1.bf16.msra.mxu1 %v17604_v11  ;;  %v17724_v11 = vcombine.low %v680_v56, %v692_v60  ;;  %v812_v56 = vld [vmem:[#allocation5 + $0x1668] sm:$0xff] }
 0x52f   :  { %15868 = vmatpush1.bf16.msra.mxu0 %v20020_v16  ;;  %8289 = vmatprep.subr.bf16.mxu1 %v17629_v52  ;;  %v20035_v16 = vld [vmem:[#allocation8 + $0x14d0] ss:$24 sps:$4 sm:$0xff]   ;;  %v17749_v52 = vcombine.high %v704_v6, %v716_v9  ;;  %v20049_v60 = vld [vmem:[#allocation8 + $0x1594] ss:$24 sps:$4 sm:$0xff]   ;;  %v20052_v9 = vld [vmem:[#allocation8 + $0x15c4] ss:$24 sps:$4 sm:$0xff]  }
 0x530   :  { %15869 = vmatprep.subr.bf16.mxu0 %v20025_v0  ;;  %v728_v0 = vld [vmem:[#allocation5 + $0x13c8] sm:$0xff] }
 0x531   :  { %v17772_v39 = vcombine.low %v728_v0, %v740_v17  ;;  %v836_v6 = vld [vmem:[#allocation5 + $0x1728] sm:$0xff] }
 0x532   :  { %8290 = vmatpush1.bf16.msra.mxu1 %v17628_v29  ;;  %v21457_v29 = vpop.eup %21456 }
 0x533   :  { %15870 = vmatpush1.bf16.msra.mxu0 %v20023_v31  ;;  %8291 = vmatprep.subr.bf16.mxu1 %v17653_v4  ;;  %v17773_v31 = vcombine.high %v728_v0, %v740_v17  ;;  %v20038_v4 = vld [vmem:[#allocation8 + $0x1500] ss:$24 sps:$4 sm:$0xff]   ;;  %v848_v0 = vld [vmem:[#allocation5 + $0x1788] sm:$0xff] }
 0x534   :  { %15871 = vmatprep.subr.bf16.mxu0 %v20028_v7  ;;  %v21951_v7 = vpack.c.bf16 %v21457_v29, %v21457_v29  ;;  %v860_v17 = vld [vmem:[#allocation5 + $0x17e8] sm:$0xff] }
 0x536   :  { %8292 = vmatpush1.bf16.msra.mxu1 %v17652_v37  ;;  %v20043_v37 = vld [vmem:[#allocation8 + $0x1534] ss:$24 sps:$4 sm:$0xff]  }
 0x537   :  { %15872 = vmatpush1.bf16.msra.mxu0 %v20026_v41  ;;  %8293 = vmatprep.subr.bf16.mxu1 %v17677_v42  ;;  %v17797_v41 = vcombine.high %v752_v35, %v764_v36  ;;  %v20041_v42 = vld [vmem:[#allocation8 + $0x1530] ss:$24 sps:$4 sm:$0xff]  }
 0x538   :  { %15873 = vmatprep.subr.bf16.mxu0 %v20031_v45  ;;  %v776_v45 = vld [vmem:[#allocation5 + $0x1548] sm:$0xff] }
 0x53a   :  { %8294 = vmatpush1.bf16.msra.mxu1 %v17676_v58  ;;  %v17796_v58 = vcombine.low %v752_v35, %v764_v36  ;;  %v884_v35 = vld [vmem:[#allocation5 + $0x18a8] sm:$0xff]  ;;  %v20058_v36 = vld [vmem:[#allocation8 + $0x1624] ss:$24 sps:$4 sm:$0xff]  }
 0x53b   :  { %15874 = vmatpush1.bf16.msra.mxu0 %v20029_v22  ;;  %8295 = vmatprep.subr.bf16.mxu1 %v17701_v3  ;;  %v17821_v22 = vcombine.high %v776_v45, %v788_v48  ;;  %v20044_v3 = vld [vmem:[#allocation8 + $0x1560] ss:$24 sps:$4 sm:$0xff]  }
 0x53c   :  { %15875 = vmatprep.subr.bf16.mxu0 %v20034_v55  ;;  %v800_v55 = vld [vmem:[#allocation5 + $0x1608] sm:$0xff] }
 0x53e   :  { %8296 = vmatpush1.bf16.msra.mxu1 %v17700_v19  ;;  %v17820_v19 = vcombine.low %v776_v45, %v788_v48  ;;  %v908_v45 = vld [vmem:[#allocation5 + $0x1968] sm:$0xff] }
 0x53f   :  { %15876 = vmatpush1.bf16.msra.mxu0 %v20032_v61  ;;  %8297 = vmatprep.subr.bf16.mxu1 %v17725_v2  ;;  %v17845_v61 = vcombine.high %v800_v55, %v812_v56  ;;  %v20047_v2 = vld [vmem:[#allocation8 + $0x1590] ss:$24 sps:$4 sm:$0xff]   ;;  %v20061_v48 = vld [vmem:[#allocation8 + $0x1654] ss:$24 sps:$4 sm:$0xff]  }
 0x540   :  { %15877 = vmatprep.subr.bf16.mxu0 %v20037_v5  ;;  %v824_v5 = vld [vmem:[#allocation5 + $0x16c8] sm:$0xff] }
 0x541   :  { %v17868_v29 = vcombine.low %v824_v5, %v836_v6 }
 0x542   :  { %8298 = vmatpush1.bf16.msra.mxu1 %v17724_v11  ;;  %v17844_v11 = vcombine.low %v800_v55, %v812_v56  ;;  %v932_v55 = vld [vmem:[#allocation5 + $0x1a28] sm:$0xff]  ;;  %v20064_v56 = vld [vmem:[#allocation8 + $0x1684] ss:$24 sps:$4 sm:$0xff]  }
 0x543   :  { %15878 = vmatpush1.bf16.msra.mxu0 %v20035_v16  ;;  %8299 = vmatprep.subr.bf16.mxu1 %v17749_v52  ;;  %v17869_v16 = vcombine.high %v824_v5, %v836_v6  ;;  %v20050_v52 = vld [vmem:[#allocation8 + $0x15c0] ss:$24 sps:$4 sm:$0xff]   ;;  %v956_v5 = vld [vmem:[#allocation5 + $0x1ae8] sm:$0xff] }
 0x544   :  { %15888 = vmatprep.subr.bf16.mxu0 %v20040_v27  ;;  %v20055_v27 = vld [vmem:[#allocation8 + $0x15f4] ss:$24 sps:$4 sm:$0xff]  }
 0x545   :  { %v20067_v6 = vld [vmem:[#allocation8 + $0x16b4] ss:$24 sps:$4 sm:$0xff]  }
 0x546   :  { %15880 = vmatmul.mubr.bf16.vlgmr.msra.gmra.mrb[16].mxu0 %v21951_v7  ;;  %8300 = vmatpush1.bf16.msra.mxu1 %v17748_v30  ;;  %v17893_v30 = vcombine.high %v848_v0, %v860_v17 }
 0x547   :  { %8301 = vmatprep.subr.bf16.mxu1 %v17773_v31  ;;  %15889 = vmatpush1.bf16.msra.mxu0 %v20038_v4  ;;  %v20053_v31 = vld [vmem:[#allocation8 + $0x15f0] ss:$24 sps:$4 sm:$0xff]  }
 0x548   :  { %15890 = vmatprep.subr.bf16.mxu0 %v20043_v37  ;;  %v872_v4 = vld [vmem:[#allocation5 + $0x1848] sm:$0xff]  ;;  %v17892_v37 = vcombine.low %v848_v0, %v860_v17  ;;  %v20070_v17 = vld [vmem:[#allocation8 + $0x16e4] ss:$24 sps:$4 sm:$0xff]  }
 0x549   :  { %v980_v0 = vld [vmem:[#allocation5 + $0x1ba8] sm:$0xff] }
 0x54a   :  { %8302 = vmatpush1.bf16.msra.mxu1 %v17772_v39  ;;  %v17917_v39 = vcombine.high %v872_v4, %v884_v35 }
 0x54b   :  { %8303 = vmatprep.subr.bf16.mxu1 %v17797_v41  ;;  %15891 = vmatpush1.bf16.msra.mxu0 %v20041_v42  ;;  %v20056_v41 = vld [vmem:[#allocation8 + $0x1620] ss:$24 sps:$4 sm:$0xff]   ;;  %v896_v42 = vld [vmem:[#allocation5 + $0x1908] sm:$0xff] }
 0x54c   :  { %15892 = vmatprep.subr.bf16.mxu0 %v20046_v49  ;;  %v17916_v49 = vcombine.low %v872_v4, %v884_v35  ;;  %v1004_v4 = vld [vmem:[#allocation5 + $0x1c68] sm:$0xff] }
 0x54d   :  { %v20073_v35 = vld [vmem:[#allocation8 + $0x1714] ss:$24 sps:$4 sm:$0xff]  }
 0x54e   :  { %8304 = vmatpush1.bf16.msra.mxu1 %v17796_v58  ;;  %v17941_v58 = vcombine.high %v896_v42, %v908_v45 }
 0x54f   :  { %8305 = vmatprep.subr.bf16.mxu1 %v17821_v22  ;;  %15893 = vmatpush1.bf16.msra.mxu0 %v20044_v3  ;;  %v20059_v22 = vld [vmem:[#allocation8 + $0x1650] ss:$24 sps:$4 sm:$0xff]  }
 0x550   :  { %15894 = vmatprep.subr.bf16.mxu0 %v20049_v60  ;;  %v920_v3 = vld [vmem:[#allocation5 + $0x19c8] sm:$0xff]  ;;  %v17940_v60 = vcombine.low %v896_v42, %v908_v45  ;;  %v20076_v45 = vld [vmem:[#allocation8 + $0x1744] ss:$24 sps:$4 sm:$0xff]  }
 0x551   :  { %v1028_v42 = vld [vmem:[#allocation5 + $0x1d28] sm:$0xff] }
 0x552   :  { %8306 = vmatpush1.bf16.msra.mxu1 %v17820_v19  ;;  %v17965_v19 = vcombine.high %v920_v3, %v932_v55 }
 0x553   :  { %8307 = vmatprep.subr.bf16.mxu1 %v17845_v61  ;;  %15895 = vmatpush1.bf16.msra.mxu0 %v20047_v2  ;;  %v20062_v61 = vld [vmem:[#allocation8 + $0x1680] ss:$24 sps:$4 sm:$0xff]   ;;  %v944_v2 = vld [vmem:[#allocation5 + $0x1a88] sm:$0xff] }
 0x554   :  { %15896 = vmatprep.subr.bf16.mxu0 %v20052_v9  ;;  %v17964_v9 = vcombine.low %v920_v3, %v932_v55  ;;  %v1052_v3 = vld [vmem:[#allocation5 + $0x1de8] sm:$0xff] }
 0x555   :  { %v20079_v55 = vld [vmem:[#allocation8 + $0x1774] ss:$24 sps:$4 sm:$0xff]  }
 0x556   :  { %8308 = vmatpush1.bf16.msra.mxu1 %v17844_v11  ;;  %v17989_v11 = vcombine.high %v944_v2, %v956_v5 }
 0x557   :  { %8309 = vmatprep.subr.bf16.mxu1 %v17869_v16  ;;  %15897 = vmatpush1.bf16.msra.mxu0 %v20050_v52  ;;  %v20065_v16 = vld [vmem:[#allocation8 + $0x16b0] ss:$24 sps:$4 sm:$0xff]  }
 0x558   :  { %15898 = vmatprep.subr.bf16.mxu0 %v20055_v27  ;;  %v968_v52 = vld [vmem:[#allocation5 + $0x1b48] sm:$0xff]  ;;  %v17988_v27 = vcombine.low %v944_v2, %v956_v5  ;;  %v20082_v5 = vld [vmem:[#allocation8 + $0x17a4] ss:$24 sps:$4 sm:$0xff]  }
 0x559   :  { %v1076_v2 = vld [vmem:[#allocation5 + $0x1ea8] sm:$0xff] }
 0x55a   :  { %8310 = vmatpush1.bf16.msra.mxu1 %v17868_v29  ;;  %v18013_v29 = vcombine.high %v968_v52, %v980_v0 }
 0x55b   :  { %8311 = vmatprep.subr.bf16.mxu1 %v17893_v30  ;;  %15899 = vmatpush1.bf16.msra.mxu0 %v20053_v31  ;;  %v20068_v30 = vld [vmem:[#allocation8 + $0x16e0] ss:$24 sps:$4 sm:$0xff]   ;;  %v992_v31 = vld [vmem:[#allocation5 + $0x1c08] sm:$0xff] }
 0x55c   :  { %15900 = vmatprep.subr.bf16.mxu0 %v20058_v36  ;;  %v18012_v36 = vcombine.low %v968_v52, %v980_v0  ;;  %v1100_v52 = vld [vmem:[#allocation5 + $0x1f68] sm:$0xff] }
 0x55d   :  { %v20085_v0 = vld [vmem:[#allocation8 + $0x17d4] ss:$24 sps:$4 sm:$0xff]  }
 0x55e   :  { %8312 = vmatpush1.bf16.msra.mxu1 %v17892_v37  ;;  %v18037_v37 = vcombine.high %v992_v31, %v1004_v4 }
 0x55f   :  { %8322 = vmatprep.subr.bf16.mxu1 %v17917_v39  ;;  %15901 = vmatpush1.bf16.msra.mxu0 %v20056_v41  ;;  %v20071_v39 = vld [vmem:[#allocation8 + $0x1710] ss:$24 sps:$4 sm:$0xff]  }
 0x560   :  { %15902 = vmatprep.subr.bf16.mxu0 %v20061_v48  ;;  %v1016_v41 = vld [vmem:[#allocation5 + $0x1cc8] sm:$0xff]  ;;  %v18036_v48 = vcombine.low %v992_v31, %v1004_v4  ;;  %v20088_v4 = vld [vmem:[#allocation8 + $0x1804] ss:$24 sps:$4 sm:$0xff]  }
 0x561   :  { %8314 = vmatmul.mubr.bf16.vlgmr.msra.gmra.mrb[24].mxu1 %v21746_v25  ;;  %v1124_v31 = vld [vmem:[#allocation5 + $0x2028] sm:$0xff] }
 0x562   :  { %8323 = vmatpush1.bf16.msra.mxu1 %v17916_v49  ;;  %8354 = vmatprep.mubr.bf16.mxu1 %v21748_v34  ;;  %v18061_v49 = vcombine.high %v1016_v41, %v1028_v42 }
 0x563   :  { %8324 = vmatprep.subr.bf16.mxu1 %v17941_v58  ;;  %15903 = vmatpush1.bf16.msra.mxu0 %v20059_v22  ;;  %v20074_v58 = vld [vmem:[#allocation8 + $0x1740] ss:$24 sps:$4 sm:$0xff]   ;;  %v1040_v22 = vld [vmem:[#allocation5 + $0x1d88] sm:$0xff] }
 0x564   :  { %15904 = vmatprep.subr.bf16.mxu0 %v20064_v56  ;;  %v18060_v56 = vcombine.low %v1016_v41, %v1028_v42 }
 0x566   :  { %8325 = vmatpush1.bf16.msra.mxu1 %v17940_v60  ;;  %v18085_v60 = vcombine.high %v1040_v22, %v1052_v3 }
 0x567   :  { %8326 = vmatprep.subr.bf16.mxu1 %v17965_v19  ;;  %15905 = vmatpush1.bf16.msra.mxu0 %v20062_v61  ;;  %v20077_v19 = vld [vmem:[#allocation8 + $0x1770] ss:$24 sps:$4 sm:$0xff]  }
 0x568   :  { %15906 = vmatprep.subr.bf16.mxu0 %v20067_v6  ;;  %v1064_v61 = vld [vmem:[#allocation5 + $0x1e48] sm:$0xff]  ;;  %v18084_v6 = vcombine.low %v1040_v22, %v1052_v3 }
 0x569   :  { %v1184_v22 = vld [vmem:[#allocation5 + $0x2208] sm:$0xff] }
 0x56a   :  { %8327 = vmatpush1.bf16.msra.mxu1 %v17964_v9  ;;  %v18109_v9 = vcombine.high %v1064_v61, %v1076_v2  ;;  %v1196_v3 = vld [vmem:[#allocation5 + $0x2268] sm:$0xff] }
 0x56b   :  { %8328 = vmatprep.subr.bf16.mxu1 %v17989_v11  ;;  %15907 = vmatpush1.bf16.msra.mxu0 %v20065_v16  ;;  %v20080_v11 = vld [vmem:[#allocation8 + $0x17a0] ss:$24 sps:$4 sm:$0xff]   ;;  %v1088_v16 = vld [vmem:[#allocation5 + $0x1f08] sm:$0xff] }
 0x56c   :  { %15908 = vmatprep.subr.bf16.mxu0 %v20070_v17  ;;  %v18108_v17 = vcombine.low %v1064_v61, %v1076_v2  ;;  %v18228_v61 = vcombine.low %v1184_v22, %v1196_v3 }
 0x56e   :  { %8329 = vmatpush1.bf16.msra.mxu1 %v17988_v27  ;;  %v18133_v27 = vcombine.high %v1088_v16, %v1100_v52 }
 0x56f   :  { %8330 = vmatprep.subr.bf16.mxu1 %v18013_v29  ;;  %15909 = vmatpush1.bf16.msra.mxu0 %v20068_v30  ;;  %v20083_v29 = vld [vmem:[#allocation8 + $0x17d0] ss:$24 sps:$4 sm:$0xff]  }
 0x570   :  { %15910 = vmatprep.subr.bf16.mxu0 %v20073_v35  ;;  %v1112_v30 = vld [vmem:[#allocation5 + $0x1fc8] sm:$0xff]  ;;  %v18132_v35 = vcombine.low %v1088_v16, %v1100_v52  ;;  %v106_v16 = vld [vmem:[#allocation5 + $0x58] sm:$0xff] }
 0x571   :  { %v18156_v41 = vcombine.low %v1112_v30, %v1124_v31  ;;  %v118_v52 = vld [vmem:[#allocation5 + $0xb8] sm:$0xff] }
 0x572   :  { %8331 = vmatpush1.bf16.msra.mxu1 %v18012_v36  ;;  %v18157_v36 = vcombine.high %v1112_v30, %v1124_v31  ;;  %v17152_v30 = vcombine.low %v106_v16, %v118_v52 }
 0x573   :  { %8332 = vmatprep.subr.bf16.mxu1 %v18037_v37  ;;  %15911 = vmatpush1.bf16.msra.mxu0 %v20071_v39  ;;  %v1136_v37 = vld [vmem:[#allocation5 + $0x2088] sm:$0xff] }
 0x574   :  { %15912 = vmatprep.subr.bf16.mxu0 %v20076_v45  ;;  %v1148_v39 = vld [vmem:[#allocation5 + $0x20e8] sm:$0xff] }
 0x575   :  { %v18181_v42 = vcombine.high %v1136_v37, %v1148_v39  ;;  %v1160_v45 = vld [vmem:[#allocation5 + $0x2148] sm:$0xff] }
 0x576   :  { %8333 = vmatpush1.bf16.msra.mxu1 %v18036_v48  ;;  %v1172_v48 = vld [vmem:[#allocation5 + $0x21a8] sm:$0xff] }
 0x577   :  { %8334 = vmatprep.subr.bf16.mxu1 %v18061_v49  ;;  %15913 = vmatpush1.bf16.msra.mxu0 %v20074_v58  ;;  %v18180_v49 = vcombine.low %v1136_v37, %v1148_v39  ;;  %v18205_v58 = vcombine.high %v1160_v45, %v1172_v48  ;;  %v178_v39 = vld [vmem:[#allocation5 + $0x298] sm:$0xff] }
 0x578   :  { %15914 = vmatprep.subr.bf16.mxu0 %v20079_v55  ;;  %v18204_v55 = vcombine.low %v1160_v45, %v1172_v48  ;;  %v202_v48 = vld [vmem:[#allocation5 + $0x358] sm:$0xff] }
 0x57a   :  { %8335 = vmatpush1.bf16.msra.mxu1 %v18060_v56  ;;  %v18229_v56 = vcombine.high %v1184_v22, %v1196_v3  ;;  %v21958_v22 = vld [vmem:[#allocation7 + $0x10] sm:$0xff] }
 0x57b   :  { %8336 = vmatprep.subr.bf16.mxu1 %v18085_v60  ;;  %15915 = vmatpush1.bf16.msra.mxu0 %v20077_v19  ;;  %v1208_v60 = vld [vmem:[#allocation5 + $0x22c8] sm:$0xff] }
 0x57c   :  { %15916 = vmatprep.subr.bf16.mxu0 %v20082_v5  ;;  %v1220_v19 = vld [vmem:[#allocation5 + $0x2328] sm:$0xff] }
 0x57d   :  { %v18253_v2 = vcombine.high %v1208_v60, %v1220_v19  ;;  %v1232_v5 = vld [vmem:[#allocation5 + $0x2388] sm:$0xff] }
 0x57e   :  { %8337 = vmatpush1.bf16.msra.mxu1 %v18084_v6  ;;  %v1244_v6 = vld [vmem:[#allocation5 + $0x23e8] sm:$0xff] }
 0x57f   :  { %8338 = vmatprep.subr.bf16.mxu1 %v18109_v9  ;;  %15917 = vmatpush1.bf16.msra.mxu0 %v20080_v11  ;;  %v18252_v9 = vcombine.low %v1208_v60, %v1220_v19  ;;  %v18277_v11 = vcombine.high %v1232_v5, %v1244_v6 }
 0x580   :  { %15918 = vmatprep.subr.bf16.mxu0 %v20085_v0  ;;  %v18276_v0 = vcombine.low %v1232_v5, %v1244_v6  ;;  %v1312_v5 = vrot.slane %v21946_v40, %v21900_v21 }
 0x582   :  { %8339 = vmatpush1.bf16.msra.mxu1 %v18108_v17  ;;  %v17153_v17 = vcombine.high %v106_v16, %v118_v52 }
 0x583   :  { %8340 = vmatprep.subr.bf16.mxu1 %v18133_v27  ;;  %15919 = vmatpush1.bf16.msra.mxu0 %v20083_v29  ;;  %v130_v27 = vld [vmem:[#allocation5 + $0x118] sm:$0xff] }
 0x584   :  { %15929 = vmatprep.subr.bf16.mxu0 %v20088_v4  ;;  %v142_v29 = vld [vmem:[#allocation5 + $0x178] sm:$0xff] }
 0x585   :  { %v17177_v31 = vcombine.high %v130_v27, %v142_v29  ;;  %v154_v4 = vld [vmem:[#allocation5 + $0x1d8] sm:$0xff] }
 0x586   :  { %8341 = vmatpush1.bf16.msra.mxu1 %v18132_v35  ;;  %v166_v35 = vld [vmem:[#allocation5 + $0x238] sm:$0xff] }
 0x587   :  { %8342 = vmatprep.subr.bf16.mxu1 %v18157_v36  ;;  %v17176_v36 = vcombine.low %v130_v27, %v142_v29  ;;  %v17201_v37 = vcombine.high %v154_v4, %v166_v35 }
 0x58a   :  { %8343 = vmatpush1.bf16.msra.mxu1 %v18156_v41  ;;  %v190_v41 = vld [vmem:[#allocation5 + $0x2f8] sm:$0xff] }
 0x58b   :  { %8344 = vmatprep.subr.bf16.mxu1 %v18181_v42  ;;  %v17200_v42 = vcombine.low %v154_v4, %v166_v35  ;;  %v17225_v45 = vcombine.high %v178_v39, %v190_v41 }
 0x58e   :  { %8345 = vmatpush1.bf16.msra.mxu1 %v18180_v49  ;;  %v214_v49 = vld [vmem:[#allocation5 + $0x3b8] sm:$0xff] }
 0x58f   :  { %8346 = vmatprep.subr.bf16.mxu1 %v18205_v58  ;;  %v17224_v58 = vcombine.low %v178_v39, %v190_v41  ;;  %v17249_v3 = vcombine.high %v202_v48, %v214_v49  ;;  %v17248_v60 = vcombine.low %v202_v48, %v214_v49  ;;  %v322_v41 = vld [vmem:[#allocation5 + $0x718] sm:$0xff] }
 0x592   :  { %8347 = vmatpush1.bf16.msra.mxu1 %v18204_v55  ;;  %v226_v55 = vld [vmem:[#allocation5 + $0x418] sm:$0xff] }
 0x593   :  { %8348 = vmatprep.subr.bf16.mxu1 %v18229_v56  ;;  %v238_v56 = vld [vmem:[#allocation5 + $0x478] sm:$0xff] }
 0x594   :  { %v17273_v19 = vcombine.high %v226_v55, %v238_v56 }
 0x596   :  { %8349 = vmatpush1.bf16.msra.mxu1 %v18228_v61  ;;  %v250_v61 = vld [vmem:[#allocation5 + $0x4d8] sm:$0xff] }
 0x597   :  { %8350 = vmatprep.subr.bf16.mxu1 %v18253_v2  ;;  %v262_v2 = vld [vmem:[#allocation5 + $0x538] sm:$0xff] }
 0x598   :  { %v17297_v16 = vcombine.high %v250_v61, %v262_v2  ;;  %v17296_v4 = vcombine.low %v250_v61, %v262_v2 }
 0x59a   :  { %8351 = vmatpush1.bf16.msra.mxu1 %v18252_v9  ;;  %v1316_v9 = vrot.slane %v21946_v40, %v21886_v54  ;;  %v310_v40 = vld [vmem:[#allocation5 + $0x6b8] sm:$0xff] }
 0x59b   :  { %8352 = vmatprep.subr.bf16.mxu1 %v18277_v11  ;;  %v17272_v11 = vcombine.low %v226_v55, %v238_v56  ;;  %v358_v55 = vld [vmem:[#allocation5 + $0x838] sm:$0xff] }
 0x59e   :  { %8353 = vmatpush1.bf16.msra.mxu1 %v18276_v0  ;;  %v274_v0 = vld [vmem:[#allocation5 + $0x598] sm:$0xff] }
 0x59f   :  { %8486 = vmatprep.subr.bf16.mxu1 %v17153_v17  ;;  %v286_v17 = vld [vmem:[#allocation5 + $0x5f8] sm:$0xff] }
 0x5a1   :  { %8355 = vmatmul.mubr.bf16.vlgmr.msra.gmra.mrb[24].mxu1 %v21754_v38 }
 0x5a2   :  { %8487 = vmatpush1.bf16.msra.mxu1 %v17152_v30  ;;  %8518 = vmatprep.mubr.bf16.mxu1 %v21734_v57  ;;  %v1324_v57 = vrot.slane %v21958_v22, %v21811_v14 }
 0x5a3   :  { %8488 = vmatprep.subr.bf16.mxu1 %v17177_v31 }
 0x5a4   :  { %v19451_v6 = vadd.f32 %v21830_v62, %v1324_v57  ;;  %v17321_v62 = vcombine.high %v274_v0, %v286_v17 }
 0x5a6   :  { %8489 = vmatpush1.bf16.msra.mxu1 %v17176_v36  ;;  %21458 = vtanh.f32 %v19451_v6  ;;  %v298_v36 = vld [vmem:[#allocation5 + $0x658] sm:$0xff] }
 0x5a7   :  { %8490 = vmatprep.subr.bf16.mxu1 %v17201_v37  ;;  %v17320_v37 = vcombine.low %v274_v0, %v286_v17  ;;  %v17345_v39 = vcombine.high %v298_v36, %v310_v40  ;;  %v370_v6 = vld [vmem:[#allocation5 + $0x898] sm:$0xff] }
 0x5a8   :  { %v20094_v17 = vld [vmem:[#allocation8 + $0x1864] ss:$24 sps:$4 sm:$0xff]  }
 0x5aa   :  { %8491 = vmatpush1.bf16.msra.mxu1 %v17200_v42  ;;  %v334_v42 = vld [vmem:[#allocation5 + $0x778] sm:$0xff] }
 0x5ab   :  { %8492 = vmatprep.subr.bf16.mxu1 %v17225_v45  ;;  %v17344_v45 = vcombine.low %v298_v36, %v310_v40  ;;  %v17369_v48 = vcombine.high %v322_v41, %v334_v42  ;;  %v17368_v57 = vcombine.low %v322_v41, %v334_v42  ;;  %v430_v36 = vld [vmem:[#allocation5 + $0xa78] sm:$0xff] }
 0x5ac   :  { %v20100_v41 = vld [vmem:[#allocation8 + $0x18c4] ss:$24 sps:$4 sm:$0xff]  }
 0x5ad   :  { %v442_v42 = vld [vmem:[#allocation5 + $0xad8] sm:$0xff] }
 0x5ae   :  { %8493 = vmatpush1.bf16.msra.mxu1 %v17224_v58 }
 0x5af   :  { %8494 = vmatprep.subr.bf16.mxu1 %v17249_v3  ;;  %v346_v3 = vld [vmem:[#allocation5 + $0x7d8] sm:$0xff] }
 0x5b0   :  { %v21459_v49 = vpop.eup %21458  ;;  %v17393_v2 = vcombine.high %v346_v3, %v358_v55 }
 0x5b2   :  { %8495 = vmatpush1.bf16.msra.mxu1 %v17248_v60 }
 0x5b3   :  { %8496 = vmatprep.subr.bf16.mxu1 %v17273_v19  ;;  %v20086_v19 = vld [vmem:[#allocation8 + $0x1800] ss:$24 sps:$4 sm:$0xff]  }
 0x5b4   :  { %v8110_v52 = vpop.f32.mrb[20].mxu1 }
 0x5b5   :  { %v19448_v27 = vadd.f32 %v8110_v52, %v1312_v5  ;;  %v8112_v29 = vpop.f32.mrb[21].mxu1  ;;  %v20091_v5 = vld [vmem:[#allocation8 + $0x1834] ss:$24 sps:$4 sm:$0xff]   ;;  %v20089_v52 = vld [vmem:[#allocation8 + $0x1830] ss:$24 sps:$4 sm:$0xff]  }
 0x5b6   :  { %v19449_v30 = vadd.f32 %v8112_v29, %v1316_v9  ;;  %v8114_v31 = vpop.f32.mrb[22].mxu1  ;;  %8497 = vmatpush1.bf16.msra.mxu1 %v17272_v11  ;;  %v382_v9 = vld [vmem:[#allocation5 + $0x8f8] sm:$0xff]  ;;  %v21971_v11 = vpack.c.bf16 %v21459_v49, %v21459_v49 }
 0x5b7   :  { %21460 = vtanh.f32 %v19448_v27  ;;  %v8115_v35 = vpop.f32.mrb[23].mxu1  ;;  %8498 = vmatprep.subr.bf16.mxu1 %v17297_v16  ;;  %v17392_v16 = vcombine.low %v346_v3, %v358_v55  ;;  %v17417_v0 = vcombine.high %v370_v6, %v382_v9  ;;  %v394_v27 = vld [vmem:[#allocation5 + $0x958] sm:$0xff]  ;;  %v20103_v3 = vld [vmem:[#allocation8 + $0x18f4] ss:$24 sps:$4 sm:$0xff]  }
 0x5b8   :  { %21462 = vtanh.f32 %v19449_v30  ;;  %v406_v29 = vld [vmem:[#allocation5 + $0x9b8] sm:$0xff]  ;;  %v17416_v30 = vcombine.low %v370_v6, %v382_v9  ;;  %v20097_v35 = vld [vmem:[#allocation8 + $0x1894] ss:$24 sps:$4 sm:$0xff]  }
 0x5b9   :  { %v20092_v31 = vld [vmem:[#allocation8 + $0x1860] ss:$24 sps:$4 sm:$0xff]   ;;  %v17440_v40 = vcombine.low %v394_v27, %v406_v29 }
 0x5ba   :  { %8499 = vmatpush1.bf16.msra.mxu1 %v17296_v4  ;;  %v17441_v4 = vcombine.high %v394_v27, %v406_v29  ;;  %v20098_v49 = vld [vmem:[#allocation8 + $0x18c0] ss:$24 sps:$4 sm:$0xff]  }
 0x5bb   :  { %8500 = vmatprep.subr.bf16.mxu1 %v17321_v62  ;;  %v418_v62 = vld [vmem:[#allocation5 + $0xa18] sm:$0xff] }
 0x5bc   :  { %v466_v55 = vld [vmem:[#allocation5 + $0xb98] sm:$0xff] }
 0x5bd   :  { %v490_v6 = vld [vmem:[#allocation5 + $0xc58] sm:$0xff] }
 0x5be   :  { %8501 = vmatpush1.bf16.msra.mxu1 %v17320_v37  ;;  %v20095_v37 = vld [vmem:[#allocation8 + $0x1890] ss:$24 sps:$4 sm:$0xff]   ;;  %v502_v9 = vld [vmem:[#allocation5 + $0xcb8] sm:$0xff] }
 0x5bf   :  { %8502 = vmatprep.subr.bf16.mxu1 %v17345_v39  ;;  %v17465_v39 = vcombine.high %v418_v62, %v430_v36  ;;  %v514_v27 = vld [vmem:[#allocation5 + $0xd18] sm:$0xff] }
 0x5c0   :  { %v526_v29 = vld [vmem:[#allocation5 + $0xd78] sm:$0xff] }
 0x5c1   :  { %v21461_v58 = vpop.eup %21460 }
 0x5c2   :  { %v21463_v56 = vpop.eup %21462  ;;  %8503 = vmatpush1.bf16.msra.mxu1 %v17344_v45  ;;  %v21969_v61 = vpack.c.bf16 %v21461_v58, %v21461_v58  ;;  %v454_v45 = vld [vmem:[#allocation5 + $0xb38] sm:$0xff] }
 0x5c3   :  { %v21967_v60 = vpack.c.bf16 %v21463_v56, %v21463_v56  ;;  %8504 = vmatprep.subr.bf16.mxu1 %v17369_v48  ;;  %v17464_v48 = vcombine.low %v418_v62, %v430_v36  ;;  %v17489_v58 = vcombine.high %v442_v42, %v454_v45  ;;  %v478_v56 = vld [vmem:[#allocation5 + $0xbf8] sm:$0xff] }
 0x5c4   :  { %v538_v62 = vld [vmem:[#allocation5 + $0xdd8] sm:$0xff] }
 0x5c5   :  { %15920 = vmatprep.mubr.bf16.mxu0 %v21967_v60  ;;  %v550_v36 = vld [vmem:[#allocation5 + $0xe38] sm:$0xff] }
 0x5c6   :  { %8505 = vmatpush1.bf16.msra.mxu1 %v17368_v57  ;;  %15921 = vmatmul.mubr.bf16.vlgmr.msra.gmra.mrb[16].mxu0 %v21969_v61  ;;  %v17488_v57 = vcombine.low %v442_v42, %v454_v45  ;;  %v562_v42 = vld [vmem:[#allocation5 + $0xe98] sm:$0xff] }
 0x5c7   :  { %15930 = vmatpush1.bf16.msra.mxu0 %v20086_v19  ;;  %15961 = vmatprep.mubr.bf16.mxu0 %v21971_v11  ;;  %v20101_v19 = vld [vmem:[#allocation8 + $0x18f0] ss:$24 sps:$4 sm:$0xff]   ;;  %v574_v45 = vld [vmem:[#allocation5 + $0xef8] sm:$0xff] }
 0x5c8   :  { %8506 = vmatprep.subr.bf16.mxu1 %v17393_v2  ;;  %15931 = vmatprep.subr.bf16.mxu0 %v20091_v5  ;;  %v17513_v2 = vcombine.high %v466_v55, %v478_v56  ;;  %v20106_v5 = vld [vmem:[#allocation8 + $0x1924] ss:$24 sps:$4 sm:$0xff]  }
 0x5ca   :  { %8507 = vmatpush1.bf16.msra.mxu1 %v17392_v16  ;;  %v17512_v16 = vcombine.low %v466_v55, %v478_v56  ;;  %v598_v55 = vld [vmem:[#allocation5 + $0xfb8] sm:$0xff] }
 0x5cb   :  { %15932 = vmatpush1.bf16.msra.mxu0 %v20089_v52  ;;  %8508 = vmatprep.subr.bf16.mxu1 %v17417_v0  ;;  %v20104_v52 = vld [vmem:[#allocation8 + $0x1920] ss:$24 sps:$4 sm:$0xff]   ;;  %v17537_v0 = vcombine.high %v490_v6, %v502_v9 }
 0x5cc   :  { %15933 = vmatprep.subr.bf16.mxu0 %v20094_v17  ;;  %v20109_v17 = vld [vmem:[#allocation8 + $0x1954] ss:$24 sps:$4 sm:$0xff]   ;;  %v20116_v56 = vld [vmem:[#allocation8 + $0x19e0] ss:$24 sps:$4 sm:$0xff]  }
 0x5ce   :  { %8509 = vmatpush1.bf16.msra.mxu1 %v17416_v30  ;;  %v17536_v30 = vcombine.low %v490_v6, %v502_v9  ;;  %v1320_v9 = vrot.slane %v21958_v22, %v21833_v43 }
 0x5cf   :  { %15934 = vmatpush1.bf16.msra.mxu0 %v20092_v31  ;;  %8510 = vmatprep.subr.bf16.mxu1 %v17441_v4  ;;  %v20107_v31 = vld [vmem:[#allocation8 + $0x1950] ss:$24 sps:$4 sm:$0xff]   ;;  %v17561_v4 = vcombine.high %v514_v27, %v526_v29 }
 0x5d0   :  { %15935 = vmatprep.subr.bf16.mxu0 %v20097_v35  ;;  %v20112_v35 = vld [vmem:[#allocation8 + $0x1984] ss:$24 sps:$4 sm:$0xff]  }
 0x5d2   :  { %8511 = vmatpush1.bf16.msra.mxu1 %v17440_v40  ;;  %v17560_v40 = vcombine.low %v514_v27, %v526_v29  ;;  %v646_v27 = vld [vmem:[#allocation5 + $0x1138] sm:$0xff] }
 0x5d3   :  { %15936 = vmatpush1.bf16.msra.mxu0 %v20095_v37  ;;  %8512 = vmatprep.subr.bf16.mxu1 %v17465_v39  ;;  %v20110_v37 = vld [vmem:[#allocation8 + $0x1980] ss:$24 sps:$4 sm:$0xff]   ;;  %v17585_v39 = vcombine.high %v538_v62, %v550_v36 }
 0x5d4   :  { %15937 = vmatprep.subr.bf16.mxu0 %v20100_v41  ;;  %v20115_v41 = vld [vmem:[#allocation8 + $0x19b4] ss:$24 sps:$4 sm:$0xff]  }
 0x5d6   :  { %8513 = vmatpush1.bf16.msra.mxu1 %v17464_v48  ;;  %v17584_v48 = vcombine.low %v538_v62, %v550_v36  ;;  %v658_v62 = vld [vmem:[#allocation5 + $0x1198] sm:$0xff] }
 0x5d7   :  { %15938 = vmatpush1.bf16.msra.mxu0 %v20098_v49  ;;  %8514 = vmatprep.subr.bf16.mxu1 %v17489_v58  ;;  %v20113_v49 = vld [vmem:[#allocation8 + $0x19b0] ss:$24 sps:$4 sm:$0xff]   ;;  %v17609_v58 = vcombine.high %v562_v42, %v574_v45  ;;  %v670_v36 = vld [vmem:[#allocation5 + $0x11f8] sm:$0xff] }
 0x5d8   :  { %15939 = vmatprep.subr.bf16.mxu0 %v20103_v3  ;;  %v586_v3 = vld [vmem:[#allocation5 + $0xf58] sm:$0xff] }
 0x5d9   :  { %v17632_v6 = vcombine.low %v586_v3, %v598_v55 }
 0x5da   :  { %8515 = vmatpush1.bf16.msra.mxu1 %v17488_v57  ;;  %v17633_v57 = vcombine.high %v586_v3, %v598_v55  ;;  %v718_v3 = vld [vmem:[#allocation5 + $0x1378] sm:$0xff] }
 0x5db   :  { %15940 = vmatpush1.bf16.msra.mxu0 %v20101_v19  ;;  %8516 = vmatprep.subr.bf16.mxu1 %v17513_v2  ;;  %v20121_v19 = vld [vmem:[#allocation8 + $0x1a14] ss:$24 sps:$4 sm:$0xff]   ;;  %v610_v2 = vld [vmem:[#allocation5 + $0x1018] sm:$0xff] }
 0x5dc   :  { %15941 = vmatprep.subr.bf16.mxu0 %v20106_v5  ;;  %v622_v5 = vld [vmem:[#allocation5 + $0x1078] sm:$0xff] }
 0x5dd   :  { %v17656_v29 = vcombine.low %v610_v2, %v622_v5 }
 0x5de   :  { %8517 = vmatpush1.bf16.msra.mxu1 %v17512_v16  ;;  %v20119_v16 = vld [vmem:[#allocation8 + $0x1a10] ss:$24 sps:$4 sm:$0xff]  }
 0x5df   :  { %15942 = vmatpush1.bf16.msra.mxu0 %v20104_v52  ;;  %8527 = vmatprep.subr.bf16.mxu1 %v17537_v0  ;;  %v17657_v52 = vcombine.high %v610_v2, %v622_v5  ;;  %v20124_v0 = vld [vmem:[#allocation8 + $0x1a44] ss:$24 sps:$4 sm:$0xff]  }
 0x5e0   :  { %15943 = vmatprep.subr.bf16.mxu0 %v20109_v17  ;;  %v634_v17 = vld [vmem:[#allocation5 + $0x10d8] sm:$0xff] }
 0x5e1   :  { %8519 = vmatmul.mubr.bf16.vlgmr.msra.gmra.mrb[28].mxu1 %v21738_v12  ;;  %v20118_v12 = vld [vmem:[#allocation8 + $0x19e4] ss:$24 sps:$4 sm:$0xff]  }
 0x5e2   :  { %8528 = vmatpush1.bf16.msra.mxu1 %v17536_v30  ;;  %8559 = vmatprep.mubr.bf16.mxu1 %v21740_v23  ;;  %v17608_v23 = vcombine.low %v562_v42, %v574_v45  ;;  %v19450_v30 = vadd.f32 %v21828_v59, %v1320_v9  ;;  %v682_v42 = vld [vmem:[#allocation5 + $0x1258] sm:$0xff]  ;;  %v17704_v59 = vcombine.low %v658_v62, %v670_v36 }
 0x5e3   :  { %15944 = vmatpush1.bf16.msra.mxu0 %v20107_v31  ;;  %8529 = vmatprep.subr.bf16.mxu1 %v17561_v4  ;;  %v20122_v31 = vld [vmem:[#allocation8 + $0x1a40] ss:$24 sps:$4 sm:$0xff]   ;;  %v17681_v4 = vcombine.high %v634_v17, %v646_v27  ;;  %v20136_v2 = vld [vmem:[#allocation8 + $0x1b04] ss:$24 sps:$4 sm:$0xff]  }
 0x5e4   :  { %15945 = vmatprep.subr.bf16.mxu0 %v20112_v35  ;;  %v20127_v35 = vld [vmem:[#allocation8 + $0x1a74] ss:$24 sps:$4 sm:$0xff]   ;;  %21464 = vtanh.f32 %v19450_v30  ;;  %v694_v45 = vld [vmem:[#allocation5 + $0x12b8] sm:$0xff] }
 0x5e5   :  { %v17728_v55 = vcombine.low %v682_v42, %v694_v45 }
 0x5e6   :  { %8530 = vmatpush1.bf16.msra.mxu1 %v17560_v40  ;;  %v17680_v40 = vcombine.low %v634_v17, %v646_v27  ;;  %v766_v17 = vld [vmem:[#allocation5 + $0x14f8] sm:$0xff]  ;;  %v20139_v27 = vld [vmem:[#allocation8 + $0x1b34] ss:$24 sps:$4 sm:$0xff]  }
 0x5e7   :  { %15946 = vmatpush1.bf16.msra.mxu0 %v20110_v37  ;;  %8531 = vmatprep.subr.bf16.mxu1 %v17585_v39  ;;  %v20125_v37 = vld [vmem:[#allocation8 + $0x1a70] ss:$24 sps:$4 sm:$0xff]   ;;  %v17705_v39 = vcombine.high %v658_v62, %v670_v36  ;;  %v20142_v62 = vld [vmem:[#allocation8 + $0x1b64] ss:$24 sps:$4 sm:$0xff]  }
 0x5e8   :  { %15947 = vmatprep.subr.bf16.mxu0 %v20115_v41  ;;  %v20130_v41 = vld [vmem:[#allocation8 + $0x1aa4] ss:$24 sps:$4 sm:$0xff]  }
 0x5ea   :  { %8532 = vmatpush1.bf16.msra.mxu1 %v17584_v48  ;;  %v20128_v48 = vld [vmem:[#allocation8 + $0x1aa0] ss:$24 sps:$4 sm:$0xff]  }
 0x5eb   :  { %15948 = vmatpush1.bf16.msra.mxu0 %v20113_v49  ;;  %8533 = vmatprep.subr.bf16.mxu1 %v17609_v58  ;;  %v17729_v49 = vcombine.high %v682_v42, %v694_v45  ;;  %v20133_v58 = vld [vmem:[#allocation8 + $0x1ad4] ss:$24 sps:$4 sm:$0xff]  }
 0x5ec   :  { %15949 = vmatprep.subr.bf16.mxu0 %v20118_v12  ;;  %v706_v12 = vld [vmem:[#allocation5 + $0x1318] sm:$0xff]  ;;  %v20145_v42 = vld [vmem:[#allocation8 + $0x1b94] ss:$24 sps:$4 sm:$0xff]  }
 0x5ee   :  { %8534 = vmatpush1.bf16.msra.mxu1 %v17608_v23  ;;  %v20131_v23 = vld [vmem:[#allocation8 + $0x1ad0] ss:$24 sps:$4 sm:$0xff]   ;;  %v21465_v5 = vpop.eup %21464 }
 0x5ef   :  { %15950 = vmatpush1.bf16.msra.mxu0 %v20116_v56  ;;  %8535 = vmatprep.subr.bf16.mxu1 %v17633_v57  ;;  %v17753_v56 = vcombine.high %v706_v12, %v718_v3  ;;  %v730_v57 = vld [vmem:[#allocation5 + $0x13d8] sm:$0xff] }
 0x5f0   :  { %15951 = vmatprep.subr.bf16.mxu0 %v20121_v19  ;;  %v742_v19 = vld [vmem:[#allocation5 + $0x1438] sm:$0xff] }
 0x5f1   :  { %v17777_v9 = vcombine.high %v730_v57, %v742_v19 }
 0x5f2   :  { %8536 = vmatpush1.bf16.msra.mxu1 %v17632_v6  ;;  %v17752_v6 = vcombine.low %v706_v12, %v718_v3  ;;  %v20148_v12 = vld [vmem:[#allocation8 + $0x1bc4] ss:$24 sps:$4 sm:$0xff]  }
 0x5f3   :  { %15952 = vmatpush1.bf16.msra.mxu0 %v20119_v16  ;;  %8537 = vmatprep.subr.bf16.mxu1 %v17657_v52  ;;  %v20134_v16 = vld [vmem:[#allocation8 + $0x1b00] ss:$24 sps:$4 sm:$0xff]   ;;  %v21981_v52 = vpack.c.bf16 %v21465_v5, %v21465_v5 }
 0x5f4   :  { %15953 = vmatprep.subr.bf16.mxu0 %v20124_v0  ;;  %v754_v0 = vld [vmem:[#allocation5 + $0x1498] sm:$0xff] }
 0x5f5   :  { %v17801_v30 = vcombine.high %v754_v0, %v766_v17  ;;  %v17800_v36 = vcombine.low %v754_v0, %v766_v17  ;;  %v20154_v0 = vld [vmem:[#allocation8 + $0x1c24] ss:$24 sps:$4 sm:$0xff]  }
 0x5f6   :  { %8538 = vmatpush1.bf16.msra.mxu1 %v17656_v29  ;;  %v17776_v29 = vcombine.low %v730_v57, %v742_v19  ;;  %v862_v57 = vld [vmem:[#allocation5 + $0x17f8] sm:$0xff]  ;;  %v20151_v19 = vld [vmem:[#allocation8 + $0x1bf4] ss:$24 sps:$4 sm:$0xff]  }
 0x5f7   :  { %15954 = vmatpush1.bf16.msra.mxu0 %v20122_v31  ;;  %8539 = vmatprep.subr.bf16.mxu1 %v17681_v4  ;;  %v20137_v31 = vld [vmem:[#allocation8 + $0x1b30] ss:$24 sps:$4 sm:$0xff]   ;;  %v778_v4 = vld [vmem:[#allocation5 + $0x1558] sm:$0xff] }
 0x5f8   :  { %15955 = vmatprep.subr.bf16.mxu0 %v20127_v35  ;;  %v790_v35 = vld [vmem:[#allocation5 + $0x15b8] sm:$0xff] }
 0x5f9   :  { %v17824_v45 = vcombine.low %v778_v4, %v790_v35 }
 0x5fa   :  { %8540 = vmatpush1.bf16.msra.mxu1 %v17680_v40  ;;  %v17825_v40 = vcombine.high %v778_v4, %v790_v35  ;;  %v20157_v4 = vld [vmem:[#allocation8 + $0x1c54] ss:$24 sps:$4 sm:$0xff]  }
 0x5fb   :  { %15956 = vmatpush1.bf16.msra.mxu0 %v20125_v37  ;;  %8541 = vmatprep.subr.bf16.mxu1 %v17705_v39  ;;  %v20140_v37 = vld [vmem:[#allocation8 + $0x1b60] ss:$24 sps:$4 sm:$0xff]  }
 0x5fc   :  { %15957 = vmatprep.subr.bf16.mxu0 %v20130_v41  ;;  %v802_v39 = vld [vmem:[#allocation5 + $0x1618] sm:$0xff] }
 0x5fd   :  { %v814_v41 = vld [vmem:[#allocation5 + $0x1678] sm:$0xff] }
 0x5fe   :  { %8542 = vmatpush1.bf16.msra.mxu1 %v17704_v59  ;;  %v17849_v59 = vcombine.high %v802_v39, %v814_v41  ;;  %v17848_v3 = vcombine.low %v802_v39, %v814_v41  ;;  %v20163_v39 = vld [vmem:[#allocation8 + $0x1c84] ss:$24 sps:$4 sm:$0xff]  }
 0x5ff   :  { %15958 = vmatpush1.bf16.msra.mxu0 %v20128_v48  ;;  %8543 = vmatprep.subr.bf16.mxu1 %v17729_v49  ;;  %v20143_v48 = vld [vmem:[#allocation8 + $0x1b90] ss:$24 sps:$4 sm:$0xff]   ;;  %v826_v49 = vld [vmem:[#allocation5 + $0x16d8] sm:$0xff] }
 0x600   :  { %15959 = vmatprep.subr.bf16.mxu0 %v20133_v58  ;;  %v838_v58 = vld [vmem:[#allocation5 + $0x1738] sm:$0xff] }
 0x602   :  { %8544 = vmatpush1.bf16.msra.mxu1 %v17728_v55  ;;  %v17873_v55 = vcombine.high %v826_v49, %v838_v58 }
 0x603   :  { %15960 = vmatpush1.bf16.msra.mxu0 %v20131_v23  ;;  %8545 = vmatprep.subr.bf16.mxu1 %v17753_v56  ;;  %v20146_v23 = vld [vmem:[#allocation8 + $0x1bc0] ss:$24 sps:$4 sm:$0xff]  }
 0x604   :  { %15970 = vmatprep.subr.bf16.mxu0 %v20136_v2  ;;  %v850_v56 = vld [vmem:[#allocation5 + $0x1798] sm:$0xff]  ;;  %v17872_v2 = vcombine.low %v826_v49, %v838_v58  ;;  %v20169_v49 = vld [vmem:[#allocation8 + $0x1cb4] ss:$24 sps:$4 sm:$0xff]  }
 0x605   :  { %v17897_v5 = vcombine.high %v850_v56, %v862_v57  ;;  %v17896_v17 = vcombine.low %v850_v56, %v862_v57  ;;  %v20173_v57 = vld [vmem:[#allocation8 + $0x1ce0] ss:$24 sps:$4 sm:$0xff]  }
 0x606   :  { %15962 = vmatmul.mubr.bf16.vlgmr.msra.gmra.mrb[16].mxu0 %v21981_v52  ;;  %8546 = vmatpush1.bf16.msra.mxu1 %v17752_v6  ;;  %v20149_v6 = vld [vmem:[#allocation8 + $0x1bf0] ss:$24 sps:$4 sm:$0xff]  }
 0x607   :  { %8547 = vmatprep.subr.bf16.mxu1 %v17777_v9  ;;  %15971 = vmatpush1.bf16.msra.mxu0 %v20134_v16  ;;  %v874_v9 = vld [vmem:[#allocation5 + $0x1858] sm:$0xff] }
 0x608   :  { %15972 = vmatprep.subr.bf16.mxu0 %v20139_v27  ;;  %v886_v16 = vld [vmem:[#allocation5 + $0x18b8] sm:$0xff] }
 0x609   :  { %v17921_v27 = vcombine.high %v874_v9, %v886_v16  ;;  %v17920_v35 = vcombine.low %v874_v9, %v886_v16  ;;  %v20179_v16 = vld [vmem:[#allocation8 + $0x1d10] ss:$24 sps:$4 sm:$0xff]  }
 0x60a   :  { %8548 = vmatpush1.bf16.msra.mxu1 %v17776_v29  ;;  %v20152_v29 = vld [vmem:[#allocation8 + $0x1c20] ss:$24 sps:$4 sm:$0xff]  }
 0x60b   :  { %8549 = vmatprep.subr.bf16.mxu1 %v17801_v30  ;;  %15973 = vmatpush1.bf16.msra.mxu0 %v20137_v31  ;;  %v898_v30 = vld [vmem:[#allocation5 + $0x1918] sm:$0xff] }
 0x60c   :  { %15974 = vmatprep.subr.bf16.mxu0 %v20142_v62  ;;  %v910_v31 = vld [vmem:[#allocation5 + $0x1978] sm:$0xff] }
 0x60d   :  { %v17945_v62 = vcombine.high %v898_v30, %v910_v31  ;;  %v17944_v41 = vcombine.low %v898_v30, %v910_v31  ;;  %v20185_v31 = vld [vmem:[#allocation8 + $0x1d40] ss:$24 sps:$4 sm:$0xff]  }
 0x60e   :  { %8550 = vmatpush1.bf16.msra.mxu1 %v17800_v36  ;;  %v20155_v36 = vld [vmem:[#allocation8 + $0x1c50] ss:$24 sps:$4 sm:$0xff]  }
 0x60f   :  { %8551 = vmatprep.subr.bf16.mxu1 %v17825_v40  ;;  %15975 = vmatpush1.bf16.msra.mxu0 %v20140_v37  ;;  %v922_v40 = vld [vmem:[#allocation5 + $0x19d8] sm:$0xff] }
 0x610   :  { %15976 = vmatprep.subr.bf16.mxu0 %v20145_v42  ;;  %v934_v37 = vld [vmem:[#allocation5 + $0x1a38] sm:$0xff] }
 0x611   :  { %v17969_v42 = vcombine.high %v922_v40, %v934_v37  ;;  %v17968_v58 = vcombine.low %v922_v40, %v934_v37  ;;  %v20191_v37 = vld [vmem:[#allocation8 + $0x1d70] ss:$24 sps:$4 sm:$0xff]  }
 0x612   :  { %8552 = vmatpush1.bf16.msra.mxu1 %v17824_v45  ;;  %v20161_v45 = vld [vmem:[#allocation8 + $0x1c80] ss:$24 sps:$4 sm:$0xff]  }
 0x613   :  { %8553 = vmatprep.subr.bf16.mxu1 %v17849_v59  ;;  %15977 = vmatpush1.bf16.msra.mxu0 %v20143_v48  ;;  %v946_v59 = vld [vmem:[#allocation5 + $0x1a98] sm:$0xff] }
 0x614   :  { %15978 = vmatprep.subr.bf16.mxu0 %v20148_v12  ;;  %v958_v48 = vld [vmem:[#allocation5 + $0x1af8] sm:$0xff] }
 0x615   :  { %v17993_v12 = vcombine.high %v946_v59, %v958_v48 }
 0x616   :  { %8554 = vmatpush1.bf16.msra.mxu1 %v17848_v3  ;;  %v20167_v3 = vld [vmem:[#allocation8 + $0x1cb0] ss:$24 sps:$4 sm:$0xff]  }
 0x617   :  { %8555 = vmatprep.subr.bf16.mxu1 %v17873_v55  ;;  %15979 = vmatpush1.bf16.msra.mxu0 %v20146_v23  ;;  %v970_v55 = vld [vmem:[#allocation5 + $0x1b58] sm:$0xff] }
 0x618   :  { %15980 = vmatprep.subr.bf16.mxu0 %v20151_v19  ;;  %v20175_v23 = vld [vmem:[#allocation8 + $0x1ce4] ss:$24 sps:$4 sm:$0xff]  }
 0x619   :  { %v994_v19 = vld [vmem:[#allocation5 + $0x1c18] sm:$0xff] }
 0x61a   :  { %8556 = vmatpush1.bf16.msra.mxu1 %v17872_v2  ;;  %v1006_v2 = vld [vmem:[#allocation5 + $0x1c78] sm:$0xff] }
 0x61b   :  { %8557 = vmatprep.subr.bf16.mxu1 %v17897_v5  ;;  %15981 = vmatpush1.bf16.msra.mxu0 %v20149_v6  ;;  %v20181_v5 = vld [vmem:[#allocation8 + $0x1d14] ss:$24 sps:$4 sm:$0xff]   ;;  %v18041_v9 = vcombine.high %v994_v19, %v1006_v2 }
 0x61c   :  { %15982 = vmatprep.subr.bf16.mxu0 %v20154_v0  ;;  %v1018_v0 = vld [vmem:[#allocation5 + $0x1cd8] sm:$0xff] }
 0x61e   :  { %8558 = vmatpush1.bf16.msra.mxu1 %v17896_v17  ;;  %v1030_v17 = vld [vmem:[#allocation5 + $0x1d38] sm:$0xff] }
 0x61f   :  { %8568 = vmatprep.subr.bf16.mxu1 %v17921_v27  ;;  %15983 = vmatpush1.bf16.msra.mxu0 %v20152_v29  ;;  %v20187_v27 = vld [vmem:[#allocation8 + $0x1d44] ss:$24 sps:$4 sm:$0xff]   ;;  %v18040_v29 = vcombine.low %v994_v19, %v1006_v2  ;;  %v18065_v30 = vcombine.high %v1018_v0, %v1030_v17 }
 0x620   :  { %15984 = vmatprep.subr.bf16.mxu0 %v20157_v4  ;;  %v1042_v4 = vld [vmem:[#allocation5 + $0x1d98] sm:$0xff] }
 0x621   :  { %8560 = vmatmul.mubr.bf16.vlgmr.msra.gmra.mrb[28].mxu1 %v21746_v25  ;;  %v982_v25 = vld [vmem:[#allocation5 + $0x1bb8] sm:$0xff] }
 0x622   :  { %8569 = vmatpush1.bf16.msra.mxu1 %v17920_v35  ;;  %8600 = vmatprep.mubr.bf16.mxu1 %v21748_v34  ;;  %v17992_v34 = vcombine.low %v946_v59, %v958_v48  ;;  %v18017_v56 = vcombine.high %v970_v55, %v982_v25  ;;  %v18016_v6 = vcombine.low %v970_v55, %v982_v25  ;;  %v1054_v35 = vld [vmem:[#allocation5 + $0x1df8] sm:$0xff]  ;;  %v20203_v25 = vld [vmem:[#allocation8 + $0x1dd0] ss:$24 sps:$4 sm:$0xff]  }
 0x623   :  { %8570 = vmatprep.subr.bf16.mxu1 %v17945_v62  ;;  %15985 = vmatpush1.bf16.msra.mxu0 %v20155_v36  ;;  %v20193_v62 = vld [vmem:[#allocation8 + $0x1d74] ss:$24 sps:$4 sm:$0xff]   ;;  %v18064_v36 = vcombine.low %v1018_v0, %v1030_v17  ;;  %v18089_v40 = vcombine.high %v1042_v4, %v1054_v35  ;;  %v20197_v48 = vld [vmem:[#allocation8 + $0x1da0] ss:$24 sps:$4 sm:$0xff]  }
 0x624   :  { %15986 = vmatprep.subr.bf16.mxu0 %v20163_v39  ;;  %v1066_v39 = vld [vmem:[#allocation5 + $0x1e58] sm:$0xff] }
 0x625   :  { %v1138_v2 = vld [vmem:[#allocation5 + $0x2098] sm:$0xff] }
 0x626   :  { %8571 = vmatpush1.bf16.msra.mxu1 %v17944_v41  ;;  %v1078_v41 = vld [vmem:[#allocation5 + $0x1eb8] sm:$0xff] }
 0x627   :  { %8572 = vmatprep.subr.bf16.mxu1 %v17969_v42  ;;  %15987 = vmatpush1.bf16.msra.mxu0 %v20161_v45  ;;  %v20199_v42 = vld [vmem:[#allocation8 + $0x1da4] ss:$24 sps:$4 sm:$0xff]   ;;  %v18088_v45 = vcombine.low %v1042_v4, %v1054_v35  ;;  %v18113_v59 = vcombine.high %v1066_v39, %v1078_v41 }
 0x628   :  { %15988 = vmatprep.subr.bf16.mxu0 %v20169_v49  ;;  %v1090_v49 = vld [vmem:[#allocation5 + $0x1f18] sm:$0xff] }
 0x629   :  { %v1174_v0 = vld [vmem:[#allocation5 + $0x21b8] sm:$0xff] }
 0x62a   :  { %8573 = vmatpush1.bf16.msra.mxu1 %v17968_v58  ;;  %v1102_v58 = vld [vmem:[#allocation5 + $0x1f78] sm:$0xff] }
 0x62b   :  { %8574 = vmatprep.subr.bf16.mxu1 %v17993_v12  ;;  %15989 = vmatpush1.bf16.msra.mxu0 %v20167_v3  ;;  %v20205_v12 = vld [vmem:[#allocation8 + $0x1dd4] ss:$24 sps:$4 sm:$0xff]   ;;  %v18112_v3 = vcombine.low %v1066_v39, %v1078_v41  ;;  %v18137_v55 = vcombine.high %v1090_v49, %v1102_v58  ;;  %v1210_v35 = vld [vmem:[#allocation5 + $0x22d8] sm:$0xff] }
 0x62c   :  { %15990 = vmatprep.subr.bf16.mxu0 %v20175_v23  ;;  %v1114_v23 = vld [vmem:[#allocation5 + $0x1fd8] sm:$0xff] }
 0x62d   :  { %v1246_v39 = vld [vmem:[#allocation5 + $0x23f8] sm:$0xff] }
 0x62e   :  { %8575 = vmatpush1.bf16.msra.mxu1 %v17992_v34  ;;  %v1126_v34 = vld [vmem:[#allocation5 + $0x2038] sm:$0xff] }
 0x62f   :  { %8576 = vmatprep.subr.bf16.mxu1 %v18017_v56  ;;  %15991 = vmatpush1.bf16.msra.mxu0 %v20173_v57  ;;  %v20211_v56 = vld [vmem:[#allocation8 + $0x1e04] ss:$24 sps:$4 sm:$0xff]   ;;  %v18136_v57 = vcombine.low %v1090_v49, %v1102_v58  ;;  %v18161_v19 = vcombine.high %v1114_v23, %v1126_v34  ;;  %v20164_v58 = vld [vmem:[#allocation8 + $0x38] ss:$24 sps:$4 sm:$0xff]  }
 0x630   :  { %15992 = vmatprep.subr.bf16.mxu0 %v20181_v5  ;;  %v1150_v5 = vld [vmem:[#allocation5 + $0x20f8] sm:$0xff]  ;;  %v20166_v49 = vld [vmem:[#allocation8 + $0x3c] ss:$24 sps:$4 sm:$0xff]  }
 0x631   :  { %v18184_v17 = vcombine.low %v1138_v2, %v1150_v5 }
 0x632   :  { %8577 = vmatpush1.bf16.msra.mxu1 %v18016_v6  ;;  %v18160_v6 = vcombine.low %v1114_v23, %v1126_v34  ;;  %v20184_v23 = vld [vmem:[#allocation8 + $0xcc] ss:$24 sps:$4 sm:$0xff]   ;;  %v1340_v34 = vrot.slane %v21958_v22, %v21856_v24 }
 0x633   :  { %8578 = vmatprep.subr.bf16.mxu1 %v18041_v9  ;;  %15993 = vmatpush1.bf16.msra.mxu0 %v20179_v16  ;;  %v18185_v9 = vcombine.high %v1138_v2, %v1150_v5  ;;  %v1162_v16 = vld [vmem:[#allocation5 + $0x2158] sm:$0xff]  ;;  %v1332_v2 = vrot.slane %v21958_v22, %v21836_v46  ;;  %v20188_v5 = vld [vmem:[#allocation8 + $0xf8] ss:$24 sps:$4 sm:$0xff]  }
 0x634   :  { %15994 = vmatprep.subr.bf16.mxu0 %v20187_v27  ;;  %v18209_v27 = vcombine.high %v1162_v16, %v1174_v0 }
 0x636   :  { %8579 = vmatpush1.bf16.msra.mxu1 %v18040_v29  ;;  %v1186_v29 = vld [vmem:[#allocation5 + $0x2218] sm:$0xff] }
 0x637   :  { %8580 = vmatprep.subr.bf16.mxu1 %v18065_v30  ;;  %15995 = vmatpush1.bf16.msra.mxu0 %v20185_v31  ;;  %v1198_v30 = vld [vmem:[#allocation5 + $0x2278] sm:$0xff]  ;;  %v18208_v31 = vcombine.low %v1162_v16, %v1174_v0 }
 0x638   :  { %15996 = vmatprep.subr.bf16.mxu0 %v20193_v62  ;;  %v18233_v4 = vcombine.high %v1186_v29, %v1198_v30  ;;  %v1222_v62 = vld [vmem:[#allocation5 + $0x2338] sm:$0xff] }
 0x639   :  { %v18256_v41 = vcombine.low %v1210_v35, %v1222_v62 }
 0x63a   :  { %8581 = vmatpush1.bf16.msra.mxu1 %v18064_v36  ;;  %v18232_v36 = vcombine.low %v1186_v29, %v1198_v30  ;;  %v20194_v29 = vld [vmem:[#allocation8 + $0x128] ss:$24 sps:$4 sm:$0xff]  }
 0x63b   :  { %8582 = vmatprep.subr.bf16.mxu1 %v18089_v40  ;;  %15997 = vmatpush1.bf16.msra.mxu0 %v20191_v37  ;;  %v18257_v40 = vcombine.high %v1210_v35, %v1222_v62  ;;  %v1234_v37 = vld [vmem:[#allocation5 + $0x2398] sm:$0xff]  ;;  %v20214_v35 = vld [vmem:[#allocation8 + $0x1bc] ss:$24 sps:$4 sm:$0xff]  }
 0x63c   :  { %15998 = vmatprep.subr.bf16.mxu0 %v20199_v42  ;;  %v18281_v42 = vcombine.high %v1234_v37, %v1246_v39 }
 0x63e   :  { %8583 = vmatpush1.bf16.msra.mxu1 %v18088_v45  ;;  %v18280_v45 = vcombine.low %v1234_v37, %v1246_v39  ;;  %v20212_v37 = vld [vmem:[#allocation8 + $0x1b8] ss:$24 sps:$4 sm:$0xff]  }
 0x63f   :  { %8584 = vmatprep.subr.bf16.mxu1 %v18113_v59  ;;  %15999 = vmatpush1.bf16.msra.mxu0 %v20197_v48  ;;  %v20160_v59 = vld [vmem:[#allocation8 + $0xc] ss:$24 sps:$4 sm:$0xff]   ;;  %v20158_v48 = vld [vmem:[#allocation8 + $0x8] ss:$24 sps:$4 sm:$0xff]  }
 0x640   :  { %16000 = vmatprep.subr.bf16.mxu0 %v20205_v12  ;;  %v20172_v12 = vld [vmem:[#allocation8 + $0x6c] ss:$24 sps:$4 sm:$0xff]  }
 0x642   :  { %8585 = vmatpush1.bf16.msra.mxu1 %v18112_v3  ;;  %v20170_v3 = vld [vmem:[#allocation8 + $0x68] ss:$24 sps:$4 sm:$0xff]  }
 0x643   :  { %8586 = vmatprep.subr.bf16.mxu1 %v18137_v55  ;;  %16001 = vmatpush1.bf16.msra.mxu0 %v20203_v25  ;;  %v20178_v55 = vld [vmem:[#allocation8 + $0x9c] ss:$24 sps:$4 sm:$0xff]   ;;  %v20176_v25 = vld [vmem:[#allocation8 + $0x98] ss:$24 sps:$4 sm:$0xff]  }
 0x644   :  { %16011 = vmatprep.subr.bf16.mxu0 %v20211_v56  ;;  %v20182_v56 = vld [vmem:[#allocation8 + $0xc8] ss:$24 sps:$4 sm:$0xff]  }
 0x646   :  { %8587 = vmatpush1.bf16.msra.mxu1 %v18136_v57  ;;  %v1328_v57 = vrot.slane %v21958_v22, %v21853_v10  ;;  %v20208_v22 = vld [vmem:[#allocation8 + $0x18c] ss:$24 sps:$4 sm:$0xff]  }
 0x647   :  { %8588 = vmatprep.subr.bf16.mxu1 %v18161_v19  ;;  %v19455_v19 = vadd.f32 %v21894_v53, %v1340_v34  ;;  %v20200_v53 = vld [vmem:[#allocation8 + $0x158] ss:$24 sps:$4 sm:$0xff]   ;;  %v20229_v34 = vld [vmem:[#allocation8 + $0x1e94] ss:$24 sps:$4 sm:$0xff]  }
 0x649   :  { %21466 = vtanh.f32 %v19455_v19  ;;  %v20235_v19 = vld [vmem:[#allocation8 + $0x1ec4] ss:$24 sps:$4 sm:$0xff]  }
 0x64a   :  { %8589 = vmatpush1.bf16.msra.mxu1 %v18160_v6  ;;  %v20196_v6 = vld [vmem:[#allocation8 + $0x12c] ss:$24 sps:$4 sm:$0xff]  }
 0x64b   :  { %8590 = vmatprep.subr.bf16.mxu1 %v18185_v9 }
 0x64e   :  { %8591 = vmatpush1.bf16.msra.mxu1 %v18184_v17 }
 0x64f   :  { %8592 = vmatprep.subr.bf16.mxu1 %v18209_v27 }
 0x652   :  { %8593 = vmatpush1.bf16.msra.mxu1 %v18208_v31  ;;  %v20202_v31 = vld [vmem:[#allocation8 + $0x15c] ss:$24 sps:$4 sm:$0xff]  }
 0x653   :  { %8594 = vmatprep.subr.bf16.mxu1 %v18233_v4  ;;  %v20206_v4 = vld [vmem:[#allocation8 + $0x188] ss:$24 sps:$4 sm:$0xff]   ;;  %v21467_v62 = vpop.eup %21466 }
 0x656   :  { %8595 = vmatpush1.bf16.msra.mxu1 %v18232_v36 }
 0x657   :  { %8596 = vmatprep.subr.bf16.mxu1 %v18257_v40 }
 0x65a   :  { %8597 = vmatpush1.bf16.msra.mxu1 %v18256_v41  ;;  %v20209_v41 = vld [vmem:[#allocation8 + $0x1e00] ss:$24 sps:$4 sm:$0xff]  }
 0x65b   :  { %8598 = vmatprep.subr.bf16.mxu1 %v18281_v42 }
 0x65e   :  { %8599 = vmatpush1.bf16.msra.mxu1 %v18280_v45  ;;  %v20217_v45 = vld [vmem:[#allocation8 + $0x1e34] ss:$24 sps:$4 sm:$0xff]  }
 0x65f   :  { %16093 = vmatprep.subr.bf16.mxu1 %v20160_v59  ;;  %v20220_v59 = vld [vmem:[#allocation8 + $0x1ec] ss:$24 sps:$4 sm:$0xff]  }
 0x661   :  { %8601 = vmatmul.mubr.bf16.vlgmr.msra.gmra.mrb[28].mxu1 %v21754_v38  ;;  %v20190_v38 = vld [vmem:[#allocation8 + $0xfc] ss:$24 sps:$4 sm:$0xff]  }
 0x662   :  { %16094 = vmatpush1.bf16.msra.mxu1 %v20158_v48  ;;  %16125 = vmatprep.mubr.bf16.mxu1 %v21818_v20  ;;  %v21999_v48 = vpack.c.bf16 %v21467_v62, %v21467_v62  ;;  %v20259_v62 = vld [vmem:[#allocation8 + $0x1f84] ss:$24 sps:$4 sm:$0xff]  }
 0x663   :  { %16095 = vmatprep.subr.bf16.mxu1 %v20166_v49  ;;  %v20218_v49 = vld [vmem:[#allocation8 + $0x1e8] ss:$24 sps:$4 sm:$0xff]  }
 0x666   :  { %16096 = vmatpush1.bf16.msra.mxu1 %v20164_v58  ;;  %v20215_v58 = vld [vmem:[#allocation8 + $0x1e30] ss:$24 sps:$4 sm:$0xff]  }
 0x667   :  { %16097 = vmatprep.subr.bf16.mxu1 %v20172_v12  ;;  %v20226_v12 = vld [vmem:[#allocation8 + $0x21c] ss:$24 sps:$4 sm:$0xff]  }
 0x66a   :  { %16098 = vmatpush1.bf16.msra.mxu1 %v20170_v3  ;;  %v20223_v3 = vld [vmem:[#allocation8 + $0x1e64] ss:$24 sps:$4 sm:$0xff]  }
 0x66b   :  { %16099 = vmatprep.subr.bf16.mxu1 %v20178_v55  ;;  %v20224_v55 = vld [vmem:[#allocation8 + $0x218] ss:$24 sps:$4 sm:$0xff]  }
 0x66e   :  { %16100 = vmatpush1.bf16.msra.mxu1 %v20176_v25  ;;  %v20221_v25 = vld [vmem:[#allocation8 + $0x1e60] ss:$24 sps:$4 sm:$0xff]  }
 0x66f   :  { %16101 = vmatprep.subr.bf16.mxu1 %v20184_v23  ;;  %v20232_v23 = vld [vmem:[#allocation8 + $0x24c] ss:$24 sps:$4 sm:$0xff]  }
 0x672   :  { %16102 = vmatpush1.bf16.msra.mxu1 %v20182_v56  ;;  %v20230_v56 = vld [vmem:[#allocation8 + $0x248] ss:$24 sps:$4 sm:$0xff]  }
 0x673   :  { %16103 = vmatprep.subr.bf16.mxu1 %v20190_v38  ;;  %v20227_v38 = vld [vmem:[#allocation8 + $0x1e90] ss:$24 sps:$4 sm:$0xff]  }
 0x674   :  { %v8356_v9 = vpop.f32.mrb[24].mxu1 }
 0x675   :  { %v19452_v16 = vadd.f32 %v8356_v9, %v1328_v57  ;;  %v8358_v0 = vpop.f32.mrb[25].mxu1  ;;  %v20238_v57 = vld [vmem:[#allocation8 + $0x27c] ss:$24 sps:$4 sm:$0xff]  }
 0x676   :  { %v19453_v17 = vadd.f32 %v8358_v0, %v1332_v2  ;;  %v8360_v27 = vpop.f32.mrb[26].mxu1  ;;  %16104 = vmatpush1.bf16.msra.mxu1 %v20188_v5  ;;  %v20236_v2 = vld [vmem:[#allocation8 + $0x278] ss:$24 sps:$4 sm:$0xff]   ;;  %v20241_v9 = vld [vmem:[#allocation8 + $0x1ef4] ss:$24 sps:$4 sm:$0xff]  }
 0x677   :  { %21468 = vtanh.f32 %v19452_v16  ;;  %v8361_v30 = vpop.f32.mrb[27].mxu1  ;;  %16105 = vmatprep.subr.bf16.mxu1 %v20196_v6  ;;  %v20233_v5 = vld [vmem:[#allocation8 + $0x1ec0] ss:$24 sps:$4 sm:$0xff]   ;;  %v20244_v6 = vld [vmem:[#allocation8 + $0x2ac] ss:$24 sps:$4 sm:$0xff]  }
 0x678   :  { %21470 = vtanh.f32 %v19453_v17  ;;  %v20242_v16 = vld [vmem:[#allocation8 + $0x2a8] ss:$24 sps:$4 sm:$0xff]   ;;  %v20250_v17 = vld [vmem:[#allocation8 + $0x2dc] ss:$24 sps:$4 sm:$0xff]  }
 0x679   :  { %v20239_v0 = vld [vmem:[#allocation8 + $0x1ef0] ss:$24 sps:$4 sm:$0xff]   ;;  %v20247_v27 = vld [vmem:[#allocation8 + $0x1f24] ss:$24 sps:$4 sm:$0xff]   ;;  %v20245_v30 = vld [vmem:[#allocation8 + $0x1f20] ss:$24 sps:$4 sm:$0xff]  }
 0x67a   :  { %16106 = vmatpush1.bf16.msra.mxu1 %v20194_v29  ;;  %v20248_v29 = vld [vmem:[#allocation8 + $0x2d8] ss:$24 sps:$4 sm:$0xff]  }
 0x67b   :  { %16107 = vmatprep.subr.bf16.mxu1 %v20202_v31  ;;  %v20256_v31 = vld [vmem:[#allocation8 + $0x30c] ss:$24 sps:$4 sm:$0xff]  }
 0x67e   :  { %16108 = vmatpush1.bf16.msra.mxu1 %v20200_v53  ;;  %v20253_v53 = vld [vmem:[#allocation8 + $0x1f54] ss:$24 sps:$4 sm:$0xff]  }
 0x67f   :  { %16109 = vmatprep.subr.bf16.mxu1 %v20208_v22  ;;  %v20254_v22 = vld [vmem:[#allocation8 + $0x308] ss:$24 sps:$4 sm:$0xff]  }
 0x681   :  { %v21469_v36 = vpop.eup %21468 }
 0x682   :  { %v21471_v40 = vpop.eup %21470  ;;  %16110 = vmatpush1.bf16.msra.mxu1 %v20206_v4  ;;  %v21997_v42 = vpack.c.bf16 %v21469_v36, %v21469_v36  ;;  %v20251_v4 = vld [vmem:[#allocation8 + $0x1f50] ss:$24 sps:$4 sm:$0xff]  }
 0x683   :  { %v21995_v39 = vpack.c.bf16 %v21471_v40, %v21471_v40  ;;  %16111 = vmatprep.subr.bf16.mxu1 %v20214_v35  ;;  %v20262_v35 = vld [vmem:[#allocation8 + $0x33c] ss:$24 sps:$4 sm:$0xff]   ;;  %v20260_v36 = vld [vmem:[#allocation8 + $0x338] ss:$24 sps:$4 sm:$0xff]  }
 0x684   :  { %v20257_v40 = vld [vmem:[#allocation8 + $0x1f80] ss:$24 sps:$4 sm:$0xff]  }
 0x685   :  { %16002 = vmatprep.mubr.bf16.mxu0 %v21995_v39 }
 0x686   :  { %16003 = vmatmul.mubr.bf16.vlgmr.msra.gmra.mrb[16].mxu0 %v21997_v42  ;;  %16112 = vmatpush1.bf16.msra.mxu1 %v20212_v37  ;;  %v20268_v37 = vld [vmem:[#allocation8 + $0x36c] ss:$24 sps:$4 sm:$0xff]  }
 0x687   :  { %16012 = vmatpush1.bf16.msra.mxu0 %v20209_v41  ;;  %16043 = vmatprep.mubr.bf16.mxu0 %v21999_v48  ;;  %v20265_v41 = vld [vmem:[#allocation8 + $0x1fb4] ss:$24 sps:$4 sm:$0xff]  }
 0x688   :  { %16013 = vmatprep.subr.bf16.mxu0 %v20217_v45  ;;  %16113 = vmatprep.subr.bf16.mxu1 %v20220_v59  ;;  %v20266_v45 = vld [vmem:[#allocation8 + $0x368] ss:$24 sps:$4 sm:$0xff]  }
 0x689   :  { %v20263_v59 = vld [vmem:[#allocation8 + $0x1fb0] ss:$24 sps:$4 sm:$0xff]  }
 0x68a   :  { %16114 = vmatpush1.bf16.msra.mxu1 %v20218_v49  ;;  %v20274_v49 = vld [vmem:[#allocation8 + $0x39c] ss:$24 sps:$4 sm:$0xff]  }
 0x68b   :  { %16014 = vmatpush1.bf16.msra.mxu0 %v20215_v58  ;;  %16115 = vmatprep.subr.bf16.mxu1 %v20226_v12  ;;  %v20271_v58 = vld [vmem:[#allocation8 + $0x1fe4] ss:$24 sps:$4 sm:$0xff]   ;;  %v20272_v12 = vld [vmem:[#allocation8 + $0x398] ss:$24 sps:$4 sm:$0xff]  }
 0x68c   :  { %16015 = vmatprep.subr.bf16.mxu0 %v20223_v3  ;;  %v20269_v3 = vld [vmem:[#allocation8 + $0x1fe0] ss:$24 sps:$4 sm:$0xff]  }
 0x68e   :  { %16116 = vmatpush1.bf16.msra.mxu1 %v20224_v55  ;;  %v20280_v55 = vld [vmem:[#allocation8 + $0x3cc] ss:$24 sps:$4 sm:$0xff]  }
 0x68f   :  { %16016 = vmatpush1.bf16.msra.mxu0 %v20221_v25  ;;  %16117 = vmatprep.subr.bf16.mxu1 %v20232_v23  ;;  %v20277_v25 = vld [vmem:[#allocation8 + $0x2014] ss:$24 sps:$4 sm:$0xff]   ;;  %v20278_v23 = vld [vmem:[#allocation8 + $0x3c8] ss:$24 sps:$4 sm:$0xff]  }
 0x690   :  { %16017 = vmatprep.subr.bf16.mxu0 %v20229_v34  ;;  %v22006_v34 = vld [vmem:[#allocation7 + $0x10] sm:$0xff] }
 0x692   :  { %16118 = vmatpush1.bf16.msra.mxu1 %v20230_v56  ;;  %v1336_v56 = vrot.slane %v22006_v34, %v21873_v51 }
 0x693   :  { %16018 = vmatpush1.bf16.msra.mxu0 %v20227_v38  ;;  %16119 = vmatprep.subr.bf16.mxu1 %v20238_v57  ;;  %v20275_v38 = vld [vmem:[#allocation8 + $0x2010] ss:$24 sps:$4 sm:$0xff]   ;;  %v20286_v57 = vld [vmem:[#allocation8 + $0x3fc] ss:$24 sps:$4 sm:$0xff]  }
 0x694   :  { %16019 = vmatprep.subr.bf16.mxu0 %v20235_v19  ;;  %v20283_v19 = vld [vmem:[#allocation8 + $0x2044] ss:$24 sps:$4 sm:$0xff]  }
 0x696   :  { %16120 = vmatpush1.bf16.msra.mxu1 %v20236_v2  ;;  %v20284_v2 = vld [vmem:[#allocation8 + $0x3f8] ss:$24 sps:$4 sm:$0xff]  }
 0x697   :  { %16020 = vmatpush1.bf16.msra.mxu0 %v20233_v5  ;;  %16121 = vmatprep.subr.bf16.mxu1 %v20244_v6  ;;  %v19454_v5 = vadd.f32 %v21892_v47, %v1336_v56  ;;  %v20281_v6 = vld [vmem:[#allocation8 + $0x2040] ss:$24 sps:$4 sm:$0xff]   ;;  %v20304_v47 = vld [vmem:[#allocation8 + $0x48c] ss:$24 sps:$4 sm:$0xff]  }
 0x698   :  { %16021 = vmatprep.subr.bf16.mxu0 %v20241_v9  ;;  %v20292_v9 = vld [vmem:[#allocation8 + $0x42c] ss:$24 sps:$4 sm:$0xff]  }
 0x699   :  { %21472 = vtanh.f32 %v19454_v5  ;;  %v20373_v56 = vld [vmem:[#allocation8 + $0x2194] ss:$24 sps:$4 sm:$0xff]   ;;  %v20317_v5 = vld [vmem:[#allocation8 + $0x578] ss:$24 sps:$4 sm:$0xff]  }
 0x69a   :  { %16122 = vmatpush1.bf16.msra.mxu1 %v20242_v16  ;;  %v20289_v16 = vld [vmem:[#allocation8 + $0x2074] ss:$24 sps:$4 sm:$0xff]  }
 0x69b   :  { %16022 = vmatpush1.bf16.msra.mxu0 %v20239_v0  ;;  %16123 = vmatprep.subr.bf16.mxu1 %v20250_v17  ;;  %v20290_v0 = vld [vmem:[#allocation8 + $0x428] ss:$24 sps:$4 sm:$0xff]  }
 0x69c   :  { %16023 = vmatprep.subr.bf16.mxu0 %v20247_v27  ;;  %v20287_v17 = vld [vmem:[#allocation8 + $0x2070] ss:$24 sps:$4 sm:$0xff]   ;;  %v20298_v27 = vld [vmem:[#allocation8 + $0x45c] ss:$24 sps:$4 sm:$0xff]  }
 0x69e   :  { %16124 = vmatpush1.bf16.msra.mxu1 %v20248_v29  ;;  %v20295_v29 = vld [vmem:[#allocation8 + $0x20a4] ss:$24 sps:$4 sm:$0xff]  }
 0x69f   :  { %16024 = vmatpush1.bf16.msra.mxu0 %v20245_v30  ;;  %16134 = vmatprep.subr.bf16.mxu1 %v20256_v31  ;;  %v20296_v30 = vld [vmem:[#allocation8 + $0x458] ss:$24 sps:$4 sm:$0xff]  }
 0x6a0   :  { %16025 = vmatprep.subr.bf16.mxu0 %v20253_v53  ;;  %v20293_v31 = vld [vmem:[#allocation8 + $0x20a0] ss:$24 sps:$4 sm:$0xff]   ;;  %v20301_v53 = vld [vmem:[#allocation8 + $0x20d4] ss:$24 sps:$4 sm:$0xff]  }
 0x6a1   :  { %16126 = vmatmul.mubr.bf16.vlgmr.msra.gmra.mrb[32].mxu1 %v21844_v44 }
 0x6a2   :  { %16135 = vmatpush1.bf16.msra.mxu1 %v20254_v22  ;;  %16166 = vmatprep.mubr.bf16.mxu1 %v21846_v50  ;;  %v20302_v22 = vld [vmem:[#allocation8 + $0x488] ss:$24 sps:$4 sm:$0xff]  }
 0x6a3   :  { %16026 = vmatpush1.bf16.msra.mxu0 %v20251_v4  ;;  %16136 = vmatprep.subr.bf16.mxu1 %v20262_v35  ;;  %v20299_v4 = vld [vmem:[#allocation8 + $0x20d0] ss:$24 sps:$4 sm:$0xff]   ;;  %v20307_v35 = vld [vmem:[#allocation8 + $0x4bc] ss:$24 sps:$4 sm:$0xff]  }
 0x6a4   :  { %16027 = vmatprep.subr.bf16.mxu0 %v20259_v62  ;;  %v20355_v62 = vld [vmem:[#allocation8 + $0x2104] ss:$24 sps:$4 sm:$0xff]  }
 0x6a6   :  { %16137 = vmatpush1.bf16.msra.mxu1 %v20260_v36  ;;  %v21473_v36 = vpop.eup %21472 }
 0x6a7   :  { %16028 = vmatpush1.bf16.msra.mxu0 %v20257_v40  ;;  %16138 = vmatprep.subr.bf16.mxu1 %v20268_v37  ;;  %v20305_v40 = vld [vmem:[#allocation8 + $0x4b8] ss:$24 sps:$4 sm:$0xff]   ;;  %v20310_v37 = vld [vmem:[#allocation8 + $0x4ec] ss:$24 sps:$4 sm:$0xff]  }
 0x6a8   :  { %16029 = vmatprep.subr.bf16.mxu0 %v20265_v41  ;;  %v20353_v41 = vld [vmem:[#allocation8 + $0x2100] ss:$24 sps:$4 sm:$0xff]  }
 0x6aa   :  { %16139 = vmatpush1.bf16.msra.mxu1 %v20266_v45  ;;  %v22011_v45 = vpack.c.bf16 %v21473_v36, %v21473_v36  ;;  %v20329_v36 = vld [vmem:[#allocation8 + $0x638] ss:$24 sps:$4 sm:$0xff]  }
 0x6ab   :  { %16030 = vmatpush1.bf16.msra.mxu0 %v20263_v59  ;;  %16140 = vmatprep.subr.bf16.mxu1 %v20274_v49  ;;  %v20361_v59 = vld [vmem:[#allocation8 + $0x2134] ss:$24 sps:$4 sm:$0xff]   ;;  %v20308_v49 = vld [vmem:[#allocation8 + $0x4e8] ss:$24 sps:$4 sm:$0xff]  }
 0x6ac   :  { %16031 = vmatprep.subr.bf16.mxu0 %v20271_v58  ;;  %v20313_v58 = vld [vmem:[#allocation8 + $0x51c] ss:$24 sps:$4 sm:$0xff]  }
 0x6ae   :  { %16141 = vmatpush1.bf16.msra.mxu1 %v20272_v12  ;;  %v20359_v12 = vld [vmem:[#allocation8 + $0x2130] ss:$24 sps:$4 sm:$0xff]  }
 0x6af   :  { %16032 = vmatpush1.bf16.msra.mxu0 %v20269_v3  ;;  %16142 = vmatprep.subr.bf16.mxu1 %v20280_v55  ;;  %v20367_v3 = vld [vmem:[#allocation8 + $0x2164] ss:$24 sps:$4 sm:$0xff]   ;;  %v20311_v55 = vld [vmem:[#allocation8 + $0x518] ss:$24 sps:$4 sm:$0xff]  }
 0x6b0   :  { %16033 = vmatprep.subr.bf16.mxu0 %v20277_v25  ;;  %v20316_v25 = vld [vmem:[#allocation8 + $0x54c] ss:$24 sps:$4 sm:$0xff]  }
 0x6b2   :  { %16143 = vmatpush1.bf16.msra.mxu1 %v20278_v23  ;;  %v20365_v23 = vld [vmem:[#allocation8 + $0x2160] ss:$24 sps:$4 sm:$0xff]  }
 0x6b3   :  { %16034 = vmatpush1.bf16.msra.mxu0 %v20275_v38  ;;  %16144 = vmatprep.subr.bf16.mxu1 %v20286_v57  ;;  %v20314_v38 = vld [vmem:[#allocation8 + $0x548] ss:$24 sps:$4 sm:$0xff]   ;;  %v20319_v57 = vld [vmem:[#allocation8 + $0x57c] ss:$24 sps:$4 sm:$0xff]  }
 0x6b4   :  { %16035 = vmatprep.subr.bf16.mxu0 %v20283_v19  ;;  %v20371_v19 = vld [vmem:[#allocation8 + $0x2190] ss:$24 sps:$4 sm:$0xff]  }
 0x6b6   :  { %16145 = vmatpush1.bf16.msra.mxu1 %v20284_v2  ;;  %v20379_v2 = vld [vmem:[#allocation8 + $0x21c4] ss:$24 sps:$4 sm:$0xff]  }
 0x6b7   :  { %16036 = vmatpush1.bf16.msra.mxu0 %v20281_v6  ;;  %16146 = vmatprep.subr.bf16.mxu1 %v20292_v9  ;;  %v20322_v6 = vld [vmem:[#allocation8 + $0x5ac] ss:$24 sps:$4 sm:$0xff]   ;;  %v20377_v9 = vld [vmem:[#allocation8 + $0x21c0] ss:$24 sps:$4 sm:$0xff]  }
 0x6b8   :  { %16037 = vmatprep.subr.bf16.mxu0 %v20289_v16  ;;  %v20385_v16 = vld [vmem:[#allocation8 + $0x21f4] ss:$24 sps:$4 sm:$0xff]  }
 0x6ba   :  { %16147 = vmatpush1.bf16.msra.mxu1 %v20290_v0  ;;  %v20320_v0 = vld [vmem:[#allocation8 + $0x5a8] ss:$24 sps:$4 sm:$0xff]  }
 0x6bb   :  { %16038 = vmatpush1.bf16.msra.mxu0 %v20287_v17  ;;  %16148 = vmatprep.subr.bf16.mxu1 %v20298_v27  ;;  %v20325_v17 = vld [vmem:[#allocation8 + $0x5dc] ss:$24 sps:$4 sm:$0xff]   ;;  %v20383_v27 = vld [vmem:[#allocation8 + $0x21f0] ss:$24 sps:$4 sm:$0xff]  }
 0x6bc   :  { %16039 = vmatprep.subr.bf16.mxu0 %v20295_v29  ;;  %v20391_v29 = vld [vmem:[#allocation8 + $0x2224] ss:$24 sps:$4 sm:$0xff]  }
 0x6be   :  { %16149 = vmatpush1.bf16.msra.mxu1 %v20296_v30  ;;  %v20323_v30 = vld [vmem:[#allocation8 + $0x5d8] ss:$24 sps:$4 sm:$0xff]  }
 0x6bf   :  { %16040 = vmatpush1.bf16.msra.mxu0 %v20293_v31  ;;  %16150 = vmatprep.subr.bf16.mxu1 %v20304_v47  ;;  %v20328_v31 = vld [vmem:[#allocation8 + $0x60c] ss:$24 sps:$4 sm:$0xff]   ;;  %v20389_v47 = vld [vmem:[#allocation8 + $0x2220] ss:$24 sps:$4 sm:$0xff]  }
 0x6c0   :  { %16041 = vmatprep.subr.bf16.mxu0 %v20301_v53  ;;  %v20397_v53 = vld [vmem:[#allocation8 + $0x2254] ss:$24 sps:$4 sm:$0xff]  }
 0x6c2   :  { %16151 = vmatpush1.bf16.msra.mxu1 %v20302_v22  ;;  %v20326_v22 = vld [vmem:[#allocation8 + $0x608] ss:$24 sps:$4 sm:$0xff]  }
 0x6c3   :  { %16042 = vmatpush1.bf16.msra.mxu0 %v20299_v4  ;;  %16152 = vmatprep.subr.bf16.mxu1 %v20307_v35  ;;  %v20331_v4 = vld [vmem:[#allocation8 + $0x63c] ss:$24 sps:$4 sm:$0xff]   ;;  %v20395_v35 = vld [vmem:[#allocation8 + $0x2250] ss:$24 sps:$4 sm:$0xff]  }
 0x6c4   :  { %16052 = vmatprep.subr.bf16.mxu0 %v20355_v62  ;;  %v20403_v62 = vld [vmem:[#allocation8 + $0x2284] ss:$24 sps:$4 sm:$0xff]  }
 0x6c6   :  { %16044 = vmatmul.mubr.bf16.vlgmr.msra.gmra.mrb[16].mxu0 %v22011_v45  ;;  %16153 = vmatpush1.bf16.msra.mxu1 %v20305_v40  ;;  %v20334_v40 = vld [vmem:[#allocation8 + $0x66c] ss:$24 sps:$4 sm:$0xff]  }
 0x6c7   :  { %16154 = vmatprep.subr.bf16.mxu1 %v20310_v37  ;;  %16053 = vmatpush1.bf16.msra.mxu0 %v20353_v41  ;;  %v20401_v37 = vld [vmem:[#allocation8 + $0x2280] ss:$24 sps:$4 sm:$0xff]   ;;  %v20409_v41 = vld [vmem:[#allocation8 + $0x22b4] ss:$24 sps:$4 sm:$0xff]  }
 0x6c8   :  { %16054 = vmatprep.subr.bf16.mxu0 %v20361_v59  ;;  %v20332_v59 = vld [vmem:[#allocation8 + $0x668] ss:$24 sps:$4 sm:$0xff]  }
 0x6ca   :  { %16155 = vmatpush1.bf16.msra.mxu1 %v20308_v49  ;;  %v20337_v49 = vld [vmem:[#allocation8 + $0x69c] ss:$24 sps:$4 sm:$0xff]  }
 0x6cb   :  { %16156 = vmatprep.subr.bf16.mxu1 %v20313_v58  ;;  %16055 = vmatpush1.bf16.msra.mxu0 %v20359_v12  ;;  %v20407_v58 = vld [vmem:[#allocation8 + $0x22b0] ss:$24 sps:$4 sm:$0xff]   ;;  %v20415_v12 = vld [vmem:[#allocation8 + $0x22e4] ss:$24 sps:$4 sm:$0xff]  }
 0x6cc   :  { %16056 = vmatprep.subr.bf16.mxu0 %v20367_v3  ;;  %v20335_v3 = vld [vmem:[#allocation8 + $0x698] ss:$24 sps:$4 sm:$0xff]  }
 0x6ce   :  { %16157 = vmatpush1.bf16.msra.mxu1 %v20311_v55  ;;  %v20340_v55 = vld [vmem:[#allocation8 + $0x6cc] ss:$24 sps:$4 sm:$0xff]  }
 0x6cf   :  { %16158 = vmatprep.subr.bf16.mxu1 %v20316_v25  ;;  %16057 = vmatpush1.bf16.msra.mxu0 %v20365_v23  ;;  %v20413_v25 = vld [vmem:[#allocation8 + $0x22e0] ss:$24 sps:$4 sm:$0xff]   ;;  %v20421_v23 = vld [vmem:[#allocation8 + $0x2314] ss:$24 sps:$4 sm:$0xff]  }
 0x6d0   :  { %16058 = vmatprep.subr.bf16.mxu0 %v20373_v56  ;;  %v20338_v56 = vld [vmem:[#allocation8 + $0x6c8] ss:$24 sps:$4 sm:$0xff]  }
 0x6d2   :  { %16159 = vmatpush1.bf16.msra.mxu1 %v20314_v38  ;;  %v20343_v38 = vld [vmem:[#allocation8 + $0x6fc] ss:$24 sps:$4 sm:$0xff]  }
 0x6d3   :  { %16160 = vmatprep.subr.bf16.mxu1 %v20319_v57  ;;  %16059 = vmatpush1.bf16.msra.mxu0 %v20371_v19  ;;  %v20419_v57 = vld [vmem:[#allocation8 + $0x2310] ss:$24 sps:$4 sm:$0xff]   ;;  %v20427_v19 = vld [vmem:[#allocation8 + $0x2344] ss:$24 sps:$4 sm:$0xff]  }
 0x6d4   :  { %16060 = vmatprep.subr.bf16.mxu0 %v20379_v2  ;;  %v20341_v2 = vld [vmem:[#allocation8 + $0x6f8] ss:$24 sps:$4 sm:$0xff]  }
 0x6d6   :  { %16161 = vmatpush1.bf16.msra.mxu1 %v20317_v5  ;;  %v20346_v5 = vld [vmem:[#allocation8 + $0x72c] ss:$24 sps:$4 sm:$0xff]  }
 0x6d7   :  { %16162 = vmatprep.subr.bf16.mxu1 %v20322_v6  ;;  %16061 = vmatpush1.bf16.msra.mxu0 %v20377_v9  ;;  %v20425_v6 = vld [vmem:[#allocation8 + $0x2340] ss:$24 sps:$4 sm:$0xff]   ;;  %v20433_v9 = vld [vmem:[#allocation8 + $0x2374] ss:$24 sps:$4 sm:$0xff]  }
 0x6d8   :  { %16062 = vmatprep.subr.bf16.mxu0 %v20385_v16  ;;  %v20344_v16 = vld [vmem:[#allocation8 + $0x728] ss:$24 sps:$4 sm:$0xff]  }
 0x6da   :  { %16163 = vmatpush1.bf16.msra.mxu1 %v20320_v0  ;;  %v20349_v0 = vld [vmem:[#allocation8 + $0x75c] ss:$24 sps:$4 sm:$0xff]  }
 0x6db   :  { %16164 = vmatprep.subr.bf16.mxu1 %v20325_v17  ;;  %16063 = vmatpush1.bf16.msra.mxu0 %v20383_v27  ;;  %v20431_v17 = vld [vmem:[#allocation8 + $0x2370] ss:$24 sps:$4 sm:$0xff]   ;;  %v20439_v27 = vld [vmem:[#allocation8 + $0x23a4] ss:$24 sps:$4 sm:$0xff]  }
 0x6dc   :  { %16064 = vmatprep.subr.bf16.mxu0 %v20391_v29  ;;  %v20347_v29 = vld [vmem:[#allocation8 + $0x758] ss:$24 sps:$4 sm:$0xff]  }
 0x6de   :  { %16165 = vmatpush1.bf16.msra.mxu1 %v20323_v30  ;;  %v20352_v30 = vld [vmem:[#allocation8 + $0x78c] ss:$24 sps:$4 sm:$0xff]  }
 0x6df   :  { %16175 = vmatprep.subr.bf16.mxu1 %v20328_v31  ;;  %16065 = vmatpush1.bf16.msra.mxu0 %v20389_v47  ;;  %v20437_v31 = vld [vmem:[#allocation8 + $0x23a0] ss:$24 sps:$4 sm:$0xff]   ;;  %v20445_v47 = vld [vmem:[#allocation8 + $0x23d4] ss:$24 sps:$4 sm:$0xff]  }
 0x6e0   :  { %16066 = vmatprep.subr.bf16.mxu0 %v20397_v53  ;;  %v20350_v53 = vld [vmem:[#allocation8 + $0x788] ss:$24 sps:$4 sm:$0xff]  }
 0x6e1   :  { %16167 = vmatmul.mubr.bf16.vlgmr.msra.gmra.mrb[32].mxu1 %v21864_v13 }
 0x6e2   :  { %16176 = vmatpush1.bf16.msra.mxu1 %v20326_v22  ;;  %16207 = vmatprep.mubr.bf16.mxu1 %v21866_v18  ;;  %v20358_v22 = vld [vmem:[#allocation8 + $0x7bc] ss:$24 sps:$4 sm:$0xff]  }
 0x6e3   :  { %16177 = vmatprep.subr.bf16.mxu1 %v20331_v4  ;;  %16067 = vmatpush1.bf16.msra.mxu0 %v20395_v35  ;;  %v20443_v4 = vld [vmem:[#allocation8 + $0x23d0] ss:$24 sps:$4 sm:$0xff]   ;;  %v20454_v35 = vld [vmem:[#allocation8 + $0x14] ss:$24 sps:$4 sm:$0xff]  }
 0x6e4   :  { %16068 = vmatprep.subr.bf16.mxu0 %v20403_v62  ;;  %v20356_v62 = vld [vmem:[#allocation8 + $0x7b8] ss:$24 sps:$4 sm:$0xff]  }
 0x6e6   :  { %16178 = vmatpush1.bf16.msra.mxu1 %v20329_v36  ;;  %v20364_v36 = vld [vmem:[#allocation8 + $0x7ec] ss:$24 sps:$4 sm:$0xff]  }
 0x6e7   :  { %16179 = vmatprep.subr.bf16.mxu1 %v20334_v40  ;;  %16069 = vmatpush1.bf16.msra.mxu0 %v20401_v37  ;;  %v20362_v40 = vld [vmem:[#allocation8 + $0x7e8] ss:$24 sps:$4 sm:$0xff]   ;;  %v20370_v37 = vld [vmem:[#allocation8 + $0x81c] ss:$24 sps:$4 sm:$0xff]  }
 0x6e8   :  { %16070 = vmatprep.subr.bf16.mxu0 %v20409_v41  ;;  %v20368_v41 = vld [vmem:[#allocation8 + $0x818] ss:$24 sps:$4 sm:$0xff]  }
 0x6ea   :  { %16180 = vmatpush1.bf16.msra.mxu1 %v20332_v59  ;;  %v20376_v59 = vld [vmem:[#allocation8 + $0x84c] ss:$24 sps:$4 sm:$0xff]  }
 0x6eb   :  { %16181 = vmatprep.subr.bf16.mxu1 %v20337_v49  ;;  %16071 = vmatpush1.bf16.msra.mxu0 %v20407_v58  ;;  %v20374_v49 = vld [vmem:[#allocation8 + $0x848] ss:$24 sps:$4 sm:$0xff]   ;;  %v20382_v58 = vld [vmem:[#allocation8 + $0x87c] ss:$24 sps:$4 sm:$0xff]  }
 0x6ec   :  { %16072 = vmatprep.subr.bf16.mxu0 %v20415_v12  ;;  %v20380_v12 = vld [vmem:[#allocation8 + $0x878] ss:$24 sps:$4 sm:$0xff]  }
 0x6ee   :  { %16182 = vmatpush1.bf16.msra.mxu1 %v20335_v3  ;;  %v20388_v3 = vld [vmem:[#allocation8 + $0x8ac] ss:$24 sps:$4 sm:$0xff]  }
 0x6ef   :  { %16183 = vmatprep.subr.bf16.mxu1 %v20340_v55  ;;  %16073 = vmatpush1.bf16.msra.mxu0 %v20413_v25  ;;  %v20386_v55 = vld [vmem:[#allocation8 + $0x8a8] ss:$24 sps:$4 sm:$0xff]   ;;  %v20394_v25 = vld [vmem:[#allocation8 + $0x8dc] ss:$24 sps:$4 sm:$0xff]  }
 0x6f0   :  { %16074 = vmatprep.subr.bf16.mxu0 %v20421_v23  ;;  %v20392_v23 = vld [vmem:[#allocation8 + $0x8d8] ss:$24 sps:$4 sm:$0xff]  }
 0x6f2   :  { %16184 = vmatpush1.bf16.msra.mxu1 %v20338_v56  ;;  %v20400_v56 = vld [vmem:[#allocation8 + $0x90c] ss:$24 sps:$4 sm:$0xff]  }
 0x6f3   :  { %16185 = vmatprep.subr.bf16.mxu1 %v20343_v38  ;;  %16075 = vmatpush1.bf16.msra.mxu0 %v20419_v57  ;;  %v20398_v38 = vld [vmem:[#allocation8 + $0x908] ss:$24 sps:$4 sm:$0xff]   ;;  %v20406_v57 = vld [vmem:[#allocation8 + $0x93c] ss:$24 sps:$4 sm:$0xff]  }
 0x6f4   :  { %16076 = vmatprep.subr.bf16.mxu0 %v20427_v19  ;;  %v20404_v19 = vld [vmem:[#allocation8 + $0x938] ss:$24 sps:$4 sm:$0xff]  }
 0x6f6   :  { %16186 = vmatpush1.bf16.msra.mxu1 %v20341_v2  ;;  %v20412_v2 = vld [vmem:[#allocation8 + $0x96c] ss:$24 sps:$4 sm:$0xff]  }
 0x6f7   :  { %16187 = vmatprep.subr.bf16.mxu1 %v20346_v5  ;;  %16077 = vmatpush1.bf16.msra.mxu0 %v20425_v6  ;;  %v20410_v5 = vld [vmem:[#allocation8 + $0x968] ss:$24 sps:$4 sm:$0xff]   ;;  %v20418_v6 = vld [vmem:[#allocation8 + $0x99c] ss:$24 sps:$4 sm:$0xff]  }
 0x6f8   :  { %16078 = vmatprep.subr.bf16.mxu0 %v20433_v9  ;;  %v20416_v9 = vld [vmem:[#allocation8 + $0x998] ss:$24 sps:$4 sm:$0xff]  }
 0x6fa   :  { %16188 = vmatpush1.bf16.msra.mxu1 %v20344_v16  ;;  %v20424_v16 = vld [vmem:[#allocation8 + $0x9cc] ss:$24 sps:$4 sm:$0xff]  }
 0x6fb   :  { %16189 = vmatprep.subr.bf16.mxu1 %v20349_v0  ;;  %16079 = vmatpush1.bf16.msra.mxu0 %v20431_v17  ;;  %v20422_v0 = vld [vmem:[#allocation8 + $0x9c8] ss:$24 sps:$4 sm:$0xff]   ;;  %v20430_v17 = vld [vmem:[#allocation8 + $0x9fc] ss:$24 sps:$4 sm:$0xff]  }
 0x6fc   :  { %16080 = vmatprep.subr.bf16.mxu0 %v20439_v27  ;;  %v1344_v27 = vrot.slane %v22006_v34, %v21900_v21  ;;  %v20440_v21 = vld [vmem:[#allocation8 + $0xa58] ss:$24 sps:$4 sm:$0xff]  }
 0x6fe   :  { %16190 = vmatpush1.bf16.msra.mxu1 %v20347_v29  ;;  %v1348_v29 = vrot.slane %v22006_v34, %v21886_v54  ;;  %v20446_v54 = vld [vmem:[#allocation8 + $0xa88] ss:$24 sps:$4 sm:$0xff]   ;;  %v20451_v34 = vld [vmem:[#allocation8 + $0xabc] ss:$24 sps:$4 sm:$0xff]  }
 0x6ff   :  { %16191 = vmatprep.subr.bf16.mxu1 %v20352_v30  ;;  %16081 = vmatpush1.bf16.msra.mxu0 %v20437_v31  ;;  %v20428_v30 = vld [vmem:[#allocation8 + $0x9f8] ss:$24 sps:$4 sm:$0xff]   ;;  %v20436_v31 = vld [vmem:[#allocation8 + $0xa2c] ss:$24 sps:$4 sm:$0xff]  }
 0x700   :  { %16082 = vmatprep.subr.bf16.mxu0 %v20445_v47 }
 0x702   :  { %16192 = vmatpush1.bf16.msra.mxu1 %v20350_v53 }
 0x703   :  { %16193 = vmatprep.subr.bf16.mxu1 %v20358_v22  ;;  %16083 = vmatpush1.bf16.msra.mxu0 %v20443_v4 }
 0x704   :  { %16585 = vmatprep.subr.bf16.mxu0 %v20454_v35 }
 0x706   :  { %16194 = vmatpush1.bf16.msra.mxu1 %v20356_v62  ;;  %v20434_v62 = vld [vmem:[#allocation8 + $0xa28] ss:$24 sps:$4 sm:$0xff]  }
 0x707   :  { %16195 = vmatprep.subr.bf16.mxu1 %v20364_v36 }
 0x70a   :  { %16196 = vmatpush1.bf16.msra.mxu1 %v20362_v40  ;;  %v20442_v40 = vld [vmem:[#allocation8 + $0xa5c] ss:$24 sps:$4 sm:$0xff]  }
 0x70b   :  { %16197 = vmatprep.subr.bf16.mxu1 %v20370_v37  ;;  %v20448_v37 = vld [vmem:[#allocation8 + $0xa8c] ss:$24 sps:$4 sm:$0xff]  }
 0x70e   :  { %16198 = vmatpush1.bf16.msra.mxu1 %v20368_v41 }
 0x70f   :  { %16199 = vmatprep.subr.bf16.mxu1 %v20376_v59 }
 0x712   :  { %16200 = vmatpush1.bf16.msra.mxu1 %v20374_v49  ;;  %v20449_v49 = vld [vmem:[#allocation8 + $0xab8] ss:$24 sps:$4 sm:$0xff]  }
 0x713   :  { %16201 = vmatprep.subr.bf16.mxu1 %v20382_v58 }
 0x716   :  { %16202 = vmatpush1.bf16.msra.mxu1 %v20380_v12  ;;  %v20452_v12 = vld [vmem:[#allocation8 + $0x10] ss:$24 sps:$4 sm:$0xff]  }
 0x717   :  { %16203 = vmatprep.subr.bf16.mxu1 %v20388_v3 }
 0x71a   :  { %16204 = vmatpush1.bf16.msra.mxu1 %v20386_v55  ;;  %v20457_v55 = vld [vmem:[#allocation8 + $0xaec] ss:$24 sps:$4 sm:$0xff]  }
 0x71b   :  { %16205 = vmatprep.subr.bf16.mxu1 %v20394_v25  ;;  %v20460_v25 = vld [vmem:[#allocation8 + $0x44] ss:$24 sps:$4 sm:$0xff]  }
 0x71e   :  { %16206 = vmatpush1.bf16.msra.mxu1 %v20392_v23  ;;  %v20455_v23 = vld [vmem:[#allocation8 + $0xae8] ss:$24 sps:$4 sm:$0xff]  }
 0x71f   :  { %16216 = vmatprep.subr.bf16.mxu1 %v20400_v56  ;;  %v20458_v56 = vld [vmem:[#allocation8 + $0x40] ss:$24 sps:$4 sm:$0xff]  }
 0x721   :  { %16208 = vmatmul.mubr.bf16.vlgmr.msra.gmra.mrb[32].mxu1 %v21880_v15 }
 0x722   :  { %16217 = vmatpush1.bf16.msra.mxu1 %v20398_v38  ;;  %16248 = vmatprep.mubr.bf16.mxu1 %v21896_v33  ;;  %v20463_v38 = vld [vmem:[#allocation8 + $0xb1c] ss:$24 sps:$4 sm:$0xff]  }
 0x723   :  { %16218 = vmatprep.subr.bf16.mxu1 %v20406_v57  ;;  %v20466_v57 = vld [vmem:[#allocation8 + $0x74] ss:$24 sps:$4 sm:$0xff]  }
 0x726   :  { %16219 = vmatpush1.bf16.msra.mxu1 %v20404_v19  ;;  %v20461_v19 = vld [vmem:[#allocation8 + $0xb18] ss:$24 sps:$4 sm:$0xff]  }
 0x727   :  { %16220 = vmatprep.subr.bf16.mxu1 %v20412_v2  ;;  %v20464_v2 = vld [vmem:[#allocation8 + $0x70] ss:$24 sps:$4 sm:$0xff]  }
 0x72a   :  { %16221 = vmatpush1.bf16.msra.mxu1 %v20410_v5  ;;  %v20469_v5 = vld [vmem:[#allocation8 + $0xb4c] ss:$24 sps:$4 sm:$0xff]  }
 0x72b   :  { %16222 = vmatprep.subr.bf16.mxu1 %v20418_v6  ;;  %v20472_v6 = vld [vmem:[#allocation8 + $0xa4] ss:$24 sps:$4 sm:$0xff]  }
 0x72e   :  { %16223 = vmatpush1.bf16.msra.mxu1 %v20416_v9  ;;  %v20467_v9 = vld [vmem:[#allocation8 + $0xb48] ss:$24 sps:$4 sm:$0xff]  }
 0x72f   :  { %16224 = vmatprep.subr.bf16.mxu1 %v20424_v16  ;;  %v20470_v16 = vld [vmem:[#allocation8 + $0xa0] ss:$24 sps:$4 sm:$0xff]  }
 0x732   :  { %16225 = vmatpush1.bf16.msra.mxu1 %v20422_v0  ;;  %v20475_v0 = vld [vmem:[#allocation8 + $0xb7c] ss:$24 sps:$4 sm:$0xff]  }
 0x733   :  { %16226 = vmatprep.subr.bf16.mxu1 %v20430_v17  ;;  %v20473_v17 = vld [vmem:[#allocation8 + $0xb78] ss:$24 sps:$4 sm:$0xff]  }
 0x734   :  { %v8602_v47 = vpop.f32.mrb[28].mxu1 }
 0x735   :  { %v19456_v53 = vadd.f32 %v8602_v47, %v1344_v27  ;;  %v8604_v22 = vpop.f32.mrb[29].mxu1  ;;  %v20476_v27 = vld [vmem:[#allocation8 + $0xd0] ss:$24 sps:$4 sm:$0xff]   ;;  %v20482_v47 = vld [vmem:[#allocation8 + $0x100] ss:$24 sps:$4 sm:$0xff]  }
 0x736   :  { %v19457_v4 = vadd.f32 %v8604_v22, %v1348_v29  ;;  %v8606_v35 = vpop.f32.mrb[30].mxu1  ;;  %16227 = vmatpush1.bf16.msra.mxu1 %v20428_v30  ;;  %v20481_v29 = vld [vmem:[#allocation8 + $0xbac] ss:$24 sps:$4 sm:$0xff]  }
 0x737   :  { %21474 = vtanh.f32 %v19456_v53  ;;  %v8607_v36 = vpop.f32.mrb[31].mxu1  ;;  %16228 = vmatprep.subr.bf16.mxu1 %v20436_v31  ;;  %v20484_v30 = vld [vmem:[#allocation8 + $0x104] ss:$24 sps:$4 sm:$0xff]   ;;  %v20479_v31 = vld [vmem:[#allocation8 + $0xba8] ss:$24 sps:$4 sm:$0xff]  }
 0x738   :  { %21476 = vtanh.f32 %v19457_v4  ;;  %v20487_v53 = vld [vmem:[#allocation8 + $0xbdc] ss:$24 sps:$4 sm:$0xff]   ;;  %v20485_v4 = vld [vmem:[#allocation8 + $0xbd8] ss:$24 sps:$4 sm:$0xff]  }
 0x739   :  { %v20490_v22 = vld [vmem:[#allocation8 + $0x134] ss:$24 sps:$4 sm:$0xff]   ;;  %v20488_v35 = vld [vmem:[#allocation8 + $0x130] ss:$24 sps:$4 sm:$0xff]   ;;  %v20496_v36 = vld [vmem:[#allocation8 + $0x164] ss:$24 sps:$4 sm:$0xff]  }
 0x73a   :  { %16229 = vmatpush1.bf16.msra.mxu1 %v20434_v62  ;;  %v20493_v62 = vld [vmem:[#allocation8 + $0xc0c] ss:$24 sps:$4 sm:$0xff]  }
 0x73b   :  { %16230 = vmatprep.subr.bf16.mxu1 %v20442_v40  ;;  %v20491_v40 = vld [vmem:[#allocation8 + $0xc08] ss:$24 sps:$4 sm:$0xff]  }
 0x73e   :  { %16231 = vmatpush1.bf16.msra.mxu1 %v20440_v21  ;;  %v20494_v21 = vld [vmem:[#allocation8 + $0x160] ss:$24 sps:$4 sm:$0xff]  }
 0x73f   :  { %16232 = vmatprep.subr.bf16.mxu1 %v20448_v37  ;;  %v20499_v37 = vld [vmem:[#allocation8 + $0xc3c] ss:$24 sps:$4 sm:$0xff]  }
 0x741   :  { %v21475_v41 = vpop.eup %21474 }
 0x742   :  { %v21477_v59 = vpop.eup %21476  ;;  %16233 = vmatpush1.bf16.msra.mxu1 %v20446_v54  ;;  %v22024_v3 = vpack.c.bf16 %v21475_v41, %v21475_v41  ;;  %v20502_v54 = vld [vmem:[#allocation8 + $0x194] ss:$24 sps:$4 sm:$0xff]   ;;  %v20500_v41 = vld [vmem:[#allocation8 + $0x190] ss:$24 sps:$4 sm:$0xff]  }
 0x743   :  { %v22022_v58 = vpack.c.bf16 %v21477_v59, %v21477_v59  ;;  %16234 = vmatprep.subr.bf16.mxu1 %v20451_v34  ;;  %v20497_v34 = vld [vmem:[#allocation8 + $0xc38] ss:$24 sps:$4 sm:$0xff]   ;;  %v20505_v59 = vld [vmem:[#allocation8 + $0xc6c] ss:$24 sps:$4 sm:$0xff]  }
 0x745   :  { %16084 = vmatprep.mubr.bf16.mxu0 %v22022_v58 }
 0x746   :  { %16085 = vmatmul.mubr.bf16.vlgmr.msra.gmra.mrb[16].mxu0 %v22024_v3  ;;  %16235 = vmatpush1.bf16.msra.mxu1 %v20449_v49  ;;  %v20508_v49 = vld [vmem:[#allocation8 + $0x1c4] ss:$24 sps:$4 sm:$0xff]  }
 0x747   :  { %16586 = vmatpush1.bf16.msra.mxu0 %v20452_v12  ;;  %16617 = vmatprep.mubr.bf16.mxu0 %v21818_v20  ;;  %v20478_v20 = vld [vmem:[#allocation8 + $0xd4] ss:$24 sps:$4 sm:$0xff]   ;;  %v20503_v12 = vld [vmem:[#allocation8 + $0xc68] ss:$24 sps:$4 sm:$0xff]  }
 0x748   :  { %16236 = vmatprep.subr.bf16.mxu1 %v20457_v55  ;;  %16587 = vmatprep.subr.bf16.mxu0 %v20460_v25  ;;  %v20506_v55 = vld [vmem:[#allocation8 + $0x1c0] ss:$24 sps:$4 sm:$0xff]   ;;  %v20511_v25 = vld [vmem:[#allocation8 + $0xc9c] ss:$24 sps:$4 sm:$0xff]  }
 0x74a   :  { %16237 = vmatpush1.bf16.msra.mxu1 %v20455_v23  ;;  %v20514_v23 = vld [vmem:[#allocation8 + $0x1f4] ss:$24 sps:$4 sm:$0xff]  }
 0x74b   :  { %16588 = vmatpush1.bf16.msra.mxu0 %v20458_v56  ;;  %16238 = vmatprep.subr.bf16.mxu1 %v20463_v38  ;;  %v20509_v56 = vld [vmem:[#allocation8 + $0xc98] ss:$24 sps:$4 sm:$0xff]  }
 0x74c   :  { %16589 = vmatprep.subr.bf16.mxu0 %v20466_v57  ;;  %v20512_v38 = vld [vmem:[#allocation8 + $0x1f0] ss:$24 sps:$4 sm:$0xff]   ;;  %v20517_v57 = vld [vmem:[#allocation8 + $0xccc] ss:$24 sps:$4 sm:$0xff]  }
 0x74e   :  { %16239 = vmatpush1.bf16.msra.mxu1 %v20461_v19  ;;  %v20520_v19 = vld [vmem:[#allocation8 + $0x224] ss:$24 sps:$4 sm:$0xff]  }
 0x74f   :  { %16590 = vmatpush1.bf16.msra.mxu0 %v20464_v2  ;;  %16240 = vmatprep.subr.bf16.mxu1 %v20469_v5  ;;  %v20515_v2 = vld [vmem:[#allocation8 + $0xcc8] ss:$24 sps:$4 sm:$0xff]  }
 0x750   :  { %16591 = vmatprep.subr.bf16.mxu0 %v20472_v6  ;;  %v20518_v5 = vld [vmem:[#allocation8 + $0x220] ss:$24 sps:$4 sm:$0xff]   ;;  %v20523_v6 = vld [vmem:[#allocation8 + $0xcfc] ss:$24 sps:$4 sm:$0xff]  }
 0x752   :  { %16241 = vmatpush1.bf16.msra.mxu1 %v20467_v9  ;;  %v20526_v9 = vld [vmem:[#allocation8 + $0x254] ss:$24 sps:$4 sm:$0xff]  }
 0x753   :  { %16592 = vmatpush1.bf16.msra.mxu0 %v20470_v16  ;;  %16242 = vmatprep.subr.bf16.mxu1 %v20475_v0  ;;  %v20521_v16 = vld [vmem:[#allocation8 + $0xcf8] ss:$24 sps:$4 sm:$0xff]  }
 0x754   :  { %16593 = vmatprep.subr.bf16.mxu0 %v20478_v20  ;;  %v20524_v0 = vld [vmem:[#allocation8 + $0x250] ss:$24 sps:$4 sm:$0xff]   ;;  %v20529_v20 = vld [vmem:[#allocation8 + $0xd2c] ss:$24 sps:$4 sm:$0xff]  }
 0x756   :  { %16243 = vmatpush1.bf16.msra.mxu1 %v20473_v17  ;;  %v20532_v17 = vld [vmem:[#allocation8 + $0x284] ss:$24 sps:$4 sm:$0xff]  }
 0x757   :  { %16594 = vmatpush1.bf16.msra.mxu0 %v20476_v27  ;;  %16244 = vmatprep.subr.bf16.mxu1 %v20481_v29  ;;  %v20527_v27 = vld [vmem:[#allocation8 + $0xd28] ss:$24 sps:$4 sm:$0xff]  }
 0x758   :  { %16595 = vmatprep.subr.bf16.mxu0 %v20484_v30  ;;  %v20530_v29 = vld [vmem:[#allocation8 + $0x280] ss:$24 sps:$4 sm:$0xff]   ;;  %v20535_v30 = vld [vmem:[#allocation8 + $0xd5c] ss:$24 sps:$4 sm:$0xff]  }
 0x75a   :  { %16245 = vmatpush1.bf16.msra.mxu1 %v20479_v31  ;;  %v20538_v31 = vld [vmem:[#allocation8 + $0x2b4] ss:$24 sps:$4 sm:$0xff]  }
 0x75b   :  { %16596 = vmatpush1.bf16.msra.mxu0 %v20482_v47  ;;  %16246 = vmatprep.subr.bf16.mxu1 %v20487_v53  ;;  %v20533_v47 = vld [vmem:[#allocation8 + $0xd58] ss:$24 sps:$4 sm:$0xff]  }
 0x75c   :  { %16597 = vmatprep.subr.bf16.mxu0 %v20490_v22  ;;  %v20536_v53 = vld [vmem:[#allocation8 + $0x2b0] ss:$24 sps:$4 sm:$0xff]   ;;  %v20541_v22 = vld [vmem:[#allocation8 + $0xd8c] ss:$24 sps:$4 sm:$0xff]  }
 0x75e   :  { %16247 = vmatpush1.bf16.msra.mxu1 %v20485_v4  ;;  %v20544_v4 = vld [vmem:[#allocation8 + $0x2e4] ss:$24 sps:$4 sm:$0xff]  }
 0x75f   :  { %16598 = vmatpush1.bf16.msra.mxu0 %v20488_v35  ;;  %16257 = vmatprep.subr.bf16.mxu1 %v20493_v62  ;;  %v20539_v35 = vld [vmem:[#allocation8 + $0xd88] ss:$24 sps:$4 sm:$0xff]  }
 0x760   :  { %16599 = vmatprep.subr.bf16.mxu0 %v20496_v36  ;;  %v20542_v62 = vld [vmem:[#allocation8 + $0x2e0] ss:$24 sps:$4 sm:$0xff]   ;;  %v20547_v36 = vld [vmem:[#allocation8 + $0xdbc] ss:$24 sps:$4 sm:$0xff]  }
 0x761   :  { %16249 = vmatmul.mubr.bf16.vlgmr.msra.gmra.mrb[32].mxu1 %v21910_v1 }
 0x762   :  { %16258 = vmatpush1.bf16.msra.mxu1 %v20491_v40  ;;  %16289 = vmatprep.mubr.bf16.mxu1 %v21912_v8  ;;  %v20550_v40 = vld [vmem:[#allocation8 + $0x314] ss:$24 sps:$4 sm:$0xff]  }
 0x763   :  { %16600 = vmatpush1.bf16.msra.mxu0 %v20494_v21  ;;  %16259 = vmatprep.subr.bf16.mxu1 %v20499_v37  ;;  %v20545_v21 = vld [vmem:[#allocation8 + $0xdb8] ss:$24 sps:$4 sm:$0xff]  }
 0x764   :  { %16601 = vmatprep.subr.bf16.mxu0 %v20502_v54  ;;  %v20548_v37 = vld [vmem:[#allocation8 + $0x310] ss:$24 sps:$4 sm:$0xff]   ;;  %v20553_v54 = vld [vmem:[#allocation8 + $0xdec] ss:$24 sps:$4 sm:$0xff]  }
 0x766   :  { %16260 = vmatpush1.bf16.msra.mxu1 %v20497_v34  ;;  %v20556_v34 = vld [vmem:[#allocation8 + $0x344] ss:$24 sps:$4 sm:$0xff]  }
 0x767   :  { %16602 = vmatpush1.bf16.msra.mxu0 %v20500_v41  ;;  %16261 = vmatprep.subr.bf16.mxu1 %v20505_v59  ;;  %v20551_v41 = vld [vmem:[#allocation8 + $0xde8] ss:$24 sps:$4 sm:$0xff]  }
 0x768   :  { %16603 = vmatprep.subr.bf16.mxu0 %v20508_v49  ;;  %v20554_v59 = vld [vmem:[#allocation8 + $0x340] ss:$24 sps:$4 sm:$0xff]   ;;  %v20559_v49 = vld [vmem:[#allocation8 + $0xe1c] ss:$24 sps:$4 sm:$0xff]  }
 0x76a   :  { %16262 = vmatpush1.bf16.msra.mxu1 %v20503_v12  ;;  %v20562_v12 = vld [vmem:[#allocation8 + $0x374] ss:$24 sps:$4 sm:$0xff]  }
 0x76b   :  { %16604 = vmatpush1.bf16.msra.mxu0 %v20506_v55  ;;  %16263 = vmatprep.subr.bf16.mxu1 %v20511_v25  ;;  %v20557_v55 = vld [vmem:[#allocation8 + $0xe18] ss:$24 sps:$4 sm:$0xff]  }
 0x76c   :  { %16605 = vmatprep.subr.bf16.mxu0 %v20514_v23  ;;  %v20560_v25 = vld [vmem:[#allocation8 + $0x370] ss:$24 sps:$4 sm:$0xff]   ;;  %v20565_v23 = vld [vmem:[#allocation8 + $0xe4c] ss:$24 sps:$4 sm:$0xff]  }
 0x76e   :  { %16264 = vmatpush1.bf16.msra.mxu1 %v20509_v56  ;;  %v20568_v56 = vld [vmem:[#allocation8 + $0x3a4] ss:$24 sps:$4 sm:$0xff]  }
 0x76f   :  { %16606 = vmatpush1.bf16.msra.mxu0 %v20512_v38  ;;  %16265 = vmatprep.subr.bf16.mxu1 %v20517_v57  ;;  %v20566_v38 = vld [vmem:[#allocation8 + $0x3a0] ss:$24 sps:$4 sm:$0xff]   ;;  %v20571_v57 = vld [vmem:[#allocation8 + $0xe7c] ss:$24 sps:$4 sm:$0xff]  }
 0x770   :  { %16607 = vmatprep.subr.bf16.mxu0 %v20520_v19  ;;  %v20569_v19 = vld [vmem:[#allocation8 + $0xe78] ss:$24 sps:$4 sm:$0xff]  }
 0x772   :  { %16266 = vmatpush1.bf16.msra.mxu1 %v20515_v2  ;;  %v20572_v2 = vld [vmem:[#allocation8 + $0x3d0] ss:$24 sps:$4 sm:$0xff]  }
 0x773   :  { %16608 = vmatpush1.bf16.msra.mxu0 %v20518_v5  ;;  %16267 = vmatprep.subr.bf16.mxu1 %v20523_v6  ;;  %v20577_v5 = vld [vmem:[#allocation8 + $0xeac] ss:$24 sps:$4 sm:$0xff]  }
 0x774   :  { %16609 = vmatprep.subr.bf16.mxu0 %v20526_v9  ;;  %v20580_v6 = vld [vmem:[#allocation8 + $0x404] ss:$24 sps:$4 sm:$0xff]   ;;  %v20575_v9 = vld [vmem:[#allocation8 + $0xea8] ss:$24 sps:$4 sm:$0xff]  }
 0x776   :  { %16268 = vmatpush1.bf16.msra.mxu1 %v20521_v16  ;;  %v20578_v16 = vld [vmem:[#allocation8 + $0x400] ss:$24 sps:$4 sm:$0xff]  }
 0x777   :  { %16610 = vmatpush1.bf16.msra.mxu0 %v20524_v0  ;;  %16269 = vmatprep.subr.bf16.mxu1 %v20529_v20  ;;  %v20583_v0 = vld [vmem:[#allocation8 + $0xedc] ss:$24 sps:$4 sm:$0xff]  }
 0x778   :  { %16611 = vmatprep.subr.bf16.mxu0 %v20532_v17  ;;  %v20586_v20 = vld [vmem:[#allocation8 + $0x434] ss:$24 sps:$4 sm:$0xff]   ;;  %v20581_v17 = vld [vmem:[#allocation8 + $0xed8] ss:$24 sps:$4 sm:$0xff]  }
 0x77a   :  { %16270 = vmatpush1.bf16.msra.mxu1 %v20527_v27  ;;  %v20584_v27 = vld [vmem:[#allocation8 + $0x430] ss:$24 sps:$4 sm:$0xff]  }
 0x77b   :  { %16612 = vmatpush1.bf16.msra.mxu0 %v20530_v29  ;;  %16271 = vmatprep.subr.bf16.mxu1 %v20535_v30  ;;  %v20589_v29 = vld [vmem:[#allocation8 + $0xf0c] ss:$24 sps:$4 sm:$0xff]  }
 0x77c   :  { %16613 = vmatprep.subr.bf16.mxu0 %v20538_v31  ;;  %v20592_v30 = vld [vmem:[#allocation8 + $0x464] ss:$24 sps:$4 sm:$0xff]   ;;  %v20587_v31 = vld [vmem:[#allocation8 + $0xf08] ss:$24 sps:$4 sm:$0xff]  }
 0x77e   :  { %16272 = vmatpush1.bf16.msra.mxu1 %v20533_v47  ;;  %v20590_v47 = vld [vmem:[#allocation8 + $0x460] ss:$24 sps:$4 sm:$0xff]  }
 0x77f   :  { %16614 = vmatpush1.bf16.msra.mxu0 %v20536_v53  ;;  %16273 = vmatprep.subr.bf16.mxu1 %v20541_v22  ;;  %v20595_v53 = vld [vmem:[#allocation8 + $0xf3c] ss:$24 sps:$4 sm:$0xff]  }
 0x780   :  { %16615 = vmatprep.subr.bf16.mxu0 %v20544_v4  ;;  %v20598_v22 = vld [vmem:[#allocation8 + $0x494] ss:$24 sps:$4 sm:$0xff]   ;;  %v20593_v4 = vld [vmem:[#allocation8 + $0xf38] ss:$24 sps:$4 sm:$0xff]  }
 0x782   :  { %16274 = vmatpush1.bf16.msra.mxu1 %v20539_v35  ;;  %v20596_v35 = vld [vmem:[#allocation8 + $0x490] ss:$24 sps:$4 sm:$0xff]  }
 0x783   :  { %16616 = vmatpush1.bf16.msra.mxu0 %v20542_v62  ;;  %16275 = vmatprep.subr.bf16.mxu1 %v20547_v36  ;;  %v20601_v62 = vld [vmem:[#allocation8 + $0xf6c] ss:$24 sps:$4 sm:$0xff]  }
 0x784   :  { %16626 = vmatprep.subr.bf16.mxu0 %v20550_v40  ;;  %v20604_v36 = vld [vmem:[#allocation8 + $0x4c4] ss:$24 sps:$4 sm:$0xff]   ;;  %v20599_v40 = vld [vmem:[#allocation8 + $0xf68] ss:$24 sps:$4 sm:$0xff]  }
 0x786   :  { %16618 = vmatmul.mubr.bf16.vlgmr.msra.gmra.mrb[20].mxu0 %v21844_v44  ;;  %16276 = vmatpush1.bf16.msra.mxu1 %v20545_v21  ;;  %v20563_v44 = vld [vmem:[#allocation8 + $0xe48] ss:$24 sps:$4 sm:$0xff]  }
 0x787   :  { %16627 = vmatpush1.bf16.msra.mxu0 %v20548_v37  ;;  %16658 = vmatprep.mubr.bf16.mxu0 %v21846_v50  ;;  %v20574_v50 = vld [vmem:[#allocation8 + $0x3d4] ss:$24 sps:$4 sm:$0xff]   ;;  %v20602_v21 = vld [vmem:[#allocation8 + $0x4c0] ss:$24 sps:$4 sm:$0xff]  }
 0x788   :  { %16277 = vmatprep.subr.bf16.mxu1 %v20553_v54  ;;  %16628 = vmatprep.subr.bf16.mxu0 %v20556_v34  ;;  %v20607_v37 = vld [vmem:[#allocation8 + $0xf9c] ss:$24 sps:$4 sm:$0xff]   ;;  %v20605_v34 = vld [vmem:[#allocation8 + $0xf98] ss:$24 sps:$4 sm:$0xff]  }
 0x789   :  { %v20610_v54 = vld [vmem:[#allocation8 + $0x4f4] ss:$24 sps:$4 sm:$0xff]  }
 0x78a   :  { %16278 = vmatpush1.bf16.msra.mxu1 %v20551_v41  ;;  %v20608_v41 = vld [vmem:[#allocation8 + $0x4f0] ss:$24 sps:$4 sm:$0xff]  }
 0x78b   :  { %16629 = vmatpush1.bf16.msra.mxu0 %v20554_v59  ;;  %16279 = vmatprep.subr.bf16.mxu1 %v20559_v49  ;;  %v20613_v59 = vld [vmem:[#allocation8 + $0xfcc] ss:$24 sps:$4 sm:$0xff]  }
 0x78c   :  { %16630 = vmatprep.subr.bf16.mxu0 %v20562_v12  ;;  %v20616_v49 = vld [vmem:[#allocation8 + $0x524] ss:$24 sps:$4 sm:$0xff]   ;;  %v20611_v12 = vld [vmem:[#allocation8 + $0xfc8] ss:$24 sps:$4 sm:$0xff]  }
 0x78e   :  { %16280 = vmatpush1.bf16.msra.mxu1 %v20557_v55  ;;  %v20614_v55 = vld [vmem:[#allocation8 + $0x520] ss:$24 sps:$4 sm:$0xff]  }
 0x78f   :  { %16631 = vmatpush1.bf16.msra.mxu0 %v20560_v25  ;;  %16281 = vmatprep.subr.bf16.mxu1 %v20565_v23  ;;  %v20619_v25 = vld [vmem:[#allocation8 + $0xffc] ss:$24 sps:$4 sm:$0xff]  }
 0x790   :  { %16632 = vmatprep.subr.bf16.mxu0 %v20568_v56  ;;  %v20622_v23 = vld [vmem:[#allocation8 + $0x554] ss:$24 sps:$4 sm:$0xff]   ;;  %v20617_v56 = vld [vmem:[#allocation8 + $0xff8] ss:$24 sps:$4 sm:$0xff]  }
 0x792   :  { %16282 = vmatpush1.bf16.msra.mxu1 %v20563_v44  ;;  %v20620_v44 = vld [vmem:[#allocation8 + $0x550] ss:$24 sps:$4 sm:$0xff]  }
 0x793   :  { %16633 = vmatpush1.bf16.msra.mxu0 %v20566_v38  ;;  %16283 = vmatprep.subr.bf16.mxu1 %v20571_v57  ;;  %v20625_v38 = vld [vmem:[#allocation8 + $0x102c] ss:$24 sps:$4 sm:$0xff]  }
 0x794   :  { %16634 = vmatprep.subr.bf16.mxu0 %v20574_v50  ;;  %v20628_v57 = vld [vmem:[#allocation8 + $0x584] ss:$24 sps:$4 sm:$0xff]   ;;  %v20623_v50 = vld [vmem:[#allocation8 + $0x1028] ss:$24 sps:$4 sm:$0xff]  }
 0x796   :  { %16284 = vmatpush1.bf16.msra.mxu1 %v20569_v19  ;;  %v20626_v19 = vld [vmem:[#allocation8 + $0x580] ss:$24 sps:$4 sm:$0xff]  }
 0x797   :  { %16635 = vmatpush1.bf16.msra.mxu0 %v20572_v2  ;;  %16285 = vmatprep.subr.bf16.mxu1 %v20577_v5  ;;  %v20631_v2 = vld [vmem:[#allocation8 + $0x105c] ss:$24 sps:$4 sm:$0xff]  }
 0x798   :  { %16636 = vmatprep.subr.bf16.mxu0 %v20580_v6  ;;  %v20634_v5 = vld [vmem:[#allocation8 + $0x5b4] ss:$24 sps:$4 sm:$0xff]   ;;  %v20629_v6 = vld [vmem:[#allocation8 + $0x1058] ss:$24 sps:$4 sm:$0xff]  }
 0x79a   :  { %16286 = vmatpush1.bf16.msra.mxu1 %v20575_v9  ;;  %v20632_v9 = vld [vmem:[#allocation8 + $0x5b0] ss:$24 sps:$4 sm:$0xff]  }
 0x79b   :  { %16637 = vmatpush1.bf16.msra.mxu0 %v20578_v16  ;;  %16287 = vmatprep.subr.bf16.mxu1 %v20583_v0  ;;  %v20637_v16 = vld [vmem:[#allocation8 + $0x108c] ss:$24 sps:$4 sm:$0xff]  }
 0x79c   :  { %16638 = vmatprep.subr.bf16.mxu0 %v20586_v20  ;;  %v20640_v0 = vld [vmem:[#allocation8 + $0x5e4] ss:$24 sps:$4 sm:$0xff]   ;;  %v20635_v20 = vld [vmem:[#allocation8 + $0x1088] ss:$24 sps:$4 sm:$0xff]  }
 0x79e   :  { %16288 = vmatpush1.bf16.msra.mxu1 %v20581_v17  ;;  %v20638_v17 = vld [vmem:[#allocation8 + $0x5e0] ss:$24 sps:$4 sm:$0xff]  }
 0x79f   :  { %16639 = vmatpush1.bf16.msra.mxu0 %v20584_v27  ;;  %16298 = vmatprep.subr.bf16.mxu1 %v20589_v29  ;;  %v20643_v27 = vld [vmem:[#allocation8 + $0x10bc] ss:$24 sps:$4 sm:$0xff]  }
 0x7a0   :  { %16640 = vmatprep.subr.bf16.mxu0 %v20592_v30  ;;  %v20646_v29 = vld [vmem:[#allocation8 + $0x614] ss:$24 sps:$4 sm:$0xff]   ;;  %v20641_v30 = vld [vmem:[#allocation8 + $0x10b8] ss:$24 sps:$4 sm:$0xff]  }
 0x7a1   :  { %16290 = vmatmul.mubr.bf16.vlgmr.msra.gmra.mrb[32].mxu1 %v21921_v63 }
 0x7a2   :  { %16299 = vmatpush1.bf16.msra.mxu1 %v20587_v31  ;;  %16330 = vmatprep.mubr.bf16.mxu1 %v21935_v26  ;;  %v20644_v31 = vld [vmem:[#allocation8 + $0x610] ss:$24 sps:$4 sm:$0xff]  }
 0x7a3   :  { %16641 = vmatpush1.bf16.msra.mxu0 %v20590_v47  ;;  %16300 = vmatprep.subr.bf16.mxu1 %v20595_v53  ;;  %v20649_v47 = vld [vmem:[#allocation8 + $0x10ec] ss:$24 sps:$4 sm:$0xff]  }
 0x7a4   :  { %16642 = vmatprep.subr.bf16.mxu0 %v20598_v22  ;;  %v20652_v53 = vld [vmem:[#allocation8 + $0x644] ss:$24 sps:$4 sm:$0xff]   ;;  %v20647_v22 = vld [vmem:[#allocation8 + $0x10e8] ss:$24 sps:$4 sm:$0xff]  }
 0x7a6   :  { %16301 = vmatpush1.bf16.msra.mxu1 %v20593_v4  ;;  %v20650_v4 = vld [vmem:[#allocation8 + $0x640] ss:$24 sps:$4 sm:$0xff]  }
 0x7a7   :  { %16643 = vmatpush1.bf16.msra.mxu0 %v20596_v35  ;;  %16302 = vmatprep.subr.bf16.mxu1 %v20601_v62  ;;  %v20655_v35 = vld [vmem:[#allocation8 + $0x111c] ss:$24 sps:$4 sm:$0xff]  }
 0x7a8   :  { %16644 = vmatprep.subr.bf16.mxu0 %v20604_v36  ;;  %v20658_v62 = vld [vmem:[#allocation8 + $0x674] ss:$24 sps:$4 sm:$0xff]   ;;  %v20653_v36 = vld [vmem:[#allocation8 + $0x1118] ss:$24 sps:$4 sm:$0xff]  }
 0x7aa   :  { %16303 = vmatpush1.bf16.msra.mxu1 %v20599_v40  ;;  %v20656_v40 = vld [vmem:[#allocation8 + $0x670] ss:$24 sps:$4 sm:$0xff]  }
 0x7ab   :  { %16645 = vmatpush1.bf16.msra.mxu0 %v20602_v21  ;;  %16304 = vmatprep.subr.bf16.mxu1 %v20607_v37  ;;  %v20661_v21 = vld [vmem:[#allocation8 + $0x114c] ss:$24 sps:$4 sm:$0xff]  }
 0x7ac   :  { %16646 = vmatprep.subr.bf16.mxu0 %v20610_v54  ;;  %v20664_v37 = vld [vmem:[#allocation8 + $0x6a4] ss:$24 sps:$4 sm:$0xff]   ;;  %v20662_v54 = vld [vmem:[#allocation8 + $0x6a0] ss:$24 sps:$4 sm:$0xff]  }
 0x7ae   :  { %16305 = vmatpush1.bf16.msra.mxu1 %v20605_v34  ;;  %v20667_v34 = vld [vmem:[#allocation8 + $0x117c] ss:$24 sps:$4 sm:$0xff]  }
 0x7af   :  { %16647 = vmatpush1.bf16.msra.mxu0 %v20608_v41  ;;  %16306 = vmatprep.subr.bf16.mxu1 %v20613_v59  ;;  %v20665_v41 = vld [vmem:[#allocation8 + $0x1178] ss:$24 sps:$4 sm:$0xff]  }
 0x7b0   :  { %16648 = vmatprep.subr.bf16.mxu0 %v20616_v49  ;;  %v20668_v59 = vld [vmem:[#allocation8 + $0x6d0] ss:$24 sps:$4 sm:$0xff]   ;;  %v20673_v49 = vld [vmem:[#allocation8 + $0x11ac] ss:$24 sps:$4 sm:$0xff]  }
 0x7b2   :  { %16307 = vmatpush1.bf16.msra.mxu1 %v20611_v12  ;;  %v20676_v12 = vld [vmem:[#allocation8 + $0x704] ss:$24 sps:$4 sm:$0xff]  }
 0x7b3   :  { %16649 = vmatpush1.bf16.msra.mxu0 %v20614_v55  ;;  %16308 = vmatprep.subr.bf16.mxu1 %v20619_v25  ;;  %v20671_v55 = vld [vmem:[#allocation8 + $0x11a8] ss:$24 sps:$4 sm:$0xff]  }
 0x7b4   :  { %16650 = vmatprep.subr.bf16.mxu0 %v20622_v23  ;;  %v20674_v25 = vld [vmem:[#allocation8 + $0x700] ss:$24 sps:$4 sm:$0xff]   ;;  %v20679_v23 = vld [vmem:[#allocation8 + $0x11dc] ss:$24 sps:$4 sm:$0xff]  }
 0x7b6   :  { %16309 = vmatpush1.bf16.msra.mxu1 %v20617_v56  ;;  %v20682_v56 = vld [vmem:[#allocation8 + $0x734] ss:$24 sps:$4 sm:$0xff]  }
 0x7b7   :  { %16651 = vmatpush1.bf16.msra.mxu0 %v20620_v44  ;;  %16310 = vmatprep.subr.bf16.mxu1 %v20625_v38  ;;  %v20677_v44 = vld [vmem:[#allocation8 + $0x11d8] ss:$24 sps:$4 sm:$0xff]  }
 0x7b8   :  { %16652 = vmatprep.subr.bf16.mxu0 %v20628_v57  ;;  %v20680_v38 = vld [vmem:[#allocation8 + $0x730] ss:$24 sps:$4 sm:$0xff]   ;;  %v20685_v57 = vld [vmem:[#allocation8 + $0x120c] ss:$24 sps:$4 sm:$0xff]  }
 0x7ba   :  { %16311 = vmatpush1.bf16.msra.mxu1 %v20623_v50  ;;  %v20688_v50 = vld [vmem:[#allocation8 + $0x764] ss:$24 sps:$4 sm:$0xff]  }
 0x7bb   :  { %16653 = vmatpush1.bf16.msra.mxu0 %v20626_v19  ;;  %16312 = vmatprep.subr.bf16.mxu1 %v20631_v2  ;;  %v20683_v19 = vld [vmem:[#allocation8 + $0x1208] ss:$24 sps:$4 sm:$0xff]  }
 0x7bc   :  { %16654 = vmatprep.subr.bf16.mxu0 %v20634_v5  ;;  %v20686_v2 = vld [vmem:[#allocation8 + $0x760] ss:$24 sps:$4 sm:$0xff]   ;;  %v20691_v5 = vld [vmem:[#allocation8 + $0x123c] ss:$24 sps:$4 sm:$0xff]  }
 0x7be   :  { %16313 = vmatpush1.bf16.msra.mxu1 %v20629_v6  ;;  %v20694_v6 = vld [vmem:[#allocation8 + $0x794] ss:$24 sps:$4 sm:$0xff]  }
 0x7bf   :  { %16655 = vmatpush1.bf16.msra.mxu0 %v20632_v9  ;;  %16314 = vmatprep.subr.bf16.mxu1 %v20637_v16  ;;  %v20689_v9 = vld [vmem:[#allocation8 + $0x1238] ss:$24 sps:$4 sm:$0xff]  }
 0x7c0   :  { %16656 = vmatprep.subr.bf16.mxu0 %v20640_v0  ;;  %v20692_v16 = vld [vmem:[#allocation8 + $0x790] ss:$24 sps:$4 sm:$0xff]   ;;  %v20697_v0 = vld [vmem:[#allocation8 + $0x126c] ss:$24 sps:$4 sm:$0xff]  }
 0x7c2   :  { %16315 = vmatpush1.bf16.msra.mxu1 %v20635_v20  ;;  %v20700_v20 = vld [vmem:[#allocation8 + $0x7c4] ss:$24 sps:$4 sm:$0xff]  }
 0x7c3   :  { %16657 = vmatpush1.bf16.msra.mxu0 %v20638_v17  ;;  %16316 = vmatprep.subr.bf16.mxu1 %v20643_v27  ;;  %v20695_v17 = vld [vmem:[#allocation8 + $0x1268] ss:$24 sps:$4 sm:$0xff]  }
 0x7c4   :  { %16667 = vmatprep.subr.bf16.mxu0 %v20646_v29  ;;  %v20698_v27 = vld [vmem:[#allocation8 + $0x7c0] ss:$24 sps:$4 sm:$0xff]   ;;  %v20703_v29 = vld [vmem:[#allocation8 + $0x129c] ss:$24 sps:$4 sm:$0xff]  }
 0x7c6   :  { %16659 = vmatmul.mubr.bf16.vlgmr.msra.gmra.mrb[20].mxu0 %v21864_v13  ;;  %16317 = vmatpush1.bf16.msra.mxu1 %v20641_v30  ;;  %v20659_v13 = vld [vmem:[#allocation8 + $0x1148] ss:$24 sps:$4 sm:$0xff]   ;;  %v20706_v30 = vld [vmem:[#allocation8 + $0x7f4] ss:$24 sps:$4 sm:$0xff]  }
 0x7c7   :  { %16668 = vmatpush1.bf16.msra.mxu0 %v20644_v31  ;;  %16699 = vmatprep.mubr.bf16.mxu0 %v21866_v18  ;;  %v20670_v18 = vld [vmem:[#allocation8 + $0x6d4] ss:$24 sps:$4 sm:$0xff]   ;;  %v20701_v31 = vld [vmem:[#allocation8 + $0x1298] ss:$24 sps:$4 sm:$0xff]  }
 0x7c8   :  { %16318 = vmatprep.subr.bf16.mxu1 %v20649_v47  ;;  %16669 = vmatprep.subr.bf16.mxu0 %v20652_v53  ;;  %v20704_v47 = vld [vmem:[#allocation8 + $0x7f0] ss:$24 sps:$4 sm:$0xff]   ;;  %v20709_v53 = vld [vmem:[#allocation8 + $0x12cc] ss:$24 sps:$4 sm:$0xff]  }
 0x7ca   :  { %16319 = vmatpush1.bf16.msra.mxu1 %v20647_v22  ;;  %v20712_v22 = vld [vmem:[#allocation8 + $0x824] ss:$24 sps:$4 sm:$0xff]  }
 0x7cb   :  { %16670 = vmatpush1.bf16.msra.mxu0 %v20650_v4  ;;  %16320 = vmatprep.subr.bf16.mxu1 %v20655_v35  ;;  %v20707_v4 = vld [vmem:[#allocation8 + $0x12c8] ss:$24 sps:$4 sm:$0xff]  }
 0x7cc   :  { %16671 = vmatprep.subr.bf16.mxu0 %v20658_v62  ;;  %v20710_v35 = vld [vmem:[#allocation8 + $0x820] ss:$24 sps:$4 sm:$0xff]   ;;  %v20715_v62 = vld [vmem:[#allocation8 + $0x12fc] ss:$24 sps:$4 sm:$0xff]  }
 0x7ce   :  { %16321 = vmatpush1.bf16.msra.mxu1 %v20653_v36  ;;  %v20718_v36 = vld [vmem:[#allocation8 + $0x854] ss:$24 sps:$4 sm:$0xff]  }
 0x7cf   :  { %16672 = vmatpush1.bf16.msra.mxu0 %v20656_v40  ;;  %16322 = vmatprep.subr.bf16.mxu1 %v20661_v21  ;;  %v20713_v40 = vld [vmem:[#allocation8 + $0x12f8] ss:$24 sps:$4 sm:$0xff]  }
 0x7d0   :  { %16673 = vmatprep.subr.bf16.mxu0 %v20664_v37  ;;  %v20716_v21 = vld [vmem:[#allocation8 + $0x850] ss:$24 sps:$4 sm:$0xff]   ;;  %v20721_v37 = vld [vmem:[#allocation8 + $0x132c] ss:$24 sps:$4 sm:$0xff]  }
 0x7d2   :  { %16323 = vmatpush1.bf16.msra.mxu1 %v20659_v13  ;;  %v20724_v13 = vld [vmem:[#allocation8 + $0x884] ss:$24 sps:$4 sm:$0xff]  }
 0x7d3   :  { %16674 = vmatpush1.bf16.msra.mxu0 %v20662_v54  ;;  %16324 = vmatprep.subr.bf16.mxu1 %v20667_v34  ;;  %v20719_v54 = vld [vmem:[#allocation8 + $0x1328] ss:$24 sps:$4 sm:$0xff]  }
 0x7d4   :  { %16675 = vmatprep.subr.bf16.mxu0 %v20670_v18  ;;  %v20722_v34 = vld [vmem:[#allocation8 + $0x880] ss:$24 sps:$4 sm:$0xff]   ;;  %v20727_v18 = vld [vmem:[#allocation8 + $0x135c] ss:$24 sps:$4 sm:$0xff]  }
 0x7d6   :  { %16325 = vmatpush1.bf16.msra.mxu1 %v20665_v41  ;;  %v20730_v41 = vld [vmem:[#allocation8 + $0x8b4] ss:$24 sps:$4 sm:$0xff]  }
 0x7d7   :  { %16676 = vmatpush1.bf16.msra.mxu0 %v20668_v59  ;;  %16326 = vmatprep.subr.bf16.mxu1 %v20673_v49  ;;  %v20725_v59 = vld [vmem:[#allocation8 + $0x1358] ss:$24 sps:$4 sm:$0xff]  }
 0x7d8   :  { %16677 = vmatprep.subr.bf16.mxu0 %v20676_v12  ;;  %v20728_v49 = vld [vmem:[#allocation8 + $0x8b0] ss:$24 sps:$4 sm:$0xff]   ;;  %v20733_v12 = vld [vmem:[#allocation8 + $0x138c] ss:$24 sps:$4 sm:$0xff]  }
 0x7da   :  { %16327 = vmatpush1.bf16.msra.mxu1 %v20671_v55  ;;  %v20736_v55 = vld [vmem:[#allocation8 + $0x8e4] ss:$24 sps:$4 sm:$0xff]  }
 0x7db   :  { %16678 = vmatpush1.bf16.msra.mxu0 %v20674_v25  ;;  %16328 = vmatprep.subr.bf16.mxu1 %v20679_v23  ;;  %v20731_v25 = vld [vmem:[#allocation8 + $0x1388] ss:$24 sps:$4 sm:$0xff]  }
 0x7dc   :  { %16679 = vmatprep.subr.bf16.mxu0 %v20682_v56  ;;  %v20734_v23 = vld [vmem:[#allocation8 + $0x8e0] ss:$24 sps:$4 sm:$0xff]   ;;  %v20739_v56 = vld [vmem:[#allocation8 + $0x13bc] ss:$24 sps:$4 sm:$0xff]  }
 0x7de   :  { %16329 = vmatpush1.bf16.msra.mxu1 %v20677_v44  ;;  %v20742_v44 = vld [vmem:[#allocation8 + $0x914] ss:$24 sps:$4 sm:$0xff]  }
 0x7df   :  { %16680 = vmatpush1.bf16.msra.mxu0 %v20680_v38  ;;  %16339 = vmatprep.subr.bf16.mxu1 %v20685_v57  ;;  %v20737_v38 = vld [vmem:[#allocation8 + $0x13b8] ss:$24 sps:$4 sm:$0xff]  }
 0x7e0   :  { %16681 = vmatprep.subr.bf16.mxu0 %v20688_v50  ;;  %v20740_v57 = vld [vmem:[#allocation8 + $0x910] ss:$24 sps:$4 sm:$0xff]   ;;  %v20745_v50 = vld [vmem:[#allocation8 + $0x13ec] ss:$24 sps:$4 sm:$0xff]  }
 0x7e1   :  { %16331 = vmatmul.mubr.bf16.vlgmr.msra.gmra.mrb[32].mxu1 %v21937_v28 }
 0x7e2   :  { %16340 = vmatpush1.bf16.msra.mxu1 %v20683_v19  ;;  %16371 = vmatprep.mubr.bf16.mxu1 %v21939_v32  ;;  %v20748_v19 = vld [vmem:[#allocation8 + $0x944] ss:$24 sps:$4 sm:$0xff]  }
 0x7e3   :  { %16682 = vmatpush1.bf16.msra.mxu0 %v20686_v2  ;;  %16341 = vmatprep.subr.bf16.mxu1 %v20691_v5  ;;  %v20743_v2 = vld [vmem:[#allocation8 + $0x13e8] ss:$24 sps:$4 sm:$0xff]  }
 0x7e4   :  { %16683 = vmatprep.subr.bf16.mxu0 %v20694_v6  ;;  %v20746_v5 = vld [vmem:[#allocation8 + $0x940] ss:$24 sps:$4 sm:$0xff]   ;;  %v20751_v6 = vld [vmem:[#allocation8 + $0x141c] ss:$24 sps:$4 sm:$0xff]  }
 0x7e6   :  { %16342 = vmatpush1.bf16.msra.mxu1 %v20689_v9  ;;  %v20754_v9 = vld [vmem:[#allocation8 + $0x974] ss:$24 sps:$4 sm:$0xff]  }
 0x7e7   :  { %16684 = vmatpush1.bf16.msra.mxu0 %v20692_v16  ;;  %16343 = vmatprep.subr.bf16.mxu1 %v20697_v0  ;;  %v20749_v16 = vld [vmem:[#allocation8 + $0x1418] ss:$24 sps:$4 sm:$0xff]  }
 0x7e8   :  { %16685 = vmatprep.subr.bf16.mxu0 %v20700_v20  ;;  %v20752_v0 = vld [vmem:[#allocation8 + $0x970] ss:$24 sps:$4 sm:$0xff]   ;;  %v20757_v20 = vld [vmem:[#allocation8 + $0x144c] ss:$24 sps:$4 sm:$0xff]  }
 0x7ea   :  { %16344 = vmatpush1.bf16.msra.mxu1 %v20695_v17  ;;  %v20760_v17 = vld [vmem:[#allocation8 + $0x9a4] ss:$24 sps:$4 sm:$0xff]  }
 0x7eb   :  { %16686 = vmatpush1.bf16.msra.mxu0 %v20698_v27  ;;  %16345 = vmatprep.subr.bf16.mxu1 %v20703_v29  ;;  %v20758_v27 = vld [vmem:[#allocation8 + $0x9a0] ss:$24 sps:$4 sm:$0xff]   ;;  %v20763_v29 = vld [vmem:[#allocation8 + $0x147c] ss:$24 sps:$4 sm:$0xff]  }
 0x7ec   :  { %16687 = vmatprep.subr.bf16.mxu0 %v20706_v30  ;;  %v20761_v30 = vld [vmem:[#allocation8 + $0x1478] ss:$24 sps:$4 sm:$0xff]  }
 0x7ee   :  { %16346 = vmatpush1.bf16.msra.mxu1 %v20701_v31  ;;  %v20764_v31 = vld [vmem:[#allocation8 + $0x9d0] ss:$24 sps:$4 sm:$0xff]  }
 0x7ef   :  { %16688 = vmatpush1.bf16.msra.mxu0 %v20704_v47  ;;  %16347 = vmatprep.subr.bf16.mxu1 %v20709_v53  ;;  %v9809_v47 = vld [vmem:[#allocation10] sm:$0x3f] }
 0x7f0   :  { %16689 = vmatprep.subr.bf16.mxu0 %v20712_v22  ;;  %v20769_v53 = vld [vmem:[#allocation8 + $0x14ac] ss:$24 sps:$4 sm:$0xff]  }
 0x7f1   :  { %v20772_v22 = vld [vmem:[#allocation8 + $0xa04] ss:$24 sps:$4 sm:$0xff]  }
 0x7f2   :  { %16348 = vmatpush1.bf16.msra.mxu1 %v20707_v4  ;;  %v9814_v4 = vrot.slane %v9809_v47, %v21833_v43  ;;  %v20781_v43 = vld [vmem:[#allocation8 + $0x150c] ss:$24 sps:$4 sm:$0xff]  }
 0x7f3   :  { %16690 = vmatpush1.bf16.msra.mxu0 %v20710_v35  ;;  %16349 = vmatprep.subr.bf16.mxu1 %v20715_v62  ;;  %v20767_v35 = vld [vmem:[#allocation8 + $0x14a8] ss:$24 sps:$4 sm:$0xff]  }
 0x7f4   :  { %16691 = vmatprep.subr.bf16.mxu0 %v20718_v36  ;;  %v20770_v62 = vld [vmem:[#allocation8 + $0xa00] ss:$24 sps:$4 sm:$0xff]   ;;  %v9818_v36 = vrot.slane %v9809_v47, %v21811_v14 }
 0x7f5   :  { %v20779_v14 = vld [vmem:[#allocation8 + $0x1508] ss:$24 sps:$4 sm:$0xff]  }
 0x7f6   :  { %16350 = vmatpush1.bf16.msra.mxu1 %v20713_v40  ;;  %v20775_v40 = vld [vmem:[#allocation8 + $0x14dc] ss:$24 sps:$4 sm:$0xff]  }
 0x7f7   :  { %16692 = vmatpush1.bf16.msra.mxu0 %v20716_v21  ;;  %16351 = vmatprep.subr.bf16.mxu1 %v20721_v37  ;;  %v20778_v21 = vld [vmem:[#allocation8 + $0xa34] ss:$24 sps:$4 sm:$0xff]  }
 0x7f8   :  { %16693 = vmatprep.subr.bf16.mxu0 %v20724_v13 }
 0x7fa   :  { %16352 = vmatpush1.bf16.msra.mxu1 %v20719_v54 }
 0x7fb   :  { %16694 = vmatpush1.bf16.msra.mxu0 %v20722_v34  ;;  %16353 = vmatprep.subr.bf16.mxu1 %v20727_v18  ;;  %v20773_v34 = vld [vmem:[#allocation8 + $0x14d8] ss:$24 sps:$4 sm:$0xff]  }
 0x7fc   :  { %16695 = vmatprep.subr.bf16.mxu0 %v20730_v41 }
 0x7fe   :  { %16354 = vmatpush1.bf16.msra.mxu1 %v20725_v59  ;;  %v20776_v59 = vld [vmem:[#allocation8 + $0xa30] ss:$24 sps:$4 sm:$0xff]  }
 0x7ff   :  { %16696 = vmatpush1.bf16.msra.mxu0 %v20728_v49  ;;  %16355 = vmatprep.subr.bf16.mxu1 %v20733_v12 }
 0x800   :  { %16697 = vmatprep.subr.bf16.mxu0 %v20736_v55  ;;  %v20784_v55 = vld [vmem:[#allocation8 + $0xa64] ss:$24 sps:$4 sm:$0xff]  }
 0x802   :  { %16356 = vmatpush1.bf16.msra.mxu1 %v20731_v25 }
 0x803   :  { %16698 = vmatpush1.bf16.msra.mxu0 %v20734_v23  ;;  %16357 = vmatprep.subr.bf16.mxu1 %v20739_v56  ;;  %v20782_v23 = vld [vmem:[#allocation8 + $0xa60] ss:$24 sps:$4 sm:$0xff]   ;;  %v20787_v56 = vld [vmem:[#allocation8 + $0x153c] ss:$24 sps:$4 sm:$0xff]  }
 0x804   :  { %16708 = vmatprep.subr.bf16.mxu0 %v20742_v44  ;;  %v20790_v44 = vld [vmem:[#allocation8 + $0xa94] ss:$24 sps:$4 sm:$0xff]  }
 0x806   :  { %16700 = vmatmul.mubr.bf16.vlgmr.msra.gmra.mrb[20].mxu0 %v21880_v15  ;;  %16358 = vmatpush1.bf16.msra.mxu1 %v20737_v38  ;;  %v20755_v15 = vld [vmem:[#allocation8 + $0x1448] ss:$24 sps:$4 sm:$0xff]   ;;  %v20785_v38 = vld [vmem:[#allocation8 + $0x1538] ss:$24 sps:$4 sm:$0xff]  }
 0x807   :  { %16709 = vmatpush1.bf16.msra.mxu0 %v20740_v57  ;;  %16740 = vmatprep.mubr.bf16.mxu0 %v21896_v33  ;;  %v20766_v33 = vld [vmem:[#allocation8 + $0x9d4] ss:$24 sps:$4 sm:$0xff]   ;;  %v20788_v57 = vld [vmem:[#allocation8 + $0xa90] ss:$24 sps:$4 sm:$0xff]  }
 0x808   :  { %16359 = vmatprep.subr.bf16.mxu1 %v20745_v50  ;;  %16710 = vmatprep.subr.bf16.mxu0 %v20748_v19  ;;  %v20793_v50 = vld [vmem:[#allocation8 + $0x156c] ss:$24 sps:$4 sm:$0xff]  }
 0x809   :  { %v20796_v19 = vld [vmem:[#allocation8 + $0xac4] ss:$24 sps:$4 sm:$0xff]  }
 0x80a   :  { %16360 = vmatpush1.bf16.msra.mxu1 %v20743_v2  ;;  %v20791_v2 = vld [vmem:[#allocation8 + $0x1568] ss:$24 sps:$4 sm:$0xff]  }
 0x80b   :  { %16711 = vmatpush1.bf16.msra.mxu0 %v20746_v5  ;;  %16361 = vmatprep.subr.bf16.mxu1 %v20751_v6  ;;  %v20794_v5 = vld [vmem:[#allocation8 + $0xac0] ss:$24 sps:$4 sm:$0xff]   ;;  %v20799_v6 = vld [vmem:[#allocation8 + $0x159c] ss:$24 sps:$4 sm:$0xff]  }
 0x80c   :  { %16712 = vmatprep.subr.bf16.mxu0 %v20754_v9 }
 0x80e   :  { %16362 = vmatpush1.bf16.msra.mxu1 %v20749_v16  ;;  %v20802_v16 = vld [vmem:[#allocation8 + $0xaf4] ss:$24 sps:$4 sm:$0xff]  }
 0x80f   :  { %16713 = vmatpush1.bf16.msra.mxu0 %v20752_v0  ;;  %16363 = vmatprep.subr.bf16.mxu1 %v20757_v20 }
 0x810   :  { %16714 = vmatprep.subr.bf16.mxu0 %v20760_v17 }
 0x812   :  { %16364 = vmatpush1.bf16.msra.mxu1 %v20755_v15 }
 0x813   :  { %16715 = vmatpush1.bf16.msra.mxu0 %v20758_v27  ;;  %16365 = vmatprep.subr.bf16.mxu1 %v20763_v29  ;;  %v20797_v29 = vld [vmem:[#allocation8 + $0x1598] ss:$24 sps:$4 sm:$0xff]  }
 0x814   :  { %16716 = vmatprep.subr.bf16.mxu0 %v20766_v33 }
 0x816   :  { %16366 = vmatpush1.bf16.msra.mxu1 %v20761_v30  ;;  %v20800_v30 = vld [vmem:[#allocation8 + $0xaf0] ss:$24 sps:$4 sm:$0xff]  }
 0x817   :  { %16717 = vmatpush1.bf16.msra.mxu0 %v20764_v31  ;;  %16367 = vmatprep.subr.bf16.mxu1 %v20769_v53  ;;  %v20805_v31 = vld [vmem:[#allocation8 + $0x15cc] ss:$24 sps:$4 sm:$0xff]  }
 0x818   :  { %16718 = vmatprep.subr.bf16.mxu0 %v20772_v22  ;;  %v20808_v53 = vld [vmem:[#allocation8 + $0xb24] ss:$24 sps:$4 sm:$0xff]   ;;  %v20803_v22 = vld [vmem:[#allocation8 + $0x15c8] ss:$24 sps:$4 sm:$0xff]  }
 0x819   :  { %v16086_v37 = vpop.f32.mrb[16].mxu0 }
 0x81a   :  { %v19458_v13 = vadd.f32 %v16086_v37, %v9814_v4  ;;  %v16088_v54 = vpop.f32.mrb[17].mxu0  ;;  %16368 = vmatpush1.bf16.msra.mxu1 %v20767_v35  ;;  %v20806_v4 = vld [vmem:[#allocation8 + $0xb20] ss:$24 sps:$4 sm:$0xff]   ;;  %v20811_v35 = vld [vmem:[#allocation8 + $0x15fc] ss:$24 sps:$4 sm:$0xff]  }
 0x81b   :  { %v19459_v18 = vadd.f32 %v16088_v54, %v9818_v36  ;;  %16719 = vmatpush1.bf16.msra.mxu0 %v20770_v62  ;;  %v16090_v41 = vpop.f32.mrb[18].mxu0  ;;  %16369 = vmatprep.subr.bf16.mxu1 %v20775_v40  ;;  %v20814_v62 = vld [vmem:[#allocation8 + $0xb54] ss:$24 sps:$4 sm:$0xff]   ;;  %v20809_v36 = vld [vmem:[#allocation8 + $0x15f8] ss:$24 sps:$4 sm:$0xff]  }
 0x81c   :  { %v17083_v49 = vmul.f32 0.70710677, %v19458_v13  ;;  %v16091_v12 = vpop.f32.mrb[19].mxu0  ;;  %16720 = vmatprep.subr.bf16.mxu0 %v20778_v21  ;;  %v17077_v20 = vmul.f32 0.5, %v19458_v13  ;;  %v20812_v40 = vld [vmem:[#allocation8 + $0xb50] ss:$24 sps:$4 sm:$0xff]  }
 0x81d   :  { %v17084_v25 = vmul.f32 0.70710677, %v19459_v18  ;;  %v17078_v15 = vmul.f32 0.5, %v19459_v18  ;;  %v20817_v21 = vld [vmem:[#allocation8 + $0x162c] ss:$24 sps:$4 sm:$0xff]  }
 0x81e   :  { %21478 = verf.f32 %v17083_v49  ;;  %16370 = vmatpush1.bf16.msra.mxu1 %v20773_v34  ;;  %v20820_v37 = vld [vmem:[#allocation8 + $0xb84] ss:$24 sps:$4 sm:$0xff]   ;;  %v20815_v13 = vld [vmem:[#allocation8 + $0x1628] ss:$24 sps:$4 sm:$0xff]   ;;  %v20826_v18 = vld [vmem:[#allocation8 + $0xbb4] ss:$24 sps:$4 sm:$0xff]  }
 0x81f   :  { %21480 = verf.f32 %v17084_v25  ;;  %16721 = vmatpush1.bf16.msra.mxu0 %v20776_v59  ;;  %16380 = vmatprep.subr.bf16.mxu1 %v20781_v43  ;;  %v20818_v54 = vld [vmem:[#allocation8 + $0xb80] ss:$24 sps:$4 sm:$0xff]   ;;  %v20823_v34 = vld [vmem:[#allocation8 + $0x165c] ss:$24 sps:$4 sm:$0xff]   ;;  %v20824_v59 = vld [vmem:[#allocation8 + $0xbb0] ss:$24 sps:$4 sm:$0xff]  }
 0x820   :  { %16722 = vmatprep.subr.bf16.mxu0 %v20784_v55  ;;  %v20821_v41 = vld [vmem:[#allocation8 + $0x1658] ss:$24 sps:$4 sm:$0xff]   ;;  %v20829_v43 = vld [vmem:[#allocation8 + $0x168c] ss:$24 sps:$4 sm:$0xff]   ;;  %v20827_v12 = vld [vmem:[#allocation8 + $0x1688] ss:$24 sps:$4 sm:$0xff]  }
 0x821   :  { %16372 = vmatmul.mubr.bf16.vlgmr.msra.gmra.mrb[32].mxu1 %v21951_v7  ;;  %v20832_v49 = vld [vmem:[#allocation8 + $0xbe4] ss:$24 sps:$4 sm:$0xff]   ;;  %v20830_v55 = vld [vmem:[#allocation8 + $0xbe0] ss:$24 sps:$4 sm:$0xff]  }
 0x822   :  { %16381 = vmatpush1.bf16.msra.mxu1 %v20779_v14  ;;  %16412 = vmatprep.mubr.bf16.mxu1 %v21967_v60  ;;  %v20835_v25 = vld [vmem:[#allocation8 + $0x16bc] ss:$24 sps:$4 sm:$0xff]  }
 0x823   :  { %16723 = vmatpush1.bf16.msra.mxu0 %v20782_v23  ;;  %16382 = vmatprep.subr.bf16.mxu1 %v20787_v56  ;;  %v20838_v14 = vld [vmem:[#allocation8 + $0xc14] ss:$24 sps:$4 sm:$0xff]   ;;  %v20833_v23 = vld [vmem:[#allocation8 + $0x16b8] ss:$24 sps:$4 sm:$0xff]  }
 0x824   :  { %16724 = vmatprep.subr.bf16.mxu0 %v20790_v44  ;;  %v20836_v56 = vld [vmem:[#allocation8 + $0xc10] ss:$24 sps:$4 sm:$0xff]   ;;  %v20841_v44 = vld [vmem:[#allocation8 + $0x16ec] ss:$24 sps:$4 sm:$0xff]  }
 0x826   :  { %16383 = vmatpush1.bf16.msra.mxu1 %v20785_v38  ;;  %v20844_v38 = vld [vmem:[#allocation8 + $0xc44] ss:$24 sps:$4 sm:$0xff]  }
 0x827   :  { %16725 = vmatpush1.bf16.msra.mxu0 %v20788_v57  ;;  %16384 = vmatprep.subr.bf16.mxu1 %v20793_v50  ;;  %v20839_v57 = vld [vmem:[#allocation8 + $0x16e8] ss:$24 sps:$4 sm:$0xff]  }
 0x828   :  { %v21479_v9 = vpop.eup %21478  ;;  %16726 = vmatprep.subr.bf16.mxu0 %v20796_v19  ;;  %v20842_v50 = vld [vmem:[#allocation8 + $0xc40] ss:$24 sps:$4 sm:$0xff]   ;;  %v20847_v19 = vld [vmem:[#allocation8 + $0x171c] ss:$24 sps:$4 sm:$0xff]  }
 0x829   :  { %v21481_v0 = vpop.eup %21480  ;;  %v17095_v17 = vadd.f32 1.0, %v21479_v9  ;;  %v20853_v9 = vld [vmem:[#allocation8 + $0x174c] ss:$24 sps:$4 sm:$0xff]  }
 0x82a   :  { %v17096_v27 = vadd.f32 1.0, %v21481_v0  ;;  %16385 = vmatpush1.bf16.msra.mxu1 %v20791_v2  ;;  %v20850_v2 = vld [vmem:[#allocation8 + $0xc74] ss:$24 sps:$4 sm:$0xff]   ;;  %v20854_v0 = vld [vmem:[#allocation8 + $0xca0] ss:$24 sps:$4 sm:$0xff]  }
 0x82b   :  { %v17101_v33 = vmul.f32 %v17095_v17, %v17077_v20  ;;  %16727 = vmatpush1.bf16.msra.mxu0 %v20794_v5  ;;  %16386 = vmatprep.subr.bf16.mxu1 %v20799_v6  ;;  %v20845_v5 = vld [vmem:[#allocation8 + $0x1718] ss:$24 sps:$4 sm:$0xff]   ;;  %v20859_v20 = vld [vmem:[#allocation8 + $0x177c] ss:$24 sps:$4 sm:$0xff]  }
 0x82c   :  { %v17102_v47 = vmul.f32 %v17096_v27, %v17078_v15  ;;  %16728 = vmatprep.subr.bf16.mxu0 %v20802_v16  ;;  %v20848_v6 = vld [vmem:[#allocation8 + $0xc70] ss:$24 sps:$4 sm:$0xff]   ;;  %v20856_v16 = vld [vmem:[#allocation8 + $0xca4] ss:$24 sps:$4 sm:$0xff]  }
 0x82d   :  { %17107 = vst [vmem:[#allocation11] sm:$0xff] %v17101_v33  ;;  %v20857_v17 = vld [vmem:[#allocation8 + $0x1778] ss:$24 sps:$4 sm:$0xff]   ;;  %v20865_v27 = vld [vmem:[#allocation8 + $0x17ac] ss:$24 sps:$4 sm:$0xff]  }
 0x82e   :  { %17108 = vst [vmem:[#allocation11 + $0x8] sm:$0xff] %v17102_v47  ;;  %16387 = vmatpush1.bf16.msra.mxu1 %v20797_v29  ;;  %v20860_v15 = vld [vmem:[#allocation8 + $0xcd0] ss:$24 sps:$4 sm:$0xff]   ;;  %v20868_v29 = vld [vmem:[#allocation8 + $0xd04] ss:$24 sps:$4 sm:$0xff]  }
 0x82f   :  { %16729 = vmatpush1.bf16.msra.mxu0 %v20800_v30  ;;  %16388 = vmatprep.subr.bf16.mxu1 %v20805_v31  ;;  %v20863_v33 = vld [vmem:[#allocation8 + $0x17a8] ss:$24 sps:$4 sm:$0xff]   ;;  %v20871_v31 = vld [vmem:[#allocation8 + $0x17dc] ss:$24 sps:$4 sm:$0xff]  }
 0x830   :  { %16730 = vmatprep.subr.bf16.mxu0 %v20808_v53  ;;  %v20866_v30 = vld [vmem:[#allocation8 + $0xd00] ss:$24 sps:$4 sm:$0xff]   ;;  %v20874_v47 = vld [vmem:[#allocation8 + $0xd34] ss:$24 sps:$4 sm:$0xff]  }
 0x831   :  { %v20869_v53 = vld [vmem:[#allocation8 + $0x17d8] ss:$24 sps:$4 sm:$0xff]  }
 0x832   :  { %16389 = vmatpush1.bf16.msra.mxu1 %v20803_v22  ;;  %v20872_v22 = vld [vmem:[#allocation8 + $0xd30] ss:$24 sps:$4 sm:$0xff]  }
 0x833   :  { %16731 = vmatpush1.bf16.msra.mxu0 %v20806_v4  ;;  %16390 = vmatprep.subr.bf16.mxu1 %v20811_v35  ;;  %v20877_v4 = vld [vmem:[#allocation8 + $0x180c] ss:$24 sps:$4 sm:$0xff]  }
 0x834   :  { %16732 = vmatprep.subr.bf16.mxu0 %v20814_v62  ;;  %v20880_v35 = vld [vmem:[#allocation8 + $0xd64] ss:$24 sps:$4 sm:$0xff]   ;;  %v20875_v62 = vld [vmem:[#allocation8 + $0x1808] ss:$24 sps:$4 sm:$0xff]  }
 0x836   :  { %16391 = vmatpush1.bf16.msra.mxu1 %v20809_v36  ;;  %v20878_v36 = vld [vmem:[#allocation8 + $0xd60] ss:$24 sps:$4 sm:$0xff]  }
 0x837   :  { %16733 = vmatpush1.bf16.msra.mxu0 %v20812_v40  ;;  %16392 = vmatprep.subr.bf16.mxu1 %v20817_v21  ;;  %v20883_v40 = vld [vmem:[#allocation8 + $0x183c] ss:$24 sps:$4 sm:$0xff]  }
 0x838   :  { %16734 = vmatprep.subr.bf16.mxu0 %v20820_v37  ;;  %v20886_v21 = vld [vmem:[#allocation8 + $0xd94] ss:$24 sps:$4 sm:$0xff]   ;;  %v20881_v37 = vld [vmem:[#allocation8 + $0x1838] ss:$24 sps:$4 sm:$0xff]  }
 0x83a   :  { %16393 = vmatpush1.bf16.msra.mxu1 %v20815_v13  ;;  %v20884_v13 = vld [vmem:[#allocation8 + $0xd90] ss:$24 sps:$4 sm:$0xff]  }
 0x83b   :  { %16735 = vmatpush1.bf16.msra.mxu0 %v20818_v54  ;;  %16394 = vmatprep.subr.bf16.mxu1 %v20823_v34  ;;  %v20889_v54 = vld [vmem:[#allocation8 + $0x186c] ss:$24 sps:$4 sm:$0xff]  }
 0x83c   :  { %16736 = vmatprep.subr.bf16.mxu0 %v20826_v18  ;;  %v20892_v34 = vld [vmem:[#allocation8 + $0xdc4] ss:$24 sps:$4 sm:$0xff]   ;;  %v20887_v18 = vld [vmem:[#allocation8 + $0x1868] ss:$24 sps:$4 sm:$0xff]  }
 0x83e   :  { %16395 = vmatpush1.bf16.msra.mxu1 %v20821_v41  ;;  %v20890_v41 = vld [vmem:[#allocation8 + $0xdc0] ss:$24 sps:$4 sm:$0xff]  }
 0x83f   :  { %16737 = vmatpush1.bf16.msra.mxu0 %v20824_v59  ;;  %16396 = vmatprep.subr.bf16.mxu1 %v20829_v43  ;;  %v20895_v59 = vld [vmem:[#allocation8 + $0x189c] ss:$24 sps:$4 sm:$0xff]  }
 0x840   :  { %16738 = vmatprep.subr.bf16.mxu0 %v20832_v49  ;;  %v20898_v43 = vld [vmem:[#allocation8 + $0xdf4] ss:$24 sps:$4 sm:$0xff]   ;;  %v20893_v49 = vld [vmem:[#allocation8 + $0x1898] ss:$24 sps:$4 sm:$0xff]  }
 0x842   :  { %16397 = vmatpush1.bf16.msra.mxu1 %v20827_v12  ;;  %v20896_v12 = vld [vmem:[#allocation8 + $0xdf0] ss:$24 sps:$4 sm:$0xff]  }
 0x843   :  { %16739 = vmatpush1.bf16.msra.mxu0 %v20830_v55  ;;  %16398 = vmatprep.subr.bf16.mxu1 %v20835_v25  ;;  %v20901_v55 = vld [vmem:[#allocation8 + $0x18cc] ss:$24 sps:$4 sm:$0xff]  }
 0x844   :  { %16749 = vmatprep.subr.bf16.mxu0 %v20838_v14  ;;  %v20904_v25 = vld [vmem:[#allocation8 + $0xe24] ss:$24 sps:$4 sm:$0xff]   ;;  %v20899_v14 = vld [vmem:[#allocation8 + $0x18c8] ss:$24 sps:$4 sm:$0xff]  }
 0x846   :  { %16741 = vmatmul.mubr.bf16.vlgmr.msra.gmra.mrb[20].mxu0 %v21910_v1  ;;  %16399 = vmatpush1.bf16.msra.mxu1 %v20833_v23  ;;  %v20851_v1 = vld [vmem:[#allocation8 + $0x1748] ss:$24 sps:$4 sm:$0xff]  }
 0x847   :  { %16750 = vmatpush1.bf16.msra.mxu0 %v20836_v56  ;;  %16781 = vmatprep.mubr.bf16.mxu0 %v21912_v8  ;;  %v20862_v8 = vld [vmem:[#allocation8 + $0xcd4] ss:$24 sps:$4 sm:$0xff]   ;;  %v20902_v23 = vld [vmem:[#allocation8 + $0xe20] ss:$24 sps:$4 sm:$0xff]  }
 0x848   :  { %16400 = vmatprep.subr.bf16.mxu1 %v20841_v44  ;;  %16751 = vmatprep.subr.bf16.mxu0 %v20844_v38  ;;  %v20907_v56 = vld [vmem:[#allocation8 + $0x18fc] ss:$24 sps:$4 sm:$0xff]   ;;  %v20905_v38 = vld [vmem:[#allocation8 + $0x18f8] ss:$24 sps:$4 sm:$0xff]  }
 0x849   :  { %v20910_v44 = vld [vmem:[#allocation8 + $0xe54] ss:$24 sps:$4 sm:$0xff]  }
 0x84a   :  { %16401 = vmatpush1.bf16.msra.mxu1 %v20839_v57  ;;  %v20908_v57 = vld [vmem:[#allocation8 + $0xe50] ss:$24 sps:$4 sm:$0xff]  }
 0x84b   :  { %16752 = vmatpush1.bf16.msra.mxu0 %v20842_v50  ;;  %16402 = vmatprep.subr.bf16.mxu1 %v20847_v19  ;;  %v20913_v50 = vld [vmem:[#allocation8 + $0x192c] ss:$24 sps:$4 sm:$0xff]  }
 0x84c   :  { %16753 = vmatprep.subr.bf16.mxu0 %v20850_v2  ;;  %v20916_v19 = vld [vmem:[#allocation8 + $0xe84] ss:$24 sps:$4 sm:$0xff]   ;;  %v20911_v2 = vld [vmem:[#allocation8 + $0x1928] ss:$24 sps:$4 sm:$0xff]  }
 0x84e   :  { %16403 = vmatpush1.bf16.msra.mxu1 %v20845_v5  ;;  %v20914_v5 = vld [vmem:[#allocation8 + $0xe80] ss:$24 sps:$4 sm:$0xff]  }
 0x84f   :  { %16754 = vmatpush1.bf16.msra.mxu0 %v20848_v6  ;;  %16404 = vmatprep.subr.bf16.mxu1 %v20853_v9  ;;  %v20919_v6 = vld [vmem:[#allocation8 + $0x195c] ss:$24 sps:$4 sm:$0xff]  }
 0x850   :  { %16755 = vmatprep.subr.bf16.mxu0 %v20856_v16  ;;  %v20922_v9 = vld [vmem:[#allocation8 + $0xeb4] ss:$24 sps:$4 sm:$0xff]   ;;  %v20917_v16 = vld [vmem:[#allocation8 + $0x1958] ss:$24 sps:$4 sm:$0xff]  }
 0x852   :  { %16405 = vmatpush1.bf16.msra.mxu1 %v20851_v1  ;;  %v20920_v1 = vld [vmem:[#allocation8 + $0xeb0] ss:$24 sps:$4 sm:$0xff]  }
 0x853   :  { %16756 = vmatpush1.bf16.msra.mxu0 %v20854_v0  ;;  %16406 = vmatprep.subr.bf16.mxu1 %v20859_v20  ;;  %v20925_v0 = vld [vmem:[#allocation8 + $0x198c] ss:$24 sps:$4 sm:$0xff]  }
 0x854   :  { %16757 = vmatprep.subr.bf16.mxu0 %v20862_v8  ;;  %v20928_v20 = vld [vmem:[#allocation8 + $0xee4] ss:$24 sps:$4 sm:$0xff]   ;;  %v20923_v8 = vld [vmem:[#allocation8 + $0x1988] ss:$24 sps:$4 sm:$0xff]  }
 0x856   :  { %16407 = vmatpush1.bf16.msra.mxu1 %v20857_v17  ;;  %v20926_v17 = vld [vmem:[#allocation8 + $0xee0] ss:$24 sps:$4 sm:$0xff]  }
 0x857   :  { %16758 = vmatpush1.bf16.msra.mxu0 %v20860_v15  ;;  %16408 = vmatprep.subr.bf16.mxu1 %v20865_v27  ;;  %v20931_v15 = vld [vmem:[#allocation8 + $0x19bc] ss:$24 sps:$4 sm:$0xff]  }
 0x858   :  { %16759 = vmatprep.subr.bf16.mxu0 %v20868_v29  ;;  %v20934_v27 = vld [vmem:[#allocation8 + $0xf14] ss:$24 sps:$4 sm:$0xff]   ;;  %v20929_v29 = vld [vmem:[#allocation8 + $0x19b8] ss:$24 sps:$4 sm:$0xff]  }
 0x85a   :  { %16409 = vmatpush1.bf16.msra.mxu1 %v20863_v33  ;;  %v20932_v33 = vld [vmem:[#allocation8 + $0xf10] ss:$24 sps:$4 sm:$0xff]  }
 0x85b   :  { %16760 = vmatpush1.bf16.msra.mxu0 %v20866_v30  ;;  %16410 = vmatprep.subr.bf16.mxu1 %v20871_v31  ;;  %v20937_v30 = vld [vmem:[#allocation8 + $0x19ec] ss:$24 sps:$4 sm:$0xff]  }
 0x85c   :  { %16761 = vmatprep.subr.bf16.mxu0 %v20874_v47  ;;  %v20940_v31 = vld [vmem:[#allocation8 + $0xf44] ss:$24 sps:$4 sm:$0xff]   ;;  %v20935_v47 = vld [vmem:[#allocation8 + $0x19e8] ss:$24 sps:$4 sm:$0xff]  }
 0x85e   :  { %16411 = vmatpush1.bf16.msra.mxu1 %v20869_v53  ;;  %v20938_v53 = vld [vmem:[#allocation8 + $0xf40] ss:$24 sps:$4 sm:$0xff]  }
 0x85f   :  { %16762 = vmatpush1.bf16.msra.mxu0 %v20872_v22  ;;  %16421 = vmatprep.subr.bf16.mxu1 %v20877_v4  ;;  %v20943_v22 = vld [vmem:[#allocation8 + $0x1a1c] ss:$24 sps:$4 sm:$0xff]  }
 0x860   :  { %16763 = vmatprep.subr.bf16.mxu0 %v20880_v35  ;;  %v20946_v4 = vld [vmem:[#allocation8 + $0xf74] ss:$24 sps:$4 sm:$0xff]   ;;  %v20941_v35 = vld [vmem:[#allocation8 + $0x1a18] ss:$24 sps:$4 sm:$0xff]  }
 0x861   :  { %16413 = vmatmul.mubr.bf16.vlgmr.msra.gmra.mrb[32].mxu1 %v21969_v61 }
 0x862   :  { %16422 = vmatpush1.bf16.msra.mxu1 %v20875_v62  ;;  %16453 = vmatprep.mubr.bf16.mxu1 %v21971_v11  ;;  %v20944_v62 = vld [vmem:[#allocation8 + $0xf70] ss:$24 sps:$4 sm:$0xff]  }
 0x863   :  { %16764 = vmatpush1.bf16.msra.mxu0 %v20878_v36  ;;  %16423 = vmatprep.subr.bf16.mxu1 %v20883_v40  ;;  %v20949_v36 = vld [vmem:[#allocation8 + $0x1a4c] ss:$24 sps:$4 sm:$0xff]  }
 0x864   :  { %16765 = vmatprep.subr.bf16.mxu0 %v20886_v21  ;;  %v20952_v40 = vld [vmem:[#allocation8 + $0xfa4] ss:$24 sps:$4 sm:$0xff]   ;;  %v20950_v21 = vld [vmem:[#allocation8 + $0xfa0] ss:$24 sps:$4 sm:$0xff]  }
 0x866   :  { %16424 = vmatpush1.bf16.msra.mxu1 %v20881_v37  ;;  %v20955_v37 = vld [vmem:[#allocation8 + $0x1a7c] ss:$24 sps:$4 sm:$0xff]  }
 0x867   :  { %16766 = vmatpush1.bf16.msra.mxu0 %v20884_v13  ;;  %16425 = vmatprep.subr.bf16.mxu1 %v20889_v54  ;;  %v20953_v13 = vld [vmem:[#allocation8 + $0x1a78] ss:$24 sps:$4 sm:$0xff]  }
 0x868   :  { %16767 = vmatprep.subr.bf16.mxu0 %v20892_v34  ;;  %v20956_v54 = vld [vmem:[#allocation8 + $0xfd0] ss:$24 sps:$4 sm:$0xff]   ;;  %v20961_v34 = vld [vmem:[#allocation8 + $0x1aac] ss:$24 sps:$4 sm:$0xff]  }
 0x86a   :  { %16426 = vmatpush1.bf16.msra.mxu1 %v20887_v18  ;;  %v20964_v18 = vld [vmem:[#allocation8 + $0x1004] ss:$24 sps:$4 sm:$0xff]  }
 0x86b   :  { %16768 = vmatpush1.bf16.msra.mxu0 %v20890_v41  ;;  %16427 = vmatprep.subr.bf16.mxu1 %v20895_v59  ;;  %v20959_v41 = vld [vmem:[#allocation8 + $0x1aa8] ss:$24 sps:$4 sm:$0xff]  }
 0x86c   :  { %16769 = vmatprep.subr.bf16.mxu0 %v20898_v43  ;;  %v20962_v59 = vld [vmem:[#allocation8 + $0x1000] ss:$24 sps:$4 sm:$0xff]   ;;  %v20967_v43 = vld [vmem:[#allocation8 + $0x1adc] ss:$24 sps:$4 sm:$0xff]  }
 0x86e   :  { %16428 = vmatpush1.bf16.msra.mxu1 %v20893_v49  ;;  %v20970_v49 = vld [vmem:[#allocation8 + $0x1034] ss:$24 sps:$4 sm:$0xff]  }
 0x86f   :  { %16770 = vmatpush1.bf16.msra.mxu0 %v20896_v12  ;;  %16429 = vmatprep.subr.bf16.mxu1 %v20901_v55  ;;  %v20965_v12 = vld [vmem:[#allocation8 + $0x1ad8] ss:$24 sps:$4 sm:$0xff]  }
 0x870   :  { %16771 = vmatprep.subr.bf16.mxu0 %v20904_v25  ;;  %v20968_v55 = vld [vmem:[#allocation8 + $0x1030] ss:$24 sps:$4 sm:$0xff]   ;;  %v20973_v25 = vld [vmem:[#allocation8 + $0x1b0c] ss:$24 sps:$4 sm:$0xff]  }
 0x872   :  { %16430 = vmatpush1.bf16.msra.mxu1 %v20899_v14  ;;  %v20976_v14 = vld [vmem:[#allocation8 + $0x1064] ss:$24 sps:$4 sm:$0xff]  }
 0x873   :  { %16772 = vmatpush1.bf16.msra.mxu0 %v20902_v23  ;;  %16431 = vmatprep.subr.bf16.mxu1 %v20907_v56  ;;  %v20971_v23 = vld [vmem:[#allocation8 + $0x1b08] ss:$24 sps:$4 sm:$0xff]  }
 0x874   :  { %16773 = vmatprep.subr.bf16.mxu0 %v20910_v44  ;;  %v20974_v56 = vld [vmem:[#allocation8 + $0x1060] ss:$24 sps:$4 sm:$0xff]   ;;  %v20979_v44 = vld [vmem:[#allocation8 + $0x1b3c] ss:$24 sps:$4 sm:$0xff]  }
 0x876   :  { %16432 = vmatpush1.bf16.msra.mxu1 %v20905_v38  ;;  %v20982_v38 = vld [vmem:[#allocation8 + $0x1094] ss:$24 sps:$4 sm:$0xff]  }
 0x877   :  { %16774 = vmatpush1.bf16.msra.mxu0 %v20908_v57  ;;  %16433 = vmatprep.subr.bf16.mxu1 %v20913_v50  ;;  %v20977_v57 = vld [vmem:[#allocation8 + $0x1b38] ss:$24 sps:$4 sm:$0xff]  }
 0x878   :  { %16775 = vmatprep.subr.bf16.mxu0 %v20916_v19  ;;  %v20980_v50 = vld [vmem:[#allocation8 + $0x1090] ss:$24 sps:$4 sm:$0xff]   ;;  %v20985_v19 = vld [vmem:[#allocation8 + $0x1b6c] ss:$24 sps:$4 sm:$0xff]  }
 0x87a   :  { %16434 = vmatpush1.bf16.msra.mxu1 %v20911_v2  ;;  %v20988_v2 = vld [vmem:[#allocation8 + $0x10c4] ss:$24 sps:$4 sm:$0xff]  }
 0x87b   :  { %16776 = vmatpush1.bf16.msra.mxu0 %v20914_v5  ;;  %16435 = vmatprep.subr.bf16.mxu1 %v20919_v6  ;;  %v20983_v5 = vld [vmem:[#allocation8 + $0x1b68] ss:$24 sps:$4 sm:$0xff]  }
 0x87c   :  { %16777 = vmatprep.subr.bf16.mxu0 %v20922_v9  ;;  %v20986_v6 = vld [vmem:[#allocation8 + $0x10c0] ss:$24 sps:$4 sm:$0xff]   ;;  %v20991_v9 = vld [vmem:[#allocation8 + $0x1b9c] ss:$24 sps:$4 sm:$0xff]  }
 0x87e   :  { %16436 = vmatpush1.bf16.msra.mxu1 %v20917_v16  ;;  %v20994_v16 = vld [vmem:[#allocation8 + $0x10f4] ss:$24 sps:$4 sm:$0xff]  }
 0x87f   :  { %16778 = vmatpush1.bf16.msra.mxu0 %v20920_v1  ;;  %16437 = vmatprep.subr.bf16.mxu1 %v20925_v0  ;;  %v20989_v1 = vld [vmem:[#allocation8 + $0x1b98] ss:$24 sps:$4 sm:$0xff]  }
 0x880   :  { %16779 = vmatprep.subr.bf16.mxu0 %v20928_v20  ;;  %v20992_v0 = vld [vmem:[#allocation8 + $0x10f0] ss:$24 sps:$4 sm:$0xff]   ;;  %v20997_v20 = vld [vmem:[#allocation8 + $0x1bcc] ss:$24 sps:$4 sm:$0xff]  }
 0x882   :  { %16438 = vmatpush1.bf16.msra.mxu1 %v20923_v8  ;;  %v21000_v8 = vld [vmem:[#allocation8 + $0x1124] ss:$24 sps:$4 sm:$0xff]  }
 0x883   :  { %16780 = vmatpush1.bf16.msra.mxu0 %v20926_v17  ;;  %16439 = vmatprep.subr.bf16.mxu1 %v20931_v15  ;;  %v20995_v17 = vld [vmem:[#allocation8 + $0x1bc8] ss:$24 sps:$4 sm:$0xff]  }
 0x884   :  { %16790 = vmatprep.subr.bf16.mxu0 %v20934_v27  ;;  %v20998_v15 = vld [vmem:[#allocation8 + $0x1120] ss:$24 sps:$4 sm:$0xff]   ;;  %v21003_v27 = vld [vmem:[#allocation8 + $0x1bfc] ss:$24 sps:$4 sm:$0xff]  }
 0x886   :  { %16782 = vmatmul.mubr.bf16.vlgmr.msra.gmra.mrb[20].mxu0 %v21921_v63  ;;  %16440 = vmatpush1.bf16.msra.mxu1 %v20929_v29  ;;  %v20947_v63 = vld [vmem:[#allocation8 + $0x1a48] ss:$24 sps:$4 sm:$0xff]   ;;  %v21006_v29 = vld [vmem:[#allocation8 + $0x1154] ss:$24 sps:$4 sm:$0xff]  }
 0x887   :  { %16791 = vmatpush1.bf16.msra.mxu0 %v20932_v33  ;;  %16822 = vmatprep.mubr.bf16.mxu0 %v21935_v26  ;;  %v20958_v26 = vld [vmem:[#allocation8 + $0xfd4] ss:$24 sps:$4 sm:$0xff]   ;;  %v21001_v33 = vld [vmem:[#allocation8 + $0x1bf8] ss:$24 sps:$4 sm:$0xff]  }
 0x888   :  { %16441 = vmatprep.subr.bf16.mxu1 %v20937_v30  ;;  %16792 = vmatprep.subr.bf16.mxu0 %v20940_v31  ;;  %v21004_v30 = vld [vmem:[#allocation8 + $0x1150] ss:$24 sps:$4 sm:$0xff]   ;;  %v21009_v31 = vld [vmem:[#allocation8 + $0x1c2c] ss:$24 sps:$4 sm:$0xff]  }
 0x88a   :  { %16442 = vmatpush1.bf16.msra.mxu1 %v20935_v47  ;;  %v21012_v47 = vld [vmem:[#allocation8 + $0x1184] ss:$24 sps:$4 sm:$0xff]  }
 0x88b   :  { %16793 = vmatpush1.bf16.msra.mxu0 %v20938_v53  ;;  %16443 = vmatprep.subr.bf16.mxu1 %v20943_v22  ;;  %v21007_v53 = vld [vmem:[#allocation8 + $0x1c28] ss:$24 sps:$4 sm:$0xff]  }
 0x88c   :  { %16794 = vmatprep.subr.bf16.mxu0 %v20946_v4  ;;  %v21010_v22 = vld [vmem:[#allocation8 + $0x1180] ss:$24 sps:$4 sm:$0xff]   ;;  %v21015_v4 = vld [vmem:[#allocation8 + $0x1c5c] ss:$24 sps:$4 sm:$0xff]  }
 0x88e   :  { %16444 = vmatpush1.bf16.msra.mxu1 %v20941_v35  ;;  %v21018_v35 = vld [vmem:[#allocation8 + $0x11b4] ss:$24 sps:$4 sm:$0xff]  }
 0x88f   :  { %16795 = vmatpush1.bf16.msra.mxu0 %v20944_v62  ;;  %16445 = vmatprep.subr.bf16.mxu1 %v20949_v36  ;;  %v21013_v62 = vld [vmem:[#allocation8 + $0x1c58] ss:$24 sps:$4 sm:$0xff]  }
 0x890   :  { %16796 = vmatprep.subr.bf16.mxu0 %v20952_v40  ;;  %v21016_v36 = vld [vmem:[#allocation8 + $0x11b0] ss:$24 sps:$4 sm:$0xff]   ;;  %v21021_v40 = vld [vmem:[#allocation8 + $0x1c8c] ss:$24 sps:$4 sm:$0xff]  }
 0x892   :  { %16446 = vmatpush1.bf16.msra.mxu1 %v20947_v63  ;;  %v21024_v63 = vld [vmem:[#allocation8 + $0x11e4] ss:$24 sps:$4 sm:$0xff]  }
 0x893   :  { %16797 = vmatpush1.bf16.msra.mxu0 %v20950_v21  ;;  %16447 = vmatprep.subr.bf16.mxu1 %v20955_v37  ;;  %v21019_v21 = vld [vmem:[#allocation8 + $0x1c88] ss:$24 sps:$4 sm:$0xff]  }
 0x894   :  { %16798 = vmatprep.subr.bf16.mxu0 %v20958_v26  ;;  %v21022_v37 = vld [vmem:[#allocation8 + $0x11e0] ss:$24 sps:$4 sm:$0xff]   ;;  %v21027_v26 = vld [vmem:[#allocation8 + $0x1cbc] ss:$24 sps:$4 sm:$0xff]  }
 0x896   :  { %16448 = vmatpush1.bf16.msra.mxu1 %v20953_v13  ;;  %v21030_v13 = vld [vmem:[#allocation8 + $0x1214] ss:$24 sps:$4 sm:$0xff]  }
 0x897   :  { %16799 = vmatpush1.bf16.msra.mxu0 %v20956_v54  ;;  %16449 = vmatprep.subr.bf16.mxu1 %v20961_v34  ;;  %v21025_v54 = vld [vmem:[#allocation8 + $0x1cb8] ss:$24 sps:$4 sm:$0xff]  }
 0x898   :  { %16800 = vmatprep.subr.bf16.mxu0 %v20964_v18  ;;  %v21028_v34 = vld [vmem:[#allocation8 + $0x1210] ss:$24 sps:$4 sm:$0xff]   ;;  %v21033_v18 = vld [vmem:[#allocation8 + $0x1cec] ss:$24 sps:$4 sm:$0xff]  }
 0x89a   :  { %16450 = vmatpush1.bf16.msra.mxu1 %v20959_v41  ;;  %v21036_v41 = vld [vmem:[#allocation8 + $0x1244] ss:$24 sps:$4 sm:$0xff]  }
 0x89b   :  { %16801 = vmatpush1.bf16.msra.mxu0 %v20962_v59  ;;  %16451 = vmatprep.subr.bf16.mxu1 %v20967_v43  ;;  %v21031_v59 = vld [vmem:[#allocation8 + $0x1ce8] ss:$24 sps:$4 sm:$0xff]  }
 0x89c   :  { %16802 = vmatprep.subr.bf16.mxu0 %v20970_v49  ;;  %v21034_v43 = vld [vmem:[#allocation8 + $0x1240] ss:$24 sps:$4 sm:$0xff]   ;;  %v21039_v49 = vld [vmem:[#allocation8 + $0x1d1c] ss:$24 sps:$4 sm:$0xff]  }
 0x89e   :  { %16452 = vmatpush1.bf16.msra.mxu1 %v20965_v12  ;;  %v21042_v12 = vld [vmem:[#allocation8 + $0x1274] ss:$24 sps:$4 sm:$0xff]  }
 0x89f   :  { %16803 = vmatpush1.bf16.msra.mxu0 %v20968_v55  ;;  %16462 = vmatprep.subr.bf16.mxu1 %v20973_v25  ;;  %v21037_v55 = vld [vmem:[#allocation8 + $0x1d18] ss:$24 sps:$4 sm:$0xff]  }
 0x8a0   :  { %16804 = vmatprep.subr.bf16.mxu0 %v20976_v14  ;;  %v21040_v25 = vld [vmem:[#allocation8 + $0x1270] ss:$24 sps:$4 sm:$0xff]   ;;  %v21045_v14 = vld [vmem:[#allocation8 + $0x1d4c] ss:$24 sps:$4 sm:$0xff]  }
 0x8a1   :  { %16454 = vmatmul.mubr.bf16.vlgmr.msra.gmra.mrb[32].mxu1 %v21981_v52 }
 0x8a2   :  { %16463 = vmatpush1.bf16.msra.mxu1 %v20971_v23  ;;  %16494 = vmatprep.mubr.bf16.mxu1 %v21995_v39  ;;  %v21048_v23 = vld [vmem:[#allocation8 + $0x12a4] ss:$24 sps:$4 sm:$0xff]  }
 0x8a3   :  { %16805 = vmatpush1.bf16.msra.mxu0 %v20974_v56  ;;  %16464 = vmatprep.subr.bf16.mxu1 %v20979_v44  ;;  %v21046_v56 = vld [vmem:[#allocation8 + $0x12a0] ss:$24 sps:$4 sm:$0xff]   ;;  %v21051_v44 = vld [vmem:[#allocation8 + $0x1d7c] ss:$24 sps:$4 sm:$0xff]  }
 0x8a4   :  { %16806 = vmatprep.subr.bf16.mxu0 %v20982_v38  ;;  %v21049_v38 = vld [vmem:[#allocation8 + $0x1d78] ss:$24 sps:$4 sm:$0xff]  }
 0x8a6   :  { %16465 = vmatpush1.bf16.msra.mxu1 %v20977_v57  ;;  %v21052_v57 = vld [vmem:[#allocation8 + $0x12d0] ss:$24 sps:$4 sm:$0xff]  }
 0x8a7   :  { %16807 = vmatpush1.bf16.msra.mxu0 %v20980_v50  ;;  %16466 = vmatprep.subr.bf16.mxu1 %v20985_v19  ;;  %v21057_v50 = vld [vmem:[#allocation8 + $0x1dac] ss:$24 sps:$4 sm:$0xff]  }
 0x8a8   :  { %16808 = vmatprep.subr.bf16.mxu0 %v20988_v2  ;;  %v21060_v19 = vld [vmem:[#allocation8 + $0x1304] ss:$24 sps:$4 sm:$0xff]   ;;  %v21055_v2 = vld [vmem:[#allocation8 + $0x1da8] ss:$24 sps:$4 sm:$0xff]  }
 0x8aa   :  { %16467 = vmatpush1.bf16.msra.mxu1 %v20983_v5  ;;  %v21058_v5 = vld [vmem:[#allocation8 + $0x1300] ss:$24 sps:$4 sm:$0xff]  }
 0x8ab   :  { %16809 = vmatpush1.bf16.msra.mxu0 %v20986_v6  ;;  %16468 = vmatprep.subr.bf16.mxu1 %v20991_v9  ;;  %v21063_v6 = vld [vmem:[#allocation8 + $0x1ddc] ss:$24 sps:$4 sm:$0xff]  }
 0x8ac   :  { %16810 = vmatprep.subr.bf16.mxu0 %v20994_v16  ;;  %v21066_v9 = vld [vmem:[#allocation8 + $0x1334] ss:$24 sps:$4 sm:$0xff]   ;;  %v21061_v16 = vld [vmem:[#allocation8 + $0x1dd8] ss:$24 sps:$4 sm:$0xff]  }
 0x8ae   :  { %16469 = vmatpush1.bf16.msra.mxu1 %v20989_v1  ;;  %v21064_v1 = vld [vmem:[#allocation8 + $0x1330] ss:$24 sps:$4 sm:$0xff]  }
 0x8af   :  { %16811 = vmatpush1.bf16.msra.mxu0 %v20992_v0  ;;  %16470 = vmatprep.subr.bf16.mxu1 %v20997_v20  ;;  %v21069_v0 = vld [vmem:[#allocation8 + $0x1e0c] ss:$24 sps:$4 sm:$0xff]  }
 0x8b0   :  { %16812 = vmatprep.subr.bf16.mxu0 %v21000_v8  ;;  %v21072_v20 = vld [vmem:[#allocation8 + $0x1364] ss:$24 sps:$4 sm:$0xff]   ;;  %v21067_v8 = vld [vmem:[#allocation8 + $0x1e08] ss:$24 sps:$4 sm:$0xff]  }
 0x8b2   :  { %16471 = vmatpush1.bf16.msra.mxu1 %v20995_v17  ;;  %v21070_v17 = vld [vmem:[#allocation8 + $0x1360] ss:$24 sps:$4 sm:$0xff]  }
 0x8b3   :  { %16813 = vmatpush1.bf16.msra.mxu0 %v20998_v15  ;;  %16472 = vmatprep.subr.bf16.mxu1 %v21003_v27  ;;  %v21075_v15 = vld [vmem:[#allocation8 + $0x1e3c] ss:$24 sps:$4 sm:$0xff]  }
 0x8b4   :  { %16814 = vmatprep.subr.bf16.mxu0 %v21006_v29  ;;  %v21078_v27 = vld [vmem:[#allocation8 + $0x1394] ss:$24 sps:$4 sm:$0xff]   ;;  %v21073_v29 = vld [vmem:[#allocation8 + $0x1e38] ss:$24 sps:$4 sm:$0xff]  }
 0x8b6   :  { %16473 = vmatpush1.bf16.msra.mxu1 %v21001_v33  ;;  %v21076_v33 = vld [vmem:[#allocation8 + $0x1390] ss:$24 sps:$4 sm:$0xff]  }
 0x8b7   :  { %16815 = vmatpush1.bf16.msra.mxu0 %v21004_v30  ;;  %16474 = vmatprep.subr.bf16.mxu1 %v21009_v31  ;;  %v21081_v30 = vld [vmem:[#allocation8 + $0x1e6c] ss:$24 sps:$4 sm:$0xff]  }
 0x8b8   :  { %16816 = vmatprep.subr.bf16.mxu0 %v21012_v47  ;;  %v21084_v31 = vld [vmem:[#allocation8 + $0x13c4] ss:$24 sps:$4 sm:$0xff]   ;;  %v21079_v47 = vld [vmem:[#allocation8 + $0x1e68] ss:$24 sps:$4 sm:$0xff]  }
 0x8ba   :  { %16475 = vmatpush1.bf16.msra.mxu1 %v21007_v53  ;;  %v21082_v53 = vld [vmem:[#allocation8 + $0x13c0] ss:$24 sps:$4 sm:$0xff]  }
 0x8bb   :  { %16817 = vmatpush1.bf16.msra.mxu0 %v21010_v22  ;;  %16476 = vmatprep.subr.bf16.mxu1 %v21015_v4  ;;  %v21087_v22 = vld [vmem:[#allocation8 + $0x1e9c] ss:$24 sps:$4 sm:$0xff]  }
 0x8bc   :  { %16818 = vmatprep.subr.bf16.mxu0 %v21018_v35  ;;  %v21090_v4 = vld [vmem:[#allocation8 + $0x13f4] ss:$24 sps:$4 sm:$0xff]   ;;  %v21085_v35 = vld [vmem:[#allocation8 + $0x1e98] ss:$24 sps:$4 sm:$0xff]  }
 0x8be   :  { %16477 = vmatpush1.bf16.msra.mxu1 %v21013_v62  ;;  %v21088_v62 = vld [vmem:[#allocation8 + $0x13f0] ss:$24 sps:$4 sm:$0xff]  }
 0x8bf   :  { %16819 = vmatpush1.bf16.msra.mxu0 %v21016_v36  ;;  %16478 = vmatprep.subr.bf16.mxu1 %v21021_v40  ;;  %v21093_v36 = vld [vmem:[#allocation8 + $0x1ecc] ss:$24 sps:$4 sm:$0xff]  }
 0x8c0   :  { %16820 = vmatprep.subr.bf16.mxu0 %v21024_v63  ;;  %v21096_v40 = vld [vmem:[#allocation8 + $0x1424] ss:$24 sps:$4 sm:$0xff]   ;;  %v21091_v63 = vld [vmem:[#allocation8 + $0x1ec8] ss:$24 sps:$4 sm:$0xff]  }
 0x8c2   :  { %16479 = vmatpush1.bf16.msra.mxu1 %v21019_v21  ;;  %v21094_v21 = vld [vmem:[#allocation8 + $0x1420] ss:$24 sps:$4 sm:$0xff]  }
 0x8c3   :  { %16821 = vmatpush1.bf16.msra.mxu0 %v21022_v37  ;;  %16480 = vmatprep.subr.bf16.mxu1 %v21027_v26  ;;  %v21099_v37 = vld [vmem:[#allocation8 + $0x1efc] ss:$24 sps:$4 sm:$0xff]  }
 0x8c4   :  { %16831 = vmatprep.subr.bf16.mxu0 %v21030_v13  ;;  %v21102_v26 = vld [vmem:[#allocation8 + $0x1454] ss:$24 sps:$4 sm:$0xff]   ;;  %v21097_v13 = vld [vmem:[#allocation8 + $0x1ef8] ss:$24 sps:$4 sm:$0xff]  }
 0x8c6   :  { %16823 = vmatmul.mubr.bf16.vlgmr.msra.gmra.mrb[20].mxu0 %v21937_v28  ;;  %16481 = vmatpush1.bf16.msra.mxu1 %v21025_v54  ;;  %v21043_v28 = vld [vmem:[#allocation8 + $0x1d48] ss:$24 sps:$4 sm:$0xff]  }
 0x8c7   :  { %16832 = vmatpush1.bf16.msra.mxu0 %v21028_v34  ;;  %16863 = vmatprep.mubr.bf16.mxu0 %v21939_v32  ;;  %v21054_v32 = vld [vmem:[#allocation8 + $0x12d4] ss:$24 sps:$4 sm:$0xff]   ;;  %v21100_v54 = vld [vmem:[#allocation8 + $0x1450] ss:$24 sps:$4 sm:$0xff]  }
 0x8c8   :  { %16482 = vmatprep.subr.bf16.mxu1 %v21033_v18  ;;  %16833 = vmatprep.subr.bf16.mxu0 %v21036_v41  ;;  %v21105_v34 = vld [vmem:[#allocation8 + $0x1f2c] ss:$24 sps:$4 sm:$0xff]   ;;  %v21103_v41 = vld [vmem:[#allocation8 + $0x1f28] ss:$24 sps:$4 sm:$0xff]  }
 0x8c9   :  { %v21108_v18 = vld [vmem:[#allocation8 + $0x1484] ss:$24 sps:$4 sm:$0xff]  }
 0x8ca   :  { %16483 = vmatpush1.bf16.msra.mxu1 %v21031_v59  ;;  %v21106_v59 = vld [vmem:[#allocation8 + $0x1480] ss:$24 sps:$4 sm:$0xff]  }
 0x8cb   :  { %16834 = vmatpush1.bf16.msra.mxu0 %v21034_v43  ;;  %16484 = vmatprep.subr.bf16.mxu1 %v21039_v49  ;;  %v21111_v43 = vld [vmem:[#allocation8 + $0x1f5c] ss:$24 sps:$4 sm:$0xff]  }
 0x8cc   :  { %16835 = vmatprep.subr.bf16.mxu0 %v21042_v12  ;;  %v21114_v49 = vld [vmem:[#allocation8 + $0x14b4] ss:$24 sps:$4 sm:$0xff]   ;;  %v21109_v12 = vld [vmem:[#allocation8 + $0x1f58] ss:$24 sps:$4 sm:$0xff]  }
 0x8ce   :  { %16485 = vmatpush1.bf16.msra.mxu1 %v21037_v55  ;;  %v21112_v55 = vld [vmem:[#allocation8 + $0x14b0] ss:$24 sps:$4 sm:$0xff]  }
 0x8cf   :  { %16836 = vmatpush1.bf16.msra.mxu0 %v21040_v25  ;;  %16486 = vmatprep.subr.bf16.mxu1 %v21045_v14  ;;  %v21117_v25 = vld [vmem:[#allocation8 + $0x1f8c] ss:$24 sps:$4 sm:$0xff]  }
 0x8d0   :  { %16837 = vmatprep.subr.bf16.mxu0 %v21048_v23  ;;  %v21120_v14 = vld [vmem:[#allocation8 + $0x14e4] ss:$24 sps:$4 sm:$0xff]   ;;  %v21115_v23 = vld [vmem:[#allocation8 + $0x1f88] ss:$24 sps:$4 sm:$0xff]  }
 0x8d2   :  { %16487 = vmatpush1.bf16.msra.mxu1 %v21043_v28  ;;  %v21118_v28 = vld [vmem:[#allocation8 + $0x14e0] ss:$24 sps:$4 sm:$0xff]  }
 0x8d3   :  { %16838 = vmatpush1.bf16.msra.mxu0 %v21046_v56  ;;  %16488 = vmatprep.subr.bf16.mxu1 %v21051_v44  ;;  %v21123_v56 = vld [vmem:[#allocation8 + $0x1fbc] ss:$24 sps:$4 sm:$0xff]  }
 0x8d4   :  { %16839 = vmatprep.subr.bf16.mxu0 %v21054_v32  ;;  %v21126_v44 = vld [vmem:[#allocation8 + $0x1514] ss:$24 sps:$4 sm:$0xff]   ;;  %v21121_v32 = vld [vmem:[#allocation8 + $0x1fb8] ss:$24 sps:$4 sm:$0xff]  }
 0x8d6   :  { %16489 = vmatpush1.bf16.msra.mxu1 %v21049_v38  ;;  %v21124_v38 = vld [vmem:[#allocation8 + $0x1510] ss:$24 sps:$4 sm:$0xff]  }
 0x8d7   :  { %16840 = vmatpush1.bf16.msra.mxu0 %v21052_v57  ;;  %16490 = vmatprep.subr.bf16.mxu1 %v21057_v50  ;;  %v21129_v57 = vld [vmem:[#allocation8 + $0x1fec] ss:$24 sps:$4 sm:$0xff]  }
 0x8d8   :  { %16841 = vmatprep.subr.bf16.mxu0 %v21060_v19  ;;  %v21132_v50 = vld [vmem:[#allocation8 + $0x1544] ss:$24 sps:$4 sm:$0xff]   ;;  %v21127_v19 = vld [vmem:[#allocation8 + $0x1fe8] ss:$24 sps:$4 sm:$0xff]  }
 0x8da   :  { %16491 = vmatpush1.bf16.msra.mxu1 %v21055_v2  ;;  %v21130_v2 = vld [vmem:[#allocation8 + $0x1540] ss:$24 sps:$4 sm:$0xff]  }
 0x8db   :  { %16842 = vmatpush1.bf16.msra.mxu0 %v21058_v5  ;;  %16492 = vmatprep.subr.bf16.mxu1 %v21063_v6  ;;  %v21135_v5 = vld [vmem:[#allocation8 + $0x201c] ss:$24 sps:$4 sm:$0xff]  }
 0x8dc   :  { %16843 = vmatprep.subr.bf16.mxu0 %v21066_v9  ;;  %v21138_v6 = vld [vmem:[#allocation8 + $0x1574] ss:$24 sps:$4 sm:$0xff]   ;;  %v21133_v9 = vld [vmem:[#allocation8 + $0x2018] ss:$24 sps:$4 sm:$0xff]  }
 0x8de   :  { %16493 = vmatpush1.bf16.msra.mxu1 %v21061_v16  ;;  %v21136_v16 = vld [vmem:[#allocation8 + $0x1570] ss:$24 sps:$4 sm:$0xff]  }
 0x8df   :  { %16844 = vmatpush1.bf16.msra.mxu0 %v21064_v1  ;;  %16503 = vmatprep.subr.bf16.mxu1 %v21069_v0  ;;  %v21141_v1 = vld [vmem:[#allocation8 + $0x204c] ss:$24 sps:$4 sm:$0xff]  }
 0x8e0   :  { %16845 = vmatprep.subr.bf16.mxu0 %v21072_v20  ;;  %v21144_v0 = vld [vmem:[#allocation8 + $0x15a4] ss:$24 sps:$4 sm:$0xff]   ;;  %v21142_v20 = vld [vmem:[#allocation8 + $0x15a0] ss:$24 sps:$4 sm:$0xff]  }
 0x8e1   :  { %16495 = vmatmul.mubr.bf16.vlgmr.msra.gmra.mrb[32].mxu1 %v21997_v42 }
 0x8e2   :  { %16504 = vmatpush1.bf16.msra.mxu1 %v21067_v8  ;;  %16535 = vmatprep.mubr.bf16.mxu1 %v21999_v48  ;;  %v21147_v8 = vld [vmem:[#allocation8 + $0x207c] ss:$24 sps:$4 sm:$0xff]  }
 0x8e3   :  { %16846 = vmatpush1.bf16.msra.mxu0 %v21070_v17  ;;  %16505 = vmatprep.subr.bf16.mxu1 %v21075_v15  ;;  %v21145_v17 = vld [vmem:[#allocation8 + $0x2078] ss:$24 sps:$4 sm:$0xff]  }
 0x8e4   :  { %16847 = vmatprep.subr.bf16.mxu0 %v21078_v27  ;;  %v21148_v15 = vld [vmem:[#allocation8 + $0x15d0] ss:$24 sps:$4 sm:$0xff]   ;;  %v21153_v27 = vld [vmem:[#allocation8 + $0x20ac] ss:$24 sps:$4 sm:$0xff]  }
 0x8e6   :  { %16506 = vmatpush1.bf16.msra.mxu1 %v21073_v29  ;;  %v21156_v29 = vld [vmem:[#allocation8 + $0x1604] ss:$24 sps:$4 sm:$0xff]  }
 0x8e7   :  { %16848 = vmatpush1.bf16.msra.mxu0 %v21076_v33  ;;  %16507 = vmatprep.subr.bf16.mxu1 %v21081_v30  ;;  %v21151_v33 = vld [vmem:[#allocation8 + $0x20a8] ss:$24 sps:$4 sm:$0xff]  }
 0x8e8   :  { %16849 = vmatprep.subr.bf16.mxu0 %v21084_v31  ;;  %v21154_v30 = vld [vmem:[#allocation8 + $0x1600] ss:$24 sps:$4 sm:$0xff]   ;;  %v21159_v31 = vld [vmem:[#allocation8 + $0x20dc] ss:$24 sps:$4 sm:$0xff]  }
 0x8ea   :  { %16508 = vmatpush1.bf16.msra.mxu1 %v21079_v47  ;;  %v21162_v47 = vld [vmem:[#allocation8 + $0x1634] ss:$24 sps:$4 sm:$0xff]  }
 0x8eb   :  { %16850 = vmatpush1.bf16.msra.mxu0 %v21082_v53  ;;  %16509 = vmatprep.subr.bf16.mxu1 %v21087_v22  ;;  %v21157_v53 = vld [vmem:[#allocation8 + $0x20d8] ss:$24 sps:$4 sm:$0xff]  }
 0x8ec   :  { %16851 = vmatprep.subr.bf16.mxu0 %v21090_v4  ;;  %v21160_v22 = vld [vmem:[#allocation8 + $0x1630] ss:$24 sps:$4 sm:$0xff]   ;;  %v21165_v4 = vld [vmem:[#allocation8 + $0x210c] ss:$24 sps:$4 sm:$0xff]  }
 0x8ee   :  { %16510 = vmatpush1.bf16.msra.mxu1 %v21085_v35  ;;  %v21168_v35 = vld [vmem:[#allocation8 + $0x1664] ss:$24 sps:$4 sm:$0xff]  }
 0x8ef   :  { %16852 = vmatpush1.bf16.msra.mxu0 %v21088_v62  ;;  %16511 = vmatprep.subr.bf16.mxu1 %v21093_v36  ;;  %v21163_v62 = vld [vmem:[#allocation8 + $0x2108] ss:$24 sps:$4 sm:$0xff]  }
 0x8f0   :  { %16853 = vmatprep.subr.bf16.mxu0 %v21096_v40  ;;  %v21166_v36 = vld [vmem:[#allocation8 + $0x1660] ss:$24 sps:$4 sm:$0xff]   ;;  %v21171_v40 = vld [vmem:[#allocation8 + $0x213c] ss:$24 sps:$4 sm:$0xff]  }
 0x8f2   :  { %16512 = vmatpush1.bf16.msra.mxu1 %v21091_v63  ;;  %v21174_v63 = vld [vmem:[#allocation8 + $0x1694] ss:$24 sps:$4 sm:$0xff]  }
 0x8f3   :  { %16854 = vmatpush1.bf16.msra.mxu0 %v21094_v21  ;;  %16513 = vmatprep.subr.bf16.mxu1 %v21099_v37  ;;  %v21169_v21 = vld [vmem:[#allocation8 + $0x2138] ss:$24 sps:$4 sm:$0xff]  }
 0x8f4   :  { %16855 = vmatprep.subr.bf16.mxu0 %v21102_v26  ;;  %v21172_v37 = vld [vmem:[#allocation8 + $0x1690] ss:$24 sps:$4 sm:$0xff]   ;;  %v21177_v26 = vld [vmem:[#allocation8 + $0x216c] ss:$24 sps:$4 sm:$0xff]  }
 0x8f6   :  { %16514 = vmatpush1.bf16.msra.mxu1 %v21097_v13  ;;  %v21180_v13 = vld [vmem:[#allocation8 + $0x16c4] ss:$24 sps:$4 sm:$0xff]  }
 0x8f7   :  { %16856 = vmatpush1.bf16.msra.mxu0 %v21100_v54  ;;  %16515 = vmatprep.subr.bf16.mxu1 %v21105_v34  ;;  %v21175_v54 = vld [vmem:[#allocation8 + $0x2168] ss:$24 sps:$4 sm:$0xff]  }
 0x8f8   :  { %16857 = vmatprep.subr.bf16.mxu0 %v21108_v18  ;;  %v21178_v34 = vld [vmem:[#allocation8 + $0x16c0] ss:$24 sps:$4 sm:$0xff]   ;;  %v21183_v18 = vld [vmem:[#allocation8 + $0x219c] ss:$24 sps:$4 sm:$0xff]  }
 0x8fa   :  { %16516 = vmatpush1.bf16.msra.mxu1 %v21103_v41  ;;  %v21186_v41 = vld [vmem:[#allocation8 + $0x16f4] ss:$24 sps:$4 sm:$0xff]  }
 0x8fb   :  { %16858 = vmatpush1.bf16.msra.mxu0 %v21106_v59  ;;  %16517 = vmatprep.subr.bf16.mxu1 %v21111_v43  ;;  %v21181_v59 = vld [vmem:[#allocation8 + $0x2198] ss:$24 sps:$4 sm:$0xff]  }
 0x8fc   :  { %16859 = vmatprep.subr.bf16.mxu0 %v21114_v49  ;;  %v21184_v43 = vld [vmem:[#allocation8 + $0x16f0] ss:$24 sps:$4 sm:$0xff]   ;;  %v21189_v49 = vld [vmem:[#allocation8 + $0x21cc] ss:$24 sps:$4 sm:$0xff]  }
 0x8fe   :  { %16518 = vmatpush1.bf16.msra.mxu1 %v21109_v12  ;;  %v21192_v12 = vld [vmem:[#allocation8 + $0x1724] ss:$24 sps:$4 sm:$0xff]  }
 0x8ff   :  { %16860 = vmatpush1.bf16.msra.mxu0 %v21112_v55  ;;  %16519 = vmatprep.subr.bf16.mxu1 %v21117_v25  ;;  %v21187_v55 = vld [vmem:[#allocation8 + $0x21c8] ss:$24 sps:$4 sm:$0xff]  }
 0x900   :  { %16861 = vmatprep.subr.bf16.mxu0 %v21120_v14  ;;  %v21190_v25 = vld [vmem:[#allocation8 + $0x1720] ss:$24 sps:$4 sm:$0xff]   ;;  %v21195_v14 = vld [vmem:[#allocation8 + $0x21fc] ss:$24 sps:$4 sm:$0xff]  }
 0x902   :  { %16520 = vmatpush1.bf16.msra.mxu1 %v21115_v23  ;;  %v21198_v23 = vld [vmem:[#allocation8 + $0x1754] ss:$24 sps:$4 sm:$0xff]  }
 0x903   :  { %16862 = vmatpush1.bf16.msra.mxu0 %v21118_v28  ;;  %16521 = vmatprep.subr.bf16.mxu1 %v21123_v56  ;;  %v21193_v28 = vld [vmem:[#allocation8 + $0x21f8] ss:$24 sps:$4 sm:$0xff]  }
 0x904   :  { %16872 = vmatprep.subr.bf16.mxu0 %v21126_v44  ;;  %v21196_v56 = vld [vmem:[#allocation8 + $0x1750] ss:$24 sps:$4 sm:$0xff]   ;;  %v21201_v44 = vld [vmem:[#allocation8 + $0x222c] ss:$24 sps:$4 sm:$0xff]  }
 0x906   :  { %16864 = vmatmul.mubr.bf16.vlgmr.msra.gmra.mrb[20].mxu0 %v21951_v7  ;;  %16522 = vmatpush1.bf16.msra.mxu1 %v21121_v32  ;;  %v21139_v7 = vld [vmem:[#allocation8 + $0x2048] ss:$24 sps:$4 sm:$0xff]   ;;  %v21204_v32 = vld [vmem:[#allocation8 + $0x1784] ss:$24 sps:$4 sm:$0xff]  }
 0x907   :  { %16873 = vmatpush1.bf16.msra.mxu0 %v21124_v38  ;;  %16904 = vmatprep.mubr.bf16.mxu0 %v21967_v60  ;;  %v21150_v60 = vld [vmem:[#allocation8 + $0x15d4] ss:$24 sps:$4 sm:$0xff]   ;;  %v21199_v38 = vld [vmem:[#allocation8 + $0x2228] ss:$24 sps:$4 sm:$0xff]  }
 0x908   :  { %16523 = vmatprep.subr.bf16.mxu1 %v21129_v57  ;;  %16874 = vmatprep.subr.bf16.mxu0 %v21132_v50  ;;  %v21202_v57 = vld [vmem:[#allocation8 + $0x1780] ss:$24 sps:$4 sm:$0xff]   ;;  %v21207_v50 = vld [vmem:[#allocation8 + $0x225c] ss:$24 sps:$4 sm:$0xff]  }
 0x90a   :  { %16524 = vmatpush1.bf16.msra.mxu1 %v21127_v19  ;;  %v21210_v19 = vld [vmem:[#allocation8 + $0x17b4] ss:$24 sps:$4 sm:$0xff]  }
 0x90b   :  { %16875 = vmatpush1.bf16.msra.mxu0 %v21130_v2  ;;  %16525 = vmatprep.subr.bf16.mxu1 %v21135_v5  ;;  %v21205_v2 = vld [vmem:[#allocation8 + $0x2258] ss:$24 sps:$4 sm:$0xff]  }
 0x90c   :  { %16876 = vmatprep.subr.bf16.mxu0 %v21138_v6  ;;  %v21208_v5 = vld [vmem:[#allocation8 + $0x17b0] ss:$24 sps:$4 sm:$0xff]   ;;  %v21213_v6 = vld [vmem:[#allocation8 + $0x228c] ss:$24 sps:$4 sm:$0xff]  }
 0x90e   :  { %16526 = vmatpush1.bf16.msra.mxu1 %v21133_v9  ;;  %v21216_v9 = vld [vmem:[#allocation8 + $0x17e4] ss:$24 sps:$4 sm:$0xff]  }
 0x90f   :  { %16877 = vmatpush1.bf16.msra.mxu0 %v21136_v16  ;;  %16527 = vmatprep.subr.bf16.mxu1 %v21141_v1  ;;  %v21211_v16 = vld [vmem:[#allocation8 + $0x2288] ss:$24 sps:$4 sm:$0xff]  }
 0x910   :  { %16878 = vmatprep.subr.bf16.mxu0 %v21144_v0  ;;  %v21214_v1 = vld [vmem:[#allocation8 + $0x17e0] ss:$24 sps:$4 sm:$0xff]   ;;  %v21219_v0 = vld [vmem:[#allocation8 + $0x22bc] ss:$24 sps:$4 sm:$0xff]  }
 0x912   :  { %16528 = vmatpush1.bf16.msra.mxu1 %v21139_v7  ;;  %v21222_v7 = vld [vmem:[#allocation8 + $0x1814] ss:$24 sps:$4 sm:$0xff]  }
 0x913   :  { %16879 = vmatpush1.bf16.msra.mxu0 %v21142_v20  ;;  %16529 = vmatprep.subr.bf16.mxu1 %v21147_v8  ;;  %v21217_v20 = vld [vmem:[#allocation8 + $0x22b8] ss:$24 sps:$4 sm:$0xff]  }
 0x914   :  { %16880 = vmatprep.subr.bf16.mxu0 %v21150_v60  ;;  %v21220_v8 = vld [vmem:[#allocation8 + $0x1810] ss:$24 sps:$4 sm:$0xff]   ;;  %v21225_v60 = vld [vmem:[#allocation8 + $0x22ec] ss:$24 sps:$4 sm:$0xff]  }
 0x916   :  { %16530 = vmatpush1.bf16.msra.mxu1 %v21145_v17  ;;  %v21228_v17 = vld [vmem:[#allocation8 + $0x1844] ss:$24 sps:$4 sm:$0xff]  }
 0x917   :  { %16881 = vmatpush1.bf16.msra.mxu0 %v21148_v15  ;;  %16531 = vmatprep.subr.bf16.mxu1 %v21153_v27  ;;  %v21223_v15 = vld [vmem:[#allocation8 + $0x22e8] ss:$24 sps:$4 sm:$0xff]  }
 0x918   :  { %16882 = vmatprep.subr.bf16.mxu0 %v21156_v29  ;;  %v21226_v27 = vld [vmem:[#allocation8 + $0x1840] ss:$24 sps:$4 sm:$0xff]   ;;  %v21231_v29 = vld [vmem:[#allocation8 + $0x231c] ss:$24 sps:$4 sm:$0xff]  }
 0x91a   :  { %16532 = vmatpush1.bf16.msra.mxu1 %v21151_v33  ;;  %v21234_v33 = vld [vmem:[#allocation8 + $0x1874] ss:$24 sps:$4 sm:$0xff]  }
 0x91b   :  { %16883 = vmatpush1.bf16.msra.mxu0 %v21154_v30  ;;  %16533 = vmatprep.subr.bf16.mxu1 %v21159_v31  ;;  %v21229_v30 = vld [vmem:[#allocation8 + $0x2318] ss:$24 sps:$4 sm:$0xff]  }
 0x91c   :  { %16884 = vmatprep.subr.bf16.mxu0 %v21162_v47  ;;  %v21232_v31 = vld [vmem:[#allocation8 + $0x1870] ss:$24 sps:$4 sm:$0xff]   ;;  %v21237_v47 = vld [vmem:[#allocation8 + $0x234c] ss:$24 sps:$4 sm:$0xff]  }
 0x91e   :  { %16534 = vmatpush1.bf16.msra.mxu1 %v21157_v53  ;;  %v21240_v53 = vld [vmem:[#allocation8 + $0x18a4] ss:$24 sps:$4 sm:$0xff]  }
 0x91f   :  { %16885 = vmatpush1.bf16.msra.mxu0 %v21160_v22  ;;  %16544 = vmatprep.subr.bf16.mxu1 %v21165_v4  ;;  %v21238_v22 = vld [vmem:[#allocation8 + $0x18a0] ss:$24 sps:$4 sm:$0xff]   ;;  %v21243_v4 = vld [vmem:[#allocation8 + $0x237c] ss:$24 sps:$4 sm:$0xff]  }
 0x920   :  { %16886 = vmatprep.subr.bf16.mxu0 %v21168_v35  ;;  %v21241_v35 = vld [vmem:[#allocation8 + $0x2378] ss:$24 sps:$4 sm:$0xff]  }
 0x921   :  { %16536 = vmatmul.mubr.bf16.vlgmr.msra.gmra.mrb[32].mxu1 %v22011_v45 }
 0x922   :  { %16545 = vmatpush1.bf16.msra.mxu1 %v21163_v62  ;;  %16576 = vmatprep.mubr.bf16.mxu1 %v22022_v58  ;;  %v21244_v62 = vld [vmem:[#allocation8 + $0x18d0] ss:$24 sps:$4 sm:$0xff]  }
 0x923   :  { %16887 = vmatpush1.bf16.msra.mxu0 %v21166_v36  ;;  %16546 = vmatprep.subr.bf16.mxu1 %v21171_v40  ;;  %v21249_v36 = vld [vmem:[#allocation8 + $0x23ac] ss:$24 sps:$4 sm:$0xff]  }
 0x924   :  { %16888 = vmatprep.subr.bf16.mxu0 %v21174_v63  ;;  %v21252_v40 = vld [vmem:[#allocation8 + $0x1904] ss:$24 sps:$4 sm:$0xff]   ;;  %v21247_v63 = vld [vmem:[#allocation8 + $0x23a8] ss:$24 sps:$4 sm:$0xff]  }
 0x926   :  { %16547 = vmatpush1.bf16.msra.mxu1 %v21169_v21  ;;  %v21250_v21 = vld [vmem:[#allocation8 + $0x1900] ss:$24 sps:$4 sm:$0xff]  }
 0x927   :  { %16889 = vmatpush1.bf16.msra.mxu0 %v21172_v37  ;;  %16548 = vmatprep.subr.bf16.mxu1 %v21177_v26  ;;  %v21255_v37 = vld [vmem:[#allocation8 + $0x23dc] ss:$24 sps:$4 sm:$0xff]  }
 0x928   :  { %16890 = vmatprep.subr.bf16.mxu0 %v21180_v13  ;;  %v21258_v26 = vld [vmem:[#allocation8 + $0x1934] ss:$24 sps:$4 sm:$0xff]   ;;  %v21253_v13 = vld [vmem:[#allocation8 + $0x23d8] ss:$24 sps:$4 sm:$0xff]  }
 0x92a   :  { %16549 = vmatpush1.bf16.msra.mxu1 %v21175_v54  ;;  %v21256_v54 = vld [vmem:[#allocation8 + $0x1930] ss:$24 sps:$4 sm:$0xff]  }
 0x92b   :  { %16891 = vmatpush1.bf16.msra.mxu0 %v21178_v34  ;;  %16550 = vmatprep.subr.bf16.mxu1 %v21183_v18  ;;  %v21261_v34 = vld [vmem:[#allocation8 + $0x1964] ss:$24 sps:$4 sm:$0xff]   ;;  %v21259_v18 = vld [vmem:[#allocation8 + $0x1960] ss:$24 sps:$4 sm:$0xff]  }
 0x92c   :  { %16892 = vmatprep.subr.bf16.mxu0 %v21186_v41  ;;  %v21264_v41 = vld [vmem:[#allocation8 + $0x1994] ss:$24 sps:$4 sm:$0xff]  }
 0x92e   :  { %16551 = vmatpush1.bf16.msra.mxu1 %v21181_v59  ;;  %v21262_v59 = vld [vmem:[#allocation8 + $0x1990] ss:$24 sps:$4 sm:$0xff]  }
 0x92f   :  { %16893 = vmatpush1.bf16.msra.mxu0 %v21184_v43  ;;  %16552 = vmatprep.subr.bf16.mxu1 %v21189_v49  ;;  %v21267_v43 = vld [vmem:[#allocation8 + $0x19c4] ss:$24 sps:$4 sm:$0xff]   ;;  %v21265_v49 = vld [vmem:[#allocation8 + $0x19c0] ss:$24 sps:$4 sm:$0xff]  }
 0x930   :  { %16894 = vmatprep.subr.bf16.mxu0 %v21192_v12  ;;  %v21270_v12 = vld [vmem:[#allocation8 + $0x19f4] ss:$24 sps:$4 sm:$0xff]  }
 0x932   :  { %16553 = vmatpush1.bf16.msra.mxu1 %v21187_v55  ;;  %v21268_v55 = vld [vmem:[#allocation8 + $0x19f0] ss:$24 sps:$4 sm:$0xff]  }
 0x933   :  { %16895 = vmatpush1.bf16.msra.mxu0 %v21190_v25  ;;  %16554 = vmatprep.subr.bf16.mxu1 %v21195_v14  ;;  %v21273_v25 = vld [vmem:[#allocation8 + $0x1a24] ss:$24 sps:$4 sm:$0xff]   ;;  %v21271_v14 = vld [vmem:[#allocation8 + $0x1a20] ss:$24 sps:$4 sm:$0xff]  }
 0x934   :  { %16896 = vmatprep.subr.bf16.mxu0 %v21198_v23  ;;  %v21276_v23 = vld [vmem:[#allocation8 + $0x1a54] ss:$24 sps:$4 sm:$0xff]  }
 0x936   :  { %16555 = vmatpush1.bf16.msra.mxu1 %v21193_v28  ;;  %v21274_v28 = vld [vmem:[#allocation8 + $0x1a50] ss:$24 sps:$4 sm:$0xff]  }
 0x937   :  { %16897 = vmatpush1.bf16.msra.mxu0 %v21196_v56  ;;  %16556 = vmatprep.subr.bf16.mxu1 %v21201_v44  ;;  %v21279_v56 = vld [vmem:[#allocation8 + $0x1a84] ss:$24 sps:$4 sm:$0xff]   ;;  %v21277_v44 = vld [vmem:[#allocation8 + $0x1a80] ss:$24 sps:$4 sm:$0xff]  }
 0x938   :  { %16898 = vmatprep.subr.bf16.mxu0 %v21204_v32  ;;  %v21282_v32 = vld [vmem:[#allocation8 + $0x1ab4] ss:$24 sps:$4 sm:$0xff]  }
 0x93a   :  { %16557 = vmatpush1.bf16.msra.mxu1 %v21199_v38  ;;  %v21280_v38 = vld [vmem:[#allocation8 + $0x1ab0] ss:$24 sps:$4 sm:$0xff]  }
 0x93b   :  { %16899 = vmatpush1.bf16.msra.mxu0 %v21202_v57  ;;  %16558 = vmatprep.subr.bf16.mxu1 %v21207_v50  ;;  %v21285_v57 = vld [vmem:[#allocation8 + $0x1ae4] ss:$24 sps:$4 sm:$0xff]   ;;  %v21283_v50 = vld [vmem:[#allocation8 + $0x1ae0] ss:$24 sps:$4 sm:$0xff]  }
 0x93c   :  { %16900 = vmatprep.subr.bf16.mxu0 %v21210_v19  ;;  %v21288_v19 = vld [vmem:[#allocation8 + $0x1b14] ss:$24 sps:$4 sm:$0xff]  }
 0x93e   :  { %16559 = vmatpush1.bf16.msra.mxu1 %v21205_v2  ;;  %v21286_v2 = vld [vmem:[#allocation8 + $0x1b10] ss:$24 sps:$4 sm:$0xff]  }
 0x93f   :  { %16901 = vmatpush1.bf16.msra.mxu0 %v21208_v5  ;;  %16560 = vmatprep.subr.bf16.mxu1 %v21213_v6  ;;  %v21291_v5 = vld [vmem:[#allocation8 + $0x1b44] ss:$24 sps:$4 sm:$0xff]   ;;  %v21289_v6 = vld [vmem:[#allocation8 + $0x1b40] ss:$24 sps:$4 sm:$0xff]  }
 0x940   :  { %16902 = vmatprep.subr.bf16.mxu0 %v21216_v9  ;;  %v21294_v9 = vld [vmem:[#allocation8 + $0x1b74] ss:$24 sps:$4 sm:$0xff]  }
 0x942   :  { %16561 = vmatpush1.bf16.msra.mxu1 %v21211_v16  ;;  %v21292_v16 = vld [vmem:[#allocation8 + $0x1b70] ss:$24 sps:$4 sm:$0xff]  }
 0x943   :  { %16903 = vmatpush1.bf16.msra.mxu0 %v21214_v1  ;;  %16562 = vmatprep.subr.bf16.mxu1 %v21219_v0  ;;  %v21297_v1 = vld [vmem:[#allocation8 + $0x1ba4] ss:$24 sps:$4 sm:$0xff]   ;;  %v21295_v0 = vld [vmem:[#allocation8 + $0x1ba0] ss:$24 sps:$4 sm:$0xff]  }
 0x944   :  { %16913 = vmatprep.subr.bf16.mxu0 %v21222_v7  ;;  %v21300_v7 = vld [vmem:[#allocation8 + $0x1bd4] ss:$24 sps:$4 sm:$0xff]  }
 0x946   :  { %16905 = vmatmul.mubr.bf16.vlgmr.msra.gmra.mrb[20].mxu0 %v21969_v61  ;;  %16563 = vmatpush1.bf16.msra.mxu1 %v21217_v20  ;;  %v21235_v61 = vld [vmem:[#allocation8 + $0x2348] ss:$24 sps:$4 sm:$0xff]  }
 0x947   :  { %16914 = vmatpush1.bf16.msra.mxu0 %v21220_v8  ;;  %16945 = vmatprep.mubr.bf16.mxu0 %v21971_v11  ;;  %v21246_v11 = vld [vmem:[#allocation8 + $0x18d4] ss:$24 sps:$4 sm:$0xff]   ;;  %v21298_v20 = vld [vmem:[#allocation8 + $0x1bd0] ss:$24 sps:$4 sm:$0xff]   ;;  %v21303_v8 = vld [vmem:[#allocation8 + $0x1c04] ss:$24 sps:$4 sm:$0xff]  }
 0x948   :  { %16564 = vmatprep.subr.bf16.mxu1 %v21225_v60  ;;  %16915 = vmatprep.subr.bf16.mxu0 %v21228_v17  ;;  %v21306_v60 = vld [vmem:[#allocation8 + $0x1c34] ss:$24 sps:$4 sm:$0xff]   ;;  %v21309_v17 = vld [vmem:[#allocation8 + $0x1c64] ss:$24 sps:$4 sm:$0xff]  }
 0x94a   :  { %16565 = vmatpush1.bf16.msra.mxu1 %v21223_v15  ;;  %v21307_v15 = vld [vmem:[#allocation8 + $0x1c60] ss:$24 sps:$4 sm:$0xff]  }
 0x94b   :  { %16916 = vmatpush1.bf16.msra.mxu0 %v21226_v27  ;;  %16566 = vmatprep.subr.bf16.mxu1 %v21231_v29  ;;  %v21312_v27 = vld [vmem:[#allocation8 + $0x1c94] ss:$24 sps:$4 sm:$0xff]   ;;  %v21310_v29 = vld [vmem:[#allocation8 + $0x1c90] ss:$24 sps:$4 sm:$0xff]  }
 0x94c   :  { %16917 = vmatprep.subr.bf16.mxu0 %v21234_v33  ;;  %v21315_v33 = vld [vmem:[#allocation8 + $0x1cc4] ss:$24 sps:$4 sm:$0xff]  }
 0x94e   :  { %16567 = vmatpush1.bf16.msra.mxu1 %v21229_v30  ;;  %v21313_v30 = vld [vmem:[#allocation8 + $0x1cc0] ss:$24 sps:$4 sm:$0xff]  }
 0x94f   :  { %16918 = vmatpush1.bf16.msra.mxu0 %v21232_v31  ;;  %16568 = vmatprep.subr.bf16.mxu1 %v21237_v47  ;;  %v21318_v31 = vld [vmem:[#allocation8 + $0x1cf4] ss:$24 sps:$4 sm:$0xff]   ;;  %v21316_v47 = vld [vmem:[#allocation8 + $0x1cf0] ss:$24 sps:$4 sm:$0xff]  }
 0x950   :  { %16919 = vmatprep.subr.bf16.mxu0 %v21240_v53  ;;  %v21321_v53 = vld [vmem:[#allocation8 + $0x1d24] ss:$24 sps:$4 sm:$0xff]  }
 0x952   :  { %16569 = vmatpush1.bf16.msra.mxu1 %v21235_v61  ;;  %v21319_v61 = vld [vmem:[#allocation8 + $0x1d20] ss:$24 sps:$4 sm:$0xff]  }
 0x953   :  { %16920 = vmatpush1.bf16.msra.mxu0 %v21238_v22  ;;  %16570 = vmatprep.subr.bf16.mxu1 %v21243_v4  ;;  %v21324_v22 = vld [vmem:[#allocation8 + $0x1d54] ss:$24 sps:$4 sm:$0xff]   ;;  %v21322_v4 = vld [vmem:[#allocation8 + $0x1d50] ss:$24 sps:$4 sm:$0xff]  }
 0x954   :  { %16921 = vmatprep.subr.bf16.mxu0 %v21246_v11  ;;  %v21327_v11 = vld [vmem:[#allocation8 + $0x1d84] ss:$24 sps:$4 sm:$0xff]  }
 0x956   :  { %16571 = vmatpush1.bf16.msra.mxu1 %v21241_v35  ;;  %v21325_v35 = vld [vmem:[#allocation8 + $0x1d80] ss:$24 sps:$4 sm:$0xff]  }
 0x957   :  { %16922 = vmatpush1.bf16.msra.mxu0 %v21244_v62  ;;  %16572 = vmatprep.subr.bf16.mxu1 %v21249_v36  ;;  %v21330_v62 = vld [vmem:[#allocation8 + $0x1db4] ss:$24 sps:$4 sm:$0xff]   ;;  %v21328_v36 = vld [vmem:[#allocation8 + $0x1db0] ss:$24 sps:$4 sm:$0xff]  }
 0x958   :  { %16923 = vmatprep.subr.bf16.mxu0 %v21252_v40  ;;  %v21333_v40 = vld [vmem:[#allocation8 + $0x1de4] ss:$24 sps:$4 sm:$0xff]  }
 0x95a   :  { %16573 = vmatpush1.bf16.msra.mxu1 %v21247_v63  ;;  %v21331_v63 = vld [vmem:[#allocation8 + $0x1de0] ss:$24 sps:$4 sm:$0xff]  }
 0x95b   :  { %16924 = vmatpush1.bf16.msra.mxu0 %v21250_v21  ;;  %16574 = vmatprep.subr.bf16.mxu1 %v21255_v37  ;;  %v21336_v21 = vld [vmem:[#allocation8 + $0x1e14] ss:$24 sps:$4 sm:$0xff]   ;;  %v21334_v37 = vld [vmem:[#allocation8 + $0x1e10] ss:$24 sps:$4 sm:$0xff]  }
 0x95c   :  { %16925 = vmatprep.subr.bf16.mxu0 %v21258_v26  ;;  %v21339_v26 = vld [vmem:[#allocation8 + $0x1e44] ss:$24 sps:$4 sm:$0xff]  }
 0x95e   :  { %16575 = vmatpush1.bf16.msra.mxu1 %v21253_v13  ;;  %v21337_v13 = vld [vmem:[#allocation8 + $0x1e40] ss:$24 sps:$4 sm:$0xff]  }
 0x95f   :  { %16926 = vmatpush1.bf16.msra.mxu0 %v21256_v54  ;;  %v21342_v54 = vld [vmem:[#allocation8 + $0x1e74] ss:$24 sps:$4 sm:$0xff]  }
 0x960   :  { %16927 = vmatprep.subr.bf16.mxu0 %v21261_v34  ;;  %v21340_v34 = vld [vmem:[#allocation8 + $0x1e70] ss:$24 sps:$4 sm:$0xff]  }
 0x961   :  { %16577 = vmatmul.mubr.bf16.vlgmr.msra.gmra.mrb[32].mxu1 %v22024_v3 }
 0x963   :  { %16928 = vmatpush1.bf16.msra.mxu0 %v21259_v18  ;;  %v21345_v18 = vld [vmem:[#allocation8 + $0x1ea4] ss:$24 sps:$4 sm:$0xff]  }
 0x964   :  { %16929 = vmatprep.subr.bf16.mxu0 %v21264_v41  ;;  %v21343_v41 = vld [vmem:[#allocation8 + $0x1ea0] ss:$24 sps:$4 sm:$0xff]  }
 0x967   :  { %16930 = vmatpush1.bf16.msra.mxu0 %v21262_v59  ;;  %v21348_v59 = vld [vmem:[#allocation8 + $0x1ed4] ss:$24 sps:$4 sm:$0xff]  }
 0x968   :  { %16931 = vmatprep.subr.bf16.mxu0 %v21267_v43  ;;  %v21346_v43 = vld [vmem:[#allocation8 + $0x1ed0] ss:$24 sps:$4 sm:$0xff]  }
 0x96b   :  { %16932 = vmatpush1.bf16.msra.mxu0 %v21265_v49  ;;  %v21351_v49 = vld [vmem:[#allocation8 + $0x1f04] ss:$24 sps:$4 sm:$0xff]  }
 0x96c   :  { %16933 = vmatprep.subr.bf16.mxu0 %v21270_v12  ;;  %v21354_v12 = vld [vmem:[#allocation8 + $0x1f34] ss:$24 sps:$4 sm:$0xff]  }
 0x96f   :  { %16934 = vmatpush1.bf16.msra.mxu0 %v21268_v55  ;;  %v21357_v55 = vld [vmem:[#allocation8 + $0x1f64] ss:$24 sps:$4 sm:$0xff]  }
 0x970   :  { %16935 = vmatprep.subr.bf16.mxu0 %v21273_v25  ;;  %v21355_v25 = vld [vmem:[#allocation8 + $0x1f60] ss:$24 sps:$4 sm:$0xff]  }
 0x973   :  { %16936 = vmatpush1.bf16.msra.mxu0 %v21271_v14  ;;  %v21360_v14 = vld [vmem:[#allocation8 + $0x1f94] ss:$24 sps:$4 sm:$0xff]  }
 0x974   :  { %16937 = vmatprep.subr.bf16.mxu0 %v21276_v23  ;;  %v21358_v23 = vld [vmem:[#allocation8 + $0x1f90] ss:$24 sps:$4 sm:$0xff]  }
 0x977   :  { %16938 = vmatpush1.bf16.msra.mxu0 %v21274_v28  ;;  %v21363_v28 = vld [vmem:[#allocation8 + $0x1fc4] ss:$24 sps:$4 sm:$0xff]  }
 0x978   :  { %16939 = vmatprep.subr.bf16.mxu0 %v21279_v56  ;;  %v21361_v56 = vld [vmem:[#allocation8 + $0x1fc0] ss:$24 sps:$4 sm:$0xff]  }
 0x97b   :  { %16940 = vmatpush1.bf16.msra.mxu0 %v21277_v44  ;;  %v21366_v44 = vld [vmem:[#allocation8 + $0x1ff4] ss:$24 sps:$4 sm:$0xff]  }
 0x97c   :  { %16941 = vmatprep.subr.bf16.mxu0 %v21282_v32  ;;  %v21364_v32 = vld [vmem:[#allocation8 + $0x1ff0] ss:$24 sps:$4 sm:$0xff]  }
 0x97f   :  { %16942 = vmatpush1.bf16.msra.mxu0 %v21280_v38  ;;  %v21369_v38 = vld [vmem:[#allocation8 + $0x2024] ss:$24 sps:$4 sm:$0xff]  }
 0x980   :  { %16943 = vmatprep.subr.bf16.mxu0 %v21285_v57  ;;  %v21367_v57 = vld [vmem:[#allocation8 + $0x2020] ss:$24 sps:$4 sm:$0xff]  }
 0x983   :  { %16944 = vmatpush1.bf16.msra.mxu0 %v21283_v50  ;;  %v21372_v50 = vld [vmem:[#allocation8 + $0x2054] ss:$24 sps:$4 sm:$0xff]  }
 0x984   :  { %16954 = vmatprep.subr.bf16.mxu0 %v21288_v19  ;;  %v21370_v19 = vld [vmem:[#allocation8 + $0x2050] ss:$24 sps:$4 sm:$0xff]  }
 0x986   :  { %16946 = vmatmul.mubr.bf16.vlgmr.msra.gmra.mrb[20].mxu0 %v21981_v52  ;;  %v21301_v52 = vld [vmem:[#allocation8 + $0x1c00] ss:$24 sps:$4 sm:$0xff]  }
 0x987   :  { %16955 = vmatpush1.bf16.msra.mxu0 %v21286_v2  ;;  %16986 = vmatprep.mubr.bf16.mxu0 %v21995_v39  ;;  %v21304_v39 = vld [vmem:[#allocation8 + $0x1c30] ss:$24 sps:$4 sm:$0xff]   ;;  %v21375_v2 = vld [vmem:[#allocation8 + $0x2084] ss:$24 sps:$4 sm:$0xff]  }
 0x988   :  { %16956 = vmatprep.subr.bf16.mxu0 %v21291_v5  ;;  %v21373_v5 = vld [vmem:[#allocation8 + $0x2080] ss:$24 sps:$4 sm:$0xff]  }
 0x98b   :  { %16957 = vmatpush1.bf16.msra.mxu0 %v21289_v6  ;;  %v21378_v6 = vld [vmem:[#allocation8 + $0x20b4] ss:$24 sps:$4 sm:$0xff]  }
 0x98c   :  { %16958 = vmatprep.subr.bf16.mxu0 %v21294_v9  ;;  %v21376_v9 = vld [vmem:[#allocation8 + $0x20b0] ss:$24 sps:$4 sm:$0xff]  }
 0x98f   :  { %16959 = vmatpush1.bf16.msra.mxu0 %v21292_v16  ;;  %v21381_v16 = vld [vmem:[#allocation8 + $0x20e4] ss:$24 sps:$4 sm:$0xff]  }
 0x990   :  { %16960 = vmatprep.subr.bf16.mxu0 %v21297_v1  ;;  %v21379_v1 = vld [vmem:[#allocation8 + $0x20e0] ss:$24 sps:$4 sm:$0xff]  }
 0x993   :  { %16961 = vmatpush1.bf16.msra.mxu0 %v21295_v0  ;;  %v21384_v0 = vld [vmem:[#allocation8 + $0x2114] ss:$24 sps:$4 sm:$0xff]  }
 0x994   :  { %16962 = vmatprep.subr.bf16.mxu0 %v21300_v7  ;;  %v21382_v7 = vld [vmem:[#allocation8 + $0x2110] ss:$24 sps:$4 sm:$0xff]  }
 0x997   :  { %16963 = vmatpush1.bf16.msra.mxu0 %v21298_v20  ;;  %v21387_v20 = vld [vmem:[#allocation8 + $0x2144] ss:$24 sps:$4 sm:$0xff]  }
 0x998   :  { %16964 = vmatprep.subr.bf16.mxu0 %v21303_v8  ;;  %v21385_v8 = vld [vmem:[#allocation8 + $0x2140] ss:$24 sps:$4 sm:$0xff]  }
 0x99b   :  { %16965 = vmatpush1.bf16.msra.mxu0 %v21301_v52  ;;  %v21390_v52 = vld [vmem:[#allocation8 + $0x2174] ss:$24 sps:$4 sm:$0xff]  }
 0x99c   :  { %16966 = vmatprep.subr.bf16.mxu0 %v21306_v60  ;;  %v21388_v60 = vld [vmem:[#allocation8 + $0x2170] ss:$24 sps:$4 sm:$0xff]  }
 0x99f   :  { %16967 = vmatpush1.bf16.msra.mxu0 %v21304_v39  ;;  %v21393_v39 = vld [vmem:[#allocation8 + $0x21a4] ss:$24 sps:$4 sm:$0xff]  }
 0x9a0   :  { %16968 = vmatprep.subr.bf16.mxu0 %v21309_v17  ;;  %v21391_v17 = vld [vmem:[#allocation8 + $0x21a0] ss:$24 sps:$4 sm:$0xff]  }
 0x9a3   :  { %16969 = vmatpush1.bf16.msra.mxu0 %v21307_v15  ;;  %v21396_v15 = vld [vmem:[#allocation8 + $0x21d4] ss:$24 sps:$4 sm:$0xff]  }
 0x9a4   :  { %16970 = vmatprep.subr.bf16.mxu0 %v21312_v27  ;;  %v21394_v27 = vld [vmem:[#allocation8 + $0x21d0] ss:$24 sps:$4 sm:$0xff]  }
 0x9a7   :  { %16971 = vmatpush1.bf16.msra.mxu0 %v21310_v29  ;;  %v21399_v29 = vld [vmem:[#allocation8 + $0x2204] ss:$24 sps:$4 sm:$0xff]  }
 0x9a8   :  { %16972 = vmatprep.subr.bf16.mxu0 %v21315_v33  ;;  %v21402_v33 = vld [vmem:[#allocation8 + $0x2234] ss:$24 sps:$4 sm:$0xff]  }
 0x9ab   :  { %16973 = vmatpush1.bf16.msra.mxu0 %v21313_v30  ;;  %v21405_v30 = vld [vmem:[#allocation8 + $0x2264] ss:$24 sps:$4 sm:$0xff]  }
 0x9ac   :  { %16974 = vmatprep.subr.bf16.mxu0 %v21318_v31  ;;  %v21403_v31 = vld [vmem:[#allocation8 + $0x2260] ss:$24 sps:$4 sm:$0xff]  }
 0x9af   :  { %16975 = vmatpush1.bf16.msra.mxu0 %v21316_v47  ;;  %v21408_v47 = vld [vmem:[#allocation8 + $0x2294] ss:$24 sps:$4 sm:$0xff]  }
 0x9b0   :  { %16976 = vmatprep.subr.bf16.mxu0 %v21321_v53  ;;  %v21406_v53 = vld [vmem:[#allocation8 + $0x2290] ss:$24 sps:$4 sm:$0xff]  }
 0x9b3   :  { %16977 = vmatpush1.bf16.msra.mxu0 %v21319_v61  ;;  %v21411_v61 = vld [vmem:[#allocation8 + $0x22c4] ss:$24 sps:$4 sm:$0xff]  }
 0x9b4   :  { %16978 = vmatprep.subr.bf16.mxu0 %v21324_v22  ;;  %v21409_v22 = vld [vmem:[#allocation8 + $0x22c0] ss:$24 sps:$4 sm:$0xff]  }
 0x9b7   :  { %16979 = vmatpush1.bf16.msra.mxu0 %v21322_v4  ;;  %v21414_v4 = vld [vmem:[#allocation8 + $0x22f4] ss:$24 sps:$4 sm:$0xff]  }
 0x9b8   :  { %16980 = vmatprep.subr.bf16.mxu0 %v21327_v11  ;;  %v21412_v11 = vld [vmem:[#allocation8 + $0x22f0] ss:$24 sps:$4 sm:$0xff]  }
 0x9bb   :  { %16981 = vmatpush1.bf16.msra.mxu0 %v21325_v35  ;;  %v21417_v35 = vld [vmem:[#allocation8 + $0x2324] ss:$24 sps:$4 sm:$0xff]  }
 0x9bc   :  { %16982 = vmatprep.subr.bf16.mxu0 %v21330_v62  ;;  %v21415_v62 = vld [vmem:[#allocation8 + $0x2320] ss:$24 sps:$4 sm:$0xff]  }
 0x9bf   :  { %16983 = vmatpush1.bf16.msra.mxu0 %v21328_v36  ;;  %v21420_v36 = vld [vmem:[#allocation8 + $0x2354] ss:$24 sps:$4 sm:$0xff]  }
 0x9c0   :  { %16984 = vmatprep.subr.bf16.mxu0 %v21333_v40  ;;  %v21493_v40 = vld [vmem:[#allocation10] sm:$0x3f] }
 0x9c3   :  { %16985 = vmatpush1.bf16.msra.mxu0 %v21331_v63  ;;  %v9822_v63 = vrot.slane %v21493_v40, %v21853_v10  ;;  %v21429_v10 = vld [vmem:[#allocation8 + $0x23e4] ss:$24 sps:$4 sm:$0xff]  }
 0x9c4   :  { %16995 = vmatprep.subr.bf16.mxu0 %v21336_v21  ;;  %v9826_v21 = vrot.slane %v21493_v40, %v21836_v46  ;;  %v21424_v46 = vld [vmem:[#allocation8 + $0x23b0] ss:$24 sps:$4 sm:$0xff]  }
 0x9c6   :  { %16987 = vmatmul.mubr.bf16.vlgmr.msra.gmra.mrb[20].mxu0 %v21997_v42  ;;  %v21349_v42 = vld [vmem:[#allocation8 + $0x1f00] ss:$24 sps:$4 sm:$0xff]  }
 0x9c7   :  { %16996 = vmatpush1.bf16.msra.mxu0 %v21334_v37  ;;  %17027 = vmatprep.mubr.bf16.mxu0 %v21999_v48  ;;  %v21352_v48 = vld [vmem:[#allocation8 + $0x1f30] ss:$24 sps:$4 sm:$0xff]  }
 0x9c8   :  { %16997 = vmatprep.subr.bf16.mxu0 %v21339_v26  ;;  %v21418_v37 = vld [vmem:[#allocation8 + $0x2350] ss:$24 sps:$4 sm:$0xff]  }
 0x9cb   :  { %16998 = vmatpush1.bf16.msra.mxu0 %v21337_v13  ;;  %v21423_v13 = vld [vmem:[#allocation8 + $0x2384] ss:$24 sps:$4 sm:$0xff]  }
 0x9cc   :  { %16999 = vmatprep.subr.bf16.mxu0 %v21342_v54 }
 0x9cf   :  { %17000 = vmatpush1.bf16.msra.mxu0 %v21340_v34 }
 0x9d0   :  { %17001 = vmatprep.subr.bf16.mxu0 %v21345_v18 }
 0x9d3   :  { %17002 = vmatpush1.bf16.msra.mxu0 %v21343_v41 }
 0x9d4   :  { %17003 = vmatprep.subr.bf16.mxu0 %v21348_v59 }
 0x9d7   :  { %17004 = vmatpush1.bf16.msra.mxu0 %v21346_v43 }
 0x9d8   :  { %17005 = vmatprep.subr.bf16.mxu0 %v21351_v49  ;;  %v21421_v49 = vld [vmem:[#allocation8 + $0x2380] ss:$24 sps:$4 sm:$0xff]  }
 0x9db   :  { %17006 = vmatpush1.bf16.msra.mxu0 %v21349_v42 }
 0x9dc   :  { %17007 = vmatprep.subr.bf16.mxu0 %v21354_v12  ;;  %v21426_v12 = vld [vmem:[#allocation8 + $0x23b4] ss:$24 sps:$4 sm:$0xff]  }
 0x9df   :  { %17008 = vmatpush1.bf16.msra.mxu0 %v21352_v48  ;;  %v21427_v48 = vld [vmem:[#allocation8 + $0x23e0] ss:$24 sps:$4 sm:$0xff]  }
 0x9e0   :  { %17009 = vmatprep.subr.bf16.mxu0 %v21357_v55 }
 0x9e3   :  { %17010 = vmatpush1.bf16.msra.mxu0 %v21355_v25 }
 0x9e4   :  { %17011 = vmatprep.subr.bf16.mxu0 %v21360_v14 }
 0x9e7   :  { %17012 = vmatpush1.bf16.msra.mxu0 %v21358_v23 }
 0x9e8   :  { %17013 = vmatprep.subr.bf16.mxu0 %v21363_v28 }
 0x9eb   :  { %17014 = vmatpush1.bf16.msra.mxu0 %v21361_v56 }
 0x9ec   :  { %17015 = vmatprep.subr.bf16.mxu0 %v21366_v44 }
 0x9ef   :  { %17016 = vmatpush1.bf16.msra.mxu0 %v21364_v32 }
 0x9f0   :  { %17017 = vmatprep.subr.bf16.mxu0 %v21369_v38  ;;  %v9830_v38 = vrot.slane %v21493_v40, %v21873_v51 }
 0x9f3   :  { %17018 = vmatpush1.bf16.msra.mxu0 %v21367_v57  ;;  %v9834_v57 = vrot.slane %v21493_v40, %v21856_v24 }
 0x9f4   :  { %17019 = vmatprep.subr.bf16.mxu0 %v21372_v50 }
 0x9f7   :  { %17020 = vmatpush1.bf16.msra.mxu0 %v21370_v19 }
 0x9f8   :  { %17021 = vmatprep.subr.bf16.mxu0 %v21375_v2 }
 0x9fb   :  { %17022 = vmatpush1.bf16.msra.mxu0 %v21373_v5 }
 0x9fc   :  { %17023 = vmatprep.subr.bf16.mxu0 %v21378_v6 }
 0x9ff   :  { %17024 = vmatpush1.bf16.msra.mxu0 %v21376_v9 }
 0xa00   :  { %17025 = vmatprep.subr.bf16.mxu0 %v21381_v16 }
 0xa03   :  { %17026 = vmatpush1.bf16.msra.mxu0 %v21379_v1 }
 0xa04   :  { %17036 = vmatprep.subr.bf16.mxu0 %v21384_v0 }
 0xa06   :  { %17028 = vmatmul.mubr.bf16.vlgmr.msra.gmra.mrb[20].mxu0 %v22011_v45  ;;  %v21397_v45 = vld [vmem:[#allocation8 + $0x2200] ss:$24 sps:$4 sm:$0xff]  }
 0xa07   :  { %17037 = vmatpush1.bf16.msra.mxu0 %v21382_v7  ;;  %17068 = vmatprep.mubr.bf16.mxu0 %v22022_v58  ;;  %v21400_v58 = vld [vmem:[#allocation8 + $0x2230] ss:$24 sps:$4 sm:$0xff]  }
 0xa08   :  { %17038 = vmatprep.subr.bf16.mxu0 %v21387_v20 }
 0xa0b   :  { %17039 = vmatpush1.bf16.msra.mxu0 %v21385_v8 }
 0xa0c   :  { %17040 = vmatprep.subr.bf16.mxu0 %v21390_v52 }
 0xa0f   :  { %17041 = vmatpush1.bf16.msra.mxu0 %v21388_v60 }
 0xa10   :  { %17042 = vmatprep.subr.bf16.mxu0 %v21393_v39 }
 0xa13   :  { %17043 = vmatpush1.bf16.msra.mxu0 %v21391_v17 }
 0xa14   :  { %17044 = vmatprep.subr.bf16.mxu0 %v21396_v15 }
 0xa17   :  { %17045 = vmatpush1.bf16.msra.mxu0 %v21394_v27 }
 0xa18   :  { %17046 = vmatprep.subr.bf16.mxu0 %v21399_v29 }
 0xa1b   :  { %17047 = vmatpush1.bf16.msra.mxu0 %v21397_v45 }
 0xa1c   :  { %17048 = vmatprep.subr.bf16.mxu0 %v21402_v33 }
 0xa1f   :  { %17049 = vmatpush1.bf16.msra.mxu0 %v21400_v58 }
 0xa20   :  { %17050 = vmatprep.subr.bf16.mxu0 %v21405_v30 }
 0xa23   :  { %17051 = vmatpush1.bf16.msra.mxu0 %v21403_v31 }
 0xa24   :  { %17052 = vmatprep.subr.bf16.mxu0 %v21408_v47 }
 0xa27   :  { %17053 = vmatpush1.bf16.msra.mxu0 %v21406_v53 }
 0xa28   :  { %17054 = vmatprep.subr.bf16.mxu0 %v21411_v61 }
 0xa2b   :  { %17055 = vmatpush1.bf16.msra.mxu0 %v21409_v22 }
 0xa2c   :  { %17056 = vmatprep.subr.bf16.mxu0 %v21414_v4 }
 0xa2f   :  { %17057 = vmatpush1.bf16.msra.mxu0 %v21412_v11 }
 0xa30   :  { %17058 = vmatprep.subr.bf16.mxu0 %v21417_v35 }
 0xa33   :  { %17059 = vmatpush1.bf16.msra.mxu0 %v21415_v62 }
 0xa34   :  { %v16578_v26 = vpop.f32.mrb[32].mxu1  ;;  %17060 = vmatprep.subr.bf16.mxu0 %v21420_v36 }
 0xa35   :  { %v19460_v54 = vadd.f32 %v16578_v26, %v9822_v63  ;;  %v16580_v34 = vpop.f32.mrb[33].mxu1 }
 0xa36   :  { %v19461_v18 = vadd.f32 %v16580_v34, %v9826_v21  ;;  %v16582_v41 = vpop.f32.mrb[34].mxu1 }
 0xa37   :  { %v17085_v59 = vmul.f32 0.70710677, %v19460_v54  ;;  %17061 = vmatpush1.bf16.msra.mxu0 %v21418_v37  ;;  %v16583_v43 = vpop.f32.mrb[35].mxu1  ;;  %v17079_v14 = vmul.f32 0.5, %v19460_v54 }
 0xa38   :  { %v17086_v42 = vmul.f32 0.70710677, %v19461_v18  ;;  %17062 = vmatprep.subr.bf16.mxu0 %v21423_v13  ;;  %v17080_v28 = vmul.f32 0.5, %v19461_v18 }
 0xa39   :  { %21482 = verf.f32 %v17085_v59 }
 0xa3a   :  { %21484 = verf.f32 %v17086_v42 }
 0xa3b   :  { %17063 = vmatpush1.bf16.msra.mxu0 %v21421_v49 }
 0xa3c   :  { %17064 = vmatprep.subr.bf16.mxu0 %v21426_v12 }
 0xa3f   :  { %17065 = vmatpush1.bf16.msra.mxu0 %v21424_v46 }
 0xa40   :  { %17066 = vmatprep.subr.bf16.mxu0 %v21429_v10 }
 0xa43   :  { %v21483_v55 = vpop.eup %21482  ;;  %17067 = vmatpush1.bf16.msra.mxu0 %v21427_v48 }
 0xa44   :  { %v21485_v25 = vpop.eup %21484  ;;  %v17097_v23 = vadd.f32 1.0, %v21483_v55 }
 0xa45   :  { %v17098_v56 = vadd.f32 1.0, %v21485_v25 }
 0xa46   :  { %v17103_v44 = vmul.f32 %v17097_v23, %v17079_v14  ;;  %17069 = vmatmul.mubr.bf16.vlgmr.msra.gmra.mrb[20].mxu0 %v22024_v3 }
 0xa47   :  { %v17104_v32 = vmul.f32 %v17098_v56, %v17080_v28 }
 0xa48   :  { %17109 = vst [vmem:[#allocation11 + $0x10] sm:$0xff] %v17103_v44 }
 0xa49   :  { %17110 = vst [vmem:[#allocation11 + $0x18] sm:$0xff] %v17104_v32 }
 0xb19   :  { %v17070_v50 = vpop.f32.mrb[20].mxu0 }
 0xb1a   :  { %v19462_v19 = vadd.f32 %v17070_v50, %v9830_v38  ;;  %v17072_v2 = vpop.f32.mrb[21].mxu0 }
 0xb1b   :  { %v19463_v5 = vadd.f32 %v17072_v2, %v9834_v57  ;;  %v17074_v6 = vpop.f32.mrb[22].mxu0 }
 0xb1c   :  { %v17087_v9 = vmul.f32 0.70710677, %v19462_v19  ;;  %v17075_v16 = vpop.f32.mrb[23].mxu0  ;;  %v17081_v3 = vmul.f32 0.5, %v19462_v19 }
 0xb1d   :  { %v17088_v1 = vmul.f32 0.70710677, %v19463_v5  ;;  %v17082_v8 = vmul.f32 0.5, %v19463_v5 }
 0xb1e   :  { %21486 = verf.f32 %v17087_v9 }
 0xb1f   :  { %21488 = verf.f32 %v17088_v1 }
 0xb28   :  { %v21487_v0 = vpop.eup %21486 }
 0xb29   :  { %v21489_v7 = vpop.eup %21488  ;;  %v17099_v20 = vadd.f32 1.0, %v21487_v0 }
 0xb2a   :  { %v17100_v51 = vadd.f32 1.0, %v21489_v7 }
 0xb2b   :  { %v17105_v52 = vmul.f32 %v17099_v20, %v17081_v3 }
 0xb2c   :  { %v17106_v24 = vmul.f32 %v17100_v51, %v17082_v8 }
 0xb2d   :  { %17111 = vst [vmem:[#allocation11 + $0x20] sm:$0xff] %v17105_v52 }
 0xb2e   :  { %17112 = vst [vmem:[#allocation11 + $0x28] sm:$0xff] %v17106_v24 }
 0xb2f   :  { %21615 = shalt.err (!%p21612_p2)
}
 0xb30   :  { %s21616_s3 = scalar_lea.hbm %s22092_s5, 768 }
 0xb31   :  { %p21617_p3 = scmp.ne.s32.totalorder %s22092_s5, %s21616_s3  ;;  %p21620_p4 = scmp.lt.u32.totalorder %s21616_s3, %s22092_s5 }
 0xb33   :  { %p21622_p5 = pnand %p21620_p4, %p21617_p3 }
 0xb35   :  { %21625 = shalt.err (!%p21622_p5)
}
 0xb36   :  { %17122 = dma.vmem_to_hbm [thread:$0]  %s17120_s27, 768, %s22092_s5, [#allocation4]  }
 0xb37   :  { %21632 = dma.done.wait [#allocation4], 768  }
 0xb38   :  { %21633 = vsyncadd [#allocation4], 4294966528 }
 0xb39   :  { %17126 = vsyncpa [#allocation3], 1 }
 0xb3a   :  { %17127 = vsyncpa [#allocation6], 1 }
 0xb3b   :  { %17128 = vsyncpa [#allocation9], 1 }
 0xb3c   :  { %17129 = vsyncpa [#allocation4], 1 }

</bundles_post_ra>
